<compile_context>
chip_gen: v6e
topology: v6e:2x2x1
jax: 0.10.0
libtpu: 0.0.40
codegen_flags: <defaults>
</compile_context>

<pallas_src>
import math

import jax
import jax.numpy as jnp
from jax import lax
from jax.experimental import pallas as pl
from jax.experimental.pallas import tpu as pltpu

# ----- small hyper-parameters consistent with the module's forward -----
VOCAB_SIZE = 128              # module uses 30522; scaled down for the demo
D_MODEL = 32                  # module default slider value is 256; scaled down
NHEAD = 4
NUM_ENCODER_LAYERS = 2
NUM_DECODER_LAYERS = 2
DIM_FEEDFORWARD = 64          # nn.Transformer default is 2048; scaled down
LN_EPS = 1e-5

PARAM_ORDER = [
    "emb",
    "e_qkv_w", "e_qkv_b", "e_out_w", "e_out_b", "e_ln1_g", "e_ln1_b",
    "e_ff1_w", "e_ff1_b", "e_ff2_w", "e_ff2_b", "e_ln2_g", "e_ln2_b",
    "e_norm_g", "e_norm_b",
    "d_sa_qkv_w", "d_sa_qkv_b", "d_sa_out_w", "d_sa_out_b", "d_ln1_g", "d_ln1_b",
    "d_ca_qkv_w", "d_ca_qkv_b", "d_ca_out_w", "d_ca_out_b", "d_ln2_g", "d_ln2_b",
    "d_ff1_w", "d_ff1_b", "d_ff2_w", "d_ff2_b", "d_ln3_g", "d_ln3_b",
    "d_norm_g", "d_norm_b", "fc_w", "fc_b",
]


# ---------------------------- fused Pallas kernel ----------------------------
def _transformer_kernel(
    src_ref, tgt_ref,
    emb_ref,
    e_qkv_w, e_qkv_b, e_out_w, e_out_b, e_ln1_g, e_ln1_b,
    e_ff1_w, e_ff1_b, e_ff2_w, e_ff2_b, e_ln2_g, e_ln2_b,
    e_norm_g, e_norm_b,
    d_sa_qkv_w, d_sa_qkv_b, d_sa_out_w, d_sa_out_b, d_ln1_g, d_ln1_b,
    d_ca_qkv_w, d_ca_qkv_b, d_ca_out_w, d_ca_out_b, d_ln2_g, d_ln2_b,
    d_ff1_w, d_ff1_b, d_ff2_w, d_ff2_b, d_ln3_g, d_ln3_b,
    d_norm_g, d_norm_b, fc_w, fc_b,
    o_ref,
):
    E, H = D_MODEL, NHEAD
    dh = E // H
    attn_scale = 1.0 / math.sqrt(dh)
    emb_scale = math.sqrt(float(E))

    table = emb_ref[...]                                  # (V, E), read once, reused

    def embed(ids):                                       # ids: (S, 1) int32
        S = ids.shape[0]
        iota = lax.broadcasted_iota(jnp.int32, (S, VOCAB_SIZE), 1)
        onehot = (iota == ids).astype(jnp.float32)        # one-hot gather on the MXU
        return jnp.dot(onehot, table,
                       preferred_element_type=jnp.float32) * emb_scale

    def layer_norm(x, g, b):                              # g, b: (1, E)
        mu = jnp.mean(x, axis=-1, keepdims=True)
        var = jnp.mean(jnp.square(x - mu), axis=-1, keepdims=True)
        return (x - mu) * lax.rsqrt(var + LN_EPS) * g + b

    def mha(q_in, kv_in, w, b, ow, ob):
        # w: (E, 3E) pre-transposed in_proj, b: (1, 3E), ow: (E, E), ob: (1, E)
        if kv_in is None:                                  # self-attn: fused QKV matmul
            qkv = jnp.dot(q_in, w, preferred_element_type=jnp.float32) + b
            q, k, v = qkv[:, :E], qkv[:, E:2 * E], qkv[:, 2 * E:]
        else:                                              # cross-attn: Q from tgt, fused KV from memory
            q = jnp.dot(q_in, w[:, :E],
                        preferred_element_type=jnp.float32) + b[:, :E]
            kv = jnp.dot(kv_in, w[:, E:],
                         preferred_element_type=jnp.float32) + b[:, E:]
            k, v = kv[:, :E], kv[:, E:]
        out = ob                                           # accumulate out-proj per head
        for h in range(H):
            sl = slice(h * dh, (h + 1) * dh)
            qh, kh, vh = q[:, sl], k[:, sl], v[:, sl]
            # q @ k^T without materializing a transpose
            s = lax.dot_general(qh, kh, (((1,), (1,)), ((), ())),
                                preferred_element_type=jnp.float32) * attn_scale
            s = s - jnp.max(s, axis=-1, keepdims=True)
            p = jnp.exp(s)
            p = p / jnp.sum(p, axis=-1, keepdims=True)
            oh = jnp.dot(p, vh, preferred_element_type=jnp.float32)
            out = out + jnp.dot(oh, ow[sl, :], preferred_element_type=jnp.float32)
        return out

    def ffn(x, w1, b1, w2, b2):
        h = jnp.maximum(jnp.dot(x, w1, preferred_element_type=jnp.float32) + b1, 0.0)
        return jnp.dot(h, w2, preferred_element_type=jnp.float32) + b2

    # ---------------- encoder ----------------
    mem = embed(src_ref[...])
    for l in range(NUM_ENCODER_LAYERS):
        sa = mha(mem, None, e_qkv_w[l], e_qkv_b[l], e_out_w[l], e_out_b[l])
        mem = layer_norm(mem + sa, e_ln1_g[l], e_ln1_b[l])
        ff = ffn(mem, e_ff1_w[l], e_ff1_b[l], e_ff2_w[l], e_ff2_b[l])
        mem = layer_norm(mem + ff, e_ln2_g[l], e_ln2_b[l])
    mem = layer_norm(mem, e_norm_g[...], e_norm_b[...])

    # ---------------- decoder ----------------
    x = embed(tgt_ref[...])
    for l in range(NUM_DECODER_LAYERS):
        sa = mha(x, None, d_sa_qkv_w[l], d_sa_qkv_b[l], d_sa_out_w[l], d_sa_out_b[l])
        x = layer_norm(x + sa, d_ln1_g[l], d_ln1_b[l])
        ca = mha(x, mem, d_ca_qkv_w[l], d_ca_qkv_b[l], d_ca_out_w[l], d_ca_out_b[l])
        x = layer_norm(x + ca, d_ln2_g[l], d_ln2_b[l])
        ff = ffn(x, d_ff1_w[l], d_ff1_b[l], d_ff2_w[l], d_ff2_b[l])
        x = layer_norm(x + ff, d_ln3_g[l], d_ln3_b[l])
    x = layer_norm(x, d_norm_g[...], d_norm_b[...])

    # ---------------- output projection (lane-dense: V = 128) ----------------
    o_ref[...] = jnp.dot(x, fc_w[...], preferred_element_type=jnp.float32) + fc_b[...]


def forward(packed, src_ids, tgt_ids):
    B, S_src = src_ids.shape
    _, S_tgt = tgt_ids.shape
    V = VOCAB_SIZE

    src3 = src_ids.astype(jnp.int32).reshape(B, S_src, 1)
    tgt3 = tgt_ids.astype(jnp.int32).reshape(B, S_tgt, 1)
    param_arrays = [packed[name] for name in PARAM_ORDER]

    def _ids_spec(S):
        return pl.BlockSpec((None, S, 1), lambda b: (b, 0, 0))

    def _const_spec(arr):
        nd = arr.ndim
        return pl.BlockSpec(tuple(arr.shape), lambda b, _nd=nd: (0,) * _nd)

    in_specs = ([_ids_spec(S_src), _ids_spec(S_tgt)]
                + [_const_spec(a) for a in param_arrays])

    logits = pl.pallas_call(
        _transformer_kernel,
        out_shape=jax.ShapeDtypeStruct((B, S_tgt, V), jnp.float32),
        grid=(B,),
        in_specs=in_specs,
        out_specs=pl.BlockSpec((None, S_tgt, V), lambda b: (b, 0, 0)),
        compiler_params=pltpu.CompilerParams(
            dimension_semantics=("parallel",)),
    )(src3, tgt3, *param_arrays)
    return logits


# ---------------------------- deterministic init ----------------------------
def init_params(key):
    kit = iter(jax.random.split(key, 256))

    def w(shape, scale=0.05):
        return (scale * jax.random.normal(next(kit), shape)).astype(jnp.float32)

    def ln():
        return {"gamma": jnp.ones((D_MODEL,), jnp.float32),
                "beta": jnp.zeros((D_MODEL,), jnp.float32)}

    def mha():
        return {"in_proj_weight": w((3 * D_MODEL, D_MODEL)),
                "in_proj_bias": w((3 * D_MODEL,)),
                "out_proj_weight": w((D_MODEL, D_MODEL)),
                "out_proj_bias": w((D_MODEL,))}

    def enc_layer():
        return {"self_attn": mha(),
                "linear1_w": w((DIM_FEEDFORWARD, D_MODEL)),
                "linear1_b": w((DIM_FEEDFORWARD,)),
                "linear2_w": w((D_MODEL, DIM_FEEDFORWARD)),
                "linear2_b": w((D_MODEL,)),
                "norm1": ln(), "norm2": ln()}

    def dec_layer():
        return {"self_attn": mha(), "cross_attn": mha(),
                "linear1_w": w((DIM_FEEDFORWARD, D_MODEL)),
                "linear1_b": w((DIM_FEEDFORWARD,)),
                "linear2_w": w((D_MODEL, DIM_FEEDFORWARD)),
                "linear2_b": w((D_MODEL,)),
                "norm1": ln(), "norm2": ln(), "norm3": ln()}

    return {
        "embedding": w((VOCAB_SIZE, D_MODEL), 1.0),
        "encoder_layers": [enc_layer() for _ in range(NUM_ENCODER_LAYERS)],
        "decoder_layers": [dec_layer() for _ in range(NUM_DECODER_LAYERS)],
        "encoder_norm": ln(),
        "decoder_norm": ln(),
        "fc_w": w((VOCAB_SIZE, D_MODEL)),
        "fc_b": w((VOCAB_SIZE,)),
    }


def pack_params(p):
    """One-time packing: stack per-layer params and pre-transpose all weights
    into (din, dout) layout so the jitted forward contains no transposes."""
    E = D_MODEL

    def stack(layers, fn):
        return jnp.stack([fn(l) for l in layers], axis=0)

    enc, dec = p["encoder_layers"], p["decoder_layers"]
    packed = {
        "emb": p["embedding"],
        # encoder
        "e_qkv_w": stack(enc, lambda l: l["self_attn"]["in_proj_weight"].T),
        "e_qkv_b": stack(enc, lambda l: l["self_attn"]["in_proj_bias"].reshape(1, -1)),
        "e_out_w": stack(enc, lambda l: l["self_attn"]["out_proj_weight"].T),
        "e_out_b": stack(enc, lambda l: l["self_attn"]["out_proj_bias"].reshape(1, -1)),
        "e_ln1_g": stack(enc, lambda l: l["norm1"]["gamma"].reshape(1, E)),
        "e_ln1_b": stack(enc, lambda l: l["norm1"]["beta"].reshape(1, E)),
        "e_ff1_w": stack(enc, lambda l: l["linear1_w"].T),
        "e_ff1_b": stack(enc, lambda l: l["linear1_b"].reshape(1, -1)),
        "e_ff2_w": stack(enc, lambda l: l["linear2_w"].T),
        "e_ff2_b": stack(enc, lambda l: l["linear2_b"].reshape(1, -1)),
        "e_ln2_g": stack(enc, lambda l: l["norm2"]["gamma"].reshape(1, E)),
        "e_ln2_b": stack(enc, lambda l: l["norm2"]["beta"].reshape(1, E)),
        "e_norm_g": p["encoder_norm"]["gamma"].reshape(1, E),
        "e_norm_b": p["encoder_norm"]["beta"].reshape(1, E),
        # decoder
        "d_sa_qkv_w": stack(dec, lambda l: l["self_attn"]["in_proj_weight"].T),
        "d_sa_qkv_b": stack(dec, lambda l: l["self_attn"]["in_proj_bias"].reshape(1, -1)),
        "d_sa_out_w": stack(dec, lambda l: l["self_attn"]["out_proj_weight"].T),
        "d_sa_out_b": stack(dec, lambda l: l["self_attn"]["out_proj_bias"].reshape(1, -1)),
        "d_ln1_g": stack(dec, lambda l: l["norm1"]["gamma"].reshape(1, E)),
        "d_ln1_b": stack(dec, lambda l: l["norm1"]["beta"].reshape(1, E)),
        "d_ca_qkv_w": stack(dec, lambda l: l["cross_attn"]["in_proj_weight"].T),
        "d_ca_qkv_b": stack(dec, lambda l: l["cross_attn"]["in_proj_bias"].reshape(1, -1)),
        "d_ca_out_w": stack(dec, lambda l: l["cross_attn"]["out_proj_weight"].T),
        "d_ca_out_b": stack(dec, lambda l: l["cross_attn"]["out_proj_bias"].reshape(1, -1)),
        "d_ln2_g": stack(dec, lambda l: l["norm2"]["gamma"].reshape(1, E)),
        "d_ln2_b": stack(dec, lambda l: l["norm2"]["beta"].reshape(1, E)),
        "d_ff1_w": stack(dec, lambda l: l["linear1_w"].T),
        "d_ff1_b": stack(dec, lambda l: l["linear1_b"].reshape(1, -1)),
        "d_ff2_w": stack(dec, lambda l: l["linear2_w"].T),
        "d_ff2_b": stack(dec, lambda l: l["linear2_b"].reshape(1, -1)),
        "d_ln3_g": stack(dec, lambda l: l["norm3"]["gamma"].reshape(1, E)),
        "d_ln3_b": stack(dec, lambda l: l["norm3"]["beta"].reshape(1, E)),
        "d_norm_g": p["decoder_norm"]["gamma"].reshape(1, E),
        "d_norm_b": p["decoder_norm"]["beta"].reshape(1, E),
        "fc_w": p["fc_w"].T,
        "fc_b": p["fc_b"].reshape(1, -1),
    }
    return packed


# ---------------------- pure-JAX reference (correctness check) ----------------------
def reference_forward(params, src_ids, tgt_ids):
    E, H = D_MODEL, NHEAD
    dh = E // H
    hp = lax.Precision.HIGHEST

    def dot(a, b):
        return jnp.dot(a, b, precision=hp)

    def ln(x, g, b):
        mu = x.mean(-1, keepdims=True)
        var = ((x - mu) ** 2).mean(-1, keepdims=True)
        return (x - mu) / jnp.sqrt(var + LN_EPS) * g + b

    def mha(q_in, kv_in, p):
        w, b = p["in_proj_weight"], p["in_proj_bias"]
        q = dot(q_in, w[:E].T) + b[:E]
        k = dot(kv_in, w[E:2 * E].T) + b[E:2 * E]
        v = dot(kv_in, w[2 * E:].T) + b[2 * E:]
        B_, Sq, _ = q.shape
        Sk = k.shape[1]
        qh = q.reshape(B_, Sq, H, dh).transpose(0, 2, 1, 3)
        kh = k.reshape(B_, Sk, H, dh).transpose(0, 2, 1, 3)
        vh = v.reshape(B_, Sk, H, dh).transpose(0, 2, 1, 3)
        s = jnp.einsum("bhqd,bhkd->bhqk", qh, kh, precision=hp) / math.sqrt(dh)
        a = jax.nn.softmax(s, axis=-1)
        o = jnp.einsum("bhqk,bhkd->bhqd", a, vh, precision=hp)
        o = o.transpose(0, 2, 1, 3).reshape(B_, Sq, E)
        return dot(o, p["out_proj_weight"].T) + p["out_proj_bias"]

    def ffn(x, p):
        h = jax.nn.relu(dot(x, p["linear1_w"].T) + p["linear1_b"])
        return dot(h, p["linear2_w"].T) + p["linear2_b"]

    scale = math.sqrt(float(E))
    mem = params["embedding"][src_ids] * scale            # (B, S, E); batch-major is
    x = params["embedding"][tgt_ids] * scale              # equivalent (no masks used)
    for p in params["encoder_layers"]:
        mem = ln(mem + mha(mem, mem, p["self_attn"]), p["norm1"]["gamma"], p["norm1"]["beta"])
        mem = ln(mem + ffn(mem, p), p["norm2"]["gamma"], p["norm2"]["beta"])
    mem = ln(mem, params["encoder_norm"]["gamma"], params["encoder_norm"]["beta"])
    for p in params["decoder_layers"]:
        x = ln(x + mha(x, x, p["self_attn"]), p["norm1"]["gamma"], p["norm1"]["beta"])
        x = ln(x + mha(x, mem, p["cross_attn"]), p["norm2"]["gamma"], p["norm2"]["beta"])
        x = ln(x + ffn(x, p), p["norm3"]["gamma"], p["norm3"]["beta"])
    x = ln(x, params["decoder_norm"]["gamma"], params["decoder_norm"]["beta"])
    return dot(x, params["fc_w"].T) + params["fc_b"]


if __name__ == "__main__":
    key = jax.random.PRNGKey(0)
    pkey, skey, tkey = jax.random.split(key, 3)
    params = init_params(pkey)
    packed = pack_params(params)                           # one-time pack / transpose

    B, S = 2, 8
    src = jax.random.randint(skey, (B, S), 0, VOCAB_SIZE, dtype=jnp.int32)
    tgt = jax.random.randint(tkey, (B, S), 0, VOCAB_SIZE, dtype=jnp.int32)

    logits = jax.jit(forward)(packed, src, tgt)
    jax.block_until_ready(logits)
    assert logits.shape == (B, S, VOCAB_SIZE), logits.shape
    assert bool(jnp.all(jnp.isfinite(logits)))

    ref = reference_forward(params, src, tgt)
    max_err = float(jnp.max(jnp.abs(logits - ref)))
    assert bool(jnp.allclose(logits, ref, atol=2e-2, rtol=2e-2)), max_err

    print("KERNEL_OK")
</pallas_src>

<mosaic_0001>
module attributes {stable_mosaic.version = 11 : i64} {
  func.func @_transformer_kernel(%arg0: i32, %arg1: memref<1x8x1xi32, #tpu.memory_space<vmem>>, %arg2: memref<1x8x1xi32, #tpu.memory_space<vmem>>, %arg3: memref<128x32xf32, #tpu.memory_space<vmem>>, %arg4: memref<2x32x96xf32, #tpu.memory_space<vmem>>, %arg5: memref<2x1x96xf32, #tpu.memory_space<vmem>>, %arg6: memref<2x32x32xf32, #tpu.memory_space<vmem>>, %arg7: memref<2x1x32xf32, #tpu.memory_space<vmem>>, %arg8: memref<2x1x32xf32, #tpu.memory_space<vmem>>, %arg9: memref<2x1x32xf32, #tpu.memory_space<vmem>>, %arg10: memref<2x32x64xf32, #tpu.memory_space<vmem>>, %arg11: memref<2x1x64xf32, #tpu.memory_space<vmem>>, %arg12: memref<2x64x32xf32, #tpu.memory_space<vmem>>, %arg13: memref<2x1x32xf32, #tpu.memory_space<vmem>>, %arg14: memref<2x1x32xf32, #tpu.memory_space<vmem>>, %arg15: memref<2x1x32xf32, #tpu.memory_space<vmem>>, %arg16: memref<1x32xf32, #tpu.memory_space<vmem>>, %arg17: memref<1x32xf32, #tpu.memory_space<vmem>>, %arg18: memref<2x32x96xf32, #tpu.memory_space<vmem>>, %arg19: memref<2x1x96xf32, #tpu.memory_space<vmem>>, %arg20: memref<2x32x32xf32, #tpu.memory_space<vmem>>, %arg21: memref<2x1x32xf32, #tpu.memory_space<vmem>>, %arg22: memref<2x1x32xf32, #tpu.memory_space<vmem>>, %arg23: memref<2x1x32xf32, #tpu.memory_space<vmem>>, %arg24: memref<2x32x96xf32, #tpu.memory_space<vmem>>, %arg25: memref<2x1x96xf32, #tpu.memory_space<vmem>>, %arg26: memref<2x32x32xf32, #tpu.memory_space<vmem>>, %arg27: memref<2x1x32xf32, #tpu.memory_space<vmem>>, %arg28: memref<2x1x32xf32, #tpu.memory_space<vmem>>, %arg29: memref<2x1x32xf32, #tpu.memory_space<vmem>>, %arg30: memref<2x32x64xf32, #tpu.memory_space<vmem>>, %arg31: memref<2x1x64xf32, #tpu.memory_space<vmem>>, %arg32: memref<2x64x32xf32, #tpu.memory_space<vmem>>, %arg33: memref<2x1x32xf32, #tpu.memory_space<vmem>>, %arg34: memref<2x1x32xf32, #tpu.memory_space<vmem>>, %arg35: memref<2x1x32xf32, #tpu.memory_space<vmem>>, %arg36: memref<1x32xf32, #tpu.memory_space<vmem>>, %arg37: memref<1x32xf32, #tpu.memory_space<vmem>>, %arg38: memref<32x128xf32, #tpu.memory_space<vmem>>, %arg39: memref<1x128xf32, #tpu.memory_space<vmem>>, %arg40: memref<1x8x128xf32, #tpu.memory_space<vmem>>) attributes {dimension_semantics = [#tpu.dimension_semantics<parallel>], iteration_bounds = array<i64: 2>, scalar_prefetch = 0 : i64, scratch_operands = 0 : i64, tpu.core_type = #tpu.core_type<tc>, window_params = [{transform_indices = @transform_0, window_bounds = array<i64: 1, 8, 1>}, {transform_indices = @transform_1, window_bounds = array<i64: 1, 8, 1>}, {pipeline_mode = #tpu.pipeline_mode<synchronous>, transform_indices = @transform_2, window_bounds = array<i64: 128, 32>}, {pipeline_mode = #tpu.pipeline_mode<synchronous>, transform_indices = @transform_3, window_bounds = array<i64: 2, 32, 96>}, {pipeline_mode = #tpu.pipeline_mode<synchronous>, transform_indices = @transform_4, window_bounds = array<i64: 2, 1, 96>}, {pipeline_mode = #tpu.pipeline_mode<synchronous>, transform_indices = @transform_5, window_bounds = array<i64: 2, 32, 32>}, {pipeline_mode = #tpu.pipeline_mode<synchronous>, transform_indices = @transform_6, window_bounds = array<i64: 2, 1, 32>}, {pipeline_mode = #tpu.pipeline_mode<synchronous>, transform_indices = @transform_7, window_bounds = array<i64: 2, 1, 32>}, {pipeline_mode = #tpu.pipeline_mode<synchronous>, transform_indices = @transform_8, window_bounds = array<i64: 2, 1, 32>}, {pipeline_mode = #tpu.pipeline_mode<synchronous>, transform_indices = @transform_9, window_bounds = array<i64: 2, 32, 64>}, {pipeline_mode = #tpu.pipeline_mode<synchronous>, transform_indices = @transform_10, window_bounds = array<i64: 2, 1, 64>}, {pipeline_mode = #tpu.pipeline_mode<synchronous>, transform_indices = @transform_11, window_bounds = array<i64: 2, 64, 32>}, {pipeline_mode = #tpu.pipeline_mode<synchronous>, transform_indices = @transform_12, window_bounds = array<i64: 2, 1, 32>}, {pipeline_mode = #tpu.pipeline_mode<synchronous>, transform_indices = @transform_13, window_bounds = array<i64: 2, 1, 32>}, {pipeline_mode = #tpu.pipeline_mode<synchronous>, transform_indices = @transform_14, window_bounds = array<i64: 2, 1, 32>}, {pipeline_mode = #tpu.pipeline_mode<synchronous>, transform_indices = @transform_15, window_bounds = array<i64: 1, 32>}, {pipeline_mode = #tpu.pipeline_mode<synchronous>, transform_indices = @transform_16, window_bounds = array<i64: 1, 32>}, {pipeline_mode = #tpu.pipeline_mode<synchronous>, transform_indices = @transform_17, window_bounds = array<i64: 2, 32, 96>}, {pipeline_mode = #tpu.pipeline_mode<synchronous>, transform_indices = @transform_18, window_bounds = array<i64: 2, 1, 96>}, {pipeline_mode = #tpu.pipeline_mode<synchronous>, transform_indices = @transform_19, window_bounds = array<i64: 2, 32, 32>}, {pipeline_mode = #tpu.pipeline_mode<synchronous>, transform_indices = @transform_20, window_bounds = array<i64: 2, 1, 32>}, {pipeline_mode = #tpu.pipeline_mode<synchronous>, transform_indices = @transform_21, window_bounds = array<i64: 2, 1, 32>}, {pipeline_mode = #tpu.pipeline_mode<synchronous>, transform_indices = @transform_22, window_bounds = array<i64: 2, 1, 32>}, {pipeline_mode = #tpu.pipeline_mode<synchronous>, transform_indices = @transform_23, window_bounds = array<i64: 2, 32, 96>}, {pipeline_mode = #tpu.pipeline_mode<synchronous>, transform_indices = @transform_24, window_bounds = array<i64: 2, 1, 96>}, {pipeline_mode = #tpu.pipeline_mode<synchronous>, transform_indices = @transform_25, window_bounds = array<i64: 2, 32, 32>}, {pipeline_mode = #tpu.pipeline_mode<synchronous>, transform_indices = @transform_26, window_bounds = array<i64: 2, 1, 32>}, {pipeline_mode = #tpu.pipeline_mode<synchronous>, transform_indices = @transform_27, window_bounds = array<i64: 2, 1, 32>}, {pipeline_mode = #tpu.pipeline_mode<synchronous>, transform_indices = @transform_28, window_bounds = array<i64: 2, 1, 32>}, {pipeline_mode = #tpu.pipeline_mode<synchronous>, transform_indices = @transform_29, window_bounds = array<i64: 2, 32, 64>}, {pipeline_mode = #tpu.pipeline_mode<synchronous>, transform_indices = @transform_30, window_bounds = array<i64: 2, 1, 64>}, {pipeline_mode = #tpu.pipeline_mode<synchronous>, transform_indices = @transform_31, window_bounds = array<i64: 2, 64, 32>}, {pipeline_mode = #tpu.pipeline_mode<synchronous>, transform_indices = @transform_32, window_bounds = array<i64: 2, 1, 32>}, {pipeline_mode = #tpu.pipeline_mode<synchronous>, transform_indices = @transform_33, window_bounds = array<i64: 2, 1, 32>}, {pipeline_mode = #tpu.pipeline_mode<synchronous>, transform_indices = @transform_34, window_bounds = array<i64: 2, 1, 32>}, {pipeline_mode = #tpu.pipeline_mode<synchronous>, transform_indices = @transform_35, window_bounds = array<i64: 1, 32>}, {pipeline_mode = #tpu.pipeline_mode<synchronous>, transform_indices = @transform_36, window_bounds = array<i64: 1, 32>}, {pipeline_mode = #tpu.pipeline_mode<synchronous>, transform_indices = @transform_37, window_bounds = array<i64: 32, 128>}, {pipeline_mode = #tpu.pipeline_mode<synchronous>, transform_indices = @transform_38, window_bounds = array<i64: 1, 128>}, {transform_indices = @transform_39, window_bounds = array<i64: 1, 8, 128>}]} {
    %c0 = arith.constant 0 : index
    %c0_0 = arith.constant 0 : index
    %0 = vector.load %arg3[%c0, %c0_0] : memref<128x32xf32, #tpu.memory_space<vmem>>, vector<128x32xf32>
    %c0_1 = arith.constant 0 : index
    %c0_2 = arith.constant 0 : index
    %c0_3 = arith.constant 0 : index
    %1 = vector.load %arg1[%c0_1, %c0_2, %c0_3] : memref<1x8x1xi32, #tpu.memory_space<vmem>>, vector<1x8x1xi32>
    %2 = vector.shape_cast %1 : vector<1x8x1xi32> to vector<8x1xi32>
    %3 = tpu.iota {dimensions = array<i32: 1>} : vector<8x128xi32>
    %4 = vector.broadcast %2 : vector<8x1xi32> to vector<8x128xi32>
    %5 = arith.cmpi eq, %3, %4 : vector<8x128xi32>
    %6 = arith.extui %5 : vector<8x128xi1> to vector<8x128xi32>
    %7 = arith.sitofp %6 : vector<8x128xi32> to vector<8x128xf32>
    %cst = arith.constant dense<0.000000e+00> : vector<8x32xf32>
    %8 = tpu.matmul %7, %0, %cst {dimension_numbers = #tpu.dot_dimension_numbers<[1], [0], [0], [1], [0, 0, 1, 1], [], []>} : vector<8x128xf32>, vector<128x32xf32>, vector<8x32xf32> -> vector<8x32xf32>
    %cst_4 = arith.constant 5.65685415 : f32
    %9 = vector.broadcast %cst_4 : f32 to vector<8x32xf32>
    %10 = arith.mulf %8, %9 : vector<8x32xf32>
    %c0_5 = arith.constant 0 : index
    %c0_6 = arith.constant 0 : index
    %c0_7 = arith.constant 0 : index
    %11 = vector.load %arg4[%c0_5, %c0_6, %c0_7] : memref<2x32x96xf32, #tpu.memory_space<vmem>>, vector<1x32x96xf32>
    %12 = vector.shape_cast %11 : vector<1x32x96xf32> to vector<32x96xf32>
    %c0_8 = arith.constant 0 : index
    %c0_9 = arith.constant 0 : index
    %c0_10 = arith.constant 0 : index
    %13 = vector.load %arg5[%c0_8, %c0_9, %c0_10] : memref<2x1x96xf32, #tpu.memory_space<vmem>>, vector<1x1x96xf32>
    %14 = vector.shape_cast %13 : vector<1x1x96xf32> to vector<1x96xf32>
    %c0_11 = arith.constant 0 : index
    %c0_12 = arith.constant 0 : index
    %c0_13 = arith.constant 0 : index
    %15 = vector.load %arg6[%c0_11, %c0_12, %c0_13] : memref<2x32x32xf32, #tpu.memory_space<vmem>>, vector<1x32x32xf32>
    %16 = vector.shape_cast %15 : vector<1x32x32xf32> to vector<32x32xf32>
    %c0_14 = arith.constant 0 : index
    %c0_15 = arith.constant 0 : index
    %c0_16 = arith.constant 0 : index
    %17 = vector.load %arg7[%c0_14, %c0_15, %c0_16] : memref<2x1x32xf32, #tpu.memory_space<vmem>>, vector<1x1x32xf32>
    %18 = vector.shape_cast %17 : vector<1x1x32xf32> to vector<1x32xf32>
    %cst_17 = arith.constant dense<0.000000e+00> : vector<8x96xf32>
    %19 = tpu.matmul %10, %12, %cst_17 {dimension_numbers = #tpu.dot_dimension_numbers<[1], [0], [0], [1], [0, 0, 1, 1], [], []>} : vector<8x32xf32>, vector<32x96xf32>, vector<8x96xf32> -> vector<8x96xf32>
    %20 = vector.broadcast %14 : vector<1x96xf32> to vector<8x96xf32>
    %21 = arith.addf %19, %20 : vector<8x96xf32>
    %22 = vector.extract_strided_slice %21 {offsets = [0, 0], sizes = [8, 32], strides = [1, 1]} : vector<8x96xf32> to vector<8x32xf32>
    %23 = vector.extract_strided_slice %21 {offsets = [0, 32], sizes = [8, 32], strides = [1, 1]} : vector<8x96xf32> to vector<8x32xf32>
    %24 = vector.extract_strided_slice %21 {offsets = [0, 64], sizes = [8, 32], strides = [1, 1]} : vector<8x96xf32> to vector<8x32xf32>
    %25 = vector.extract_strided_slice %22 {offsets = [0, 0], sizes = [8, 8], strides = [1, 1]} : vector<8x32xf32> to vector<8x8xf32>
    %26 = vector.extract_strided_slice %23 {offsets = [0, 0], sizes = [8, 8], strides = [1, 1]} : vector<8x32xf32> to vector<8x8xf32>
    %27 = vector.extract_strided_slice %24 {offsets = [0, 0], sizes = [8, 8], strides = [1, 1]} : vector<8x32xf32> to vector<8x8xf32>
    %cst_18 = arith.constant dense<0.000000e+00> : vector<8x8xf32>
    %28 = tpu.matmul %25, %26, %cst_18 {dimension_numbers = #tpu.dot_dimension_numbers<[1], [1], [0], [0], [0, 0, 1, 0], [], []>} : vector<8x8xf32>, vector<8x8xf32>, vector<8x8xf32> -> vector<8x8xf32>
    %cst_19 = arith.constant 0.353553385 : f32
    %29 = vector.broadcast %cst_19 : f32 to vector<8x8xf32>
    %30 = arith.mulf %28, %29 : vector<8x8xf32>
    %cst_20 = arith.constant dense<0xFF800000> : vector<8xf32>
    %31 = vector.multi_reduction <maximumf>, %30, %cst_20 [1] : vector<8x8xf32> to vector<8xf32>
    %32 = vector.shape_cast %31 : vector<8xf32> to vector<8x1xf32>
    %33 = vector.broadcast %32 : vector<8x1xf32> to vector<8x8xf32>
    %34 = arith.subf %30, %33 : vector<8x8xf32>
    %35 = math.exp %34 : vector<8x8xf32>
    %cst_21 = arith.constant dense<0.000000e+00> : vector<8xf32>
    %36 = vector.multi_reduction <add>, %35, %cst_21 [1] : vector<8x8xf32> to vector<8xf32>
    %37 = vector.shape_cast %36 : vector<8xf32> to vector<8x1xf32>
    %38 = vector.broadcast %37 : vector<8x1xf32> to vector<8x8xf32>
    %39 = arith.divf %35, %38 : vector<8x8xf32>
    %cst_22 = arith.constant dense<0.000000e+00> : vector<8x8xf32>
    %40 = tpu.matmul %39, %27, %cst_22 {dimension_numbers = #tpu.dot_dimension_numbers<[1], [0], [0], [1], [0, 0, 1, 1], [], []>} : vector<8x8xf32>, vector<8x8xf32>, vector<8x8xf32> -> vector<8x8xf32>
    %41 = vector.extract_strided_slice %16 {offsets = [0, 0], sizes = [8, 32], strides = [1, 1]} : vector<32x32xf32> to vector<8x32xf32>
    %cst_23 = arith.constant dense<0.000000e+00> : vector<8x32xf32>
    %42 = tpu.matmul %40, %41, %cst_23 {dimension_numbers = #tpu.dot_dimension_numbers<[1], [0], [0], [1], [0, 0, 1, 1], [], []>} : vector<8x8xf32>, vector<8x32xf32>, vector<8x32xf32> -> vector<8x32xf32>
    %43 = vector.broadcast %18 : vector<1x32xf32> to vector<8x32xf32>
    %44 = arith.addf %43, %42 : vector<8x32xf32>
    %45 = vector.extract_strided_slice %22 {offsets = [0, 8], sizes = [8, 8], strides = [1, 1]} : vector<8x32xf32> to vector<8x8xf32>
    %46 = vector.extract_strided_slice %23 {offsets = [0, 8], sizes = [8, 8], strides = [1, 1]} : vector<8x32xf32> to vector<8x8xf32>
    %47 = vector.extract_strided_slice %24 {offsets = [0, 8], sizes = [8, 8], strides = [1, 1]} : vector<8x32xf32> to vector<8x8xf32>
    %cst_24 = arith.constant dense<0.000000e+00> : vector<8x8xf32>
    %48 = tpu.matmul %45, %46, %cst_24 {dimension_numbers = #tpu.dot_dimension_numbers<[1], [1], [0], [0], [0, 0, 1, 0], [], []>} : vector<8x8xf32>, vector<8x8xf32>, vector<8x8xf32> -> vector<8x8xf32>
    %cst_25 = arith.constant 0.353553385 : f32
    %49 = vector.broadcast %cst_25 : f32 to vector<8x8xf32>
    %50 = arith.mulf %48, %49 : vector<8x8xf32>
    %cst_26 = arith.constant dense<0xFF800000> : vector<8xf32>
    %51 = vector.multi_reduction <maximumf>, %50, %cst_26 [1] : vector<8x8xf32> to vector<8xf32>
    %52 = vector.shape_cast %51 : vector<8xf32> to vector<8x1xf32>
    %53 = vector.broadcast %52 : vector<8x1xf32> to vector<8x8xf32>
    %54 = arith.subf %50, %53 : vector<8x8xf32>
    %55 = math.exp %54 : vector<8x8xf32>
    %cst_27 = arith.constant dense<0.000000e+00> : vector<8xf32>
    %56 = vector.multi_reduction <add>, %55, %cst_27 [1] : vector<8x8xf32> to vector<8xf32>
    %57 = vector.shape_cast %56 : vector<8xf32> to vector<8x1xf32>
    %58 = vector.broadcast %57 : vector<8x1xf32> to vector<8x8xf32>
    %59 = arith.divf %55, %58 : vector<8x8xf32>
    %cst_28 = arith.constant dense<0.000000e+00> : vector<8x8xf32>
    %60 = tpu.matmul %59, %47, %cst_28 {dimension_numbers = #tpu.dot_dimension_numbers<[1], [0], [0], [1], [0, 0, 1, 1], [], []>} : vector<8x8xf32>, vector<8x8xf32>, vector<8x8xf32> -> vector<8x8xf32>
    %61 = vector.extract_strided_slice %16 {offsets = [8, 0], sizes = [8, 32], strides = [1, 1]} : vector<32x32xf32> to vector<8x32xf32>
    %cst_29 = arith.constant dense<0.000000e+00> : vector<8x32xf32>
    %62 = tpu.matmul %60, %61, %cst_29 {dimension_numbers = #tpu.dot_dimension_numbers<[1], [0], [0], [1], [0, 0, 1, 1], [], []>} : vector<8x8xf32>, vector<8x32xf32>, vector<8x32xf32> -> vector<8x32xf32>
    %63 = arith.addf %44, %62 : vector<8x32xf32>
    %64 = vector.extract_strided_slice %22 {offsets = [0, 16], sizes = [8, 8], strides = [1, 1]} : vector<8x32xf32> to vector<8x8xf32>
    %65 = vector.extract_strided_slice %23 {offsets = [0, 16], sizes = [8, 8], strides = [1, 1]} : vector<8x32xf32> to vector<8x8xf32>
    %66 = vector.extract_strided_slice %24 {offsets = [0, 16], sizes = [8, 8], strides = [1, 1]} : vector<8x32xf32> to vector<8x8xf32>
    %cst_30 = arith.constant dense<0.000000e+00> : vector<8x8xf32>
    %67 = tpu.matmul %64, %65, %cst_30 {dimension_numbers = #tpu.dot_dimension_numbers<[1], [1], [0], [0], [0, 0, 1, 0], [], []>} : vector<8x8xf32>, vector<8x8xf32>, vector<8x8xf32> -> vector<8x8xf32>
    %cst_31 = arith.constant 0.353553385 : f32
    %68 = vector.broadcast %cst_31 : f32 to vector<8x8xf32>
    %69 = arith.mulf %67, %68 : vector<8x8xf32>
    %cst_32 = arith.constant dense<0xFF800000> : vector<8xf32>
    %70 = vector.multi_reduction <maximumf>, %69, %cst_32 [1] : vector<8x8xf32> to vector<8xf32>
    %71 = vector.shape_cast %70 : vector<8xf32> to vector<8x1xf32>
    %72 = vector.broadcast %71 : vector<8x1xf32> to vector<8x8xf32>
    %73 = arith.subf %69, %72 : vector<8x8xf32>
    %74 = math.exp %73 : vector<8x8xf32>
    %cst_33 = arith.constant dense<0.000000e+00> : vector<8xf32>
    %75 = vector.multi_reduction <add>, %74, %cst_33 [1] : vector<8x8xf32> to vector<8xf32>
    %76 = vector.shape_cast %75 : vector<8xf32> to vector<8x1xf32>
    %77 = vector.broadcast %76 : vector<8x1xf32> to vector<8x8xf32>
    %78 = arith.divf %74, %77 : vector<8x8xf32>
    %cst_34 = arith.constant dense<0.000000e+00> : vector<8x8xf32>
    %79 = tpu.matmul %78, %66, %cst_34 {dimension_numbers = #tpu.dot_dimension_numbers<[1], [0], [0], [1], [0, 0, 1, 1], [], []>} : vector<8x8xf32>, vector<8x8xf32>, vector<8x8xf32> -> vector<8x8xf32>
    %80 = vector.extract_strided_slice %16 {offsets = [16, 0], sizes = [8, 32], strides = [1, 1]} : vector<32x32xf32> to vector<8x32xf32>
    %cst_35 = arith.constant dense<0.000000e+00> : vector<8x32xf32>
    %81 = tpu.matmul %79, %80, %cst_35 {dimension_numbers = #tpu.dot_dimension_numbers<[1], [0], [0], [1], [0, 0, 1, 1], [], []>} : vector<8x8xf32>, vector<8x32xf32>, vector<8x32xf32> -> vector<8x32xf32>
    %82 = arith.addf %63, %81 : vector<8x32xf32>
    %83 = vector.extract_strided_slice %22 {offsets = [0, 24], sizes = [8, 8], strides = [1, 1]} : vector<8x32xf32> to vector<8x8xf32>
    %84 = vector.extract_strided_slice %23 {offsets = [0, 24], sizes = [8, 8], strides = [1, 1]} : vector<8x32xf32> to vector<8x8xf32>
    %85 = vector.extract_strided_slice %24 {offsets = [0, 24], sizes = [8, 8], strides = [1, 1]} : vector<8x32xf32> to vector<8x8xf32>
    %cst_36 = arith.constant dense<0.000000e+00> : vector<8x8xf32>
    %86 = tpu.matmul %83, %84, %cst_36 {dimension_numbers = #tpu.dot_dimension_numbers<[1], [1], [0], [0], [0, 0, 1, 0], [], []>} : vector<8x8xf32>, vector<8x8xf32>, vector<8x8xf32> -> vector<8x8xf32>
    %cst_37 = arith.constant 0.353553385 : f32
    %87 = vector.broadcast %cst_37 : f32 to vector<8x8xf32>
    %88 = arith.mulf %86, %87 : vector<8x8xf32>
    %cst_38 = arith.constant dense<0xFF800000> : vector<8xf32>
    %89 = vector.multi_reduction <maximumf>, %88, %cst_38 [1] : vector<8x8xf32> to vector<8xf32>
    %90 = vector.shape_cast %89 : vector<8xf32> to vector<8x1xf32>
    %91 = vector.broadcast %90 : vector<8x1xf32> to vector<8x8xf32>
    %92 = arith.subf %88, %91 : vector<8x8xf32>
    %93 = math.exp %92 : vector<8x8xf32>
    %cst_39 = arith.constant dense<0.000000e+00> : vector<8xf32>
    %94 = vector.multi_reduction <add>, %93, %cst_39 [1] : vector<8x8xf32> to vector<8xf32>
    %95 = vector.shape_cast %94 : vector<8xf32> to vector<8x1xf32>
    %96 = vector.broadcast %95 : vector<8x1xf32> to vector<8x8xf32>
    %97 = arith.divf %93, %96 : vector<8x8xf32>
    %cst_40 = arith.constant dense<0.000000e+00> : vector<8x8xf32>
    %98 = tpu.matmul %97, %85, %cst_40 {dimension_numbers = #tpu.dot_dimension_numbers<[1], [0], [0], [1], [0, 0, 1, 1], [], []>} : vector<8x8xf32>, vector<8x8xf32>, vector<8x8xf32> -> vector<8x8xf32>
    %99 = vector.extract_strided_slice %16 {offsets = [24, 0], sizes = [8, 32], strides = [1, 1]} : vector<32x32xf32> to vector<8x32xf32>
    %cst_41 = arith.constant dense<0.000000e+00> : vector<8x32xf32>
    %100 = tpu.matmul %98, %99, %cst_41 {dimension_numbers = #tpu.dot_dimension_numbers<[1], [0], [0], [1], [0, 0, 1, 1], [], []>} : vector<8x8xf32>, vector<8x32xf32>, vector<8x32xf32> -> vector<8x32xf32>
    %101 = arith.addf %82, %100 : vector<8x32xf32>
    %102 = arith.addf %10, %101 : vector<8x32xf32>
    %c0_42 = arith.constant 0 : index
    %c0_43 = arith.constant 0 : index
    %c0_44 = arith.constant 0 : index
    %103 = vector.load %arg8[%c0_42, %c0_43, %c0_44] : memref<2x1x32xf32, #tpu.memory_space<vmem>>, vector<1x1x32xf32>
    %104 = vector.shape_cast %103 : vector<1x1x32xf32> to vector<1x32xf32>
    %c0_45 = arith.constant 0 : index
    %c0_46 = arith.constant 0 : index
    %c0_47 = arith.constant 0 : index
    %105 = vector.load %arg9[%c0_45, %c0_46, %c0_47] : memref<2x1x32xf32, #tpu.memory_space<vmem>>, vector<1x1x32xf32>
    %106 = vector.shape_cast %105 : vector<1x1x32xf32> to vector<1x32xf32>
    %cst_48 = arith.constant dense<0.000000e+00> : vector<8xf32>
    %107 = vector.multi_reduction <add>, %102, %cst_48 [1] : vector<8x32xf32> to vector<8xf32>
    %108 = vector.shape_cast %107 : vector<8xf32> to vector<8x1xf32>
    %cst_49 = arith.constant 3.200000e+01 : f32
    %109 = vector.broadcast %cst_49 : f32 to vector<8x1xf32>
    %110 = arith.divf %108, %109 : vector<8x1xf32>
    %111 = vector.broadcast %110 : vector<8x1xf32> to vector<8x32xf32>
    %112 = arith.subf %102, %111 : vector<8x32xf32>
    %113 = arith.mulf %112, %112 : vector<8x32xf32>
    %cst_50 = arith.constant dense<0.000000e+00> : vector<8xf32>
    %114 = vector.multi_reduction <add>, %113, %cst_50 [1] : vector<8x32xf32> to vector<8xf32>
    %115 = vector.shape_cast %114 : vector<8xf32> to vector<8x1xf32>
    %cst_51 = arith.constant 3.200000e+01 : f32
    %116 = vector.broadcast %cst_51 : f32 to vector<8x1xf32>
    %117 = arith.divf %115, %116 : vector<8x1xf32>
    %118 = vector.broadcast %110 : vector<8x1xf32> to vector<8x32xf32>
    %119 = arith.subf %102, %118 : vector<8x32xf32>
    %cst_52 = arith.constant 9.99999974E-6 : f32
    %120 = vector.broadcast %cst_52 : f32 to vector<8x1xf32>
    %121 = arith.addf %117, %120 : vector<8x1xf32>
    %122 = math.rsqrt %121 : vector<8x1xf32>
    %123 = vector.broadcast %122 : vector<8x1xf32> to vector<8x32xf32>
    %124 = arith.mulf %119, %123 : vector<8x32xf32>
    %125 = vector.broadcast %104 : vector<1x32xf32> to vector<8x32xf32>
    %126 = arith.mulf %124, %125 : vector<8x32xf32>
    %127 = vector.broadcast %106 : vector<1x32xf32> to vector<8x32xf32>
    %128 = arith.addf %126, %127 : vector<8x32xf32>
    %c0_53 = arith.constant 0 : index
    %c0_54 = arith.constant 0 : index
    %c0_55 = arith.constant 0 : index
    %129 = vector.load %arg10[%c0_53, %c0_54, %c0_55] : memref<2x32x64xf32, #tpu.memory_space<vmem>>, vector<1x32x64xf32>
    %130 = vector.shape_cast %129 : vector<1x32x64xf32> to vector<32x64xf32>
    %c0_56 = arith.constant 0 : index
    %c0_57 = arith.constant 0 : index
    %c0_58 = arith.constant 0 : index
    %131 = vector.load %arg11[%c0_56, %c0_57, %c0_58] : memref<2x1x64xf32, #tpu.memory_space<vmem>>, vector<1x1x64xf32>
    %132 = vector.shape_cast %131 : vector<1x1x64xf32> to vector<1x64xf32>
    %c0_59 = arith.constant 0 : index
    %c0_60 = arith.constant 0 : index
    %c0_61 = arith.constant 0 : index
    %133 = vector.load %arg12[%c0_59, %c0_60, %c0_61] : memref<2x64x32xf32, #tpu.memory_space<vmem>>, vector<1x64x32xf32>
    %134 = vector.shape_cast %133 : vector<1x64x32xf32> to vector<64x32xf32>
    %c0_62 = arith.constant 0 : index
    %c0_63 = arith.constant 0 : index
    %c0_64 = arith.constant 0 : index
    %135 = vector.load %arg13[%c0_62, %c0_63, %c0_64] : memref<2x1x32xf32, #tpu.memory_space<vmem>>, vector<1x1x32xf32>
    %136 = vector.shape_cast %135 : vector<1x1x32xf32> to vector<1x32xf32>
    %cst_65 = arith.constant dense<0.000000e+00> : vector<8x64xf32>
    %137 = tpu.matmul %128, %130, %cst_65 {dimension_numbers = #tpu.dot_dimension_numbers<[1], [0], [0], [1], [0, 0, 1, 1], [], []>} : vector<8x32xf32>, vector<32x64xf32>, vector<8x64xf32> -> vector<8x64xf32>
    %138 = vector.broadcast %132 : vector<1x64xf32> to vector<8x64xf32>
    %139 = arith.addf %137, %138 : vector<8x64xf32>
    %cst_66 = arith.constant 0.000000e+00 : f32
    %140 = vector.broadcast %cst_66 : f32 to vector<8x64xf32>
    %141 = arith.maximumf %139, %140 : vector<8x64xf32>
    %cst_67 = arith.constant dense<0.000000e+00> : vector<8x32xf32>
    %142 = tpu.matmul %141, %134, %cst_67 {dimension_numbers = #tpu.dot_dimension_numbers<[1], [0], [0], [1], [0, 0, 1, 1], [], []>} : vector<8x64xf32>, vector<64x32xf32>, vector<8x32xf32> -> vector<8x32xf32>
    %143 = vector.broadcast %136 : vector<1x32xf32> to vector<8x32xf32>
    %144 = arith.addf %142, %143 : vector<8x32xf32>
    %145 = arith.addf %128, %144 : vector<8x32xf32>
    %c0_68 = arith.constant 0 : index
    %c0_69 = arith.constant 0 : index
    %c0_70 = arith.constant 0 : index
    %146 = vector.load %arg14[%c0_68, %c0_69, %c0_70] : memref<2x1x32xf32, #tpu.memory_space<vmem>>, vector<1x1x32xf32>
    %147 = vector.shape_cast %146 : vector<1x1x32xf32> to vector<1x32xf32>
    %c0_71 = arith.constant 0 : index
    %c0_72 = arith.constant 0 : index
    %c0_73 = arith.constant 0 : index
    %148 = vector.load %arg15[%c0_71, %c0_72, %c0_73] : memref<2x1x32xf32, #tpu.memory_space<vmem>>, vector<1x1x32xf32>
    %149 = vector.shape_cast %148 : vector<1x1x32xf32> to vector<1x32xf32>
    %cst_74 = arith.constant dense<0.000000e+00> : vector<8xf32>
    %150 = vector.multi_reduction <add>, %145, %cst_74 [1] : vector<8x32xf32> to vector<8xf32>
    %151 = vector.shape_cast %150 : vector<8xf32> to vector<8x1xf32>
    %cst_75 = arith.constant 3.200000e+01 : f32
    %152 = vector.broadcast %cst_75 : f32 to vector<8x1xf32>
    %153 = arith.divf %151, %152 : vector<8x1xf32>
    %154 = vector.broadcast %153 : vector<8x1xf32> to vector<8x32xf32>
    %155 = arith.subf %145, %154 : vector<8x32xf32>
    %156 = arith.mulf %155, %155 : vector<8x32xf32>
    %cst_76 = arith.constant dense<0.000000e+00> : vector<8xf32>
    %157 = vector.multi_reduction <add>, %156, %cst_76 [1] : vector<8x32xf32> to vector<8xf32>
    %158 = vector.shape_cast %157 : vector<8xf32> to vector<8x1xf32>
    %cst_77 = arith.constant 3.200000e+01 : f32
    %159 = vector.broadcast %cst_77 : f32 to vector<8x1xf32>
    %160 = arith.divf %158, %159 : vector<8x1xf32>
    %161 = vector.broadcast %153 : vector<8x1xf32> to vector<8x32xf32>
    %162 = arith.subf %145, %161 : vector<8x32xf32>
    %cst_78 = arith.constant 9.99999974E-6 : f32
    %163 = vector.broadcast %cst_78 : f32 to vector<8x1xf32>
    %164 = arith.addf %160, %163 : vector<8x1xf32>
    %165 = math.rsqrt %164 : vector<8x1xf32>
    %166 = vector.broadcast %165 : vector<8x1xf32> to vector<8x32xf32>
    %167 = arith.mulf %162, %166 : vector<8x32xf32>
    %168 = vector.broadcast %147 : vector<1x32xf32> to vector<8x32xf32>
    %169 = arith.mulf %167, %168 : vector<8x32xf32>
    %170 = vector.broadcast %149 : vector<1x32xf32> to vector<8x32xf32>
    %171 = arith.addf %169, %170 : vector<8x32xf32>
    %c1 = arith.constant 1 : index
    %c0_79 = arith.constant 0 : index
    %c0_80 = arith.constant 0 : index
    %172 = vector.load %arg4[%c1, %c0_79, %c0_80] : memref<2x32x96xf32, #tpu.memory_space<vmem>>, vector<1x32x96xf32>
    %173 = vector.shape_cast %172 : vector<1x32x96xf32> to vector<32x96xf32>
    %c1_81 = arith.constant 1 : index
    %c0_82 = arith.constant 0 : index
    %c0_83 = arith.constant 0 : index
    %174 = vector.load %arg5[%c1_81, %c0_82, %c0_83] : memref<2x1x96xf32, #tpu.memory_space<vmem>>, vector<1x1x96xf32>
    %175 = vector.shape_cast %174 : vector<1x1x96xf32> to vector<1x96xf32>
    %c1_84 = arith.constant 1 : index
    %c0_85 = arith.constant 0 : index
    %c0_86 = arith.constant 0 : index
    %176 = vector.load %arg6[%c1_84, %c0_85, %c0_86] : memref<2x32x32xf32, #tpu.memory_space<vmem>>, vector<1x32x32xf32>
    %177 = vector.shape_cast %176 : vector<1x32x32xf32> to vector<32x32xf32>
    %c1_87 = arith.constant 1 : index
    %c0_88 = arith.constant 0 : index
    %c0_89 = arith.constant 0 : index
    %178 = vector.load %arg7[%c1_87, %c0_88, %c0_89] : memref<2x1x32xf32, #tpu.memory_space<vmem>>, vector<1x1x32xf32>
    %179 = vector.shape_cast %178 : vector<1x1x32xf32> to vector<1x32xf32>
    %cst_90 = arith.constant dense<0.000000e+00> : vector<8x96xf32>
    %180 = tpu.matmul %171, %173, %cst_90 {dimension_numbers = #tpu.dot_dimension_numbers<[1], [0], [0], [1], [0, 0, 1, 1], [], []>} : vector<8x32xf32>, vector<32x96xf32>, vector<8x96xf32> -> vector<8x96xf32>
    %181 = vector.broadcast %175 : vector<1x96xf32> to vector<8x96xf32>
    %182 = arith.addf %180, %181 : vector<8x96xf32>
    %183 = vector.extract_strided_slice %182 {offsets = [0, 0], sizes = [8, 32], strides = [1, 1]} : vector<8x96xf32> to vector<8x32xf32>
    %184 = vector.extract_strided_slice %182 {offsets = [0, 32], sizes = [8, 32], strides = [1, 1]} : vector<8x96xf32> to vector<8x32xf32>
    %185 = vector.extract_strided_slice %182 {offsets = [0, 64], sizes = [8, 32], strides = [1, 1]} : vector<8x96xf32> to vector<8x32xf32>
    %186 = vector.extract_strided_slice %183 {offsets = [0, 0], sizes = [8, 8], strides = [1, 1]} : vector<8x32xf32> to vector<8x8xf32>
    %187 = vector.extract_strided_slice %184 {offsets = [0, 0], sizes = [8, 8], strides = [1, 1]} : vector<8x32xf32> to vector<8x8xf32>
    %188 = vector.extract_strided_slice %185 {offsets = [0, 0], sizes = [8, 8], strides = [1, 1]} : vector<8x32xf32> to vector<8x8xf32>
    %cst_91 = arith.constant dense<0.000000e+00> : vector<8x8xf32>
    %189 = tpu.matmul %186, %187, %cst_91 {dimension_numbers = #tpu.dot_dimension_numbers<[1], [1], [0], [0], [0, 0, 1, 0], [], []>} : vector<8x8xf32>, vector<8x8xf32>, vector<8x8xf32> -> vector<8x8xf32>
    %cst_92 = arith.constant 0.353553385 : f32
    %190 = vector.broadcast %cst_92 : f32 to vector<8x8xf32>
    %191 = arith.mulf %189, %190 : vector<8x8xf32>
    %cst_93 = arith.constant dense<0xFF800000> : vector<8xf32>
    %192 = vector.multi_reduction <maximumf>, %191, %cst_93 [1] : vector<8x8xf32> to vector<8xf32>
    %193 = vector.shape_cast %192 : vector<8xf32> to vector<8x1xf32>
    %194 = vector.broadcast %193 : vector<8x1xf32> to vector<8x8xf32>
    %195 = arith.subf %191, %194 : vector<8x8xf32>
    %196 = math.exp %195 : vector<8x8xf32>
    %cst_94 = arith.constant dense<0.000000e+00> : vector<8xf32>
    %197 = vector.multi_reduction <add>, %196, %cst_94 [1] : vector<8x8xf32> to vector<8xf32>
    %198 = vector.shape_cast %197 : vector<8xf32> to vector<8x1xf32>
    %199 = vector.broadcast %198 : vector<8x1xf32> to vector<8x8xf32>
    %200 = arith.divf %196, %199 : vector<8x8xf32>
    %cst_95 = arith.constant dense<0.000000e+00> : vector<8x8xf32>
    %201 = tpu.matmul %200, %188, %cst_95 {dimension_numbers = #tpu.dot_dimension_numbers<[1], [0], [0], [1], [0, 0, 1, 1], [], []>} : vector<8x8xf32>, vector<8x8xf32>, vector<8x8xf32> -> vector<8x8xf32>
    %202 = vector.extract_strided_slice %177 {offsets = [0, 0], sizes = [8, 32], strides = [1, 1]} : vector<32x32xf32> to vector<8x32xf32>
    %cst_96 = arith.constant dense<0.000000e+00> : vector<8x32xf32>
    %203 = tpu.matmul %201, %202, %cst_96 {dimension_numbers = #tpu.dot_dimension_numbers<[1], [0], [0], [1], [0, 0, 1, 1], [], []>} : vector<8x8xf32>, vector<8x32xf32>, vector<8x32xf32> -> vector<8x32xf32>
    %204 = vector.broadcast %179 : vector<1x32xf32> to vector<8x32xf32>
    %205 = arith.addf %204, %203 : vector<8x32xf32>
    %206 = vector.extract_strided_slice %183 {offsets = [0, 8], sizes = [8, 8], strides = [1, 1]} : vector<8x32xf32> to vector<8x8xf32>
    %207 = vector.extract_strided_slice %184 {offsets = [0, 8], sizes = [8, 8], strides = [1, 1]} : vector<8x32xf32> to vector<8x8xf32>
    %208 = vector.extract_strided_slice %185 {offsets = [0, 8], sizes = [8, 8], strides = [1, 1]} : vector<8x32xf32> to vector<8x8xf32>
    %cst_97 = arith.constant dense<0.000000e+00> : vector<8x8xf32>
    %209 = tpu.matmul %206, %207, %cst_97 {dimension_numbers = #tpu.dot_dimension_numbers<[1], [1], [0], [0], [0, 0, 1, 0], [], []>} : vector<8x8xf32>, vector<8x8xf32>, vector<8x8xf32> -> vector<8x8xf32>
    %cst_98 = arith.constant 0.353553385 : f32
    %210 = vector.broadcast %cst_98 : f32 to vector<8x8xf32>
    %211 = arith.mulf %209, %210 : vector<8x8xf32>
    %cst_99 = arith.constant dense<0xFF800000> : vector<8xf32>
    %212 = vector.multi_reduction <maximumf>, %211, %cst_99 [1] : vector<8x8xf32> to vector<8xf32>
    %213 = vector.shape_cast %212 : vector<8xf32> to vector<8x1xf32>
    %214 = vector.broadcast %213 : vector<8x1xf32> to vector<8x8xf32>
    %215 = arith.subf %211, %214 : vector<8x8xf32>
    %216 = math.exp %215 : vector<8x8xf32>
    %cst_100 = arith.constant dense<0.000000e+00> : vector<8xf32>
    %217 = vector.multi_reduction <add>, %216, %cst_100 [1] : vector<8x8xf32> to vector<8xf32>
    %218 = vector.shape_cast %217 : vector<8xf32> to vector<8x1xf32>
    %219 = vector.broadcast %218 : vector<8x1xf32> to vector<8x8xf32>
    %220 = arith.divf %216, %219 : vector<8x8xf32>
    %cst_101 = arith.constant dense<0.000000e+00> : vector<8x8xf32>
    %221 = tpu.matmul %220, %208, %cst_101 {dimension_numbers = #tpu.dot_dimension_numbers<[1], [0], [0], [1], [0, 0, 1, 1], [], []>} : vector<8x8xf32>, vector<8x8xf32>, vector<8x8xf32> -> vector<8x8xf32>
    %222 = vector.extract_strided_slice %177 {offsets = [8, 0], sizes = [8, 32], strides = [1, 1]} : vector<32x32xf32> to vector<8x32xf32>
    %cst_102 = arith.constant dense<0.000000e+00> : vector<8x32xf32>
    %223 = tpu.matmul %221, %222, %cst_102 {dimension_numbers = #tpu.dot_dimension_numbers<[1], [0], [0], [1], [0, 0, 1, 1], [], []>} : vector<8x8xf32>, vector<8x32xf32>, vector<8x32xf32> -> vector<8x32xf32>
    %224 = arith.addf %205, %223 : vector<8x32xf32>
    %225 = vector.extract_strided_slice %183 {offsets = [0, 16], sizes = [8, 8], strides = [1, 1]} : vector<8x32xf32> to vector<8x8xf32>
    %226 = vector.extract_strided_slice %184 {offsets = [0, 16], sizes = [8, 8], strides = [1, 1]} : vector<8x32xf32> to vector<8x8xf32>
    %227 = vector.extract_strided_slice %185 {offsets = [0, 16], sizes = [8, 8], strides = [1, 1]} : vector<8x32xf32> to vector<8x8xf32>
    %cst_103 = arith.constant dense<0.000000e+00> : vector<8x8xf32>
    %228 = tpu.matmul %225, %226, %cst_103 {dimension_numbers = #tpu.dot_dimension_numbers<[1], [1], [0], [0], [0, 0, 1, 0], [], []>} : vector<8x8xf32>, vector<8x8xf32>, vector<8x8xf32> -> vector<8x8xf32>
    %cst_104 = arith.constant 0.353553385 : f32
    %229 = vector.broadcast %cst_104 : f32 to vector<8x8xf32>
    %230 = arith.mulf %228, %229 : vector<8x8xf32>
    %cst_105 = arith.constant dense<0xFF800000> : vector<8xf32>
    %231 = vector.multi_reduction <maximumf>, %230, %cst_105 [1] : vector<8x8xf32> to vector<8xf32>
    %232 = vector.shape_cast %231 : vector<8xf32> to vector<8x1xf32>
    %233 = vector.broadcast %232 : vector<8x1xf32> to vector<8x8xf32>
    %234 = arith.subf %230, %233 : vector<8x8xf32>
    %235 = math.exp %234 : vector<8x8xf32>
    %cst_106 = arith.constant dense<0.000000e+00> : vector<8xf32>
    %236 = vector.multi_reduction <add>, %235, %cst_106 [1] : vector<8x8xf32> to vector<8xf32>
    %237 = vector.shape_cast %236 : vector<8xf32> to vector<8x1xf32>
    %238 = vector.broadcast %237 : vector<8x1xf32> to vector<8x8xf32>
    %239 = arith.divf %235, %238 : vector<8x8xf32>
    %cst_107 = arith.constant dense<0.000000e+00> : vector<8x8xf32>
    %240 = tpu.matmul %239, %227, %cst_107 {dimension_numbers = #tpu.dot_dimension_numbers<[1], [0], [0], [1], [0, 0, 1, 1], [], []>} : vector<8x8xf32>, vector<8x8xf32>, vector<8x8xf32> -> vector<8x8xf32>
    %241 = vector.extract_strided_slice %177 {offsets = [16, 0], sizes = [8, 32], strides = [1, 1]} : vector<32x32xf32> to vector<8x32xf32>
    %cst_108 = arith.constant dense<0.000000e+00> : vector<8x32xf32>
    %242 = tpu.matmul %240, %241, %cst_108 {dimension_numbers = #tpu.dot_dimension_numbers<[1], [0], [0], [1], [0, 0, 1, 1], [], []>} : vector<8x8xf32>, vector<8x32xf32>, vector<8x32xf32> -> vector<8x32xf32>
    %243 = arith.addf %224, %242 : vector<8x32xf32>
    %244 = vector.extract_strided_slice %183 {offsets = [0, 24], sizes = [8, 8], strides = [1, 1]} : vector<8x32xf32> to vector<8x8xf32>
    %245 = vector.extract_strided_slice %184 {offsets = [0, 24], sizes = [8, 8], strides = [1, 1]} : vector<8x32xf32> to vector<8x8xf32>
    %246 = vector.extract_strided_slice %185 {offsets = [0, 24], sizes = [8, 8], strides = [1, 1]} : vector<8x32xf32> to vector<8x8xf32>
    %cst_109 = arith.constant dense<0.000000e+00> : vector<8x8xf32>
    %247 = tpu.matmul %244, %245, %cst_109 {dimension_numbers = #tpu.dot_dimension_numbers<[1], [1], [0], [0], [0, 0, 1, 0], [], []>} : vector<8x8xf32>, vector<8x8xf32>, vector<8x8xf32> -> vector<8x8xf32>
    %cst_110 = arith.constant 0.353553385 : f32
    %248 = vector.broadcast %cst_110 : f32 to vector<8x8xf32>
    %249 = arith.mulf %247, %248 : vector<8x8xf32>
    %cst_111 = arith.constant dense<0xFF800000> : vector<8xf32>
    %250 = vector.multi_reduction <maximumf>, %249, %cst_111 [1] : vector<8x8xf32> to vector<8xf32>
    %251 = vector.shape_cast %250 : vector<8xf32> to vector<8x1xf32>
    %252 = vector.broadcast %251 : vector<8x1xf32> to vector<8x8xf32>
    %253 = arith.subf %249, %252 : vector<8x8xf32>
    %254 = math.exp %253 : vector<8x8xf32>
    %cst_112 = arith.constant dense<0.000000e+00> : vector<8xf32>
    %255 = vector.multi_reduction <add>, %254, %cst_112 [1] : vector<8x8xf32> to vector<8xf32>
    %256 = vector.shape_cast %255 : vector<8xf32> to vector<8x1xf32>
    %257 = vector.broadcast %256 : vector<8x1xf32> to vector<8x8xf32>
    %258 = arith.divf %254, %257 : vector<8x8xf32>
    %cst_113 = arith.constant dense<0.000000e+00> : vector<8x8xf32>
    %259 = tpu.matmul %258, %246, %cst_113 {dimension_numbers = #tpu.dot_dimension_numbers<[1], [0], [0], [1], [0, 0, 1, 1], [], []>} : vector<8x8xf32>, vector<8x8xf32>, vector<8x8xf32> -> vector<8x8xf32>
    %260 = vector.extract_strided_slice %177 {offsets = [24, 0], sizes = [8, 32], strides = [1, 1]} : vector<32x32xf32> to vector<8x32xf32>
    %cst_114 = arith.constant dense<0.000000e+00> : vector<8x32xf32>
    %261 = tpu.matmul %259, %260, %cst_114 {dimension_numbers = #tpu.dot_dimension_numbers<[1], [0], [0], [1], [0, 0, 1, 1], [], []>} : vector<8x8xf32>, vector<8x32xf32>, vector<8x32xf32> -> vector<8x32xf32>
    %262 = arith.addf %243, %261 : vector<8x32xf32>
    %263 = arith.addf %171, %262 : vector<8x32xf32>
    %c1_115 = arith.constant 1 : index
    %c0_116 = arith.constant 0 : index
    %c0_117 = arith.constant 0 : index
    %264 = vector.load %arg8[%c1_115, %c0_116, %c0_117] : memref<2x1x32xf32, #tpu.memory_space<vmem>>, vector<1x1x32xf32>
    %265 = vector.shape_cast %264 : vector<1x1x32xf32> to vector<1x32xf32>
    %c1_118 = arith.constant 1 : index
    %c0_119 = arith.constant 0 : index
    %c0_120 = arith.constant 0 : index
    %266 = vector.load %arg9[%c1_118, %c0_119, %c0_120] : memref<2x1x32xf32, #tpu.memory_space<vmem>>, vector<1x1x32xf32>
    %267 = vector.shape_cast %266 : vector<1x1x32xf32> to vector<1x32xf32>
    %cst_121 = arith.constant dense<0.000000e+00> : vector<8xf32>
    %268 = vector.multi_reduction <add>, %263, %cst_121 [1] : vector<8x32xf32> to vector<8xf32>
    %269 = vector.shape_cast %268 : vector<8xf32> to vector<8x1xf32>
    %cst_122 = arith.constant 3.200000e+01 : f32
    %270 = vector.broadcast %cst_122 : f32 to vector<8x1xf32>
    %271 = arith.divf %269, %270 : vector<8x1xf32>
    %272 = vector.broadcast %271 : vector<8x1xf32> to vector<8x32xf32>
    %273 = arith.subf %263, %272 : vector<8x32xf32>
    %274 = arith.mulf %273, %273 : vector<8x32xf32>
    %cst_123 = arith.constant dense<0.000000e+00> : vector<8xf32>
    %275 = vector.multi_reduction <add>, %274, %cst_123 [1] : vector<8x32xf32> to vector<8xf32>
    %276 = vector.shape_cast %275 : vector<8xf32> to vector<8x1xf32>
    %cst_124 = arith.constant 3.200000e+01 : f32
    %277 = vector.broadcast %cst_124 : f32 to vector<8x1xf32>
    %278 = arith.divf %276, %277 : vector<8x1xf32>
    %279 = vector.broadcast %271 : vector<8x1xf32> to vector<8x32xf32>
    %280 = arith.subf %263, %279 : vector<8x32xf32>
    %cst_125 = arith.constant 9.99999974E-6 : f32
    %281 = vector.broadcast %cst_125 : f32 to vector<8x1xf32>
    %282 = arith.addf %278, %281 : vector<8x1xf32>
    %283 = math.rsqrt %282 : vector<8x1xf32>
    %284 = vector.broadcast %283 : vector<8x1xf32> to vector<8x32xf32>
    %285 = arith.mulf %280, %284 : vector<8x32xf32>
    %286 = vector.broadcast %265 : vector<1x32xf32> to vector<8x32xf32>
    %287 = arith.mulf %285, %286 : vector<8x32xf32>
    %288 = vector.broadcast %267 : vector<1x32xf32> to vector<8x32xf32>
    %289 = arith.addf %287, %288 : vector<8x32xf32>
    %c1_126 = arith.constant 1 : index
    %c0_127 = arith.constant 0 : index
    %c0_128 = arith.constant 0 : index
    %290 = vector.load %arg10[%c1_126, %c0_127, %c0_128] : memref<2x32x64xf32, #tpu.memory_space<vmem>>, vector<1x32x64xf32>
    %291 = vector.shape_cast %290 : vector<1x32x64xf32> to vector<32x64xf32>
    %c1_129 = arith.constant 1 : index
    %c0_130 = arith.constant 0 : index
    %c0_131 = arith.constant 0 : index
    %292 = vector.load %arg11[%c1_129, %c0_130, %c0_131] : memref<2x1x64xf32, #tpu.memory_space<vmem>>, vector<1x1x64xf32>
    %293 = vector.shape_cast %292 : vector<1x1x64xf32> to vector<1x64xf32>
    %c1_132 = arith.constant 1 : index
    %c0_133 = arith.constant 0 : index
    %c0_134 = arith.constant 0 : index
    %294 = vector.load %arg12[%c1_132, %c0_133, %c0_134] : memref<2x64x32xf32, #tpu.memory_space<vmem>>, vector<1x64x32xf32>
    %295 = vector.shape_cast %294 : vector<1x64x32xf32> to vector<64x32xf32>
    %c1_135 = arith.constant 1 : index
    %c0_136 = arith.constant 0 : index
    %c0_137 = arith.constant 0 : index
    %296 = vector.load %arg13[%c1_135, %c0_136, %c0_137] : memref<2x1x32xf32, #tpu.memory_space<vmem>>, vector<1x1x32xf32>
    %297 = vector.shape_cast %296 : vector<1x1x32xf32> to vector<1x32xf32>
    %cst_138 = arith.constant dense<0.000000e+00> : vector<8x64xf32>
    %298 = tpu.matmul %289, %291, %cst_138 {dimension_numbers = #tpu.dot_dimension_numbers<[1], [0], [0], [1], [0, 0, 1, 1], [], []>} : vector<8x32xf32>, vector<32x64xf32>, vector<8x64xf32> -> vector<8x64xf32>
    %299 = vector.broadcast %293 : vector<1x64xf32> to vector<8x64xf32>
    %300 = arith.addf %298, %299 : vector<8x64xf32>
    %cst_139 = arith.constant 0.000000e+00 : f32
    %301 = vector.broadcast %cst_139 : f32 to vector<8x64xf32>
    %302 = arith.maximumf %300, %301 : vector<8x64xf32>
    %cst_140 = arith.constant dense<0.000000e+00> : vector<8x32xf32>
    %303 = tpu.matmul %302, %295, %cst_140 {dimension_numbers = #tpu.dot_dimension_numbers<[1], [0], [0], [1], [0, 0, 1, 1], [], []>} : vector<8x64xf32>, vector<64x32xf32>, vector<8x32xf32> -> vector<8x32xf32>
    %304 = vector.broadcast %297 : vector<1x32xf32> to vector<8x32xf32>
    %305 = arith.addf %303, %304 : vector<8x32xf32>
    %306 = arith.addf %289, %305 : vector<8x32xf32>
    %c1_141 = arith.constant 1 : index
    %c0_142 = arith.constant 0 : index
    %c0_143 = arith.constant 0 : index
    %307 = vector.load %arg14[%c1_141, %c0_142, %c0_143] : memref<2x1x32xf32, #tpu.memory_space<vmem>>, vector<1x1x32xf32>
    %308 = vector.shape_cast %307 : vector<1x1x32xf32> to vector<1x32xf32>
    %c1_144 = arith.constant 1 : index
    %c0_145 = arith.constant 0 : index
    %c0_146 = arith.constant 0 : index
    %309 = vector.load %arg15[%c1_144, %c0_145, %c0_146] : memref<2x1x32xf32, #tpu.memory_space<vmem>>, vector<1x1x32xf32>
    %310 = vector.shape_cast %309 : vector<1x1x32xf32> to vector<1x32xf32>
    %cst_147 = arith.constant dense<0.000000e+00> : vector<8xf32>
    %311 = vector.multi_reduction <add>, %306, %cst_147 [1] : vector<8x32xf32> to vector<8xf32>
    %312 = vector.shape_cast %311 : vector<8xf32> to vector<8x1xf32>
    %cst_148 = arith.constant 3.200000e+01 : f32
    %313 = vector.broadcast %cst_148 : f32 to vector<8x1xf32>
    %314 = arith.divf %312, %313 : vector<8x1xf32>
    %315 = vector.broadcast %314 : vector<8x1xf32> to vector<8x32xf32>
    %316 = arith.subf %306, %315 : vector<8x32xf32>
    %317 = arith.mulf %316, %316 : vector<8x32xf32>
    %cst_149 = arith.constant dense<0.000000e+00> : vector<8xf32>
    %318 = vector.multi_reduction <add>, %317, %cst_149 [1] : vector<8x32xf32> to vector<8xf32>
    %319 = vector.shape_cast %318 : vector<8xf32> to vector<8x1xf32>
    %cst_150 = arith.constant 3.200000e+01 : f32
    %320 = vector.broadcast %cst_150 : f32 to vector<8x1xf32>
    %321 = arith.divf %319, %320 : vector<8x1xf32>
    %322 = vector.broadcast %314 : vector<8x1xf32> to vector<8x32xf32>
    %323 = arith.subf %306, %322 : vector<8x32xf32>
    %cst_151 = arith.constant 9.99999974E-6 : f32
    %324 = vector.broadcast %cst_151 : f32 to vector<8x1xf32>
    %325 = arith.addf %321, %324 : vector<8x1xf32>
    %326 = math.rsqrt %325 : vector<8x1xf32>
    %327 = vector.broadcast %326 : vector<8x1xf32> to vector<8x32xf32>
    %328 = arith.mulf %323, %327 : vector<8x32xf32>
    %329 = vector.broadcast %308 : vector<1x32xf32> to vector<8x32xf32>
    %330 = arith.mulf %328, %329 : vector<8x32xf32>
    %331 = vector.broadcast %310 : vector<1x32xf32> to vector<8x32xf32>
    %332 = arith.addf %330, %331 : vector<8x32xf32>
    %c0_152 = arith.constant 0 : index
    %c0_153 = arith.constant 0 : index
    %333 = vector.load %arg16[%c0_152, %c0_153] : memref<1x32xf32, #tpu.memory_space<vmem>>, vector<1x32xf32>
    %c0_154 = arith.constant 0 : index
    %c0_155 = arith.constant 0 : index
    %334 = vector.load %arg17[%c0_154, %c0_155] : memref<1x32xf32, #tpu.memory_space<vmem>>, vector<1x32xf32>
    %cst_156 = arith.constant dense<0.000000e+00> : vector<8xf32>
    %335 = vector.multi_reduction <add>, %332, %cst_156 [1] : vector<8x32xf32> to vector<8xf32>
    %336 = vector.shape_cast %335 : vector<8xf32> to vector<8x1xf32>
    %cst_157 = arith.constant 3.200000e+01 : f32
    %337 = vector.broadcast %cst_157 : f32 to vector<8x1xf32>
    %338 = arith.divf %336, %337 : vector<8x1xf32>
    %339 = vector.broadcast %338 : vector<8x1xf32> to vector<8x32xf32>
    %340 = arith.subf %332, %339 : vector<8x32xf32>
    %341 = arith.mulf %340, %340 : vector<8x32xf32>
    %cst_158 = arith.constant dense<0.000000e+00> : vector<8xf32>
    %342 = vector.multi_reduction <add>, %341, %cst_158 [1] : vector<8x32xf32> to vector<8xf32>
    %343 = vector.shape_cast %342 : vector<8xf32> to vector<8x1xf32>
    %cst_159 = arith.constant 3.200000e+01 : f32
    %344 = vector.broadcast %cst_159 : f32 to vector<8x1xf32>
    %345 = arith.divf %343, %344 : vector<8x1xf32>
    %346 = vector.broadcast %338 : vector<8x1xf32> to vector<8x32xf32>
    %347 = arith.subf %332, %346 : vector<8x32xf32>
    %cst_160 = arith.constant 9.99999974E-6 : f32
    %348 = vector.broadcast %cst_160 : f32 to vector<8x1xf32>
    %349 = arith.addf %345, %348 : vector<8x1xf32>
    %350 = math.rsqrt %349 : vector<8x1xf32>
    %351 = vector.broadcast %350 : vector<8x1xf32> to vector<8x32xf32>
    %352 = arith.mulf %347, %351 : vector<8x32xf32>
    %353 = vector.broadcast %333 : vector<1x32xf32> to vector<8x32xf32>
    %354 = arith.mulf %352, %353 : vector<8x32xf32>
    %355 = vector.broadcast %334 : vector<1x32xf32> to vector<8x32xf32>
    %356 = arith.addf %354, %355 : vector<8x32xf32>
    %c0_161 = arith.constant 0 : index
    %c0_162 = arith.constant 0 : index
    %c0_163 = arith.constant 0 : index
    %357 = vector.load %arg2[%c0_161, %c0_162, %c0_163] : memref<1x8x1xi32, #tpu.memory_space<vmem>>, vector<1x8x1xi32>
    %358 = vector.shape_cast %357 : vector<1x8x1xi32> to vector<8x1xi32>
    %359 = tpu.iota {dimensions = array<i32: 1>} : vector<8x128xi32>
    %360 = vector.broadcast %358 : vector<8x1xi32> to vector<8x128xi32>
    %361 = arith.cmpi eq, %359, %360 : vector<8x128xi32>
    %362 = arith.extui %361 : vector<8x128xi1> to vector<8x128xi32>
    %363 = arith.sitofp %362 : vector<8x128xi32> to vector<8x128xf32>
    %cst_164 = arith.constant dense<0.000000e+00> : vector<8x32xf32>
    %364 = tpu.matmul %363, %0, %cst_164 {dimension_numbers = #tpu.dot_dimension_numbers<[1], [0], [0], [1], [0, 0, 1, 1], [], []>} : vector<8x128xf32>, vector<128x32xf32>, vector<8x32xf32> -> vector<8x32xf32>
    %cst_165 = arith.constant 5.65685415 : f32
    %365 = vector.broadcast %cst_165 : f32 to vector<8x32xf32>
    %366 = arith.mulf %364, %365 : vector<8x32xf32>
    %c0_166 = arith.constant 0 : index
    %c0_167 = arith.constant 0 : index
    %c0_168 = arith.constant 0 : index
    %367 = vector.load %arg18[%c0_166, %c0_167, %c0_168] : memref<2x32x96xf32, #tpu.memory_space<vmem>>, vector<1x32x96xf32>
    %368 = vector.shape_cast %367 : vector<1x32x96xf32> to vector<32x96xf32>
    %c0_169 = arith.constant 0 : index
    %c0_170 = arith.constant 0 : index
    %c0_171 = arith.constant 0 : index
    %369 = vector.load %arg19[%c0_169, %c0_170, %c0_171] : memref<2x1x96xf32, #tpu.memory_space<vmem>>, vector<1x1x96xf32>
    %370 = vector.shape_cast %369 : vector<1x1x96xf32> to vector<1x96xf32>
    %c0_172 = arith.constant 0 : index
    %c0_173 = arith.constant 0 : index
    %c0_174 = arith.constant 0 : index
    %371 = vector.load %arg20[%c0_172, %c0_173, %c0_174] : memref<2x32x32xf32, #tpu.memory_space<vmem>>, vector<1x32x32xf32>
    %372 = vector.shape_cast %371 : vector<1x32x32xf32> to vector<32x32xf32>
    %c0_175 = arith.constant 0 : index
    %c0_176 = arith.constant 0 : index
    %c0_177 = arith.constant 0 : index
    %373 = vector.load %arg21[%c0_175, %c0_176, %c0_177] : memref<2x1x32xf32, #tpu.memory_space<vmem>>, vector<1x1x32xf32>
    %374 = vector.shape_cast %373 : vector<1x1x32xf32> to vector<1x32xf32>
    %cst_178 = arith.constant dense<0.000000e+00> : vector<8x96xf32>
    %375 = tpu.matmul %366, %368, %cst_178 {dimension_numbers = #tpu.dot_dimension_numbers<[1], [0], [0], [1], [0, 0, 1, 1], [], []>} : vector<8x32xf32>, vector<32x96xf32>, vector<8x96xf32> -> vector<8x96xf32>
    %376 = vector.broadcast %370 : vector<1x96xf32> to vector<8x96xf32>
    %377 = arith.addf %375, %376 : vector<8x96xf32>
    %378 = vector.extract_strided_slice %377 {offsets = [0, 0], sizes = [8, 32], strides = [1, 1]} : vector<8x96xf32> to vector<8x32xf32>
    %379 = vector.extract_strided_slice %377 {offsets = [0, 32], sizes = [8, 32], strides = [1, 1]} : vector<8x96xf32> to vector<8x32xf32>
    %380 = vector.extract_strided_slice %377 {offsets = [0, 64], sizes = [8, 32], strides = [1, 1]} : vector<8x96xf32> to vector<8x32xf32>
    %381 = vector.extract_strided_slice %378 {offsets = [0, 0], sizes = [8, 8], strides = [1, 1]} : vector<8x32xf32> to vector<8x8xf32>
    %382 = vector.extract_strided_slice %379 {offsets = [0, 0], sizes = [8, 8], strides = [1, 1]} : vector<8x32xf32> to vector<8x8xf32>
    %383 = vector.extract_strided_slice %380 {offsets = [0, 0], sizes = [8, 8], strides = [1, 1]} : vector<8x32xf32> to vector<8x8xf32>
    %cst_179 = arith.constant dense<0.000000e+00> : vector<8x8xf32>
    %384 = tpu.matmul %381, %382, %cst_179 {dimension_numbers = #tpu.dot_dimension_numbers<[1], [1], [0], [0], [0, 0, 1, 0], [], []>} : vector<8x8xf32>, vector<8x8xf32>, vector<8x8xf32> -> vector<8x8xf32>
    %cst_180 = arith.constant 0.353553385 : f32
    %385 = vector.broadcast %cst_180 : f32 to vector<8x8xf32>
    %386 = arith.mulf %384, %385 : vector<8x8xf32>
    %cst_181 = arith.constant dense<0xFF800000> : vector<8xf32>
    %387 = vector.multi_reduction <maximumf>, %386, %cst_181 [1] : vector<8x8xf32> to vector<8xf32>
    %388 = vector.shape_cast %387 : vector<8xf32> to vector<8x1xf32>
    %389 = vector.broadcast %388 : vector<8x1xf32> to vector<8x8xf32>
    %390 = arith.subf %386, %389 : vector<8x8xf32>
    %391 = math.exp %390 : vector<8x8xf32>
    %cst_182 = arith.constant dense<0.000000e+00> : vector<8xf32>
    %392 = vector.multi_reduction <add>, %391, %cst_182 [1] : vector<8x8xf32> to vector<8xf32>
    %393 = vector.shape_cast %392 : vector<8xf32> to vector<8x1xf32>
    %394 = vector.broadcast %393 : vector<8x1xf32> to vector<8x8xf32>
    %395 = arith.divf %391, %394 : vector<8x8xf32>
    %cst_183 = arith.constant dense<0.000000e+00> : vector<8x8xf32>
    %396 = tpu.matmul %395, %383, %cst_183 {dimension_numbers = #tpu.dot_dimension_numbers<[1], [0], [0], [1], [0, 0, 1, 1], [], []>} : vector<8x8xf32>, vector<8x8xf32>, vector<8x8xf32> -> vector<8x8xf32>
    %397 = vector.extract_strided_slice %372 {offsets = [0, 0], sizes = [8, 32], strides = [1, 1]} : vector<32x32xf32> to vector<8x32xf32>
    %cst_184 = arith.constant dense<0.000000e+00> : vector<8x32xf32>
    %398 = tpu.matmul %396, %397, %cst_184 {dimension_numbers = #tpu.dot_dimension_numbers<[1], [0], [0], [1], [0, 0, 1, 1], [], []>} : vector<8x8xf32>, vector<8x32xf32>, vector<8x32xf32> -> vector<8x32xf32>
    %399 = vector.broadcast %374 : vector<1x32xf32> to vector<8x32xf32>
    %400 = arith.addf %399, %398 : vector<8x32xf32>
    %401 = vector.extract_strided_slice %378 {offsets = [0, 8], sizes = [8, 8], strides = [1, 1]} : vector<8x32xf32> to vector<8x8xf32>
    %402 = vector.extract_strided_slice %379 {offsets = [0, 8], sizes = [8, 8], strides = [1, 1]} : vector<8x32xf32> to vector<8x8xf32>
    %403 = vector.extract_strided_slice %380 {offsets = [0, 8], sizes = [8, 8], strides = [1, 1]} : vector<8x32xf32> to vector<8x8xf32>
    %cst_185 = arith.constant dense<0.000000e+00> : vector<8x8xf32>
    %404 = tpu.matmul %401, %402, %cst_185 {dimension_numbers = #tpu.dot_dimension_numbers<[1], [1], [0], [0], [0, 0, 1, 0], [], []>} : vector<8x8xf32>, vector<8x8xf32>, vector<8x8xf32> -> vector<8x8xf32>
    %cst_186 = arith.constant 0.353553385 : f32
    %405 = vector.broadcast %cst_186 : f32 to vector<8x8xf32>
    %406 = arith.mulf %404, %405 : vector<8x8xf32>
    %cst_187 = arith.constant dense<0xFF800000> : vector<8xf32>
    %407 = vector.multi_reduction <maximumf>, %406, %cst_187 [1] : vector<8x8xf32> to vector<8xf32>
    %408 = vector.shape_cast %407 : vector<8xf32> to vector<8x1xf32>
    %409 = vector.broadcast %408 : vector<8x1xf32> to vector<8x8xf32>
    %410 = arith.subf %406, %409 : vector<8x8xf32>
    %411 = math.exp %410 : vector<8x8xf32>
    %cst_188 = arith.constant dense<0.000000e+00> : vector<8xf32>
    %412 = vector.multi_reduction <add>, %411, %cst_188 [1] : vector<8x8xf32> to vector<8xf32>
    %413 = vector.shape_cast %412 : vector<8xf32> to vector<8x1xf32>
    %414 = vector.broadcast %413 : vector<8x1xf32> to vector<8x8xf32>
    %415 = arith.divf %411, %414 : vector<8x8xf32>
    %cst_189 = arith.constant dense<0.000000e+00> : vector<8x8xf32>
    %416 = tpu.matmul %415, %403, %cst_189 {dimension_numbers = #tpu.dot_dimension_numbers<[1], [0], [0], [1], [0, 0, 1, 1], [], []>} : vector<8x8xf32>, vector<8x8xf32>, vector<8x8xf32> -> vector<8x8xf32>
    %417 = vector.extract_strided_slice %372 {offsets = [8, 0], sizes = [8, 32], strides = [1, 1]} : vector<32x32xf32> to vector<8x32xf32>
    %cst_190 = arith.constant dense<0.000000e+00> : vector<8x32xf32>
    %418 = tpu.matmul %416, %417, %cst_190 {dimension_numbers = #tpu.dot_dimension_numbers<[1], [0], [0], [1], [0, 0, 1, 1], [], []>} : vector<8x8xf32>, vector<8x32xf32>, vector<8x32xf32> -> vector<8x32xf32>
    %419 = arith.addf %400, %418 : vector<8x32xf32>
    %420 = vector.extract_strided_slice %378 {offsets = [0, 16], sizes = [8, 8], strides = [1, 1]} : vector<8x32xf32> to vector<8x8xf32>
    %421 = vector.extract_strided_slice %379 {offsets = [0, 16], sizes = [8, 8], strides = [1, 1]} : vector<8x32xf32> to vector<8x8xf32>
    %422 = vector.extract_strided_slice %380 {offsets = [0, 16], sizes = [8, 8], strides = [1, 1]} : vector<8x32xf32> to vector<8x8xf32>
    %cst_191 = arith.constant dense<0.000000e+00> : vector<8x8xf32>
    %423 = tpu.matmul %420, %421, %cst_191 {dimension_numbers = #tpu.dot_dimension_numbers<[1], [1], [0], [0], [0, 0, 1, 0], [], []>} : vector<8x8xf32>, vector<8x8xf32>, vector<8x8xf32> -> vector<8x8xf32>
    %cst_192 = arith.constant 0.353553385 : f32
    %424 = vector.broadcast %cst_192 : f32 to vector<8x8xf32>
    %425 = arith.mulf %423, %424 : vector<8x8xf32>
    %cst_193 = arith.constant dense<0xFF800000> : vector<8xf32>
    %426 = vector.multi_reduction <maximumf>, %425, %cst_193 [1] : vector<8x8xf32> to vector<8xf32>
    %427 = vector.shape_cast %426 : vector<8xf32> to vector<8x1xf32>
    %428 = vector.broadcast %427 : vector<8x1xf32> to vector<8x8xf32>
    %429 = arith.subf %425, %428 : vector<8x8xf32>
    %430 = math.exp %429 : vector<8x8xf32>
    %cst_194 = arith.constant dense<0.000000e+00> : vector<8xf32>
    %431 = vector.multi_reduction <add>, %430, %cst_194 [1] : vector<8x8xf32> to vector<8xf32>
    %432 = vector.shape_cast %431 : vector<8xf32> to vector<8x1xf32>
    %433 = vector.broadcast %432 : vector<8x1xf32> to vector<8x8xf32>
    %434 = arith.divf %430, %433 : vector<8x8xf32>
    %cst_195 = arith.constant dense<0.000000e+00> : vector<8x8xf32>
    %435 = tpu.matmul %434, %422, %cst_195 {dimension_numbers = #tpu.dot_dimension_numbers<[1], [0], [0], [1], [0, 0, 1, 1], [], []>} : vector<8x8xf32>, vector<8x8xf32>, vector<8x8xf32> -> vector<8x8xf32>
    %436 = vector.extract_strided_slice %372 {offsets = [16, 0], sizes = [8, 32], strides = [1, 1]} : vector<32x32xf32> to vector<8x32xf32>
    %cst_196 = arith.constant dense<0.000000e+00> : vector<8x32xf32>
    %437 = tpu.matmul %435, %436, %cst_196 {dimension_numbers = #tpu.dot_dimension_numbers<[1], [0], [0], [1], [0, 0, 1, 1], [], []>} : vector<8x8xf32>, vector<8x32xf32>, vector<8x32xf32> -> vector<8x32xf32>
    %438 = arith.addf %419, %437 : vector<8x32xf32>
    %439 = vector.extract_strided_slice %378 {offsets = [0, 24], sizes = [8, 8], strides = [1, 1]} : vector<8x32xf32> to vector<8x8xf32>
    %440 = vector.extract_strided_slice %379 {offsets = [0, 24], sizes = [8, 8], strides = [1, 1]} : vector<8x32xf32> to vector<8x8xf32>
    %441 = vector.extract_strided_slice %380 {offsets = [0, 24], sizes = [8, 8], strides = [1, 1]} : vector<8x32xf32> to vector<8x8xf32>
    %cst_197 = arith.constant dense<0.000000e+00> : vector<8x8xf32>
    %442 = tpu.matmul %439, %440, %cst_197 {dimension_numbers = #tpu.dot_dimension_numbers<[1], [1], [0], [0], [0, 0, 1, 0], [], []>} : vector<8x8xf32>, vector<8x8xf32>, vector<8x8xf32> -> vector<8x8xf32>
    %cst_198 = arith.constant 0.353553385 : f32
    %443 = vector.broadcast %cst_198 : f32 to vector<8x8xf32>
    %444 = arith.mulf %442, %443 : vector<8x8xf32>
    %cst_199 = arith.constant dense<0xFF800000> : vector<8xf32>
    %445 = vector.multi_reduction <maximumf>, %444, %cst_199 [1] : vector<8x8xf32> to vector<8xf32>
    %446 = vector.shape_cast %445 : vector<8xf32> to vector<8x1xf32>
    %447 = vector.broadcast %446 : vector<8x1xf32> to vector<8x8xf32>
    %448 = arith.subf %444, %447 : vector<8x8xf32>
    %449 = math.exp %448 : vector<8x8xf32>
    %cst_200 = arith.constant dense<0.000000e+00> : vector<8xf32>
    %450 = vector.multi_reduction <add>, %449, %cst_200 [1] : vector<8x8xf32> to vector<8xf32>
    %451 = vector.shape_cast %450 : vector<8xf32> to vector<8x1xf32>
    %452 = vector.broadcast %451 : vector<8x1xf32> to vector<8x8xf32>
    %453 = arith.divf %449, %452 : vector<8x8xf32>
    %cst_201 = arith.constant dense<0.000000e+00> : vector<8x8xf32>
    %454 = tpu.matmul %453, %441, %cst_201 {dimension_numbers = #tpu.dot_dimension_numbers<[1], [0], [0], [1], [0, 0, 1, 1], [], []>} : vector<8x8xf32>, vector<8x8xf32>, vector<8x8xf32> -> vector<8x8xf32>
    %455 = vector.extract_strided_slice %372 {offsets = [24, 0], sizes = [8, 32], strides = [1, 1]} : vector<32x32xf32> to vector<8x32xf32>
    %cst_202 = arith.constant dense<0.000000e+00> : vector<8x32xf32>
    %456 = tpu.matmul %454, %455, %cst_202 {dimension_numbers = #tpu.dot_dimension_numbers<[1], [0], [0], [1], [0, 0, 1, 1], [], []>} : vector<8x8xf32>, vector<8x32xf32>, vector<8x32xf32> -> vector<8x32xf32>
    %457 = arith.addf %438, %456 : vector<8x32xf32>
    %458 = arith.addf %366, %457 : vector<8x32xf32>
    %c0_203 = arith.constant 0 : index
    %c0_204 = arith.constant 0 : index
    %c0_205 = arith.constant 0 : index
    %459 = vector.load %arg22[%c0_203, %c0_204, %c0_205] : memref<2x1x32xf32, #tpu.memory_space<vmem>>, vector<1x1x32xf32>
    %460 = vector.shape_cast %459 : vector<1x1x32xf32> to vector<1x32xf32>
    %c0_206 = arith.constant 0 : index
    %c0_207 = arith.constant 0 : index
    %c0_208 = arith.constant 0 : index
    %461 = vector.load %arg23[%c0_206, %c0_207, %c0_208] : memref<2x1x32xf32, #tpu.memory_space<vmem>>, vector<1x1x32xf32>
    %462 = vector.shape_cast %461 : vector<1x1x32xf32> to vector<1x32xf32>
    %cst_209 = arith.constant dense<0.000000e+00> : vector<8xf32>
    %463 = vector.multi_reduction <add>, %458, %cst_209 [1] : vector<8x32xf32> to vector<8xf32>
    %464 = vector.shape_cast %463 : vector<8xf32> to vector<8x1xf32>
    %cst_210 = arith.constant 3.200000e+01 : f32
    %465 = vector.broadcast %cst_210 : f32 to vector<8x1xf32>
    %466 = arith.divf %464, %465 : vector<8x1xf32>
    %467 = vector.broadcast %466 : vector<8x1xf32> to vector<8x32xf32>
    %468 = arith.subf %458, %467 : vector<8x32xf32>
    %469 = arith.mulf %468, %468 : vector<8x32xf32>
    %cst_211 = arith.constant dense<0.000000e+00> : vector<8xf32>
    %470 = vector.multi_reduction <add>, %469, %cst_211 [1] : vector<8x32xf32> to vector<8xf32>
    %471 = vector.shape_cast %470 : vector<8xf32> to vector<8x1xf32>
    %cst_212 = arith.constant 3.200000e+01 : f32
    %472 = vector.broadcast %cst_212 : f32 to vector<8x1xf32>
    %473 = arith.divf %471, %472 : vector<8x1xf32>
    %474 = vector.broadcast %466 : vector<8x1xf32> to vector<8x32xf32>
    %475 = arith.subf %458, %474 : vector<8x32xf32>
    %cst_213 = arith.constant 9.99999974E-6 : f32
    %476 = vector.broadcast %cst_213 : f32 to vector<8x1xf32>
    %477 = arith.addf %473, %476 : vector<8x1xf32>
    %478 = math.rsqrt %477 : vector<8x1xf32>
    %479 = vector.broadcast %478 : vector<8x1xf32> to vector<8x32xf32>
    %480 = arith.mulf %475, %479 : vector<8x32xf32>
    %481 = vector.broadcast %460 : vector<1x32xf32> to vector<8x32xf32>
    %482 = arith.mulf %480, %481 : vector<8x32xf32>
    %483 = vector.broadcast %462 : vector<1x32xf32> to vector<8x32xf32>
    %484 = arith.addf %482, %483 : vector<8x32xf32>
    %c0_214 = arith.constant 0 : index
    %c0_215 = arith.constant 0 : index
    %c0_216 = arith.constant 0 : index
    %485 = vector.load %arg24[%c0_214, %c0_215, %c0_216] : memref<2x32x96xf32, #tpu.memory_space<vmem>>, vector<1x32x96xf32>
    %486 = vector.shape_cast %485 : vector<1x32x96xf32> to vector<32x96xf32>
    %c0_217 = arith.constant 0 : index
    %c0_218 = arith.constant 0 : index
    %c0_219 = arith.constant 0 : index
    %487 = vector.load %arg25[%c0_217, %c0_218, %c0_219] : memref<2x1x96xf32, #tpu.memory_space<vmem>>, vector<1x1x96xf32>
    %488 = vector.shape_cast %487 : vector<1x1x96xf32> to vector<1x96xf32>
    %c0_220 = arith.constant 0 : index
    %c0_221 = arith.constant 0 : index
    %c0_222 = arith.constant 0 : index
    %489 = vector.load %arg26[%c0_220, %c0_221, %c0_222] : memref<2x32x32xf32, #tpu.memory_space<vmem>>, vector<1x32x32xf32>
    %490 = vector.shape_cast %489 : vector<1x32x32xf32> to vector<32x32xf32>
    %c0_223 = arith.constant 0 : index
    %c0_224 = arith.constant 0 : index
    %c0_225 = arith.constant 0 : index
    %491 = vector.load %arg27[%c0_223, %c0_224, %c0_225] : memref<2x1x32xf32, #tpu.memory_space<vmem>>, vector<1x1x32xf32>
    %492 = vector.shape_cast %491 : vector<1x1x32xf32> to vector<1x32xf32>
    %493 = vector.extract_strided_slice %486 {offsets = [0, 0], sizes = [32, 32], strides = [1, 1]} : vector<32x96xf32> to vector<32x32xf32>
    %cst_226 = arith.constant dense<0.000000e+00> : vector<8x32xf32>
    %494 = tpu.matmul %484, %493, %cst_226 {dimension_numbers = #tpu.dot_dimension_numbers<[1], [0], [0], [1], [0, 0, 1, 1], [], []>} : vector<8x32xf32>, vector<32x32xf32>, vector<8x32xf32> -> vector<8x32xf32>
    %495 = vector.extract_strided_slice %488 {offsets = [0, 0], sizes = [1, 32], strides = [1, 1]} : vector<1x96xf32> to vector<1x32xf32>
    %496 = vector.broadcast %495 : vector<1x32xf32> to vector<8x32xf32>
    %497 = arith.addf %494, %496 : vector<8x32xf32>
    %498 = vector.extract_strided_slice %486 {offsets = [0, 32], sizes = [32, 64], strides = [1, 1]} : vector<32x96xf32> to vector<32x64xf32>
    %cst_227 = arith.constant dense<0.000000e+00> : vector<8x64xf32>
    %499 = tpu.matmul %356, %498, %cst_227 {dimension_numbers = #tpu.dot_dimension_numbers<[1], [0], [0], [1], [0, 0, 1, 1], [], []>} : vector<8x32xf32>, vector<32x64xf32>, vector<8x64xf32> -> vector<8x64xf32>
    %500 = vector.extract_strided_slice %488 {offsets = [0, 32], sizes = [1, 64], strides = [1, 1]} : vector<1x96xf32> to vector<1x64xf32>
    %501 = vector.broadcast %500 : vector<1x64xf32> to vector<8x64xf32>
    %502 = arith.addf %499, %501 : vector<8x64xf32>
    %503 = vector.extract_strided_slice %502 {offsets = [0, 0], sizes = [8, 32], strides = [1, 1]} : vector<8x64xf32> to vector<8x32xf32>
    %504 = vector.extract_strided_slice %502 {offsets = [0, 32], sizes = [8, 32], strides = [1, 1]} : vector<8x64xf32> to vector<8x32xf32>
    %505 = vector.extract_strided_slice %497 {offsets = [0, 0], sizes = [8, 8], strides = [1, 1]} : vector<8x32xf32> to vector<8x8xf32>
    %506 = vector.extract_strided_slice %503 {offsets = [0, 0], sizes = [8, 8], strides = [1, 1]} : vector<8x32xf32> to vector<8x8xf32>
    %507 = vector.extract_strided_slice %504 {offsets = [0, 0], sizes = [8, 8], strides = [1, 1]} : vector<8x32xf32> to vector<8x8xf32>
    %cst_228 = arith.constant dense<0.000000e+00> : vector<8x8xf32>
    %508 = tpu.matmul %505, %506, %cst_228 {dimension_numbers = #tpu.dot_dimension_numbers<[1], [1], [0], [0], [0, 0, 1, 0], [], []>} : vector<8x8xf32>, vector<8x8xf32>, vector<8x8xf32> -> vector<8x8xf32>
    %cst_229 = arith.constant 0.353553385 : f32
    %509 = vector.broadcast %cst_229 : f32 to vector<8x8xf32>
    %510 = arith.mulf %508, %509 : vector<8x8xf32>
    %cst_230 = arith.constant dense<0xFF800000> : vector<8xf32>
    %511 = vector.multi_reduction <maximumf>, %510, %cst_230 [1] : vector<8x8xf32> to vector<8xf32>
    %512 = vector.shape_cast %511 : vector<8xf32> to vector<8x1xf32>
    %513 = vector.broadcast %512 : vector<8x1xf32> to vector<8x8xf32>
    %514 = arith.subf %510, %513 : vector<8x8xf32>
    %515 = math.exp %514 : vector<8x8xf32>
    %cst_231 = arith.constant dense<0.000000e+00> : vector<8xf32>
    %516 = vector.multi_reduction <add>, %515, %cst_231 [1] : vector<8x8xf32> to vector<8xf32>
    %517 = vector.shape_cast %516 : vector<8xf32> to vector<8x1xf32>
    %518 = vector.broadcast %517 : vector<8x1xf32> to vector<8x8xf32>
    %519 = arith.divf %515, %518 : vector<8x8xf32>
    %cst_232 = arith.constant dense<0.000000e+00> : vector<8x8xf32>
    %520 = tpu.matmul %519, %507, %cst_232 {dimension_numbers = #tpu.dot_dimension_numbers<[1], [0], [0], [1], [0, 0, 1, 1], [], []>} : vector<8x8xf32>, vector<8x8xf32>, vector<8x8xf32> -> vector<8x8xf32>
    %521 = vector.extract_strided_slice %490 {offsets = [0, 0], sizes = [8, 32], strides = [1, 1]} : vector<32x32xf32> to vector<8x32xf32>
    %cst_233 = arith.constant dense<0.000000e+00> : vector<8x32xf32>
    %522 = tpu.matmul %520, %521, %cst_233 {dimension_numbers = #tpu.dot_dimension_numbers<[1], [0], [0], [1], [0, 0, 1, 1], [], []>} : vector<8x8xf32>, vector<8x32xf32>, vector<8x32xf32> -> vector<8x32xf32>
    %523 = vector.broadcast %492 : vector<1x32xf32> to vector<8x32xf32>
    %524 = arith.addf %523, %522 : vector<8x32xf32>
    %525 = vector.extract_strided_slice %497 {offsets = [0, 8], sizes = [8, 8], strides = [1, 1]} : vector<8x32xf32> to vector<8x8xf32>
    %526 = vector.extract_strided_slice %503 {offsets = [0, 8], sizes = [8, 8], strides = [1, 1]} : vector<8x32xf32> to vector<8x8xf32>
    %527 = vector.extract_strided_slice %504 {offsets = [0, 8], sizes = [8, 8], strides = [1, 1]} : vector<8x32xf32> to vector<8x8xf32>
    %cst_234 = arith.constant dense<0.000000e+00> : vector<8x8xf32>
    %528 = tpu.matmul %525, %526, %cst_234 {dimension_numbers = #tpu.dot_dimension_numbers<[1], [1], [0], [0], [0, 0, 1, 0], [], []>} : vector<8x8xf32>, vector<8x8xf32>, vector<8x8xf32> -> vector<8x8xf32>
    %cst_235 = arith.constant 0.353553385 : f32
    %529 = vector.broadcast %cst_235 : f32 to vector<8x8xf32>
    %530 = arith.mulf %528, %529 : vector<8x8xf32>
    %cst_236 = arith.constant dense<0xFF800000> : vector<8xf32>
    %531 = vector.multi_reduction <maximumf>, %530, %cst_236 [1] : vector<8x8xf32> to vector<8xf32>
    %532 = vector.shape_cast %531 : vector<8xf32> to vector<8x1xf32>
    %533 = vector.broadcast %532 : vector<8x1xf32> to vector<8x8xf32>
    %534 = arith.subf %530, %533 : vector<8x8xf32>
    %535 = math.exp %534 : vector<8x8xf32>
    %cst_237 = arith.constant dense<0.000000e+00> : vector<8xf32>
    %536 = vector.multi_reduction <add>, %535, %cst_237 [1] : vector<8x8xf32> to vector<8xf32>
    %537 = vector.shape_cast %536 : vector<8xf32> to vector<8x1xf32>
    %538 = vector.broadcast %537 : vector<8x1xf32> to vector<8x8xf32>
    %539 = arith.divf %535, %538 : vector<8x8xf32>
    %cst_238 = arith.constant dense<0.000000e+00> : vector<8x8xf32>
    %540 = tpu.matmul %539, %527, %cst_238 {dimension_numbers = #tpu.dot_dimension_numbers<[1], [0], [0], [1], [0, 0, 1, 1], [], []>} : vector<8x8xf32>, vector<8x8xf32>, vector<8x8xf32> -> vector<8x8xf32>
    %541 = vector.extract_strided_slice %490 {offsets = [8, 0], sizes = [8, 32], strides = [1, 1]} : vector<32x32xf32> to vector<8x32xf32>
    %cst_239 = arith.constant dense<0.000000e+00> : vector<8x32xf32>
    %542 = tpu.matmul %540, %541, %cst_239 {dimension_numbers = #tpu.dot_dimension_numbers<[1], [0], [0], [1], [0, 0, 1, 1], [], []>} : vector<8x8xf32>, vector<8x32xf32>, vector<8x32xf32> -> vector<8x32xf32>
    %543 = arith.addf %524, %542 : vector<8x32xf32>
    %544 = vector.extract_strided_slice %497 {offsets = [0, 16], sizes = [8, 8], strides = [1, 1]} : vector<8x32xf32> to vector<8x8xf32>
    %545 = vector.extract_strided_slice %503 {offsets = [0, 16], sizes = [8, 8], strides = [1, 1]} : vector<8x32xf32> to vector<8x8xf32>
    %546 = vector.extract_strided_slice %504 {offsets = [0, 16], sizes = [8, 8], strides = [1, 1]} : vector<8x32xf32> to vector<8x8xf32>
    %cst_240 = arith.constant dense<0.000000e+00> : vector<8x8xf32>
    %547 = tpu.matmul %544, %545, %cst_240 {dimension_numbers = #tpu.dot_dimension_numbers<[1], [1], [0], [0], [0, 0, 1, 0], [], []>} : vector<8x8xf32>, vector<8x8xf32>, vector<8x8xf32> -> vector<8x8xf32>
    %cst_241 = arith.constant 0.353553385 : f32
    %548 = vector.broadcast %cst_241 : f32 to vector<8x8xf32>
    %549 = arith.mulf %547, %548 : vector<8x8xf32>
    %cst_242 = arith.constant dense<0xFF800000> : vector<8xf32>
    %550 = vector.multi_reduction <maximumf>, %549, %cst_242 [1] : vector<8x8xf32> to vector<8xf32>
    %551 = vector.shape_cast %550 : vector<8xf32> to vector<8x1xf32>
    %552 = vector.broadcast %551 : vector<8x1xf32> to vector<8x8xf32>
    %553 = arith.subf %549, %552 : vector<8x8xf32>
    %554 = math.exp %553 : vector<8x8xf32>
    %cst_243 = arith.constant dense<0.000000e+00> : vector<8xf32>
    %555 = vector.multi_reduction <add>, %554, %cst_243 [1] : vector<8x8xf32> to vector<8xf32>
    %556 = vector.shape_cast %555 : vector<8xf32> to vector<8x1xf32>
    %557 = vector.broadcast %556 : vector<8x1xf32> to vector<8x8xf32>
    %558 = arith.divf %554, %557 : vector<8x8xf32>
    %cst_244 = arith.constant dense<0.000000e+00> : vector<8x8xf32>
    %559 = tpu.matmul %558, %546, %cst_244 {dimension_numbers = #tpu.dot_dimension_numbers<[1], [0], [0], [1], [0, 0, 1, 1], [], []>} : vector<8x8xf32>, vector<8x8xf32>, vector<8x8xf32> -> vector<8x8xf32>
    %560 = vector.extract_strided_slice %490 {offsets = [16, 0], sizes = [8, 32], strides = [1, 1]} : vector<32x32xf32> to vector<8x32xf32>
    %cst_245 = arith.constant dense<0.000000e+00> : vector<8x32xf32>
    %561 = tpu.matmul %559, %560, %cst_245 {dimension_numbers = #tpu.dot_dimension_numbers<[1], [0], [0], [1], [0, 0, 1, 1], [], []>} : vector<8x8xf32>, vector<8x32xf32>, vector<8x32xf32> -> vector<8x32xf32>
    %562 = arith.addf %543, %561 : vector<8x32xf32>
    %563 = vector.extract_strided_slice %497 {offsets = [0, 24], sizes = [8, 8], strides = [1, 1]} : vector<8x32xf32> to vector<8x8xf32>
    %564 = vector.extract_strided_slice %503 {offsets = [0, 24], sizes = [8, 8], strides = [1, 1]} : vector<8x32xf32> to vector<8x8xf32>
    %565 = vector.extract_strided_slice %504 {offsets = [0, 24], sizes = [8, 8], strides = [1, 1]} : vector<8x32xf32> to vector<8x8xf32>
    %cst_246 = arith.constant dense<0.000000e+00> : vector<8x8xf32>
    %566 = tpu.matmul %563, %564, %cst_246 {dimension_numbers = #tpu.dot_dimension_numbers<[1], [1], [0], [0], [0, 0, 1, 0], [], []>} : vector<8x8xf32>, vector<8x8xf32>, vector<8x8xf32> -> vector<8x8xf32>
    %cst_247 = arith.constant 0.353553385 : f32
    %567 = vector.broadcast %cst_247 : f32 to vector<8x8xf32>
    %568 = arith.mulf %566, %567 : vector<8x8xf32>
    %cst_248 = arith.constant dense<0xFF800000> : vector<8xf32>
    %569 = vector.multi_reduction <maximumf>, %568, %cst_248 [1] : vector<8x8xf32> to vector<8xf32>
    %570 = vector.shape_cast %569 : vector<8xf32> to vector<8x1xf32>
    %571 = vector.broadcast %570 : vector<8x1xf32> to vector<8x8xf32>
    %572 = arith.subf %568, %571 : vector<8x8xf32>
    %573 = math.exp %572 : vector<8x8xf32>
    %cst_249 = arith.constant dense<0.000000e+00> : vector<8xf32>
    %574 = vector.multi_reduction <add>, %573, %cst_249 [1] : vector<8x8xf32> to vector<8xf32>
    %575 = vector.shape_cast %574 : vector<8xf32> to vector<8x1xf32>
    %576 = vector.broadcast %575 : vector<8x1xf32> to vector<8x8xf32>
    %577 = arith.divf %573, %576 : vector<8x8xf32>
    %cst_250 = arith.constant dense<0.000000e+00> : vector<8x8xf32>
    %578 = tpu.matmul %577, %565, %cst_250 {dimension_numbers = #tpu.dot_dimension_numbers<[1], [0], [0], [1], [0, 0, 1, 1], [], []>} : vector<8x8xf32>, vector<8x8xf32>, vector<8x8xf32> -> vector<8x8xf32>
    %579 = vector.extract_strided_slice %490 {offsets = [24, 0], sizes = [8, 32], strides = [1, 1]} : vector<32x32xf32> to vector<8x32xf32>
    %cst_251 = arith.constant dense<0.000000e+00> : vector<8x32xf32>
    %580 = tpu.matmul %578, %579, %cst_251 {dimension_numbers = #tpu.dot_dimension_numbers<[1], [0], [0], [1], [0, 0, 1, 1], [], []>} : vector<8x8xf32>, vector<8x32xf32>, vector<8x32xf32> -> vector<8x32xf32>
    %581 = arith.addf %562, %580 : vector<8x32xf32>
    %582 = arith.addf %484, %581 : vector<8x32xf32>
    %c0_252 = arith.constant 0 : index
    %c0_253 = arith.constant 0 : index
    %c0_254 = arith.constant 0 : index
    %583 = vector.load %arg28[%c0_252, %c0_253, %c0_254] : memref<2x1x32xf32, #tpu.memory_space<vmem>>, vector<1x1x32xf32>
    %584 = vector.shape_cast %583 : vector<1x1x32xf32> to vector<1x32xf32>
    %c0_255 = arith.constant 0 : index
    %c0_256 = arith.constant 0 : index
    %c0_257 = arith.constant 0 : index
    %585 = vector.load %arg29[%c0_255, %c0_256, %c0_257] : memref<2x1x32xf32, #tpu.memory_space<vmem>>, vector<1x1x32xf32>
    %586 = vector.shape_cast %585 : vector<1x1x32xf32> to vector<1x32xf32>
    %cst_258 = arith.constant dense<0.000000e+00> : vector<8xf32>
    %587 = vector.multi_reduction <add>, %582, %cst_258 [1] : vector<8x32xf32> to vector<8xf32>
    %588 = vector.shape_cast %587 : vector<8xf32> to vector<8x1xf32>
    %cst_259 = arith.constant 3.200000e+01 : f32
    %589 = vector.broadcast %cst_259 : f32 to vector<8x1xf32>
    %590 = arith.divf %588, %589 : vector<8x1xf32>
    %591 = vector.broadcast %590 : vector<8x1xf32> to vector<8x32xf32>
    %592 = arith.subf %582, %591 : vector<8x32xf32>
    %593 = arith.mulf %592, %592 : vector<8x32xf32>
    %cst_260 = arith.constant dense<0.000000e+00> : vector<8xf32>
    %594 = vector.multi_reduction <add>, %593, %cst_260 [1] : vector<8x32xf32> to vector<8xf32>
    %595 = vector.shape_cast %594 : vector<8xf32> to vector<8x1xf32>
    %cst_261 = arith.constant 3.200000e+01 : f32
    %596 = vector.broadcast %cst_261 : f32 to vector<8x1xf32>
    %597 = arith.divf %595, %596 : vector<8x1xf32>
    %598 = vector.broadcast %590 : vector<8x1xf32> to vector<8x32xf32>
    %599 = arith.subf %582, %598 : vector<8x32xf32>
    %cst_262 = arith.constant 9.99999974E-6 : f32
    %600 = vector.broadcast %cst_262 : f32 to vector<8x1xf32>
    %601 = arith.addf %597, %600 : vector<8x1xf32>
    %602 = math.rsqrt %601 : vector<8x1xf32>
    %603 = vector.broadcast %602 : vector<8x1xf32> to vector<8x32xf32>
    %604 = arith.mulf %599, %603 : vector<8x32xf32>
    %605 = vector.broadcast %584 : vector<1x32xf32> to vector<8x32xf32>
    %606 = arith.mulf %604, %605 : vector<8x32xf32>
    %607 = vector.broadcast %586 : vector<1x32xf32> to vector<8x32xf32>
    %608 = arith.addf %606, %607 : vector<8x32xf32>
    %c0_263 = arith.constant 0 : index
    %c0_264 = arith.constant 0 : index
    %c0_265 = arith.constant 0 : index
    %609 = vector.load %arg30[%c0_263, %c0_264, %c0_265] : memref<2x32x64xf32, #tpu.memory_space<vmem>>, vector<1x32x64xf32>
    %610 = vector.shape_cast %609 : vector<1x32x64xf32> to vector<32x64xf32>
    %c0_266 = arith.constant 0 : index
    %c0_267 = arith.constant 0 : index
    %c0_268 = arith.constant 0 : index
    %611 = vector.load %arg31[%c0_266, %c0_267, %c0_268] : memref<2x1x64xf32, #tpu.memory_space<vmem>>, vector<1x1x64xf32>
    %612 = vector.shape_cast %611 : vector<1x1x64xf32> to vector<1x64xf32>
    %c0_269 = arith.constant 0 : index
    %c0_270 = arith.constant 0 : index
    %c0_271 = arith.constant 0 : index
    %613 = vector.load %arg32[%c0_269, %c0_270, %c0_271] : memref<2x64x32xf32, #tpu.memory_space<vmem>>, vector<1x64x32xf32>
    %614 = vector.shape_cast %613 : vector<1x64x32xf32> to vector<64x32xf32>
    %c0_272 = arith.constant 0 : index
    %c0_273 = arith.constant 0 : index
    %c0_274 = arith.constant 0 : index
    %615 = vector.load %arg33[%c0_272, %c0_273, %c0_274] : memref<2x1x32xf32, #tpu.memory_space<vmem>>, vector<1x1x32xf32>
    %616 = vector.shape_cast %615 : vector<1x1x32xf32> to vector<1x32xf32>
    %cst_275 = arith.constant dense<0.000000e+00> : vector<8x64xf32>
    %617 = tpu.matmul %608, %610, %cst_275 {dimension_numbers = #tpu.dot_dimension_numbers<[1], [0], [0], [1], [0, 0, 1, 1], [], []>} : vector<8x32xf32>, vector<32x64xf32>, vector<8x64xf32> -> vector<8x64xf32>
    %618 = vector.broadcast %612 : vector<1x64xf32> to vector<8x64xf32>
    %619 = arith.addf %617, %618 : vector<8x64xf32>
    %cst_276 = arith.constant 0.000000e+00 : f32
    %620 = vector.broadcast %cst_276 : f32 to vector<8x64xf32>
    %621 = arith.maximumf %619, %620 : vector<8x64xf32>
    %cst_277 = arith.constant dense<0.000000e+00> : vector<8x32xf32>
    %622 = tpu.matmul %621, %614, %cst_277 {dimension_numbers = #tpu.dot_dimension_numbers<[1], [0], [0], [1], [0, 0, 1, 1], [], []>} : vector<8x64xf32>, vector<64x32xf32>, vector<8x32xf32> -> vector<8x32xf32>
    %623 = vector.broadcast %616 : vector<1x32xf32> to vector<8x32xf32>
    %624 = arith.addf %622, %623 : vector<8x32xf32>
    %625 = arith.addf %608, %624 : vector<8x32xf32>
    %c0_278 = arith.constant 0 : index
    %c0_279 = arith.constant 0 : index
    %c0_280 = arith.constant 0 : index
    %626 = vector.load %arg34[%c0_278, %c0_279, %c0_280] : memref<2x1x32xf32, #tpu.memory_space<vmem>>, vector<1x1x32xf32>
    %627 = vector.shape_cast %626 : vector<1x1x32xf32> to vector<1x32xf32>
    %c0_281 = arith.constant 0 : index
    %c0_282 = arith.constant 0 : index
    %c0_283 = arith.constant 0 : index
    %628 = vector.load %arg35[%c0_281, %c0_282, %c0_283] : memref<2x1x32xf32, #tpu.memory_space<vmem>>, vector<1x1x32xf32>
    %629 = vector.shape_cast %628 : vector<1x1x32xf32> to vector<1x32xf32>
    %cst_284 = arith.constant dense<0.000000e+00> : vector<8xf32>
    %630 = vector.multi_reduction <add>, %625, %cst_284 [1] : vector<8x32xf32> to vector<8xf32>
    %631 = vector.shape_cast %630 : vector<8xf32> to vector<8x1xf32>
    %cst_285 = arith.constant 3.200000e+01 : f32
    %632 = vector.broadcast %cst_285 : f32 to vector<8x1xf32>
    %633 = arith.divf %631, %632 : vector<8x1xf32>
    %634 = vector.broadcast %633 : vector<8x1xf32> to vector<8x32xf32>
    %635 = arith.subf %625, %634 : vector<8x32xf32>
    %636 = arith.mulf %635, %635 : vector<8x32xf32>
    %cst_286 = arith.constant dense<0.000000e+00> : vector<8xf32>
    %637 = vector.multi_reduction <add>, %636, %cst_286 [1] : vector<8x32xf32> to vector<8xf32>
    %638 = vector.shape_cast %637 : vector<8xf32> to vector<8x1xf32>
    %cst_287 = arith.constant 3.200000e+01 : f32
    %639 = vector.broadcast %cst_287 : f32 to vector<8x1xf32>
    %640 = arith.divf %638, %639 : vector<8x1xf32>
    %641 = vector.broadcast %633 : vector<8x1xf32> to vector<8x32xf32>
    %642 = arith.subf %625, %641 : vector<8x32xf32>
    %cst_288 = arith.constant 9.99999974E-6 : f32
    %643 = vector.broadcast %cst_288 : f32 to vector<8x1xf32>
    %644 = arith.addf %640, %643 : vector<8x1xf32>
    %645 = math.rsqrt %644 : vector<8x1xf32>
    %646 = vector.broadcast %645 : vector<8x1xf32> to vector<8x32xf32>
    %647 = arith.mulf %642, %646 : vector<8x32xf32>
    %648 = vector.broadcast %627 : vector<1x32xf32> to vector<8x32xf32>
    %649 = arith.mulf %647, %648 : vector<8x32xf32>
    %650 = vector.broadcast %629 : vector<1x32xf32> to vector<8x32xf32>
    %651 = arith.addf %649, %650 : vector<8x32xf32>
    %c1_289 = arith.constant 1 : index
    %c0_290 = arith.constant 0 : index
    %c0_291 = arith.constant 0 : index
    %652 = vector.load %arg18[%c1_289, %c0_290, %c0_291] : memref<2x32x96xf32, #tpu.memory_space<vmem>>, vector<1x32x96xf32>
    %653 = vector.shape_cast %652 : vector<1x32x96xf32> to vector<32x96xf32>
    %c1_292 = arith.constant 1 : index
    %c0_293 = arith.constant 0 : index
    %c0_294 = arith.constant 0 : index
    %654 = vector.load %arg19[%c1_292, %c0_293, %c0_294] : memref<2x1x96xf32, #tpu.memory_space<vmem>>, vector<1x1x96xf32>
    %655 = vector.shape_cast %654 : vector<1x1x96xf32> to vector<1x96xf32>
    %c1_295 = arith.constant 1 : index
    %c0_296 = arith.constant 0 : index
    %c0_297 = arith.constant 0 : index
    %656 = vector.load %arg20[%c1_295, %c0_296, %c0_297] : memref<2x32x32xf32, #tpu.memory_space<vmem>>, vector<1x32x32xf32>
    %657 = vector.shape_cast %656 : vector<1x32x32xf32> to vector<32x32xf32>
    %c1_298 = arith.constant 1 : index
    %c0_299 = arith.constant 0 : index
    %c0_300 = arith.constant 0 : index
    %658 = vector.load %arg21[%c1_298, %c0_299, %c0_300] : memref<2x1x32xf32, #tpu.memory_space<vmem>>, vector<1x1x32xf32>
    %659 = vector.shape_cast %658 : vector<1x1x32xf32> to vector<1x32xf32>
    %cst_301 = arith.constant dense<0.000000e+00> : vector<8x96xf32>
    %660 = tpu.matmul %651, %653, %cst_301 {dimension_numbers = #tpu.dot_dimension_numbers<[1], [0], [0], [1], [0, 0, 1, 1], [], []>} : vector<8x32xf32>, vector<32x96xf32>, vector<8x96xf32> -> vector<8x96xf32>
    %661 = vector.broadcast %655 : vector<1x96xf32> to vector<8x96xf32>
    %662 = arith.addf %660, %661 : vector<8x96xf32>
    %663 = vector.extract_strided_slice %662 {offsets = [0, 0], sizes = [8, 32], strides = [1, 1]} : vector<8x96xf32> to vector<8x32xf32>
    %664 = vector.extract_strided_slice %662 {offsets = [0, 32], sizes = [8, 32], strides = [1, 1]} : vector<8x96xf32> to vector<8x32xf32>
    %665 = vector.extract_strided_slice %662 {offsets = [0, 64], sizes = [8, 32], strides = [1, 1]} : vector<8x96xf32> to vector<8x32xf32>
    %666 = vector.extract_strided_slice %663 {offsets = [0, 0], sizes = [8, 8], strides = [1, 1]} : vector<8x32xf32> to vector<8x8xf32>
    %667 = vector.extract_strided_slice %664 {offsets = [0, 0], sizes = [8, 8], strides = [1, 1]} : vector<8x32xf32> to vector<8x8xf32>
    %668 = vector.extract_strided_slice %665 {offsets = [0, 0], sizes = [8, 8], strides = [1, 1]} : vector<8x32xf32> to vector<8x8xf32>
    %cst_302 = arith.constant dense<0.000000e+00> : vector<8x8xf32>
    %669 = tpu.matmul %666, %667, %cst_302 {dimension_numbers = #tpu.dot_dimension_numbers<[1], [1], [0], [0], [0, 0, 1, 0], [], []>} : vector<8x8xf32>, vector<8x8xf32>, vector<8x8xf32> -> vector<8x8xf32>
    %cst_303 = arith.constant 0.353553385 : f32
    %670 = vector.broadcast %cst_303 : f32 to vector<8x8xf32>
    %671 = arith.mulf %669, %670 : vector<8x8xf32>
    %cst_304 = arith.constant dense<0xFF800000> : vector<8xf32>
    %672 = vector.multi_reduction <maximumf>, %671, %cst_304 [1] : vector<8x8xf32> to vector<8xf32>
    %673 = vector.shape_cast %672 : vector<8xf32> to vector<8x1xf32>
    %674 = vector.broadcast %673 : vector<8x1xf32> to vector<8x8xf32>
    %675 = arith.subf %671, %674 : vector<8x8xf32>
    %676 = math.exp %675 : vector<8x8xf32>
    %cst_305 = arith.constant dense<0.000000e+00> : vector<8xf32>
    %677 = vector.multi_reduction <add>, %676, %cst_305 [1] : vector<8x8xf32> to vector<8xf32>
    %678 = vector.shape_cast %677 : vector<8xf32> to vector<8x1xf32>
    %679 = vector.broadcast %678 : vector<8x1xf32> to vector<8x8xf32>
    %680 = arith.divf %676, %679 : vector<8x8xf32>
    %cst_306 = arith.constant dense<0.000000e+00> : vector<8x8xf32>
    %681 = tpu.matmul %680, %668, %cst_306 {dimension_numbers = #tpu.dot_dimension_numbers<[1], [0], [0], [1], [0, 0, 1, 1], [], []>} : vector<8x8xf32>, vector<8x8xf32>, vector<8x8xf32> -> vector<8x8xf32>
    %682 = vector.extract_strided_slice %657 {offsets = [0, 0], sizes = [8, 32], strides = [1, 1]} : vector<32x32xf32> to vector<8x32xf32>
    %cst_307 = arith.constant dense<0.000000e+00> : vector<8x32xf32>
    %683 = tpu.matmul %681, %682, %cst_307 {dimension_numbers = #tpu.dot_dimension_numbers<[1], [0], [0], [1], [0, 0, 1, 1], [], []>} : vector<8x8xf32>, vector<8x32xf32>, vector<8x32xf32> -> vector<8x32xf32>
    %684 = vector.broadcast %659 : vector<1x32xf32> to vector<8x32xf32>
    %685 = arith.addf %684, %683 : vector<8x32xf32>
    %686 = vector.extract_strided_slice %663 {offsets = [0, 8], sizes = [8, 8], strides = [1, 1]} : vector<8x32xf32> to vector<8x8xf32>
    %687 = vector.extract_strided_slice %664 {offsets = [0, 8], sizes = [8, 8], strides = [1, 1]} : vector<8x32xf32> to vector<8x8xf32>
    %688 = vector.extract_strided_slice %665 {offsets = [0, 8], sizes = [8, 8], strides = [1, 1]} : vector<8x32xf32> to vector<8x8xf32>
    %cst_308 = arith.constant dense<0.000000e+00> : vector<8x8xf32>
    %689 = tpu.matmul %686, %687, %cst_308 {dimension_numbers = #tpu.dot_dimension_numbers<[1], [1], [0], [0], [0, 0, 1, 0], [], []>} : vector<8x8xf32>, vector<8x8xf32>, vector<8x8xf32> -> vector<8x8xf32>
    %cst_309 = arith.constant 0.353553385 : f32
    %690 = vector.broadcast %cst_309 : f32 to vector<8x8xf32>
    %691 = arith.mulf %689, %690 : vector<8x8xf32>
    %cst_310 = arith.constant dense<0xFF800000> : vector<8xf32>
    %692 = vector.multi_reduction <maximumf>, %691, %cst_310 [1] : vector<8x8xf32> to vector<8xf32>
    %693 = vector.shape_cast %692 : vector<8xf32> to vector<8x1xf32>
    %694 = vector.broadcast %693 : vector<8x1xf32> to vector<8x8xf32>
    %695 = arith.subf %691, %694 : vector<8x8xf32>
    %696 = math.exp %695 : vector<8x8xf32>
    %cst_311 = arith.constant dense<0.000000e+00> : vector<8xf32>
    %697 = vector.multi_reduction <add>, %696, %cst_311 [1] : vector<8x8xf32> to vector<8xf32>
    %698 = vector.shape_cast %697 : vector<8xf32> to vector<8x1xf32>
    %699 = vector.broadcast %698 : vector<8x1xf32> to vector<8x8xf32>
    %700 = arith.divf %696, %699 : vector<8x8xf32>
    %cst_312 = arith.constant dense<0.000000e+00> : vector<8x8xf32>
    %701 = tpu.matmul %700, %688, %cst_312 {dimension_numbers = #tpu.dot_dimension_numbers<[1], [0], [0], [1], [0, 0, 1, 1], [], []>} : vector<8x8xf32>, vector<8x8xf32>, vector<8x8xf32> -> vector<8x8xf32>
    %702 = vector.extract_strided_slice %657 {offsets = [8, 0], sizes = [8, 32], strides = [1, 1]} : vector<32x32xf32> to vector<8x32xf32>
    %cst_313 = arith.constant dense<0.000000e+00> : vector<8x32xf32>
    %703 = tpu.matmul %701, %702, %cst_313 {dimension_numbers = #tpu.dot_dimension_numbers<[1], [0], [0], [1], [0, 0, 1, 1], [], []>} : vector<8x8xf32>, vector<8x32xf32>, vector<8x32xf32> -> vector<8x32xf32>
    %704 = arith.addf %685, %703 : vector<8x32xf32>
    %705 = vector.extract_strided_slice %663 {offsets = [0, 16], sizes = [8, 8], strides = [1, 1]} : vector<8x32xf32> to vector<8x8xf32>
    %706 = vector.extract_strided_slice %664 {offsets = [0, 16], sizes = [8, 8], strides = [1, 1]} : vector<8x32xf32> to vector<8x8xf32>
    %707 = vector.extract_strided_slice %665 {offsets = [0, 16], sizes = [8, 8], strides = [1, 1]} : vector<8x32xf32> to vector<8x8xf32>
    %cst_314 = arith.constant dense<0.000000e+00> : vector<8x8xf32>
    %708 = tpu.matmul %705, %706, %cst_314 {dimension_numbers = #tpu.dot_dimension_numbers<[1], [1], [0], [0], [0, 0, 1, 0], [], []>} : vector<8x8xf32>, vector<8x8xf32>, vector<8x8xf32> -> vector<8x8xf32>
    %cst_315 = arith.constant 0.353553385 : f32
    %709 = vector.broadcast %cst_315 : f32 to vector<8x8xf32>
    %710 = arith.mulf %708, %709 : vector<8x8xf32>
    %cst_316 = arith.constant dense<0xFF800000> : vector<8xf32>
    %711 = vector.multi_reduction <maximumf>, %710, %cst_316 [1] : vector<8x8xf32> to vector<8xf32>
    %712 = vector.shape_cast %711 : vector<8xf32> to vector<8x1xf32>
    %713 = vector.broadcast %712 : vector<8x1xf32> to vector<8x8xf32>
    %714 = arith.subf %710, %713 : vector<8x8xf32>
    %715 = math.exp %714 : vector<8x8xf32>
    %cst_317 = arith.constant dense<0.000000e+00> : vector<8xf32>
    %716 = vector.multi_reduction <add>, %715, %cst_317 [1] : vector<8x8xf32> to vector<8xf32>
    %717 = vector.shape_cast %716 : vector<8xf32> to vector<8x1xf32>
    %718 = vector.broadcast %717 : vector<8x1xf32> to vector<8x8xf32>
    %719 = arith.divf %715, %718 : vector<8x8xf32>
    %cst_318 = arith.constant dense<0.000000e+00> : vector<8x8xf32>
    %720 = tpu.matmul %719, %707, %cst_318 {dimension_numbers = #tpu.dot_dimension_numbers<[1], [0], [0], [1], [0, 0, 1, 1], [], []>} : vector<8x8xf32>, vector<8x8xf32>, vector<8x8xf32> -> vector<8x8xf32>
    %721 = vector.extract_strided_slice %657 {offsets = [16, 0], sizes = [8, 32], strides = [1, 1]} : vector<32x32xf32> to vector<8x32xf32>
    %cst_319 = arith.constant dense<0.000000e+00> : vector<8x32xf32>
    %722 = tpu.matmul %720, %721, %cst_319 {dimension_numbers = #tpu.dot_dimension_numbers<[1], [0], [0], [1], [0, 0, 1, 1], [], []>} : vector<8x8xf32>, vector<8x32xf32>, vector<8x32xf32> -> vector<8x32xf32>
    %723 = arith.addf %704, %722 : vector<8x32xf32>
    %724 = vector.extract_strided_slice %663 {offsets = [0, 24], sizes = [8, 8], strides = [1, 1]} : vector<8x32xf32> to vector<8x8xf32>
    %725 = vector.extract_strided_slice %664 {offsets = [0, 24], sizes = [8, 8], strides = [1, 1]} : vector<8x32xf32> to vector<8x8xf32>
    %726 = vector.extract_strided_slice %665 {offsets = [0, 24], sizes = [8, 8], strides = [1, 1]} : vector<8x32xf32> to vector<8x8xf32>
    %cst_320 = arith.constant dense<0.000000e+00> : vector<8x8xf32>
    %727 = tpu.matmul %724, %725, %cst_320 {dimension_numbers = #tpu.dot_dimension_numbers<[1], [1], [0], [0], [0, 0, 1, 0], [], []>} : vector<8x8xf32>, vector<8x8xf32>, vector<8x8xf32> -> vector<8x8xf32>
    %cst_321 = arith.constant 0.353553385 : f32
    %728 = vector.broadcast %cst_321 : f32 to vector<8x8xf32>
    %729 = arith.mulf %727, %728 : vector<8x8xf32>
    %cst_322 = arith.constant dense<0xFF800000> : vector<8xf32>
    %730 = vector.multi_reduction <maximumf>, %729, %cst_322 [1] : vector<8x8xf32> to vector<8xf32>
    %731 = vector.shape_cast %730 : vector<8xf32> to vector<8x1xf32>
    %732 = vector.broadcast %731 : vector<8x1xf32> to vector<8x8xf32>
    %733 = arith.subf %729, %732 : vector<8x8xf32>
    %734 = math.exp %733 : vector<8x8xf32>
    %cst_323 = arith.constant dense<0.000000e+00> : vector<8xf32>
    %735 = vector.multi_reduction <add>, %734, %cst_323 [1] : vector<8x8xf32> to vector<8xf32>
    %736 = vector.shape_cast %735 : vector<8xf32> to vector<8x1xf32>
    %737 = vector.broadcast %736 : vector<8x1xf32> to vector<8x8xf32>
    %738 = arith.divf %734, %737 : vector<8x8xf32>
    %cst_324 = arith.constant dense<0.000000e+00> : vector<8x8xf32>
    %739 = tpu.matmul %738, %726, %cst_324 {dimension_numbers = #tpu.dot_dimension_numbers<[1], [0], [0], [1], [0, 0, 1, 1], [], []>} : vector<8x8xf32>, vector<8x8xf32>, vector<8x8xf32> -> vector<8x8xf32>
    %740 = vector.extract_strided_slice %657 {offsets = [24, 0], sizes = [8, 32], strides = [1, 1]} : vector<32x32xf32> to vector<8x32xf32>
    %cst_325 = arith.constant dense<0.000000e+00> : vector<8x32xf32>
    %741 = tpu.matmul %739, %740, %cst_325 {dimension_numbers = #tpu.dot_dimension_numbers<[1], [0], [0], [1], [0, 0, 1, 1], [], []>} : vector<8x8xf32>, vector<8x32xf32>, vector<8x32xf32> -> vector<8x32xf32>
    %742 = arith.addf %723, %741 : vector<8x32xf32>
    %743 = arith.addf %651, %742 : vector<8x32xf32>
    %c1_326 = arith.constant 1 : index
    %c0_327 = arith.constant 0 : index
    %c0_328 = arith.constant 0 : index
    %744 = vector.load %arg22[%c1_326, %c0_327, %c0_328] : memref<2x1x32xf32, #tpu.memory_space<vmem>>, vector<1x1x32xf32>
    %745 = vector.shape_cast %744 : vector<1x1x32xf32> to vector<1x32xf32>
    %c1_329 = arith.constant 1 : index
    %c0_330 = arith.constant 0 : index
    %c0_331 = arith.constant 0 : index
    %746 = vector.load %arg23[%c1_329, %c0_330, %c0_331] : memref<2x1x32xf32, #tpu.memory_space<vmem>>, vector<1x1x32xf32>
    %747 = vector.shape_cast %746 : vector<1x1x32xf32> to vector<1x32xf32>
    %cst_332 = arith.constant dense<0.000000e+00> : vector<8xf32>
    %748 = vector.multi_reduction <add>, %743, %cst_332 [1] : vector<8x32xf32> to vector<8xf32>
    %749 = vector.shape_cast %748 : vector<8xf32> to vector<8x1xf32>
    %cst_333 = arith.constant 3.200000e+01 : f32
    %750 = vector.broadcast %cst_333 : f32 to vector<8x1xf32>
    %751 = arith.divf %749, %750 : vector<8x1xf32>
    %752 = vector.broadcast %751 : vector<8x1xf32> to vector<8x32xf32>
    %753 = arith.subf %743, %752 : vector<8x32xf32>
    %754 = arith.mulf %753, %753 : vector<8x32xf32>
    %cst_334 = arith.constant dense<0.000000e+00> : vector<8xf32>
    %755 = vector.multi_reduction <add>, %754, %cst_334 [1] : vector<8x32xf32> to vector<8xf32>
    %756 = vector.shape_cast %755 : vector<8xf32> to vector<8x1xf32>
    %cst_335 = arith.constant 3.200000e+01 : f32
    %757 = vector.broadcast %cst_335 : f32 to vector<8x1xf32>
    %758 = arith.divf %756, %757 : vector<8x1xf32>
    %759 = vector.broadcast %751 : vector<8x1xf32> to vector<8x32xf32>
    %760 = arith.subf %743, %759 : vector<8x32xf32>
    %cst_336 = arith.constant 9.99999974E-6 : f32
    %761 = vector.broadcast %cst_336 : f32 to vector<8x1xf32>
    %762 = arith.addf %758, %761 : vector<8x1xf32>
    %763 = math.rsqrt %762 : vector<8x1xf32>
    %764 = vector.broadcast %763 : vector<8x1xf32> to vector<8x32xf32>
    %765 = arith.mulf %760, %764 : vector<8x32xf32>
    %766 = vector.broadcast %745 : vector<1x32xf32> to vector<8x32xf32>
    %767 = arith.mulf %765, %766 : vector<8x32xf32>
    %768 = vector.broadcast %747 : vector<1x32xf32> to vector<8x32xf32>
    %769 = arith.addf %767, %768 : vector<8x32xf32>
    %c1_337 = arith.constant 1 : index
    %c0_338 = arith.constant 0 : index
    %c0_339 = arith.constant 0 : index
    %770 = vector.load %arg24[%c1_337, %c0_338, %c0_339] : memref<2x32x96xf32, #tpu.memory_space<vmem>>, vector<1x32x96xf32>
    %771 = vector.shape_cast %770 : vector<1x32x96xf32> to vector<32x96xf32>
    %c1_340 = arith.constant 1 : index
    %c0_341 = arith.constant 0 : index
    %c0_342 = arith.constant 0 : index
    %772 = vector.load %arg25[%c1_340, %c0_341, %c0_342] : memref<2x1x96xf32, #tpu.memory_space<vmem>>, vector<1x1x96xf32>
    %773 = vector.shape_cast %772 : vector<1x1x96xf32> to vector<1x96xf32>
    %c1_343 = arith.constant 1 : index
    %c0_344 = arith.constant 0 : index
    %c0_345 = arith.constant 0 : index
    %774 = vector.load %arg26[%c1_343, %c0_344, %c0_345] : memref<2x32x32xf32, #tpu.memory_space<vmem>>, vector<1x32x32xf32>
    %775 = vector.shape_cast %774 : vector<1x32x32xf32> to vector<32x32xf32>
    %c1_346 = arith.constant 1 : index
    %c0_347 = arith.constant 0 : index
    %c0_348 = arith.constant 0 : index
    %776 = vector.load %arg27[%c1_346, %c0_347, %c0_348] : memref<2x1x32xf32, #tpu.memory_space<vmem>>, vector<1x1x32xf32>
    %777 = vector.shape_cast %776 : vector<1x1x32xf32> to vector<1x32xf32>
    %778 = vector.extract_strided_slice %771 {offsets = [0, 0], sizes = [32, 32], strides = [1, 1]} : vector<32x96xf32> to vector<32x32xf32>
    %cst_349 = arith.constant dense<0.000000e+00> : vector<8x32xf32>
    %779 = tpu.matmul %769, %778, %cst_349 {dimension_numbers = #tpu.dot_dimension_numbers<[1], [0], [0], [1], [0, 0, 1, 1], [], []>} : vector<8x32xf32>, vector<32x32xf32>, vector<8x32xf32> -> vector<8x32xf32>
    %780 = vector.extract_strided_slice %773 {offsets = [0, 0], sizes = [1, 32], strides = [1, 1]} : vector<1x96xf32> to vector<1x32xf32>
    %781 = vector.broadcast %780 : vector<1x32xf32> to vector<8x32xf32>
    %782 = arith.addf %779, %781 : vector<8x32xf32>
    %783 = vector.extract_strided_slice %771 {offsets = [0, 32], sizes = [32, 64], strides = [1, 1]} : vector<32x96xf32> to vector<32x64xf32>
    %cst_350 = arith.constant dense<0.000000e+00> : vector<8x64xf32>
    %784 = tpu.matmul %356, %783, %cst_350 {dimension_numbers = #tpu.dot_dimension_numbers<[1], [0], [0], [1], [0, 0, 1, 1], [], []>} : vector<8x32xf32>, vector<32x64xf32>, vector<8x64xf32> -> vector<8x64xf32>
    %785 = vector.extract_strided_slice %773 {offsets = [0, 32], sizes = [1, 64], strides = [1, 1]} : vector<1x96xf32> to vector<1x64xf32>
    %786 = vector.broadcast %785 : vector<1x64xf32> to vector<8x64xf32>
    %787 = arith.addf %784, %786 : vector<8x64xf32>
    %788 = vector.extract_strided_slice %787 {offsets = [0, 0], sizes = [8, 32], strides = [1, 1]} : vector<8x64xf32> to vector<8x32xf32>
    %789 = vector.extract_strided_slice %787 {offsets = [0, 32], sizes = [8, 32], strides = [1, 1]} : vector<8x64xf32> to vector<8x32xf32>
    %790 = vector.extract_strided_slice %782 {offsets = [0, 0], sizes = [8, 8], strides = [1, 1]} : vector<8x32xf32> to vector<8x8xf32>
    %791 = vector.extract_strided_slice %788 {offsets = [0, 0], sizes = [8, 8], strides = [1, 1]} : vector<8x32xf32> to vector<8x8xf32>
    %792 = vector.extract_strided_slice %789 {offsets = [0, 0], sizes = [8, 8], strides = [1, 1]} : vector<8x32xf32> to vector<8x8xf32>
    %cst_351 = arith.constant dense<0.000000e+00> : vector<8x8xf32>
    %793 = tpu.matmul %790, %791, %cst_351 {dimension_numbers = #tpu.dot_dimension_numbers<[1], [1], [0], [0], [0, 0, 1, 0], [], []>} : vector<8x8xf32>, vector<8x8xf32>, vector<8x8xf32> -> vector<8x8xf32>
    %cst_352 = arith.constant 0.353553385 : f32
    %794 = vector.broadcast %cst_352 : f32 to vector<8x8xf32>
    %795 = arith.mulf %793, %794 : vector<8x8xf32>
    %cst_353 = arith.constant dense<0xFF800000> : vector<8xf32>
    %796 = vector.multi_reduction <maximumf>, %795, %cst_353 [1] : vector<8x8xf32> to vector<8xf32>
    %797 = vector.shape_cast %796 : vector<8xf32> to vector<8x1xf32>
    %798 = vector.broadcast %797 : vector<8x1xf32> to vector<8x8xf32>
    %799 = arith.subf %795, %798 : vector<8x8xf32>
    %800 = math.exp %799 : vector<8x8xf32>
    %cst_354 = arith.constant dense<0.000000e+00> : vector<8xf32>
    %801 = vector.multi_reduction <add>, %800, %cst_354 [1] : vector<8x8xf32> to vector<8xf32>
    %802 = vector.shape_cast %801 : vector<8xf32> to vector<8x1xf32>
    %803 = vector.broadcast %802 : vector<8x1xf32> to vector<8x8xf32>
    %804 = arith.divf %800, %803 : vector<8x8xf32>
    %cst_355 = arith.constant dense<0.000000e+00> : vector<8x8xf32>
    %805 = tpu.matmul %804, %792, %cst_355 {dimension_numbers = #tpu.dot_dimension_numbers<[1], [0], [0], [1], [0, 0, 1, 1], [], []>} : vector<8x8xf32>, vector<8x8xf32>, vector<8x8xf32> -> vector<8x8xf32>
    %806 = vector.extract_strided_slice %775 {offsets = [0, 0], sizes = [8, 32], strides = [1, 1]} : vector<32x32xf32> to vector<8x32xf32>
    %cst_356 = arith.constant dense<0.000000e+00> : vector<8x32xf32>
    %807 = tpu.matmul %805, %806, %cst_356 {dimension_numbers = #tpu.dot_dimension_numbers<[1], [0], [0], [1], [0, 0, 1, 1], [], []>} : vector<8x8xf32>, vector<8x32xf32>, vector<8x32xf32> -> vector<8x32xf32>
    %808 = vector.broadcast %777 : vector<1x32xf32> to vector<8x32xf32>
    %809 = arith.addf %808, %807 : vector<8x32xf32>
    %810 = vector.extract_strided_slice %782 {offsets = [0, 8], sizes = [8, 8], strides = [1, 1]} : vector<8x32xf32> to vector<8x8xf32>
    %811 = vector.extract_strided_slice %788 {offsets = [0, 8], sizes = [8, 8], strides = [1, 1]} : vector<8x32xf32> to vector<8x8xf32>
    %812 = vector.extract_strided_slice %789 {offsets = [0, 8], sizes = [8, 8], strides = [1, 1]} : vector<8x32xf32> to vector<8x8xf32>
    %cst_357 = arith.constant dense<0.000000e+00> : vector<8x8xf32>
    %813 = tpu.matmul %810, %811, %cst_357 {dimension_numbers = #tpu.dot_dimension_numbers<[1], [1], [0], [0], [0, 0, 1, 0], [], []>} : vector<8x8xf32>, vector<8x8xf32>, vector<8x8xf32> -> vector<8x8xf32>
    %cst_358 = arith.constant 0.353553385 : f32
    %814 = vector.broadcast %cst_358 : f32 to vector<8x8xf32>
    %815 = arith.mulf %813, %814 : vector<8x8xf32>
    %cst_359 = arith.constant dense<0xFF800000> : vector<8xf32>
    %816 = vector.multi_reduction <maximumf>, %815, %cst_359 [1] : vector<8x8xf32> to vector<8xf32>
    %817 = vector.shape_cast %816 : vector<8xf32> to vector<8x1xf32>
    %818 = vector.broadcast %817 : vector<8x1xf32> to vector<8x8xf32>
    %819 = arith.subf %815, %818 : vector<8x8xf32>
    %820 = math.exp %819 : vector<8x8xf32>
    %cst_360 = arith.constant dense<0.000000e+00> : vector<8xf32>
    %821 = vector.multi_reduction <add>, %820, %cst_360 [1] : vector<8x8xf32> to vector<8xf32>
    %822 = vector.shape_cast %821 : vector<8xf32> to vector<8x1xf32>
    %823 = vector.broadcast %822 : vector<8x1xf32> to vector<8x8xf32>
    %824 = arith.divf %820, %823 : vector<8x8xf32>
    %cst_361 = arith.constant dense<0.000000e+00> : vector<8x8xf32>
    %825 = tpu.matmul %824, %812, %cst_361 {dimension_numbers = #tpu.dot_dimension_numbers<[1], [0], [0], [1], [0, 0, 1, 1], [], []>} : vector<8x8xf32>, vector<8x8xf32>, vector<8x8xf32> -> vector<8x8xf32>
    %826 = vector.extract_strided_slice %775 {offsets = [8, 0], sizes = [8, 32], strides = [1, 1]} : vector<32x32xf32> to vector<8x32xf32>
    %cst_362 = arith.constant dense<0.000000e+00> : vector<8x32xf32>
    %827 = tpu.matmul %825, %826, %cst_362 {dimension_numbers = #tpu.dot_dimension_numbers<[1], [0], [0], [1], [0, 0, 1, 1], [], []>} : vector<8x8xf32>, vector<8x32xf32>, vector<8x32xf32> -> vector<8x32xf32>
    %828 = arith.addf %809, %827 : vector<8x32xf32>
    %829 = vector.extract_strided_slice %782 {offsets = [0, 16], sizes = [8, 8], strides = [1, 1]} : vector<8x32xf32> to vector<8x8xf32>
    %830 = vector.extract_strided_slice %788 {offsets = [0, 16], sizes = [8, 8], strides = [1, 1]} : vector<8x32xf32> to vector<8x8xf32>
    %831 = vector.extract_strided_slice %789 {offsets = [0, 16], sizes = [8, 8], strides = [1, 1]} : vector<8x32xf32> to vector<8x8xf32>
    %cst_363 = arith.constant dense<0.000000e+00> : vector<8x8xf32>
    %832 = tpu.matmul %829, %830, %cst_363 {dimension_numbers = #tpu.dot_dimension_numbers<[1], [1], [0], [0], [0, 0, 1, 0], [], []>} : vector<8x8xf32>, vector<8x8xf32>, vector<8x8xf32> -> vector<8x8xf32>
    %cst_364 = arith.constant 0.353553385 : f32
    %833 = vector.broadcast %cst_364 : f32 to vector<8x8xf32>
    %834 = arith.mulf %832, %833 : vector<8x8xf32>
    %cst_365 = arith.constant dense<0xFF800000> : vector<8xf32>
    %835 = vector.multi_reduction <maximumf>, %834, %cst_365 [1] : vector<8x8xf32> to vector<8xf32>
    %836 = vector.shape_cast %835 : vector<8xf32> to vector<8x1xf32>
    %837 = vector.broadcast %836 : vector<8x1xf32> to vector<8x8xf32>
    %838 = arith.subf %834, %837 : vector<8x8xf32>
    %839 = math.exp %838 : vector<8x8xf32>
    %cst_366 = arith.constant dense<0.000000e+00> : vector<8xf32>
    %840 = vector.multi_reduction <add>, %839, %cst_366 [1] : vector<8x8xf32> to vector<8xf32>
    %841 = vector.shape_cast %840 : vector<8xf32> to vector<8x1xf32>
    %842 = vector.broadcast %841 : vector<8x1xf32> to vector<8x8xf32>
    %843 = arith.divf %839, %842 : vector<8x8xf32>
    %cst_367 = arith.constant dense<0.000000e+00> : vector<8x8xf32>
    %844 = tpu.matmul %843, %831, %cst_367 {dimension_numbers = #tpu.dot_dimension_numbers<[1], [0], [0], [1], [0, 0, 1, 1], [], []>} : vector<8x8xf32>, vector<8x8xf32>, vector<8x8xf32> -> vector<8x8xf32>
    %845 = vector.extract_strided_slice %775 {offsets = [16, 0], sizes = [8, 32], strides = [1, 1]} : vector<32x32xf32> to vector<8x32xf32>
    %cst_368 = arith.constant dense<0.000000e+00> : vector<8x32xf32>
    %846 = tpu.matmul %844, %845, %cst_368 {dimension_numbers = #tpu.dot_dimension_numbers<[1], [0], [0], [1], [0, 0, 1, 1], [], []>} : vector<8x8xf32>, vector<8x32xf32>, vector<8x32xf32> -> vector<8x32xf32>
    %847 = arith.addf %828, %846 : vector<8x32xf32>
    %848 = vector.extract_strided_slice %782 {offsets = [0, 24], sizes = [8, 8], strides = [1, 1]} : vector<8x32xf32> to vector<8x8xf32>
    %849 = vector.extract_strided_slice %788 {offsets = [0, 24], sizes = [8, 8], strides = [1, 1]} : vector<8x32xf32> to vector<8x8xf32>
    %850 = vector.extract_strided_slice %789 {offsets = [0, 24], sizes = [8, 8], strides = [1, 1]} : vector<8x32xf32> to vector<8x8xf32>
    %cst_369 = arith.constant dense<0.000000e+00> : vector<8x8xf32>
    %851 = tpu.matmul %848, %849, %cst_369 {dimension_numbers = #tpu.dot_dimension_numbers<[1], [1], [0], [0], [0, 0, 1, 0], [], []>} : vector<8x8xf32>, vector<8x8xf32>, vector<8x8xf32> -> vector<8x8xf32>
    %cst_370 = arith.constant 0.353553385 : f32
    %852 = vector.broadcast %cst_370 : f32 to vector<8x8xf32>
    %853 = arith.mulf %851, %852 : vector<8x8xf32>
    %cst_371 = arith.constant dense<0xFF800000> : vector<8xf32>
    %854 = vector.multi_reduction <maximumf>, %853, %cst_371 [1] : vector<8x8xf32> to vector<8xf32>
    %855 = vector.shape_cast %854 : vector<8xf32> to vector<8x1xf32>
    %856 = vector.broadcast %855 : vector<8x1xf32> to vector<8x8xf32>
    %857 = arith.subf %853, %856 : vector<8x8xf32>
    %858 = math.exp %857 : vector<8x8xf32>
    %cst_372 = arith.constant dense<0.000000e+00> : vector<8xf32>
    %859 = vector.multi_reduction <add>, %858, %cst_372 [1] : vector<8x8xf32> to vector<8xf32>
    %860 = vector.shape_cast %859 : vector<8xf32> to vector<8x1xf32>
    %861 = vector.broadcast %860 : vector<8x1xf32> to vector<8x8xf32>
    %862 = arith.divf %858, %861 : vector<8x8xf32>
    %cst_373 = arith.constant dense<0.000000e+00> : vector<8x8xf32>
    %863 = tpu.matmul %862, %850, %cst_373 {dimension_numbers = #tpu.dot_dimension_numbers<[1], [0], [0], [1], [0, 0, 1, 1], [], []>} : vector<8x8xf32>, vector<8x8xf32>, vector<8x8xf32> -> vector<8x8xf32>
    %864 = vector.extract_strided_slice %775 {offsets = [24, 0], sizes = [8, 32], strides = [1, 1]} : vector<32x32xf32> to vector<8x32xf32>
    %cst_374 = arith.constant dense<0.000000e+00> : vector<8x32xf32>
    %865 = tpu.matmul %863, %864, %cst_374 {dimension_numbers = #tpu.dot_dimension_numbers<[1], [0], [0], [1], [0, 0, 1, 1], [], []>} : vector<8x8xf32>, vector<8x32xf32>, vector<8x32xf32> -> vector<8x32xf32>
    %866 = arith.addf %847, %865 : vector<8x32xf32>
    %867 = arith.addf %769, %866 : vector<8x32xf32>
    %c1_375 = arith.constant 1 : index
    %c0_376 = arith.constant 0 : index
    %c0_377 = arith.constant 0 : index
    %868 = vector.load %arg28[%c1_375, %c0_376, %c0_377] : memref<2x1x32xf32, #tpu.memory_space<vmem>>, vector<1x1x32xf32>
    %869 = vector.shape_cast %868 : vector<1x1x32xf32> to vector<1x32xf32>
    %c1_378 = arith.constant 1 : index
    %c0_379 = arith.constant 0 : index
    %c0_380 = arith.constant 0 : index
    %870 = vector.load %arg29[%c1_378, %c0_379, %c0_380] : memref<2x1x32xf32, #tpu.memory_space<vmem>>, vector<1x1x32xf32>
    %871 = vector.shape_cast %870 : vector<1x1x32xf32> to vector<1x32xf32>
    %cst_381 = arith.constant dense<0.000000e+00> : vector<8xf32>
    %872 = vector.multi_reduction <add>, %867, %cst_381 [1] : vector<8x32xf32> to vector<8xf32>
    %873 = vector.shape_cast %872 : vector<8xf32> to vector<8x1xf32>
    %cst_382 = arith.constant 3.200000e+01 : f32
    %874 = vector.broadcast %cst_382 : f32 to vector<8x1xf32>
    %875 = arith.divf %873, %874 : vector<8x1xf32>
    %876 = vector.broadcast %875 : vector<8x1xf32> to vector<8x32xf32>
    %877 = arith.subf %867, %876 : vector<8x32xf32>
    %878 = arith.mulf %877, %877 : vector<8x32xf32>
    %cst_383 = arith.constant dense<0.000000e+00> : vector<8xf32>
    %879 = vector.multi_reduction <add>, %878, %cst_383 [1] : vector<8x32xf32> to vector<8xf32>
    %880 = vector.shape_cast %879 : vector<8xf32> to vector<8x1xf32>
    %cst_384 = arith.constant 3.200000e+01 : f32
    %881 = vector.broadcast %cst_384 : f32 to vector<8x1xf32>
    %882 = arith.divf %880, %881 : vector<8x1xf32>
    %883 = vector.broadcast %875 : vector<8x1xf32> to vector<8x32xf32>
    %884 = arith.subf %867, %883 : vector<8x32xf32>
    %cst_385 = arith.constant 9.99999974E-6 : f32
    %885 = vector.broadcast %cst_385 : f32 to vector<8x1xf32>
    %886 = arith.addf %882, %885 : vector<8x1xf32>
    %887 = math.rsqrt %886 : vector<8x1xf32>
    %888 = vector.broadcast %887 : vector<8x1xf32> to vector<8x32xf32>
    %889 = arith.mulf %884, %888 : vector<8x32xf32>
    %890 = vector.broadcast %869 : vector<1x32xf32> to vector<8x32xf32>
    %891 = arith.mulf %889, %890 : vector<8x32xf32>
    %892 = vector.broadcast %871 : vector<1x32xf32> to vector<8x32xf32>
    %893 = arith.addf %891, %892 : vector<8x32xf32>
    %c1_386 = arith.constant 1 : index
    %c0_387 = arith.constant 0 : index
    %c0_388 = arith.constant 0 : index
    %894 = vector.load %arg30[%c1_386, %c0_387, %c0_388] : memref<2x32x64xf32, #tpu.memory_space<vmem>>, vector<1x32x64xf32>
    %895 = vector.shape_cast %894 : vector<1x32x64xf32> to vector<32x64xf32>
    %c1_389 = arith.constant 1 : index
    %c0_390 = arith.constant 0 : index
    %c0_391 = arith.constant 0 : index
    %896 = vector.load %arg31[%c1_389, %c0_390, %c0_391] : memref<2x1x64xf32, #tpu.memory_space<vmem>>, vector<1x1x64xf32>
    %897 = vector.shape_cast %896 : vector<1x1x64xf32> to vector<1x64xf32>
    %c1_392 = arith.constant 1 : index
    %c0_393 = arith.constant 0 : index
    %c0_394 = arith.constant 0 : index
    %898 = vector.load %arg32[%c1_392, %c0_393, %c0_394] : memref<2x64x32xf32, #tpu.memory_space<vmem>>, vector<1x64x32xf32>
    %899 = vector.shape_cast %898 : vector<1x64x32xf32> to vector<64x32xf32>
    %c1_395 = arith.constant 1 : index
    %c0_396 = arith.constant 0 : index
    %c0_397 = arith.constant 0 : index
    %900 = vector.load %arg33[%c1_395, %c0_396, %c0_397] : memref<2x1x32xf32, #tpu.memory_space<vmem>>, vector<1x1x32xf32>
    %901 = vector.shape_cast %900 : vector<1x1x32xf32> to vector<1x32xf32>
    %cst_398 = arith.constant dense<0.000000e+00> : vector<8x64xf32>
    %902 = tpu.matmul %893, %895, %cst_398 {dimension_numbers = #tpu.dot_dimension_numbers<[1], [0], [0], [1], [0, 0, 1, 1], [], []>} : vector<8x32xf32>, vector<32x64xf32>, vector<8x64xf32> -> vector<8x64xf32>
    %903 = vector.broadcast %897 : vector<1x64xf32> to vector<8x64xf32>
    %904 = arith.addf %902, %903 : vector<8x64xf32>
    %cst_399 = arith.constant 0.000000e+00 : f32
    %905 = vector.broadcast %cst_399 : f32 to vector<8x64xf32>
    %906 = arith.maximumf %904, %905 : vector<8x64xf32>
    %cst_400 = arith.constant dense<0.000000e+00> : vector<8x32xf32>
    %907 = tpu.matmul %906, %899, %cst_400 {dimension_numbers = #tpu.dot_dimension_numbers<[1], [0], [0], [1], [0, 0, 1, 1], [], []>} : vector<8x64xf32>, vector<64x32xf32>, vector<8x32xf32> -> vector<8x32xf32>
    %908 = vector.broadcast %901 : vector<1x32xf32> to vector<8x32xf32>
    %909 = arith.addf %907, %908 : vector<8x32xf32>
    %910 = arith.addf %893, %909 : vector<8x32xf32>
    %c1_401 = arith.constant 1 : index
    %c0_402 = arith.constant 0 : index
    %c0_403 = arith.constant 0 : index
    %911 = vector.load %arg34[%c1_401, %c0_402, %c0_403] : memref<2x1x32xf32, #tpu.memory_space<vmem>>, vector<1x1x32xf32>
    %912 = vector.shape_cast %911 : vector<1x1x32xf32> to vector<1x32xf32>
    %c1_404 = arith.constant 1 : index
    %c0_405 = arith.constant 0 : index
    %c0_406 = arith.constant 0 : index
    %913 = vector.load %arg35[%c1_404, %c0_405, %c0_406] : memref<2x1x32xf32, #tpu.memory_space<vmem>>, vector<1x1x32xf32>
    %914 = vector.shape_cast %913 : vector<1x1x32xf32> to vector<1x32xf32>
    %cst_407 = arith.constant dense<0.000000e+00> : vector<8xf32>
    %915 = vector.multi_reduction <add>, %910, %cst_407 [1] : vector<8x32xf32> to vector<8xf32>
    %916 = vector.shape_cast %915 : vector<8xf32> to vector<8x1xf32>
    %cst_408 = arith.constant 3.200000e+01 : f32
    %917 = vector.broadcast %cst_408 : f32 to vector<8x1xf32>
    %918 = arith.divf %916, %917 : vector<8x1xf32>
    %919 = vector.broadcast %918 : vector<8x1xf32> to vector<8x32xf32>
    %920 = arith.subf %910, %919 : vector<8x32xf32>
    %921 = arith.mulf %920, %920 : vector<8x32xf32>
    %cst_409 = arith.constant dense<0.000000e+00> : vector<8xf32>
    %922 = vector.multi_reduction <add>, %921, %cst_409 [1] : vector<8x32xf32> to vector<8xf32>
    %923 = vector.shape_cast %922 : vector<8xf32> to vector<8x1xf32>
    %cst_410 = arith.constant 3.200000e+01 : f32
    %924 = vector.broadcast %cst_410 : f32 to vector<8x1xf32>
    %925 = arith.divf %923, %924 : vector<8x1xf32>
    %926 = vector.broadcast %918 : vector<8x1xf32> to vector<8x32xf32>
    %927 = arith.subf %910, %926 : vector<8x32xf32>
    %cst_411 = arith.constant 9.99999974E-6 : f32
    %928 = vector.broadcast %cst_411 : f32 to vector<8x1xf32>
    %929 = arith.addf %925, %928 : vector<8x1xf32>
    %930 = math.rsqrt %929 : vector<8x1xf32>
    %931 = vector.broadcast %930 : vector<8x1xf32> to vector<8x32xf32>
    %932 = arith.mulf %927, %931 : vector<8x32xf32>
    %933 = vector.broadcast %912 : vector<1x32xf32> to vector<8x32xf32>
    %934 = arith.mulf %932, %933 : vector<8x32xf32>
    %935 = vector.broadcast %914 : vector<1x32xf32> to vector<8x32xf32>
    %936 = arith.addf %934, %935 : vector<8x32xf32>
    %c0_412 = arith.constant 0 : index
    %c0_413 = arith.constant 0 : index
    %937 = vector.load %arg36[%c0_412, %c0_413] : memref<1x32xf32, #tpu.memory_space<vmem>>, vector<1x32xf32>
    %c0_414 = arith.constant 0 : index
    %c0_415 = arith.constant 0 : index
    %938 = vector.load %arg37[%c0_414, %c0_415] : memref<1x32xf32, #tpu.memory_space<vmem>>, vector<1x32xf32>
    %cst_416 = arith.constant dense<0.000000e+00> : vector<8xf32>
    %939 = vector.multi_reduction <add>, %936, %cst_416 [1] : vector<8x32xf32> to vector<8xf32>
    %940 = vector.shape_cast %939 : vector<8xf32> to vector<8x1xf32>
    %cst_417 = arith.constant 3.200000e+01 : f32
    %941 = vector.broadcast %cst_417 : f32 to vector<8x1xf32>
    %942 = arith.divf %940, %941 : vector<8x1xf32>
    %943 = vector.broadcast %942 : vector<8x1xf32> to vector<8x32xf32>
    %944 = arith.subf %936, %943 : vector<8x32xf32>
    %945 = arith.mulf %944, %944 : vector<8x32xf32>
    %cst_418 = arith.constant dense<0.000000e+00> : vector<8xf32>
    %946 = vector.multi_reduction <add>, %945, %cst_418 [1] : vector<8x32xf32> to vector<8xf32>
    %947 = vector.shape_cast %946 : vector<8xf32> to vector<8x1xf32>
    %cst_419 = arith.constant 3.200000e+01 : f32
    %948 = vector.broadcast %cst_419 : f32 to vector<8x1xf32>
    %949 = arith.divf %947, %948 : vector<8x1xf32>
    %950 = vector.broadcast %942 : vector<8x1xf32> to vector<8x32xf32>
    %951 = arith.subf %936, %950 : vector<8x32xf32>
    %cst_420 = arith.constant 9.99999974E-6 : f32
    %952 = vector.broadcast %cst_420 : f32 to vector<8x1xf32>
    %953 = arith.addf %949, %952 : vector<8x1xf32>
    %954 = math.rsqrt %953 : vector<8x1xf32>
    %955 = vector.broadcast %954 : vector<8x1xf32> to vector<8x32xf32>
    %956 = arith.mulf %951, %955 : vector<8x32xf32>
    %957 = vector.broadcast %937 : vector<1x32xf32> to vector<8x32xf32>
    %958 = arith.mulf %956, %957 : vector<8x32xf32>
    %959 = vector.broadcast %938 : vector<1x32xf32> to vector<8x32xf32>
    %960 = arith.addf %958, %959 : vector<8x32xf32>
    %c0_421 = arith.constant 0 : index
    %c0_422 = arith.constant 0 : index
    %961 = vector.load %arg38[%c0_421, %c0_422] : memref<32x128xf32, #tpu.memory_space<vmem>>, vector<32x128xf32>
    %cst_423 = arith.constant dense<0.000000e+00> : vector<8x128xf32>
    %962 = tpu.matmul %960, %961, %cst_423 {dimension_numbers = #tpu.dot_dimension_numbers<[1], [0], [0], [1], [0, 0, 1, 1], [], []>} : vector<8x32xf32>, vector<32x128xf32>, vector<8x128xf32> -> vector<8x128xf32>
    %c0_424 = arith.constant 0 : index
    %c0_425 = arith.constant 0 : index
    %963 = vector.load %arg39[%c0_424, %c0_425] : memref<1x128xf32, #tpu.memory_space<vmem>>, vector<1x128xf32>
    %964 = vector.broadcast %963 : vector<1x128xf32> to vector<8x128xf32>
    %965 = arith.addf %962, %964 : vector<8x128xf32>
    %c0_426 = arith.constant 0 : index
    %c0_427 = arith.constant 0 : index
    %c0_428 = arith.constant 0 : index
    %966 = vector.load %arg40[%c0_426, %c0_427, %c0_428] : memref<1x8x128xf32, #tpu.memory_space<vmem>>, vector<1x8x128xf32>
    %967 = vector.shape_cast %966 : vector<1x8x128xf32> to vector<8x128xf32>
    %968 = vector.shape_cast %965 : vector<8x128xf32> to vector<1x8x128xf32>
    tpu.vector_store %arg40[%c0_426, %c0_427, %c0_428], %968 {strides = array<i32>} : memref<1x8x128xf32, #tpu.memory_space<vmem>>, vector<1x8x128xf32>,
    return
  }
  func.func @transform_0(%arg0: i32) -> (i32, i32, i32) {
    %c0_i32 = arith.constant 0 : i32
    %c0_i32_0 = arith.constant 0 : i32
    %c0_i32_1 = arith.constant 0 : i32
    return %arg0, %c0_i32, %c0_i32_0 : i32, i32, i32
  }
  func.func @transform_1(%arg0: i32) -> (i32, i32, i32) {
    %c0_i32 = arith.constant 0 : i32
    %c0_i32_0 = arith.constant 0 : i32
    %c0_i32_1 = arith.constant 0 : i32
    return %arg0, %c0_i32, %c0_i32_0 : i32, i32, i32
  }
  func.func @transform_2(%arg0: i32) -> (i32, i32) {
    %c0_i32 = arith.constant 0 : i32
    %c0_i32_0 = arith.constant 0 : i32
    %c0_i32_1 = arith.constant 0 : i32
    return %c0_i32, %c0_i32_0 : i32, i32
  }
  func.func @transform_3(%arg0: i32) -> (i32, i32, i32) {
    %c0_i32 = arith.constant 0 : i32
    %c0_i32_0 = arith.constant 0 : i32
    %c0_i32_1 = arith.constant 0 : i32
    %c0_i32_2 = arith.constant 0 : i32
    return %c0_i32, %c0_i32_0, %c0_i32_1 : i32, i32, i32
  }
  func.func @transform_4(%arg0: i32) -> (i32, i32, i32) {
    %c0_i32 = arith.constant 0 : i32
    %c0_i32_0 = arith.constant 0 : i32
    %c0_i32_1 = arith.constant 0 : i32
    %c0_i32_2 = arith.constant 0 : i32
    return %c0_i32, %c0_i32_0, %c0_i32_1 : i32, i32, i32
  }
  func.func @transform_5(%arg0: i32) -> (i32, i32, i32) {
    %c0_i32 = arith.constant 0 : i32
    %c0_i32_0 = arith.constant 0 : i32
    %c0_i32_1 = arith.constant 0 : i32
    %c0_i32_2 = arith.constant 0 : i32
    return %c0_i32, %c0_i32_0, %c0_i32_1 : i32, i32, i32
  }
  func.func @transform_6(%arg0: i32) -> (i32, i32, i32) {
    %c0_i32 = arith.constant 0 : i32
    %c0_i32_0 = arith.constant 0 : i32
    %c0_i32_1 = arith.constant 0 : i32
    %c0_i32_2 = arith.constant 0 : i32
    return %c0_i32, %c0_i32_0, %c0_i32_1 : i32, i32, i32
  }
  func.func @transform_7(%arg0: i32) -> (i32, i32, i32) {
    %c0_i32 = arith.constant 0 : i32
    %c0_i32_0 = arith.constant 0 : i32
    %c0_i32_1 = arith.constant 0 : i32
    %c0_i32_2 = arith.constant 0 : i32
    return %c0_i32, %c0_i32_0, %c0_i32_1 : i32, i32, i32
  }
  func.func @transform_8(%arg0: i32) -> (i32, i32, i32) {
    %c0_i32 = arith.constant 0 : i32
    %c0_i32_0 = arith.constant 0 : i32
    %c0_i32_1 = arith.constant 0 : i32
    %c0_i32_2 = arith.constant 0 : i32
    return %c0_i32, %c0_i32_0, %c0_i32_1 : i32, i32, i32
  }
  func.func @transform_9(%arg0: i32) -> (i32, i32, i32) {
    %c0_i32 = arith.constant 0 : i32
    %c0_i32_0 = arith.constant 0 : i32
    %c0_i32_1 = arith.constant 0 : i32
    %c0_i32_2 = arith.constant 0 : i32
    return %c0_i32, %c0_i32_0, %c0_i32_1 : i32, i32, i32
  }
  func.func @transform_10(%arg0: i32) -> (i32, i32, i32) {
    %c0_i32 = arith.constant 0 : i32
    %c0_i32_0 = arith.constant 0 : i32
    %c0_i32_1 = arith.constant 0 : i32
    %c0_i32_2 = arith.constant 0 : i32
    return %c0_i32, %c0_i32_0, %c0_i32_1 : i32, i32, i32
  }
  func.func @transform_11(%arg0: i32) -> (i32, i32, i32) {
    %c0_i32 = arith.constant 0 : i32
    %c0_i32_0 = arith.constant 0 : i32
    %c0_i32_1 = arith.constant 0 : i32
    %c0_i32_2 = arith.constant 0 : i32
    return %c0_i32, %c0_i32_0, %c0_i32_1 : i32, i32, i32
  }
  func.func @transform_12(%arg0: i32) -> (i32, i32, i32) {
    %c0_i32 = arith.constant 0 : i32
    %c0_i32_0 = arith.constant 0 : i32
    %c0_i32_1 = arith.constant 0 : i32
    %c0_i32_2 = arith.constant 0 : i32
    return %c0_i32, %c0_i32_0, %c0_i32_1 : i32, i32, i32
  }
  func.func @transform_13(%arg0: i32) -> (i32, i32, i32) {
    %c0_i32 = arith.constant 0 : i32
    %c0_i32_0 = arith.constant 0 : i32
    %c0_i32_1 = arith.constant 0 : i32
    %c0_i32_2 = arith.constant 0 : i32
    return %c0_i32, %c0_i32_0, %c0_i32_1 : i32, i32, i32
  }
  func.func @transform_14(%arg0: i32) -> (i32, i32, i32) {
    %c0_i32 = arith.constant 0 : i32
    %c0_i32_0 = arith.constant 0 : i32
    %c0_i32_1 = arith.constant 0 : i32
    %c0_i32_2 = arith.constant 0 : i32
    return %c0_i32, %c0_i32_0, %c0_i32_1 : i32, i32, i32
  }
  func.func @transform_15(%arg0: i32) -> (i32, i32) {
    %c0_i32 = arith.constant 0 : i32
    %c0_i32_0 = arith.constant 0 : i32
    %c0_i32_1 = arith.constant 0 : i32
    return %c0_i32, %c0_i32_0 : i32, i32
  }
  func.func @transform_16(%arg0: i32) -> (i32, i32) {
    %c0_i32 = arith.constant 0 : i32
    %c0_i32_0 = arith.constant 0 : i32
    %c0_i32_1 = arith.constant 0 : i32
    return %c0_i32, %c0_i32_0 : i32, i32
  }
  func.func @transform_17(%arg0: i32) -> (i32, i32, i32) {
    %c0_i32 = arith.constant 0 : i32
    %c0_i32_0 = arith.constant 0 : i32
    %c0_i32_1 = arith.constant 0 : i32
    %c0_i32_2 = arith.constant 0 : i32
    return %c0_i32, %c0_i32_0, %c0_i32_1 : i32, i32, i32
  }
  func.func @transform_18(%arg0: i32) -> (i32, i32, i32) {
    %c0_i32 = arith.constant 0 : i32
    %c0_i32_0 = arith.constant 0 : i32
    %c0_i32_1 = arith.constant 0 : i32
    %c0_i32_2 = arith.constant 0 : i32
    return %c0_i32, %c0_i32_0, %c0_i32_1 : i32, i32, i32
  }
  func.func @transform_19(%arg0: i32) -> (i32, i32, i32) {
    %c0_i32 = arith.constant 0 : i32
    %c0_i32_0 = arith.constant 0 : i32
    %c0_i32_1 = arith.constant 0 : i32
    %c0_i32_2 = arith.constant 0 : i32
    return %c0_i32, %c0_i32_0, %c0_i32_1 : i32, i32, i32
  }
  func.func @transform_20(%arg0: i32) -> (i32, i32, i32) {
    %c0_i32 = arith.constant 0 : i32
    %c0_i32_0 = arith.constant 0 : i32
    %c0_i32_1 = arith.constant 0 : i32
    %c0_i32_2 = arith.constant 0 : i32
    return %c0_i32, %c0_i32_0, %c0_i32_1 : i32, i32, i32
  }
  func.func @transform_21(%arg0: i32) -> (i32, i32, i32) {
    %c0_i32 = arith.constant 0 : i32
    %c0_i32_0 = arith.constant 0 : i32
    %c0_i32_1 = arith.constant 0 : i32
    %c0_i32_2 = arith.constant 0 : i32
    return %c0_i32, %c0_i32_0, %c0_i32_1 : i32, i32, i32
  }
  func.func @transform_22(%arg0: i32) -> (i32, i32, i32) {
    %c0_i32 = arith.constant 0 : i32
    %c0_i32_0 = arith.constant 0 : i32
    %c0_i32_1 = arith.constant 0 : i32
    %c0_i32_2 = arith.constant 0 : i32
    return %c0_i32, %c0_i32_0, %c0_i32_1 : i32, i32, i32
  }
  func.func @transform_23(%arg0: i32) -> (i32, i32, i32) {
    %c0_i32 = arith.constant 0 : i32
    %c0_i32_0 = arith.constant 0 : i32
    %c0_i32_1 = arith.constant 0 : i32
    %c0_i32_2 = arith.constant 0 : i32
    return %c0_i32, %c0_i32_0, %c0_i32_1 : i32, i32, i32
  }
  func.func @transform_24(%arg0: i32) -> (i32, i32, i32) {
    %c0_i32 = arith.constant 0 : i32
    %c0_i32_0 = arith.constant 0 : i32
    %c0_i32_1 = arith.constant 0 : i32
    %c0_i32_2 = arith.constant 0 : i32
    return %c0_i32, %c0_i32_0, %c0_i32_1 : i32, i32, i32
  }
  func.func @transform_25(%arg0: i32) -> (i32, i32, i32) {
    %c0_i32 = arith.constant 0 : i32
    %c0_i32_0 = arith.constant 0 : i32
    %c0_i32_1 = arith.constant 0 : i32
    %c0_i32_2 = arith.constant 0 : i32
    return %c0_i32, %c0_i32_0, %c0_i32_1 : i32, i32, i32
  }
  func.func @transform_26(%arg0: i32) -> (i32, i32, i32) {
    %c0_i32 = arith.constant 0 : i32
    %c0_i32_0 = arith.constant 0 : i32
    %c0_i32_1 = arith.constant 0 : i32
    %c0_i32_2 = arith.constant 0 : i32
    return %c0_i32, %c0_i32_0, %c0_i32_1 : i32, i32, i32
  }
  func.func @transform_27(%arg0: i32) -> (i32, i32, i32) {
    %c0_i32 = arith.constant 0 : i32
    %c0_i32_0 = arith.constant 0 : i32
    %c0_i32_1 = arith.constant 0 : i32
    %c0_i32_2 = arith.constant 0 : i32
    return %c0_i32, %c0_i32_0, %c0_i32_1 : i32, i32, i32
  }
  func.func @transform_28(%arg0: i32) -> (i32, i32, i32) {
    %c0_i32 = arith.constant 0 : i32
    %c0_i32_0 = arith.constant 0 : i32
    %c0_i32_1 = arith.constant 0 : i32
    %c0_i32_2 = arith.constant 0 : i32
    return %c0_i32, %c0_i32_0, %c0_i32_1 : i32, i32, i32
  }
  func.func @transform_29(%arg0: i32) -> (i32, i32, i32) {
    %c0_i32 = arith.constant 0 : i32
    %c0_i32_0 = arith.constant 0 : i32
    %c0_i32_1 = arith.constant 0 : i32
    %c0_i32_2 = arith.constant 0 : i32
    return %c0_i32, %c0_i32_0, %c0_i32_1 : i32, i32, i32
  }
  func.func @transform_30(%arg0: i32) -> (i32, i32, i32) {
    %c0_i32 = arith.constant 0 : i32
    %c0_i32_0 = arith.constant 0 : i32
    %c0_i32_1 = arith.constant 0 : i32
    %c0_i32_2 = arith.constant 0 : i32
    return %c0_i32, %c0_i32_0, %c0_i32_1 : i32, i32, i32
  }
  func.func @transform_31(%arg0: i32) -> (i32, i32, i32) {
    %c0_i32 = arith.constant 0 : i32
    %c0_i32_0 = arith.constant 0 : i32
    %c0_i32_1 = arith.constant 0 : i32
    %c0_i32_2 = arith.constant 0 : i32
    return %c0_i32, %c0_i32_0, %c0_i32_1 : i32, i32, i32
  }
  func.func @transform_32(%arg0: i32) -> (i32, i32, i32) {
    %c0_i32 = arith.constant 0 : i32
    %c0_i32_0 = arith.constant 0 : i32
    %c0_i32_1 = arith.constant 0 : i32
    %c0_i32_2 = arith.constant 0 : i32
    return %c0_i32, %c0_i32_0, %c0_i32_1 : i32, i32, i32
  }
  func.func @transform_33(%arg0: i32) -> (i32, i32, i32) {
    %c0_i32 = arith.constant 0 : i32
    %c0_i32_0 = arith.constant 0 : i32
    %c0_i32_1 = arith.constant 0 : i32
    %c0_i32_2 = arith.constant 0 : i32
    return %c0_i32, %c0_i32_0, %c0_i32_1 : i32, i32, i32
  }
  func.func @transform_34(%arg0: i32) -> (i32, i32, i32) {
    %c0_i32 = arith.constant 0 : i32
    %c0_i32_0 = arith.constant 0 : i32
    %c0_i32_1 = arith.constant 0 : i32
    %c0_i32_2 = arith.constant 0 : i32
    return %c0_i32, %c0_i32_0, %c0_i32_1 : i32, i32, i32
  }
  func.func @transform_35(%arg0: i32) -> (i32, i32) {
    %c0_i32 = arith.constant 0 : i32
    %c0_i32_0 = arith.constant 0 : i32
    %c0_i32_1 = arith.constant 0 : i32
    return %c0_i32, %c0_i32_0 : i32, i32
  }
  func.func @transform_36(%arg0: i32) -> (i32, i32) {
    %c0_i32 = arith.constant 0 : i32
    %c0_i32_0 = arith.constant 0 : i32
    %c0_i32_1 = arith.constant 0 : i32
    return %c0_i32, %c0_i32_0 : i32, i32
  }
  func.func @transform_37(%arg0: i32) -> (i32, i32) {
    %c0_i32 = arith.constant 0 : i32
    %c0_i32_0 = arith.constant 0 : i32
    %c0_i32_1 = arith.constant 0 : i32
    return %c0_i32, %c0_i32_0 : i32, i32
  }
  func.func @transform_38(%arg0: i32) -> (i32, i32) {
    %c0_i32 = arith.constant 0 : i32
    %c0_i32_0 = arith.constant 0 : i32
    %c0_i32_1 = arith.constant 0 : i32
    return %c0_i32, %c0_i32_0 : i32, i32
  }
  func.func @transform_39(%arg0: i32) -> (i32, i32, i32) {
    %c0_i32 = arith.constant 0 : i32
    %c0_i32_0 = arith.constant 0 : i32
    %c0_i32_1 = arith.constant 0 : i32
    return %arg0, %c0_i32, %c0_i32_0 : i32, i32, i32
  }
}

</mosaic_0001>

<bundles_post_ra>
// kernel: forward.1
= control target key start
LH: loop header
LB: loop body
LE: loop exit
PB: predicated region body
PF: predicated region fallthrough
CT: control target
= control target key end

     0   :  { %s12146_s6 = smov 1   ;;  %s12147_s10 = smov 2   ;;  %s13672_s0 = inlined_call_operand.smem [shape: u32[40], index: -1, kind: input, shape index: {}] }
   0x1   :  { %s12235_s5 = sld [smem:[%s13672_s0]]   ;;  %s12148_s14 = smov 3  }
   0x2   :  { %s12240_s9 = sld [smem:[%s13672_s0 + %s12146_s6]]   ;;  %s12149_s18 = smov 4  }
   0x3   :  { %s12245_s13 = sld [smem:[%s13672_s0 + %s12147_s10]]   ;;  %s12150_s22 = smov 5  }
   0x4   :  { %s12250_s17 = sld [smem:[%s13672_s0 + %s12148_s14]]   ;;  %s12151_s26 = smov 6  }
   0x5   :  { %s12255_s21 = sld [smem:[%s13672_s0 + %s12149_s18]]   ;;  %s12152_s30 = smov 7  }
   0x6   :  { %s12260_s25 = sld [smem:[%s13672_s0 + %s12150_s22]]   ;;  %s12153_s4 = smov 8  }
   0x7   :  { %13721 = sst [smem:[#allocation55_spill]] %s12235_s5  ;;  %s12154_s10 = smov 9  }
   0x8   :  { %13722 = sst [smem:[#allocation56_spill]] %s12240_s9  ;;  %s12155_s15 = smov 10  }
   0x9   :  { %13723 = sst [smem:[#allocation57_spill]] %s12245_s13  ;;  %s12156_s20 = smov 11  }
   0xa   :  { %13724 = sst [smem:[#allocation58_spill]] %s12250_s17  ;;  %s12158_s1 = smov 13  }
   0xb   :  { %s12265_s29 = sld [smem:[%s13672_s0 + %s12151_s26]]   ;;  %s12157_s26 = smov 12  }
   0xc   :  { %13725 = sst [smem:[#allocation59_spill]] %s12260_s25  ;;  %s12159_s7 = smov 14  }
   0xd   :  { %s12270_s3 = sld [smem:[%s13672_s0 + %s12152_s30]]   ;;  %s12161_s22 = smov 16  }
   0xe   :  { %s12275_s8 = sld [smem:[%s13672_s0 + %s12153_s4]]   ;;  %s12162_s28 = smov 17  }
   0xf   :  { %s12280_s14 = sld [smem:[%s13672_s0 + %s12154_s10]]  }
  0x10   :  { %s12285_s19 = sld [smem:[%s13672_s0 + %s12155_s15]]   ;;  %s12160_s15 = smov 15  }
  0x11   :  { %13726 = sst [smem:[#allocation60_spill]] %s12265_s29 }
  0x12   :  { %s12290_s24 = sld [smem:[%s13672_s0 + %s12156_s20]]  }
  0x13   :  { %13727 = sst [smem:[#allocation61_spill]] %s12270_s3 }
  0x14   :  { %13728 = sst [smem:[#allocation62_spill]] %s12275_s8 }
  0x15   :  { %13729 = sst [smem:[#allocation63_spill]] %s12280_s14 }
  0x16   :  { %s12295_s30 = sld [smem:[%s13672_s0 + %s12157_s26]]  }
  0x17   :  { %s12300_s6 = sld [smem:[%s13672_s0 + %s12158_s1]]  }
  0x18   :  { %13730 = sst [smem:[#allocation64_spill]] %s12290_s24 }
  0x19   :  { %s12305_s12 = sld [smem:[%s13672_s0 + %s12159_s7]]   ;;  %s12163_s7 = smov 18  }
  0x1a   :  { %s12310_s20 = sld [smem:[%s13672_s0 + %s12160_s15]]   ;;  %s12164_s15 = smov 19  }
  0x1b   :  { %s12315_s27 = sld [smem:[%s13672_s0 + %s12161_s22]]   ;;  %s12165_s22 = smov 20  }
  0x1c   :  { %s12320_s4 = sld [smem:[%s13672_s0 + %s12162_s28]]   ;;  %s12166_s28 = smov 21  }
  0x1d   :  { %13731 = sst [smem:[#allocation65_spill]] %s12300_s6 }
  0x1e   :  { %s12325_s9 = sld [smem:[%s13672_s0 + %s12163_s7]]   ;;  %s12167_s7 = smov 22  }
  0x1f   :  { %13732 = sst [smem:[#allocation66_spill]] %s12305_s12 }
  0x20   :  { %13733 = sst [smem:[#allocation67_spill]] %s12310_s20 }
  0x21   :  { %13734 = sst [smem:[#allocation68_spill]] %s12315_s27 }
  0x22   :  { %13735 = sst [smem:[#allocation69_spill]] %s12320_s4 }
  0x23   :  { %s12330_s20 = sld [smem:[%s13672_s0 + %s12164_s15]]   ;;  %s12168_s15 = smov 23  }
  0x24   :  { %13736 = sst [smem:[#allocation70_spill]] %s12325_s9 }
  0x25   :  { %s12335_s24 = sld [smem:[%s13672_s0 + %s12165_s22]]   ;;  %s12169_s22 = smov 24  }
  0x26   :  { %s12340_s4 = sld [smem:[%s13672_s0 + %s12166_s28]]   ;;  %s12170_s28 = smov 25  }
  0x27   :  { %s12345_s14 = sld [smem:[%s13672_s0 + %s12167_s7]]   ;;  %s12171_s7 = smov 26  }
  0x28   :  { %s12355_s25 = sld [smem:[%s13672_s0 + %s12169_s22]]   ;;  %s12173_s22 = smov 28  }
  0x29   :  { %13737 = sst [smem:[#allocation71_spill]] %s12330_s20 }
  0x2a   :  { %s12350_s20 = sld [smem:[%s13672_s0 + %s12168_s15]]   ;;  %s12172_s15 = smov 27  }
  0x2b   :  { %13738 = sst [smem:[#allocation72_spill]] %s12335_s24 }
  0x2c   :  { %13739 = sst [smem:[#allocation73_spill]] %s12340_s4 }
  0x2d   :  { %13740 = sst [smem:[#allocation74_spill]] %s12345_s14 }
  0x2e   :  { %s12360_s17 = sld [smem:[%s13672_s0 + %s12170_s28]]   ;;  %s12174_s28 = smov 29  }
  0x2f   :  { %s12365_s13 = sld [smem:[%s13672_s0 + %s12171_s7]]   ;;  %s12175_s7 = smov 30  }
  0x30   :  { %13741 = sst [smem:[#allocation75_spill]] %s12350_s20 }
  0x31   :  { %s12370_s20 = sld [smem:[%s13672_s0 + %s12172_s15]]   ;;  %s12176_s15 = smov 31  }
  0x32   :  { %s12375_s5 = sld [smem:[%s13672_s0 + %s12173_s22]]   ;;  %s12177_s22 = smov 32  }
  0x33   :  { %s12390_s14 = sld [smem:[%s13672_s0 + %s12176_s15]]   ;;  %s12180_s15 = smov 35  }
  0x34   :  { %13742 = sst [smem:[#allocation76_spill]] %s12360_s17 }
  0x35   :  { %13743 = sst [smem:[#allocation77_spill]] %s12365_s13 }
  0x36   :  { %s12380_s17 = sld [smem:[%s13672_s0 + %s12174_s28]]   ;;  %s12178_s28 = smov 33  }
  0x37   :  { %s12385_s13 = sld [smem:[%s13672_s0 + %s12175_s7]]   ;;  %s12179_s7 = smov 34  }
  0x38   :  { %13744 = sst [smem:[#allocation78_spill]] %s12375_s5 }
  0x39   :  { %13747 = sst [smem:[#allocation81_spill]] %s12390_s14 }
  0x3a   :  { %s12395_s5 = sld [smem:[%s13672_s0 + %s12177_s22]]   ;;  %s12181_s22 = smov 36  }
  0x3b   :  { %s12405_s24 = sld [smem:[%s13672_s0 + %s12179_s7]]   ;;  %s12183_s7 = smov 38  }
  0x3c   :  { %13745 = sst [smem:[#allocation79_spill]] %s12380_s17 }
  0x3d   :  { %13746 = sst [smem:[#allocation80_spill]] %s12385_s13 }
  0x3e   :  { %s12400_s17 = sld [smem:[%s13672_s0 + %s12178_s28]]   ;;  %s12182_s28 = smov 37  }
  0x3f   :  { %s12410_s14 = sld [smem:[%s13672_s0 + %s12180_s15]]   ;;  %s12184_s15 = smov 39  }
  0x40   :  { %13748 = sst [smem:[#allocation82_spill]] %s12395_s5 }
  0x41   :  { %13749 = sst [smem:[#allocation83_spill]] %s12405_s24 }
  0x42   :  { %s12415_s5 = sld [smem:[%s13672_s0 + %s12181_s22]]  }
  0x43   :  { %s12420_s27 = sld [smem:[%s13672_s0 + %s12182_s28]]  }
  0x44   :  { %s12425_s24 = sld [smem:[%s13672_s0 + %s12183_s7]]  }
  0x45   :  { %13750 = sst [smem:[#allocation84_spill]] %s12410_s14 }
  0x46   :  { %s12430_s6 = sld [smem:[%s13672_s0 + %s12184_s15]]  }
  0x48   :  { %13751 = sst [smem:[#allocation85_spill]] %s12415_s5 }
  0x49   :  { %84 = vsyncpa [#allocation3], 0 }
  0x4a   :  { %85 = vsyncpa [#allocation6], 0 }
  0x4b   :  { %86 = vsyncpa [#allocation9], 0 }
  0x4c   :  { %87 = vsyncpa [#allocation12], 0 }
  0x4d   :  { %88 = vsyncpa [#allocation15], 0 }
  0x4e   :  { %89 = vsyncpa [#allocation18], 0 }
  0x4f   :  { %90 = vsyncpa [#allocation21], 0 }
  0x50   :  { %91 = vsyncpa [#allocation24], 0 }
  0x51   :  { %92 = vsyncpa [#allocation27], 0 }
  0x52   :  { %93 = vsyncpa [#allocation30], 0 }
  0x53   :  { %94 = vsyncpa [#allocation33], 0 }
  0x54   :  { %95 = vsyncpa [#allocation36], 0 }
  0x55   :  { %96 = vsyncpa [#allocation39], 0 }
  0x56   :  { %97 = vsyncpa [#allocation4], 0 }
  0x57   :  { %99 = vsyncpa [#allocation4 + $0x1], 0  ;;  %s12432_s22 = smov 0   ;;  %s12434_s23 = smov 0  }
  0x58   :  { %s12436_s0 = smov 0   ;;  %s12438_s26 = smov 0  }
  0x59 LB: > { %13752 = sst [smem:[#allocation86_spill]] %s12132_s22  ;;  %s12453_s28 = sadd.s32 4294967295, %s12144_s26   ;;  %s12144_s26 = sphi %s12438_s26, %s13840_s26   ;;  %s12140_s0 = sphi %s12436_s0, %s13842_s0   ;;  %s12136_s23 = sphi %s12434_s23, %s13844_s23   ;;  %s12132_s22 = sphi %s12432_s22, %s13843_s22  }
  0x5a   : > { %13753 = sst [smem:[#allocation87_spill]] %s12140_s0  ;;  %s9737_s1 = sadd.s32 4294967294, %s12144_s26  }
  0x5b   : > { %13754 = sst [smem:[#allocation88_spill]] %s12144_s26  ;;  %s12457_s2 = sadd.s32 1, %s12144_s26  }
  0x5c   : > { %13755 = sst [smem:[#allocation89_spill]] %s12457_s2  ;;  %s941_s7 = sadd.s32 1, %s12140_s0 }
  0x5d   : > { %s938_s10 = ssub.s32 %s12144_s26, %s12457_s2  ;;  %p951_p0 = scmp.ne.s32.totalorder %s12140_s0, %s12136_s23 }
  0x5e   : > { %p939_p1 = scmp.eq.s32.totalorder %s938_s10, 0  ;;  %p952_p2 = scmp.eq.s32.totalorder %s12453_s28, 1 }
  0x5f   : > { %p957_p3 = scmp.ne.s32.totalorder %s12136_s23, %s12132_s22  ;;  %p958_p4 = scmp.eq.s32.totalorder %s9737_s1, 1 }
  0x60   : > { %s12468_s11 = scalar_select %p939_p1, %s12140_s0, %s941_s7  }
  0x61   : > { %p12470_p5 = por %p952_p2, %p951_p0  ;;  %p12474_p6 = por %p958_p4, %p957_p3 }
  0x62   : > { %13756 = sst [smem:[#allocation90_spill]] %s12468_s11  ;;  %p9738_p7 = scmp.ge.s32.totalorder %s12144_s26, 1 }
  0x63   : > { %s13757_s15 = scalar_select %p12470_p5, 1, 0 }
  0x64   : > { %s13758_s16 = scalar_select %p12474_p6, 1, 0 }
  0x65   : > { %p965_p8 = scmp.lt.s32.totalorder %s12144_s26, 3  ;;  %p13690_p9 = scmp.eq.s32.totalorder %s12453_s28, 0 }
  0x66   : > { %13759 = sst [smem:[#allocation91_spill]] %s13758_s16  ;;  %s12185_s1 = smov [#allocation5]  }
  0x67   : > { %p12481_p10 = pnand %p9738_p7, %p965_p8  ;;  %s999_s7 = sshll.u32 %s12185_s1, 4  ;;  %s1000_s7 = int_to_ptr.vmem [resolvable:$true] %s999_s7 }
  0x68   : > { %s12186_s11 = smov [#allocation8]   ;;  %s12187_s2 = smov [#allocation11]  }
  0x69   : > { %s13760_s18 = scalar_select %p12481_p10, 1, 0 }
  0x6a   : > { %p11032_p11 = pneg %p12481_p10  ;;  %s1025_s0 = sshll.u32 %s12186_s11, 4  ;;  %s1026_s0 = int_to_ptr.vmem [resolvable:$true] %s1025_s0 }
  0x6b   : > { %s1057_s16 = sshll.u32 %s12187_s2, 4  ;;  %s11419_s26 = scalar_lea.vmem %s1000_s7, 32  ;;  %s1058_s16 = int_to_ptr.vmem [resolvable:$true] %s1057_s16 }
  0x6c   : > { %p12489_p12 = pnand %p13690_p9, %p11032_p11  ;;  %p11420_p0 = scmp.ne.s32.totalorder %s1000_s7, %s11419_s26 }
  0x6d   : > { %p11427_p3 = scmp.lt.s32.totalorder %s1000_s7, %s1000_s7  ;;  %p11428_p4 = scmp.lt.s32.totalorder %s11419_s26, %s11419_s26 }
  0x6e   : > { %p12495_p13 = pneg %p12489_p12 }
  0x6f   : > { %p11429_p7 = por %p11428_p4, %p11427_p3 }
  0x70   : > { %p11422_p1 = pnand %p11420_p0, %p12495_p13 }
  0x72   : > { %p11423_p2 = pneg %p11422_p1 }
  0x74   : > { %p11430_p8 = pnand %p11429_p7, %p11423_p2 }
  0x76   : > { %11433 = shalt.err (!%p11430_p8)
}
  0x77   : > { %s13692_s11 = smov 16   ;;  %s13763_s29 = sld [smem:[#allocation60_spill]] }
  0x78   : > { %s12189_s2 = smov 1   ;;  %s11445_s1 = scalar_lea.vmem %s1026_s0, 32 }
  0x79   : > { %p11446_p11 = scmp.ne.s32.totalorder %s1026_s0, %s11445_s1  ;;  %p11453_p9 = scmp.lt.s32.totalorder %s1026_s0, %s1026_s0 }
  0x7a   : > { %p11454_p6 = scmp.lt.s32.totalorder %s11445_s1, %s11445_s1 }
  0x7b   : > { %p11448_p0 = pnand %p11446_p11, %p12495_p13 }
  0x7c   : > { %p11455_p3 = por %p11454_p6, %p11453_p9 }
  0x7d   : > { %11038 = dma.hbm_to_vmem [thread:$0]  (!%p12489_p12), %s13763_s29, 32, %s1000_s7, [#allocation6], %s13692_s11, %s13692_s11, %s12189_s2  }
  0x7e   : > { %p11449_p1 = pneg %p11448_p0 }
  0x80   : > { %p11456_p2 = pnand %p11455_p3, %p11449_p1 }
  0x82   : > { %11459 = shalt.err (!%p11456_p2)
}
  0x83   : > { %s13764_s8 = sld [smem:[#allocation62_spill]]  ;;  %s11471_s26 = scalar_lea.vmem %s1058_s16, 32 }
  0x84   : > { %p11472_p4 = scmp.ne.s32.totalorder %s1058_s16, %s11471_s26  ;;  %p11479_p11 = scmp.lt.s32.totalorder %s1058_s16, %s1058_s16 }
  0x85   : > { %p11480_p0 = scmp.lt.s32.totalorder %s11471_s26, %s11471_s26 }
  0x86   : > { %p11474_p7 = pnand %p11472_p4, %p12495_p13 }
  0x87   : > { %p11481_p5 = por %p11480_p0, %p11479_p11 }
  0x88   : > { %p11475_p8 = pneg %p11474_p7 }
  0x89   : > { %11044 = dma.hbm_to_vmem [thread:$0]  (!%p12489_p12), %s13764_s8, 32, %s1026_s0, [#allocation9], %s13692_s11, %s13692_s11, %s12189_s2  }
  0x8a   : > { %p11482_p6 = pnand %p11481_p5, %p11475_p8 }
  0x8c   : > { %11485 = shalt.err (!%p11482_p6)
}
  0x8d   : > { %11050 = dma.hbm_to_vmem [thread:$0]  (!%p12489_p12), %s12295_s30, 32, %s1058_s16, [#allocation12], %s13692_s11, %s13692_s11, %s12189_s2  }
  0x8e   : > { %s12190_s0 = smov [#allocation14]   ;;  %s12191_s1 = smov [#allocation17]  }
  0x8f   : > { %s1083_s7 = sshll.u32 %s12190_s0, 4  ;;  %s1113_s8 = sshll.u32 %s12191_s1, 4  ;;  %s1084_s7 = int_to_ptr.vmem [resolvable:$true] %s1083_s7  ;;  %s1114_s8 = int_to_ptr.vmem [resolvable:$true] %s1113_s8 }
  0x90   : > { %s11497_s29 = scalar_lea.vmem %s1084_s7, 32  ;;  %p11505_p5 = scmp.lt.s32.totalorder %s1084_s7, %s1084_s7 }
  0x91   : > { %p11498_p9 = scmp.ne.s32.totalorder %s1084_s7, %s11497_s29  ;;  %p11506_p2 = scmp.lt.s32.totalorder %s11497_s29, %s11497_s29 }
  0x93   : > { %p11500_p1 = pnand %p11498_p9, %p12495_p13  ;;  %p11507_p4 = por %p11506_p2, %p11505_p5 }
  0x95   : > { %p11501_p3 = pneg %p11500_p1 }
  0x97   : > { %p11508_p7 = pnand %p11507_p4, %p11501_p3 }
  0x99   : > { %11511 = shalt.err (!%p11508_p7)
}
  0x9a   : > { %s13765_s12 = sld [smem:[#allocation66_spill]]  ;;  %s11523_s16 = scalar_lea.vmem %s1114_s8, 32 }
  0x9b   : > { %p11524_p8 = scmp.ne.s32.totalorder %s1114_s8, %s11523_s16  ;;  %p11531_p6 = scmp.lt.s32.totalorder %s1114_s8, %s1114_s8 }
  0x9c   : > { %p11532_p9 = scmp.lt.s32.totalorder %s11523_s16, %s11523_s16 }
  0x9d   : > { %p11526_p11 = pnand %p11524_p8, %p12495_p13 }
  0x9e   : > { %p11533_p1 = por %p11532_p9, %p11531_p6 }
  0x9f   : > { %p11527_p0 = pneg %p11526_p11 }
  0xa0   : > { %11056 = dma.hbm_to_vmem [thread:$0]  (!%p12489_p12), %s13765_s12, 32, %s1084_s7, [#allocation15], %s13692_s11, %s13692_s11, %s12189_s2  }
  0xa1   : > { %p11534_p5 = pnand %p11533_p1, %p11527_p0 }
  0xa3   : > { %11537 = shalt.err (!%p11534_p5)
}
  0xa4   : > { %s13766_s9 = sld [smem:[#allocation70_spill]]  ;;  %s12192_s29 = smov [#allocation20]  }
  0xa5   : > { %s1142_s26 = sshll.u32 %s12192_s29, 4  ;;  %s12193_s0 = smov [#allocation23]   ;;  %s1143_s26 = int_to_ptr.vmem [resolvable:$true] %s1142_s26 }
  0xa6   : > { %s1171_s7 = sshll.u32 %s12193_s0, 4  ;;  %s11549_s1 = scalar_lea.vmem %s1143_s26, 32  ;;  %s1172_s7 = int_to_ptr.vmem [resolvable:$true] %s1171_s7 }
  0xa7   : > { %p11550_p3 = scmp.ne.s32.totalorder %s1143_s26, %s11549_s1  ;;  %p11557_p7 = scmp.lt.s32.totalorder %s1143_s26, %s1143_s26 }
  0xa8   : > { %p11558_p8 = scmp.lt.s32.totalorder %s11549_s1, %s11549_s1 }
  0xa9   : > { %p11552_p2 = pnand %p11550_p3, %p12495_p13 }
  0xaa   : > { %11062 = dma.hbm_to_vmem [thread:$0]  (!%p12489_p12), %s13766_s9, 32, %s1114_s8, [#allocation18], %s13692_s11, %s13692_s11, %s12189_s2  }
  0xab   : > { %p11553_p4 = pneg %p11552_p2  ;;  %p11559_p11 = por %p11558_p8, %p11557_p7 }
  0xad   : > { %p11560_p0 = pnand %p11559_p11, %p11553_p4 }
  0xaf   : > { %11563 = shalt.err (!%p11560_p0)
}
  0xb0   : > { %s13767_s4 = sld [smem:[#allocation73_spill]]  ;;  %s11575_s8 = scalar_lea.vmem %s1172_s7, 32 }
  0xb1   : > { %p11576_p6 = scmp.ne.s32.totalorder %s1172_s7, %s11575_s8  ;;  %p11583_p5 = scmp.lt.s32.totalorder %s1172_s7, %s1172_s7 }
  0xb2   : > { %p11584_p3 = scmp.lt.s32.totalorder %s11575_s8, %s11575_s8 }
  0xb3   : > { %p11578_p9 = pnand %p11576_p6, %p12495_p13 }
  0xb4   : > { %p11585_p2 = por %p11584_p3, %p11583_p5 }
  0xb5   : > { %p11579_p1 = pneg %p11578_p9 }
  0xb6   : > { %11068 = dma.hbm_to_vmem [thread:$0]  (!%p12489_p12), %s13767_s4, 32, %s1143_s26, [#allocation21], %s13692_s11, %s13692_s11, %s12189_s2  }
  0xb7   : > { %p11586_p7 = pnand %p11585_p2, %p11579_p1 }
  0xb9   : > { %11589 = shalt.err (!%p11586_p7)
}
  0xba   : > { %11074 = dma.hbm_to_vmem [thread:$0]  (!%p12489_p12), %s12355_s25, 32, %s1172_s7, [#allocation24], %s13692_s11, %s13692_s11, %s12189_s2  }
  0xbb   : > { %s12194_s16 = smov [#allocation26]   ;;  %s12195_s26 = smov [#allocation29]  }
  0xbc   : > { %s1200_s29 = sshll.u32 %s12194_s16, 4  ;;  %s1229_s0 = sshll.u32 %s12195_s26, 4  ;;  %s1201_s29 = int_to_ptr.vmem [resolvable:$true] %s1200_s29  ;;  %s1230_s0 = int_to_ptr.vmem [resolvable:$true] %s1229_s0 }
  0xbd   : > { %s11601_s1 = scalar_lea.vmem %s1201_s29, 32  ;;  %p11609_p0 = scmp.lt.s32.totalorder %s1201_s29, %s1201_s29 }
  0xbe   : > { %p11602_p4 = scmp.ne.s32.totalorder %s1201_s29, %s11601_s1  ;;  %p11610_p6 = scmp.lt.s32.totalorder %s11601_s1, %s11601_s1 }
  0xc0   : > { %p11604_p8 = pnand %p11602_p4, %p12495_p13  ;;  %p11611_p9 = por %p11610_p6, %p11609_p0 }
  0xc2   : > { %p11605_p11 = pneg %p11604_p8 }
  0xc4   : > { %p11612_p1 = pnand %p11611_p9, %p11605_p11 }
  0xc6   : > { %11615 = shalt.err (!%p11612_p1)
}
  0xc7   : > { %11080 = dma.hbm_to_vmem [thread:$0]  (!%p12489_p12), %s12370_s20, 32, %s1201_s29, [#allocation27], %s13692_s11, %s13692_s11, %s12189_s2  }
  0xc8   : > { %s11627_s7 = scalar_lea.vmem %s1230_s0, 32  ;;  %p11635_p7 = scmp.lt.s32.totalorder %s1230_s0, %s1230_s0 }
  0xc9   : > { %p11628_p5 = scmp.ne.s32.totalorder %s1230_s0, %s11627_s7  ;;  %p11636_p4 = scmp.lt.s32.totalorder %s11627_s7, %s11627_s7 }
  0xcb   : > { %p11630_p3 = pnand %p11628_p5, %p12495_p13  ;;  %p11637_p8 = por %p11636_p4, %p11635_p7 }
  0xcd   : > { %p11631_p2 = pneg %p11630_p3 }
  0xcf   : > { %p11638_p0 = pnand %p11637_p8, %p11631_p2 }
  0xd1   : > { %11641 = shalt.err (!%p11638_p0)
}
  0xd2   : > { %s13768_s13 = sld [smem:[#allocation80_spill]]  ;;  %s12196_s8 = smov [#allocation32]  }
  0xd3   : > { %s1258_s16 = sshll.u32 %s12196_s8, 4  ;;  %s12197_s29 = smov [#allocation35]   ;;  %s1259_s16 = int_to_ptr.vmem [resolvable:$true] %s1258_s16 }
  0xd4   : > { %s1285_s26 = sshll.u32 %s12197_s29, 4  ;;  %s11653_s1 = scalar_lea.vmem %s1259_s16, 32  ;;  %s1286_s26 = int_to_ptr.vmem [resolvable:$true] %s1285_s26 }
  0xd5   : > { %p11654_p11 = scmp.ne.s32.totalorder %s1259_s16, %s11653_s1  ;;  %p11661_p1 = scmp.lt.s32.totalorder %s1259_s16, %s1259_s16 }
  0xd6   : > { %p11662_p5 = scmp.lt.s32.totalorder %s11653_s1, %s11653_s1 }
  0xd7   : > { %p11656_p6 = pnand %p11654_p11, %p12495_p13 }
  0xd8   : > { %11086 = dma.hbm_to_vmem [thread:$0]  (!%p12489_p12), %s13768_s13, 32, %s1230_s0, [#allocation30], %s13692_s11, %s13692_s11, %s12189_s2  }
  0xd9   : > { %p11657_p9 = pneg %p11656_p6  ;;  %p11663_p3 = por %p11662_p5, %p11661_p1 }
  0xdb   : > { %p11664_p2 = pnand %p11663_p3, %p11657_p9 }
  0xdd   : > { %11667 = shalt.err (!%p11664_p2)
}
  0xde   : > { %11092 = dma.hbm_to_vmem [thread:$0]  (!%p12489_p12), %s12400_s17, 32, %s1259_s16, [#allocation33], %s13692_s11, %s13692_s11, %s12189_s2  }
  0xdf   : > { %s11679_s0 = scalar_lea.vmem %s1286_s26, 16  ;;  %s11686_s7 = scalar_lea.vmem %s1286_s26, 32 }
  0xe0   : > { %p11680_p7 = scmp.ne.s32.totalorder %s1286_s26, %s11679_s0  ;;  %p11687_p0 = scmp.lt.s32.totalorder %s1286_s26, %s1286_s26 }
  0xe1   : > { %p11688_p11 = scmp.lt.s32.totalorder %s11686_s7, %s11679_s0 }
  0xe2   : > { %p11682_p4 = pnand %p11680_p7, %p12495_p13 }
  0xe3   : > { %p11689_p6 = por %p11688_p11, %p11687_p0 }
  0xe4   : > { %p11683_p8 = pneg %p11682_p4 }
  0xe6   : > { %p11690_p9 = pnand %p11689_p6, %p11683_p8 }
  0xe8   : > { %11693 = shalt.err (!%p11690_p9)
}
  0xe9   : > { %s13769_s14 = sld [smem:[#allocation84_spill]]  ;;  %s12198_s8 = smov [#allocation2]  }
  0xea   : > { %s983_s29 = sshll.u32 %s12198_s8, 4  ;;  %s12199_s16 = smov [#allocation7]   ;;  %s984_s29 = int_to_ptr.vmem [resolvable:$true] %s983_s29 }
  0xeb   : > { %s1012_s1 = sshll.u32 %s12199_s16, 4  ;;  %s11705_s11 = scalar_lea.vmem %s984_s29, 32  ;;  %s1013_s1 = int_to_ptr.vmem [resolvable:$true] %s1012_s1 }
  0xec   : > { %p11706_p1 = scmp.ne.s32.totalorder %s984_s29, %s11705_s11  ;;  %p11713_p2 = scmp.lt.s32.totalorder %s984_s29, %s984_s29 }
  0xed   : > { %p11714_p7 = scmp.lt.s32.totalorder %s11705_s11, %s11705_s11 }
  0xee   : > { %p11708_p5 = pnand %p11706_p1, %p12495_p13 }
  0xef   : > { %11098 = dma.hbm_to_vmem [thread:$0]  (!%p12489_p12), %s13769_s14, 16, %s1286_s26, [#allocation36]  }
  0xf0   : > { %p11709_p3 = pneg %p11708_p5  ;;  %p11715_p4 = por %p11714_p7, %p11713_p2 }
  0xf2   : > { %p11716_p8 = pnand %p11715_p4, %p11709_p3 }
  0xf4   : > { %11719 = shalt.err (!%p11716_p8)
}
  0xf5   : > { %s13770_s0 = smov 16   ;;  %s11731_s26 = scalar_lea.vmem %s1013_s1, 32 }
  0xf6   : > { %11035 = dma.hbm_to_vmem [thread:$0]  (!%p12489_p12), %s12255_s21, 32, %s984_s29, [#allocation3], %s13770_s0, %s13770_s0, %s12189_s2  }
  0xf7   : > { %p11732_p0 = scmp.ne.s32.totalorder %s1013_s1, %s11731_s26  ;;  %p11739_p9 = scmp.lt.s32.totalorder %s1013_s1, %s1013_s1 }
  0xf8   : > { %p11740_p1 = scmp.lt.s32.totalorder %s11731_s26, %s11731_s26 }
  0xf9   : > { %p11734_p11 = pnand %p11732_p0, %p12495_p13 }
  0xfa   : > { %p11741_p5 = por %p11740_p1, %p11739_p9 }
  0xfb   : > { %p11735_p6 = pneg %p11734_p11 }
  0xfd   : > { %p11742_p2 = pnand %p11741_p5, %p11735_p6 }
  0xff   : > { %11745 = shalt.err (!%p11742_p2)
}
 0x100   : > { %s13771_s3 = sld [smem:[#allocation61_spill]]  ;;  %s12200_s11 = smov [#allocation10]  }
 0x101   : > { %s1041_s7 = sshll.u32 %s12200_s11, 4  ;;  %s12201_s8 = smov [#allocation13]   ;;  %s1042_s7 = int_to_ptr.vmem [resolvable:$true] %s1041_s7 }
 0x102   : > { %s1070_s29 = sshll.u32 %s12201_s8, 4  ;;  %s11757_s16 = scalar_lea.vmem %s1042_s7, 32  ;;  %s1071_s29 = int_to_ptr.vmem [resolvable:$true] %s1070_s29 }
 0x103   : > { %p11758_p3 = scmp.ne.s32.totalorder %s1042_s7, %s11757_s16  ;;  %p11765_p8 = scmp.lt.s32.totalorder %s1042_s7, %s1042_s7 }
 0x104   : > { %p11766_p0 = scmp.lt.s32.totalorder %s11757_s16, %s11757_s16 }
 0x105   : > { %p11760_p7 = pnand %p11758_p3, %p12495_p13 }
 0x106   : > { %11041 = dma.hbm_to_vmem [thread:$0]  (!%p12489_p12), %s13771_s3, 32, %s1013_s1, [#allocation6], %s13770_s0, %s13770_s0, %s12189_s2  }
 0x107   : > { %p11761_p4 = pneg %p11760_p7  ;;  %p11767_p11 = por %p11766_p0, %p11765_p8 }
 0x109   : > { %p11768_p6 = pnand %p11767_p11, %p11761_p4 }
 0x10b   : > { %11771 = shalt.err (!%p11768_p6)
}
 0x10c   : > { %11047 = dma.hbm_to_vmem [thread:$0]  (!%p12489_p12), %s12285_s19, 32, %s1042_s7, [#allocation9], %s13770_s0, %s13770_s0, %s12189_s2  }
 0x10d   : > { %s11783_s1 = scalar_lea.vmem %s1071_s29, 32  ;;  %p11791_p2 = scmp.lt.s32.totalorder %s1071_s29, %s1071_s29 }
 0x10e   : > { %p11784_p9 = scmp.ne.s32.totalorder %s1071_s29, %s11783_s1  ;;  %p11792_p3 = scmp.lt.s32.totalorder %s11783_s1, %s11783_s1 }
 0x110   : > { %p11786_p1 = pnand %p11784_p9, %p12495_p13  ;;  %p11793_p7 = por %p11792_p3, %p11791_p2 }
 0x112   : > { %p11787_p5 = pneg %p11786_p1 }
 0x114   : > { %p11794_p8 = pnand %p11793_p7, %p11787_p5 }
 0x116   : > { %11797 = shalt.err (!%p11794_p8)
}
 0x117   : > { %s13772_s26 = sld [smem:[#allocation65_spill]]  ;;  %s12202_s11 = smov [#allocation16]  }
 0x118   : > { %s1100_s7 = sshll.u32 %s12202_s11, 4  ;;  %s12203_s8 = smov [#allocation19]   ;;  %s1101_s7 = int_to_ptr.vmem [resolvable:$true] %s1100_s7 }
 0x119   : > { %s1129_s16 = sshll.u32 %s12203_s8, 4  ;;  %s11809_s3 = scalar_lea.vmem %s1101_s7, 16  ;;  %s1130_s16 = int_to_ptr.vmem [resolvable:$true] %s1129_s16 }
 0x11a   : > { %p11810_p4 = scmp.ne.s32.totalorder %s1101_s7, %s11809_s3  ;;  %s11816_s1 = scalar_lea.vmem %s1101_s7, 32 }
 0x11b   : > { %p11817_p6 = scmp.lt.s32.totalorder %s1101_s7, %s1101_s7  ;;  %p11818_p9 = scmp.lt.s32.totalorder %s11816_s1, %s11809_s3 }
 0x11c   : > { %p11812_p0 = pnand %p11810_p4, %p12495_p13 }
 0x11d   : > { %11053 = dma.hbm_to_vmem [thread:$0]  (!%p12489_p12), %s13772_s26, 32, %s1071_s29, [#allocation12], %s13770_s0, %s13770_s0, %s12189_s2  }
 0x11e   : > { %p11813_p11 = pneg %p11812_p0  ;;  %p11819_p1 = por %p11818_p9, %p11817_p6 }
 0x120   : > { %p11820_p5 = pnand %p11819_p1, %p11813_p11 }
 0x122   : > { %11823 = shalt.err (!%p11820_p5)
}
 0x123   : > { %s13773_s4 = sld [smem:[#allocation68_spill]]  ;;  %s11835_s29 = scalar_lea.vmem %s1130_s16, 32 }
 0x124   : > { %p11836_p2 = scmp.ne.s32.totalorder %s1130_s16, %s11835_s29  ;;  %p11843_p8 = scmp.lt.s32.totalorder %s1130_s16, %s1130_s16 }
 0x125   : > { %p11844_p4 = scmp.lt.s32.totalorder %s11835_s29, %s11835_s29 }
 0x126   : > { %p11838_p3 = pnand %p11836_p2, %p12495_p13 }
 0x127   : > { %p11845_p0 = por %p11844_p4, %p11843_p8 }
 0x128   : > { %p11839_p7 = pneg %p11838_p3 }
 0x129   : > { %11059 = dma.hbm_to_vmem [thread:$0]  (!%p12489_p12), %s13773_s4, 16, %s1101_s7, [#allocation15]  }
 0x12a   : > { %p11846_p10 = pnand %p11845_p0, %p11839_p7 }
 0x12c   : > { %11849 = shalt.err (!%p11846_p10)
}
 0x12d   : > { %s13774_s3 = sld [smem:[#allocation72_spill]]  ;;  %s12204_s4 = smov [#allocation22]  }
 0x12e   : > { %s1155_s26 = sshll.u32 %s12204_s4, 4  ;;  %s12205_s11 = smov [#allocation25]   ;;  %s1156_s26 = int_to_ptr.vmem [resolvable:$true] %s1155_s26 }
 0x12f   : > { %s1187_s7 = sshll.u32 %s12205_s11, 4  ;;  %s11861_s8 = scalar_lea.vmem %s1156_s26, 32  ;;  %s1188_s7 = int_to_ptr.vmem [resolvable:$true] %s1187_s7 }
 0x130   : > { %p11862_p11 = scmp.ne.s32.totalorder %s1156_s26, %s11861_s8  ;;  %p11869_p1 = scmp.lt.s32.totalorder %s1156_s26, %s1156_s26 }
 0x131   : > { %p11870_p10 = scmp.lt.s32.totalorder %s11861_s8, %s11861_s8 }
 0x132   : > { %p11864_p6 = pnand %p11862_p11, %p12495_p13 }
 0x133   : > { %11065 = dma.hbm_to_vmem [thread:$0]  (!%p12489_p12), %s13774_s3, 32, %s1130_s16, [#allocation18], %s13770_s0, %s13770_s0, %s12189_s2  }
 0x134   : > { %p11865_p9 = pneg %p11864_p6  ;;  %p11871_p5 = por %p11870_p10, %p11869_p1 }
 0x136   : > { %p11872_p2 = pnand %p11871_p5, %p11865_p9 }
 0x138   : > { %11875 = shalt.err (!%p11872_p2)
}
 0x139   : > { %s13775_s16 = sld [smem:[#allocation74_spill]]  ;;  %s11887_s1 = scalar_lea.vmem %s1188_s7, 32 }
 0x13a   : > { %p11888_p3 = scmp.ne.s32.totalorder %s1188_s7, %s11887_s1  ;;  %p11895_p4 = scmp.lt.s32.totalorder %s1188_s7, %s1188_s7 }
 0x13b   : > { %p11896_p0 = scmp.lt.s32.totalorder %s11887_s1, %s11887_s1 }
 0x13c   : > { %p11890_p7 = pnand %p11888_p3, %p12495_p13 }
 0x13d   : > { %p11897_p11 = por %p11896_p0, %p11895_p4 }
 0x13e   : > { %p11891_p8 = pneg %p11890_p7 }
 0x13f   : > { %11071 = dma.hbm_to_vmem [thread:$0]  (!%p12489_p12), %s13775_s16, 32, %s1156_s26, [#allocation21], %s13770_s0, %s13770_s0, %s12189_s2  }
 0x140   : > { %p11898_p6 = pnand %p11897_p11, %p11891_p8 }
 0x142   : > { %11901 = shalt.err (!%p11898_p6)
}
 0x143   : > { %s13776_s29 = sld [smem:[#allocation77_spill]]  ;;  %s12206_s3 = smov [#allocation28]  }
 0x144   : > { %s1213_s4 = sshll.u32 %s12206_s3, 4  ;;  %s12207_s26 = smov [#allocation31]   ;;  %s1214_s4 = int_to_ptr.vmem [resolvable:$true] %s1213_s4 }
 0x145   : > { %s1245_s11 = sshll.u32 %s12207_s26, 4  ;;  %s11913_s8 = scalar_lea.vmem %s1214_s4, 32  ;;  %s1246_s11 = int_to_ptr.vmem [resolvable:$true] %s1245_s11 }
 0x146   : > { %p11914_p9 = scmp.ne.s32.totalorder %s1214_s4, %s11913_s8  ;;  %p11921_p5 = scmp.lt.s32.totalorder %s1214_s4, %s1214_s4 }
 0x147   : > { %p11922_p2 = scmp.lt.s32.totalorder %s11913_s8, %s11913_s8 }
 0x148   : > { %p11916_p1 = pnand %p11914_p9, %p12495_p13 }
 0x149   : > { %11077 = dma.hbm_to_vmem [thread:$0]  (!%p12489_p12), %s13776_s29, 32, %s1188_s7, [#allocation24], %s13770_s0, %s13770_s0, %s12189_s2  }
 0x14a   : > { %p11917_p10 = pneg %p11916_p1  ;;  %p11923_p3 = por %p11922_p2, %p11921_p5 }
 0x14c   : > { %p11924_p7 = pnand %p11923_p3, %p11917_p10 }
 0x14e   : > { %11927 = shalt.err (!%p11924_p7)
}
 0x14f   : > { %s13777_s7 = sld [smem:[#allocation78_spill]]  ;;  %s11939_s16 = scalar_lea.vmem %s1246_s11, 32 }
 0x150   : > { %p11940_p8 = scmp.ne.s32.totalorder %s1246_s11, %s11939_s16  ;;  %p11947_p11 = scmp.lt.s32.totalorder %s1246_s11, %s1246_s11 }
 0x151   : > { %p11948_p6 = scmp.lt.s32.totalorder %s11939_s16, %s11939_s16 }
 0x152   : > { %p11942_p4 = pnand %p11940_p8, %p12495_p13 }
 0x153   : > { %p11949_p9 = por %p11948_p6, %p11947_p11 }
 0x154   : > { %p11943_p0 = pneg %p11942_p4 }
 0x155   : > { %11083 = dma.hbm_to_vmem [thread:$0]  (!%p12489_p12), %s13777_s7, 32, %s1214_s4, [#allocation27], %s13770_s0, %s13770_s0, %s12189_s2  }
 0x156   : > { %p11950_p1 = pnand %p11949_p9, %p11943_p0 }
 0x158   : > { %11953 = shalt.err (!%p11950_p1)
}
 0x159   : > { %s13778_s1 = sld [smem:[#allocation82_spill]]  ;;  %s12208_s29 = smov [#allocation34]  }
 0x15a   : > { %s1271_s3 = sshll.u32 %s12208_s29, 4  ;;  %s12209_s4 = smov [#allocation37]   ;;  %s1272_s3 = int_to_ptr.vmem [resolvable:$true] %s1271_s3 }
 0x15b   : > { %s1296_s26 = sshll.u32 %s12209_s4, 4  ;;  %s11965_s8 = scalar_lea.vmem %s1272_s3, 32  ;;  %s1297_s26 = int_to_ptr.vmem [resolvable:$true] %s1296_s26 }
 0x15c   : > { %p11966_p10 = scmp.ne.s32.totalorder %s1272_s3, %s11965_s8  ;;  %p11973_p3 = scmp.lt.s32.totalorder %s1272_s3, %s1272_s3 }
 0x15d   : > { %p11974_p7 = scmp.lt.s32.totalorder %s11965_s8, %s11965_s8 }
 0x15e   : > { %p11968_p5 = pnand %p11966_p10, %p12495_p13 }
 0x15f   : > { %11089 = dma.hbm_to_vmem [thread:$0]  (!%p12489_p12), %s13778_s1, 32, %s1246_s11, [#allocation30], %s13770_s0, %s13770_s0, %s12189_s2  }
 0x160   : > { %p11969_p2 = pneg %p11968_p5  ;;  %p11975_p8 = por %p11974_p7, %p11973_p3 }
 0x162   : > { %p11976_p4 = pnand %p11975_p8, %p11969_p2 }
 0x164   : > { %11979 = shalt.err (!%p11976_p4)
}
 0x165   : > { %s13779_s11 = sld [smem:[#allocation83_spill]]  ;;  %s11991_s7 = scalar_lea.vmem %s1297_s26, 16 }
 0x166   : > { %p11992_p0 = scmp.ne.s32.totalorder %s1297_s26, %s11991_s7  ;;  %s11998_s16 = scalar_lea.vmem %s1297_s26, 32 }
 0x167   : > { %p11999_p9 = scmp.lt.s32.totalorder %s1297_s26, %s1297_s26  ;;  %p12000_p1 = scmp.lt.s32.totalorder %s11998_s16, %s11991_s7 }
 0x168   : > { %p11994_p11 = pnand %p11992_p0, %p12495_p13 }
 0x169   : > { %p12001_p10 = por %p12000_p1, %p11999_p9 }
 0x16a   : > { %p11995_p6 = pneg %p11994_p11 }
 0x16b   : > { %11095 = dma.hbm_to_vmem [thread:$0]  (!%p12489_p12), %s13779_s11, 32, %s1272_s3, [#allocation33], %s13770_s0, %s13770_s0, %s12189_s2  }
 0x16c   : > { %p12002_p5 = pnand %p12001_p10, %p11995_p6 }
 0x16e   : > { %12005 = shalt.err (!%p12002_p5)
}
 0x16f   : > { %s13780_s5 = sld [smem:[#allocation85_spill]]  ;;  %s12210_s1 = smov [#allocation38]  }
 0x170   : > { %s1310_s29 = sshll.u32 %s12210_s1, 4  ;;  %s1311_s29 = int_to_ptr.vmem [resolvable:$true] %s1310_s29 }
 0x171   : > { %s12017_s2 = scalar_lea.vmem %s1311_s29, 16  ;;  %s12024_s0 = scalar_lea.vmem %s1311_s29, 32 }
 0x172   : > { %p12018_p2 = scmp.ne.s32.totalorder %s1311_s29, %s12017_s2  ;;  %p12025_p8 = scmp.lt.s32.totalorder %s1311_s29, %s1311_s29 }
 0x173   : > { %p12026_p4 = scmp.lt.s32.totalorder %s12024_s0, %s12017_s2 }
 0x174   : > { %p12020_p3 = pnand %p12018_p2, %p12495_p13 }
 0x175   : > { %11101 = dma.hbm_to_vmem [thread:$0]  (!%p12489_p12), %s13780_s5, 16, %s1297_s26, [#allocation36]  }
 0x176   : > { %p12021_p7 = pneg %p12020_p3  ;;  %p12027_p0 = por %p12026_p4, %p12025_p8 }
 0x178   : > { %p12028_p11 = pnand %p12027_p0, %p12021_p7 }
 0x17a   : > { %12031 = shalt.err (!%p12028_p11)
}
 0x17b   : > { %11104 = dma.hbm_to_vmem [thread:$0]  (!%p12489_p12), %s12425_s24, 16, %s1311_s29, [#allocation39]  }
 0x17c   : > { %p13781_p6 = scmp.ne.s32.totalorder %s13760_s18, 0 }
 0x17d   : > { %p13782_p9 = scmp.eq.s32.totalorder (!%p13781_p6), %s12453_s28, 0 }
 0x17e   : > { %1337 = sbr.rel (%p13781_p6) target bundleno = 21744 (0x54f0), region = 176 }
 0x183   : > { %12075 = dma.done.wait (%p13782_p9), [#allocation3], 32   ;;  %p13783_p1 = pmov %p13782_p9 }
 0x185   : > { %12077 = vsyncadd (%p13783_p1), [#allocation3], 4294967264  ;;  %p13784_p13 = pmov %p13783_p1 }
 0x186   : > { %p13785_p10 = pmov %p13783_p1 }
 0x187   : > { %12079 = dma.done.wait (%p13784_p13), [#allocation6], 64  }
 0x188   : > { %12081 = vsyncadd (%p13785_p10), [#allocation6], 4294967232  ;;  %p13786_p5 = pmov %p13783_p1 }
 0x189   : > { %p13787_p12 = pmov %p13783_p1 }
 0x18a   : > { %12083 = dma.done.wait (%p13786_p5), [#allocation9], 64  }
 0x18b   : > { %12085 = vsyncadd (%p13787_p12), [#allocation9], 4294967232  ;;  %p13788_p2 = pmov %p13783_p1 }
 0x18c   : > { %p13789_p3 = pmov %p13783_p1 }
 0x18d   : > { %12087 = dma.done.wait (%p13788_p2), [#allocation12], 64  }
 0x18e   : > { %12089 = vsyncadd (%p13789_p3), [#allocation12], 4294967232  ;;  %p13790_p7 = pmov %p13783_p1 }
 0x18f   : > { %p13791_p8 = pmov %p13783_p1 }
 0x190   : > { %12091 = dma.done.wait (%p13790_p7), [#allocation15], 48  }
 0x191   : > { %12093 = vsyncadd (%p13791_p8), [#allocation15], 4294967248  ;;  %p13792_p4 = pmov %p13783_p1 }
 0x192   : > { %p13793_p0 = pmov %p13783_p1 }
 0x193   : > { %12095 = dma.done.wait (%p13792_p4), [#allocation18], 64  }
 0x194   : > { %12097 = vsyncadd (%p13793_p0), [#allocation18], 4294967232  ;;  %p13794_p11 = pmov %p13793_p0 }
 0x195   : > { %p13795_p6 = pmov %p13793_p0 }
 0x196   : > { %12099 = dma.done.wait (%p13794_p11), [#allocation21], 64  }
 0x197   : > { %12101 = vsyncadd (%p13795_p6), [#allocation21], 4294967232  ;;  %p13796_p9 = pmov %p13793_p0 }
 0x198   : > { %p13797_p1 = pmov %p13793_p0 }
 0x199   : > { %12103 = dma.done.wait (%p13796_p9), [#allocation24], 64  }
 0x19a   : > { %12105 = vsyncadd (%p13797_p1), [#allocation24], 4294967232  ;;  %p13798_p13 = pmov %p13793_p0 }
 0x19b   : > { %p13799_p10 = pmov %p13793_p0 }
 0x19c   : > { %12107 = dma.done.wait (%p13798_p13), [#allocation27], 64  }
 0x19d   : > { %12109 = vsyncadd (%p13799_p10), [#allocation27], 4294967232  ;;  %p13800_p5 = pmov %p13793_p0 }
 0x19e   : > { %p13801_p12 = pmov %p13793_p0 }
 0x19f   : > { %12111 = dma.done.wait (%p13800_p5), [#allocation30], 64  }
 0x1a0   : > { %12113 = vsyncadd (%p13801_p12), [#allocation30], 4294967232  ;;  %p13802_p2 = pmov %p13793_p0 }
 0x1a1   : > { %p13803_p3 = pmov %p13793_p0 }
 0x1a2   : > { %12115 = dma.done.wait (%p13802_p2), [#allocation33], 64  }
 0x1a3   : > { %12117 = vsyncadd (%p13803_p3), [#allocation33], 4294967232  ;;  %p13804_p7 = pmov %p13793_p0 }
 0x1a4   : > { %p13805_p8 = pmov %p13793_p0 }
 0x1a5   : > { %12119 = dma.done.wait (%p13804_p7), [#allocation36], 32  }
 0x1a6   : > { %12121 = vsyncadd (%p13805_p8), [#allocation36], 4294967264  ;;  %p13806_p4 = pmov %p13793_p0 }
 0x1a8   : > { %12123 = dma.done.wait (%p13806_p4), [#allocation39], 16  }
 0x1a9   : > { %12125 = vsyncadd (%p13793_p0), [#allocation39], 4294967280  ;;  %s13807_s22 = sld [smem:[#allocation55_spill]]  ;;  %p1528_p11 = scmp.lt.s32.totalorder %s12453_s28, 1  ;;  %v12211_v0 = vmov 0   ;;  %v12212_v1 = vmov 0.0   ;;  %v1553_v21 = vlaneseq }
 0x1aa   : > { %s13808_s18 = sld [smem:[#allocation57_spill]]  ;;  %11270 = vset.pattern.permute.xlu0 %v12211_v0  ;;  %10285 = vmatprep.subr.mxu0 %v12212_v1  ;;  %vm12213_vm0 = vmmov 0   ;;  %v12214_v24 = vmov 1.0   ;;  %vm1648_vm2 = vcmask 261120   ;;  %v9794_v30 = vld [vmem:[#allocation2] ss:$0 sm:$0xff] }
 0x1ab   : > { %s12736_s10 = scalar_select %p1528_p11, %s12453_s28, 1  ;;  %10320 = vmatprep.subr.mxu1 %v12212_v1  ;;  %11271 = vset.pattern.permute.xlu1 %v12211_v0  ;;  %v12783_v22 = vand.u32 127, %v1553_v21  ;;  %vm1725_vm3 = vcmask 64512   ;;  %vm2819_vm4 = vcmask 523264  }
 0x1ac   : > { %s13809_s4 = sld [smem:[#allocation58_spill]]  ;;  %10317 = vmatprep.mubr.msk.f32.mxu0 %vm12213_vm0, %v12212_v1  ;;  %10328 = vmatprep.mubr.msk.f32.mxu1 %vm12213_vm0, %v12212_v1  ;;  %s13716_s8 = smov 96  }
 0x1ad   : > { %s13695_s3 = sshll.u32 %s12736_s10, 3  ;;  %s13710_s11 = smov 64  }
 0x1ae   : > { %s13706_s7 = smov 120   ;;  %s13712_s16 = smov 80  }
 0x1af   : > { %s1531_s26 = scalar_lea.vmem %s13807_s22, %s13695_s3  ;;  %s13704_s1 = smov 112  }
 0x1b0   : > { %v1552_v2 = vld [vmem:[%s1531_s26] sm:$0xff]  ;;  %v1551_v3 = vld [vmem:[%s13808_s18 + $0x78] sm:$0xff]  ;;  %v1550_v4 = vld [vmem:[%s13808_s18 + $0x70] sm:$0xff]  ;;  %s13810_s29 = sld [smem:[#allocation59_spill]]  ;;  %s13708_s2 = smov 88  }
 0x1b1   : > { %1556 = vperm.xlu0 %11270, %v1552_v2   ;;  %10286 = vmatpush3.msra.mxu0 %v1551_v3  ;;  %v1549_v5 = vld [vmem:[%s13808_s18 + $0x68] sm:$0xff]  ;;  %v1548_v6 = vld [vmem:[%s13808_s18 + $0x60] sm:$0xff]  ;;  %v1547_v8 = vld [vmem:[%s13808_s18 + $0x58] sm:$0xff]  ;;  %s13714_s0 = smov 56   ;;  %s13702_s22 = smov 72  }
 0x1b2   : > { %10287 = vmatprep.subr.mxu0 %v12212_v1  ;;  %v1635_v7 = vld [vmem:[%s13809_s4 + $0x18] sm:$0xff]  ;;  %v1634_v9 = vld [vmem:[%s13809_s4 + $0x10] sm:$0xff]  ;;  %v1545_v11 = vld [vmem:[%s13808_s18 + $0x48] sm:$0xff]  ;;  %s13696_s26 = smov 104   ;;  %s13700_s3 = smov 48  }
 0x1b3   : > { %10288 = vmatpush3.msra.mxu0 %v1550_v4  ;;  %10321 = vmatpush3.msra.mxu1 %v1635_v7  ;;  %v1546_v10 = vld [vmem:[%s13808_s18 + $0x50] sm:$0xff]  ;;  %v1544_v12 = vld [vmem:[%s13808_s18 + $0x40] sm:$0xff]  ;;  %v1543_v13 = vld [vmem:[%s13808_s18 + $0x38] sm:$0xff]  ;;  %s13829_s5 = smov 120   ;;  %s13830_s9 = sld [smem:[#allocation75_spill]] }
 0x1b4   : > { %10289 = vmatprep.subr.mxu0 %v12212_v1  ;;  %10322 = vmatprep.subr.mxu1 %v12212_v1  ;;  %v1542_v14 = vld [vmem:[%s13808_s18 + $0x30] sm:$0xff]  ;;  %v1541_v15 = vld [vmem:[%s13808_s18 + $0x28] sm:$0xff]  ;;  %v1540_v16 = vld [vmem:[%s13808_s18 + $0x20] sm:$0xff]  ;;  %s13831_s12 = sld [smem:[#allocation67_spill]]  ;;  %p13835_p9 = scmp.ne.s32.totalorder %s13757_s15, 0 }
 0x1b5   : > { %10290 = vmatpush3.msra.mxu0 %v1549_v5  ;;  %10323 = vmatpush3.msra.mxu1 %v1634_v9  ;;  %v1539_v17 = vld [vmem:[%s13808_s18 + $0x18] sm:$0xff]  ;;  %v1538_v18 = vld [vmem:[%s13808_s18 + $0x10] sm:$0xff]  ;;  %v1537_v19 = vld [vmem:[%s13808_s18 + $0x8] sm:$0xff]  ;;  %s13833_s13 = sld [smem:[#allocation79_spill]] }
 0x1b6   : > { %10291 = vmatprep.subr.mxu0 %v12212_v1  ;;  %10324 = vmatprep.subr.mxu1 %v12212_v1  ;;  %v1536_v20 = vld [vmem:[%s13808_s18] sm:$0xff]  ;;  %v1633_v25 = vld [vmem:[%s13809_s4 + $0x8] sm:$0xff]  ;;  %s13834_s14 = sld [smem:[#allocation81_spill]] }
 0x1b7   : > { %10292 = vmatpush3.msra.mxu0 %v1548_v6  ;;  %10325 = vmatpush3.msra.mxu1 %v1633_v25  ;;  %v1632_v26 = vld [vmem:[%s13809_s4] sm:$0xff] }
 0x1b8   : > { %10293 = vmatprep.subr.mxu0 %v12212_v1  ;;  %10326 = vmatprep.subr.mxu1 %v12212_v1  ;;  %v1637_v53 = vld [vmem:[%s13810_s29] sm:$0xff] }
 0x1b9   : > { %10294 = vmatpush3.msra.mxu0 %v1547_v8  ;;  %10327 = vmatpush3.msra.mxu1 %v1632_v26 }
 0x1ba   : > { %10295 = vmatprep.subr.mxu0 %v12212_v1  ;;  %10331 = vmatprep.subr.mxu1 %v12212_v1 }
 0x1bb   : > { %10296 = vmatpush3.msra.mxu0 %v1546_v10 }
 0x1bc   : > { %10297 = vmatprep.subr.mxu0 %v12212_v1 }
 0x1bd   : > { %10298 = vmatpush3.msra.mxu0 %v1545_v11 }
 0x1be   : > { %10299 = vmatprep.subr.mxu0 %v12212_v1 }
 0x1bf   : > { %10300 = vmatpush3.msra.mxu0 %v1544_v12 }
 0x1c0   : > { %10301 = vmatprep.subr.mxu0 %v12212_v1 }
 0x1c1   : > { %10302 = vmatpush3.msra.mxu0 %v1543_v13 }
 0x1c2   : > { %10303 = vmatprep.subr.mxu0 %v12212_v1 }
 0x1c3   : > { %10304 = vmatpush3.msra.mxu0 %v1542_v14 }
 0x1c4   : > { %10305 = vmatprep.subr.mxu0 %v12212_v1 }
 0x1c5   : > { %10306 = vmatpush3.msra.mxu0 %v1541_v15 }
 0x1c6   : > { %10307 = vmatprep.subr.mxu0 %v12212_v1 }
 0x1c7   : > { %10308 = vmatpush3.msra.mxu0 %v1540_v16  ;;  %v1638_v16 = vld [vmem:[%s13810_s29 + $0x8] sm:$0xff] }
 0x1c8   : > { %10309 = vmatprep.subr.mxu0 %v12212_v1 }
 0x1c9   : > { %10310 = vmatpush3.msra.mxu0 %v1539_v17 }
 0x1ca   : > { %10311 = vmatprep.subr.mxu0 %v12212_v1 }
 0x1cb   : > { %10312 = vmatpush3.msra.mxu0 %v1538_v18 }
 0x1cc   : > { %10313 = vmatprep.subr.mxu0 %v12212_v1 }
 0x1cd   : > { %10314 = vmatpush3.msra.mxu0 %v1537_v19 }
 0x1ce   : > { %10315 = vmatprep.subr.mxu0 %v12212_v1 }
 0x1cf   : > { %10316 = vmatpush3.msra.mxu0 %v1536_v20 }
 0x1d0   : > { %10361 = vmatprep.subr.mxu0 %v12212_v1 }
 0x22c   : > { %v1557_v23 = vpop.permute.xlu0 %1556 }
 0x22d   : > { %vm1558_vm1 = vcmp.eq.s32.totalorder %v12783_v22, %v1557_v23 }
 0x22e   : > { %10318 = vmatmul.mubr.msk.f32.vlgmr.msra.gmra.mxu0 %vm1558_vm1, %v12214_v24 }
 0x22f   : > { %10363 = vmatprep.mubr.msk.f32.mxu0 %vm12213_vm0, %v12212_v1 }
 0x2ee   : > { %v1627_v27 = vpop.f32.mrf.mxu0 }
 0x2ef   : > { %v12793_v28 = vmul.f32 5.656854, %v1627_v27  ;;  %v1639_v27 = vld [vmem:[%s13810_s29 + $0x10] sm:$0xff] }
 0x2f0   : > { %v10319_v29 = vpop.f32.mrf.mxu0 }
 0x2f1   : > { %10329 = vmatmul.mubr.msk.f32.vlgmr.msra.gmra.mxu1 %vm1648_vm2, %v12793_v28  ;;  %v9800_v29 = vld [vmem:[#allocation5] ss:$0 sm:$0xff] }
 0x2f2   : > { %10333 = vmatprep.mubr.msk.f32.mxu1 %vm12213_vm0, %v12212_v1 }
 0x3b1   : > { %v1718_v31 = vpop.f32.mrf.mxu1 }
 0x3b2   : > { %v12799_v32 = vadd.f32 %v9794_v30, %v1718_v31 }
 0x3b3   : > { %v10330_v33 = vpop.f32.mrf.mxu1 }
 0x3b4   : > { %1723 = vrot.lane.b32.xlu0 %v12799_v32, %s13716_s8 }
 0x3b8   : > { %1812 = vrot.lane.b32.xlu0 %v12799_v32, %s13710_s11 }
 0x3bc   : > { %1968 = vrot.lane.b32.xlu0 %v12799_v32, %s13706_s7 }
 0x3c0   : > { %2210 = vrot.lane.b32.xlu0 %v12799_v32, %s13712_s16 }
 0x3c4   : > { %2208 = vrot.lane.b32.xlu0 %v12799_v32, %s13704_s1 }
 0x426   : > { %v1724_v34 = vpop.permute.xlu0 %1723 }
 0x427   : > { %10332 = vmatpush3.xpose.msk.msra.mxu1 %vm1725_vm3, %v1724_v34 }
 0x428   : > { %10336 = vmatprep.subr.mxu1 %v12212_v1 }
 0x42a   : > { %10334 = vmatmul.mubr.msk.f32.vlgmr.msra.gmra.mxu1 %vm1725_vm3, %v12799_v32  ;;  %v1813_v35 = vpop.permute.xlu0 %1812 }
 0x42b   : > { %10337 = vmatpush3.msra.mxu1 %v1813_v35  ;;  %10338 = vmatprep.mubr.msk.f32.mxu1 %vm12213_vm0, %v12212_v1 }
 0x42c   : > { %10341 = vmatprep.subr.mxu1 %v12212_v1 }
 0x42e   : > { %v1969_v36 = vpop.permute.xlu0 %1968 }
 0x432   : > { %v2211_v37 = vpop.permute.xlu0 %2210 }
 0x433   : > { %10362 = vmatpush3.xpose.msk.msra.mxu0 %vm1725_vm3, %v2211_v37 }
 0x434   : > { %10371 = vmatprep.subr.mxu0 %v12212_v1 }
 0x436   : > { %v2209_v38 = vpop.permute.xlu0 %2208 }
 0x437   : > { %10364 = vmatmul.mubr.msk.f32.vlgmr.msra.gmra.mxu0 %vm1725_vm3, %v2209_v38 }
 0x438   : > { %10373 = vmatprep.mubr.msk.f32.mxu0 %vm12213_vm0, %v12212_v1  ;;  %10372 = vmatpush3.msra.mxu0 %v1639_v27 }
 0x439   : > { %10381 = vmatprep.subr.mxu0 %v12212_v1 }
 0x4ea   : > { %v1796_v39 = vpop.f32.mrf.mxu1 }
 0x4eb   : > { %v1800_v40 = vmul.f32 0.35355338, %v1796_v39 }
 0x4ec   : > { %v10335_v41 = vpop.f32.mrf.mxu1 }
 0x4ed   : > { %v1801_v42 = vsel %vm1725_vm3, %v1800_v40, -inf }
 0x4ee   : > { %1802 = vmax.xlane.f32.xlu1 %v1801_v42 }
 0x4f7   : > { %v2282_v43 = vpop.f32.mrf.mxu0 }
 0x4f8   : > { %v2286_v5 = vmul.f32 0.35355338, %v2282_v43 }
 0x4f9   : > { %v10365_v44 = vpop.f32.mrf.mxu0 }
 0x4fa   : > { %v2287_v7 = vsel %vm1725_vm3, %v2286_v5, -inf }
 0x577   : > { %v1803_v45 = vpop.xlane.xlu1 %1802 }
 0x578   : > { %v1804_v46 = vsub.f32 %v1800_v40, %v1803_v45 }
 0x57a   : > { %v1805_v47 = vmul.f32 1.442695, %v1804_v46 }
 0x57c   : > { %11272 = vpow2.f32 %v1805_v47  ;;  %v1640_v47 = vld [vmem:[%s13810_s29 + $0x18] sm:$0xff] }
 0x589   : > { %v11273_v48 = vpop.eup %11272 }
 0x58a   : > { %v1807_v49 = vsel %vm1725_vm3, %v11273_v48, 0.0 }
 0x58b   : > { %1808 = vadd.xlane.f32.xlu1 %v1807_v49 }
 0x59c   : > { %1970 = vrot.lane.b32.xlu1 %v12799_v32, %s13708_s2 }
 0x614   : > { %v1809_v50 = vpop.xlane.xlu1 %1808 }
 0x615   : > { %11274 = vrcp.f32 %v1809_v50 }
 0x618   : > { %v1971_v55 = vpop.permute.xlu1 %1970 }
 0x622   : > { %v11275_v51 = vpop.eup %11274 }
 0x623   : > { %v1811_v52 = vmul.f32 %v11275_v51, %v11273_v48 }
 0x625   : > { %10339 = vmatmul.mubr.msk.f32.vlgmr.msra.gmra.mxu1 %vm1725_vm3, %v1811_v52 }
 0x626   : > { %10342 = vmatpush3.msra.mxu1 %v1637_v53  ;;  %10343 = vmatprep.mubr.msk.f32.mxu1 %vm12213_vm0, %v12212_v1 }
 0x627   : > { %10346 = vmatprep.subr.mxu1 %v12212_v1 }
 0x6e5   : > { %v1884_v54 = vpop.f32.mrf.mxu1 }
 0x6e6   : > { %10344 = vmatmul.mubr.msk.f32.vlgmr.msra.gmra.mxu1 %vm1725_vm3, %v1884_v54 }
 0x6e7   : > { %10347 = vmatpush3.xpose.msk.msra.mxu1 %vm1725_vm3, %v1971_v55  ;;  %v10340_v56 = vpop.f32.mrf.mxu1  ;;  %10348 = vmatprep.mubr.msk.f32.mxu1 %vm12213_vm0, %v12212_v1 }
 0x6e8   : > { %10351 = vmatprep.subr.mxu1 %v12212_v1 }
 0x6ea   : > { %10349 = vmatmul.mubr.msk.f32.vlgmr.msra.gmra.mxu1 %vm1725_vm3, %v1969_v36 }
 0x6eb   : > { %10353 = vmatprep.mubr.msk.f32.mxu1 %vm12213_vm0, %v12212_v1 }
 0x7a6   : > { %v12840_v57 = vpop.f32.mrf.mxu1 }
 0x7a7   : > { %v1967_v30 = vadd.f32 %v9800_v29, %v12840_v57 }
 0x7a8   : > { %v10345_v58 = vpop.f32.mrf.mxu1 }
 0x7aa   : > { %v2042_v59 = vpop.f32.mrf.mxu1 }
 0x7ab   : > { %v2046_v60 = vmul.f32 0.35355338, %v2042_v59 }
 0x7ac   : > { %v10350_v61 = vpop.f32.mrf.mxu1 }
 0x7ad   : > { %v2047_v62 = vsel %vm1725_vm3, %v2046_v60, -inf }
 0x7ae   : > { %2048 = vmax.xlane.f32.xlu0 %v2047_v62 }
 0x7c4   : > { %2058 = vrot.lane.b32.xlu0 %v12799_v32, %s13714_s0 }
 0x7c8   : > { %2450 = vrot.lane.b32.xlu0 %v12799_v32, %s13702_s22  ;;  %s13813_s22 = sld [smem:[#allocation64_spill]] }
 0x7cc   : > { %2448 = vrot.lane.b32.xlu0 %v12799_v32, %s13696_s26  ;;  %s13698_s26 = smov 40  }
 0x7ce   : > { %s13814_s1 = smov %s13813_s22 }
 0x837   : > { %v2049_v63 = vpop.xlane.xlu0 %2048 }
 0x838   : > { %v2050_v0 = vsub.f32 %v2046_v60, %v2049_v63 }
 0x83a   : > { %v2051_v2 = vmul.f32 1.442695, %v2050_v0 }
 0x83b   : > { %v2059_v3 = vpop.permute.xlu0 %2058 }
 0x83c   : > { %11276 = vpow2.f32 %v2051_v2  ;;  %10352 = vmatpush3.msra.mxu1 %v2059_v3 }
 0x83d   : > { %10356 = vmatprep.subr.mxu1 %v12212_v1 }
 0x83f   : > { %v2451_v21 = vpop.permute.xlu0 %2450 }
 0x843   : > { %v2449_v26 = vpop.permute.xlu0 %2448 }
 0x849   : > { %v11277_v4 = vpop.eup %11276 }
 0x84a   : > { %v2053_v6 = vsel %vm1725_vm3, %v11277_v4, 0.0 }
 0x84b   : > { %2054 = vadd.xlane.f32.xlu1 %v2053_v6  ;;  %v2730_v6 = vld [vmem:[%s13814_s1 + $0x30] sm:$0xff] }
 0x84f   : > { %2288 = vmax.xlane.f32.xlu1 %v2287_v7  ;;  %v2729_v7 = vld [vmem:[%s13814_s1 + $0x28] sm:$0xff] }
 0x8d4   : > { %v2055_v8 = vpop.xlane.xlu1 %2054 }
 0x8d5   : > { %11278 = vrcp.f32 %v2055_v8  ;;  %v2728_v8 = vld [vmem:[%s13814_s1 + $0x20] sm:$0xff] }
 0x8d8   : > { %v2289_v9 = vpop.xlane.xlu1 %2288 }
 0x8d9   : > { %v2290_v10 = vsub.f32 %v2286_v5, %v2289_v9  ;;  %v2731_v5 = vld [vmem:[%s13813_s22 + $0x38] sm:$0xff]  ;;  %s13815_s22 = smov 112  }
 0x8da   : > { %v2727_v9 = vld [vmem:[%s13814_s1 + $0x18] sm:$0xff] }
 0x8db   : > { %v2291_v11 = vmul.f32 1.442695, %v2290_v10 }
 0x8dd   : > { %11280 = vpow2.f32 %v2291_v11 }
 0x8e2   : > { %v11279_v12 = vpop.eup %11278 }
 0x8e3   : > { %v2057_v13 = vmul.f32 %v11279_v12, %v11277_v4 }
 0x8e5   : > { %10354 = vmatmul.mubr.msk.f32.vlgmr.msra.gmra.mxu1 %vm1725_vm3, %v2057_v13 }
 0x8e6   : > { %10358 = vmatprep.mubr.msk.f32.mxu1 %vm12213_vm0, %v12212_v1  ;;  %10357 = vmatpush3.msra.mxu1 %v1638_v16  ;;  %v9814_v16 = vld [vmem:[#allocation8] ss:$0 sm:$0xff] }
 0x8e7   : > { %10366 = vmatprep.subr.mxu1 %v12212_v1 }
 0x8ea   : > { %v11281_v14 = vpop.eup %11280 }
 0x8eb   : > { %v2293_v15 = vsel %vm1725_vm3, %v11281_v14, 0.0 }
 0x8ec   : > { %2294 = vadd.xlane.f32.xlu1 %v2293_v15 }
 0x8fd   : > { %2298 = vrot.lane.b32.xlu1 %v12799_v32, %s13700_s3 }
 0x975   : > { %v2295_v17 = vpop.xlane.xlu1 %2294 }
 0x976   : > { %11282 = vrcp.f32 %v2295_v17 }
 0x979   : > { %v2299_v20 = vpop.permute.xlu1 %2298 }
 0x983   : > { %v11283_v18 = vpop.eup %11282 }
 0x984   : > { %v2297_v25 = vmul.f32 %v11283_v18, %v11281_v14  ;;  %v9813_v14 = vld [vmem:[#allocation7] ss:$0 sm:$0xff] }
 0x9a5   : > { %v2130_v19 = vpop.f32.mrf.mxu1 }
 0x9a6   : > { %10359 = vmatmul.mubr.msk.f32.vlgmr.msra.gmra.mxu1 %vm1725_vm3, %v2130_v19  ;;  %v2726_v19 = vld [vmem:[%s13814_s1 + $0x10] sm:$0xff] }
 0x9a7   : > { %10367 = vmatpush3.msra.mxu1 %v2299_v20  ;;  %v10355_v23 = vpop.f32.mrf.mxu1  ;;  %10368 = vmatprep.mubr.msk.f32.mxu1 %vm12213_vm0, %v12212_v1  ;;  %v2725_v20 = vld [vmem:[%s13814_s1 + $0x8] sm:$0xff] }
 0x9a8   : > { %10376 = vmatprep.subr.mxu1 %v12212_v1  ;;  %v9815_v23 = vld [vmem:[#allocation10] ss:$0 sm:$0xff] }
 0x9aa   : > { %10369 = vmatmul.mubr.msk.f32.vlgmr.msra.gmra.mxu1 %vm1725_vm3, %v2297_v25 }
 0x9ab   : > { %10377 = vmatpush3.xpose.msk.msra.mxu1 %vm1725_vm3, %v2451_v21  ;;  %10378 = vmatprep.mubr.msk.f32.mxu1 %vm12213_vm0, %v12212_v1  ;;  %v2724_v21 = vld [vmem:[%s13814_s1] sm:$0xff] }
 0x9ac   : > { %10386 = vmatprep.subr.mxu1 %v12212_v1 }
 0x9ae   : > { %10379 = vmatmul.mubr.msk.f32.vlgmr.msra.gmra.mxu1 %vm1725_vm3, %v2449_v26 }
 0x9af   : > { %10388 = vmatprep.mubr.msk.f32.mxu1 %vm12213_vm0, %v12212_v1  ;;  %10387 = vmatpush3.msra.mxu1 %v1640_v47 }
 0x9b0   : > { %10402 = vmatprep.subr.mxu1 %v12212_v1 }
 0xa66   : > { %v2203_v31 = vpop.f32.mrf.mxu1 }
 0xa67   : > { %v2207_v33 = vadd.f32 %v2203_v31, %v1967_v30  ;;  %v9817_v30 = vld [vmem:[#allocation11] ss:$0 sm:$0xff] }
 0xa68   : > { %v10360_v34 = vpop.f32.mrf.mxu1 }
 0xa6a   : > { %v2370_v35 = vpop.f32.mrf.mxu1 }
 0xa6b   : > { %10374 = vmatmul.mubr.msk.f32.vlgmr.msra.gmra.mxu0 %vm1725_vm3, %v2370_v35 }
 0xa6c   : > { %v10370_v36 = vpop.f32.mrf.mxu1  ;;  %10383 = vmatprep.mubr.msk.f32.mxu0 %vm12213_vm0, %v12212_v1 }
 0xa6e   : > { %v2522_v37 = vpop.f32.mrf.mxu1 }
 0xa6f   : > { %v2526_v38 = vmul.f32 0.35355338, %v2522_v37 }
 0xa70   : > { %v10380_v39 = vpop.f32.mrf.mxu1 }
 0xa71   : > { %v2527_v40 = vsel %vm1725_vm3, %v2526_v38, -inf }
 0xa72   : > { %2528 = vmax.xlane.f32.xlu0 %v2527_v40 }
 0xa88   : > { %2538 = vrot.lane.b32.xlu0 %v12799_v32, %s13698_s26  ;;  %s13811_s26 = sld [smem:[#allocation63_spill]] }
 0xa8e   : > { %s13812_s3 = smov %s13811_s26  ;;  %v2722_v2 = vld [vmem:[%s13811_s26 + $0x18] sm:$0xff]  ;;  %s13816_s26 = smov 48  }
 0xa8f   : > { %v2721_v3 = vld [vmem:[%s13812_s3 + $0x10] sm:$0xff]  ;;  %v2719_v4 = vld [vmem:[%s13812_s3] sm:$0xff] }
 0xafb   : > { %v2529_v41 = vpop.xlane.xlu0 %2528 }
 0xafc   : > { %v2530_v42 = vsub.f32 %v2526_v38, %v2529_v41 }
 0xafe   : > { %v2531_v43 = vmul.f32 1.442695, %v2530_v42  ;;  %v9824_v42 = vld [vmem:[%s13809_s4 + $0x38] sm:$0xff] }
 0xaff   : > { %v2539_v44 = vpop.permute.xlu0 %2538 }
 0xb00   : > { %11284 = vpow2.f32 %v2531_v43  ;;  %10382 = vmatpush3.msra.mxu0 %v2539_v44  ;;  %v9823_v43 = vld [vmem:[%s13809_s4 + $0x30] sm:$0xff]  ;;  %v9822_v44 = vld [vmem:[%s13809_s4 + $0x28] sm:$0xff] }
 0xb01   : > { %10391 = vmatprep.subr.mxu0 %v12212_v1 }
 0xb0d   : > { %v11285_v45 = vpop.eup %11284 }
 0xb0e   : > { %v2533_v46 = vsel %vm1725_vm3, %v11285_v45, 0.0 }
 0xb0f   : > { %2534 = vadd.xlane.f32.xlu1 %v2533_v46 }
 0xb2b   : > { %v2443_v48 = vpop.f32.mrf.mxu0 }
 0xb2c   : > { %v2447_v49 = vadd.f32 %v2443_v48, %v2207_v33 }
 0xb2d   : > { %v10375_v50 = vpop.f32.mrf.mxu0 }
 0xb2e   : > { %v9819_v50 = vld [vmem:[#allocation13] ss:$0 sm:$0xff] }
 0xb98   : > { %v2535_v32 = vpop.xlane.xlu1 %2534 }
 0xb99   : > { %11286 = vrcp.f32 %v2535_v32 }
 0xba6   : > { %v11287_v51 = vpop.eup %11286 }
 0xba7   : > { %v2537_v52 = vmul.f32 %v11287_v51, %v11285_v45  ;;  %v9821_v45 = vld [vmem:[%s13809_s4 + $0x20] sm:$0xff]  ;;  %v9820_v51 = vld [vmem:[#allocation14] ss:$0 sm:$0xff]  ;;  %s13828_s4 = smov 88  }
 0xba9   : > { %10384 = vmatmul.mubr.msk.f32.vlgmr.msra.gmra.mxu0 %vm1725_vm3, %v2537_v52 }
 0xbaa   : > { %10399 = vmatprep.mubr.msk.f32.mxu0 %vm12213_vm0, %v12212_v1  ;;  %10392 = vmatpush3.msra.mxu0 %v2722_v2 }
 0xbab   : > { %10393 = vmatprep.subr.mxu0 %v12212_v1 }
 0xbac   : > { %10394 = vmatpush3.msra.mxu0 %v2721_v3 }
 0xbad   : > { %10395 = vmatprep.subr.mxu0 %v12212_v1 }
 0xc69   : > { %v2610_v53 = vpop.f32.mrf.mxu0 }
 0xc6a   : > { %10389 = vmatmul.mubr.msk.f32.vlgmr.msra.gmra.mxu1 %vm1725_vm3, %v2610_v53 }
 0xc6b   : > { %v10385_v54 = vpop.f32.mrf.mxu0  ;;  %10418 = vmatprep.mubr.msk.f32.mxu1 %vm12213_vm0, %v12212_v1  ;;  %10403 = vmatpush3.msra.mxu1 %v2731_v5  ;;  %v9825_v5 = vld [vmem:[%s13810_s29 + $0x20] sm:$0xff] }
 0xc6c   : > { %10404 = vmatprep.subr.mxu1 %v12212_v1  ;;  %v9829_v54 = vld [vmem:[#allocation2 + $0x1] ss:$0 sm:$0xff] }
 0xc6d   : > { %10405 = vmatpush3.msra.mxu1 %v2730_v6 }
 0xc6e   : > { %10406 = vmatprep.subr.mxu1 %v12212_v1 }
 0xc6f   : > { %10407 = vmatpush3.msra.mxu1 %v2729_v7 }
 0xc70   : > { %10408 = vmatprep.subr.mxu1 %v12212_v1 }
 0xc71   : > { %10409 = vmatpush3.msra.mxu1 %v2728_v8 }
 0xc72   : > { %10410 = vmatprep.subr.mxu1 %v12212_v1 }
 0xc73   : > { %10411 = vmatpush3.msra.mxu1 %v2727_v9 }
 0xc74   : > { %10412 = vmatprep.subr.mxu1 %v12212_v1 }
 0xc75   : > { %10413 = vmatpush3.msra.mxu1 %v2726_v19 }
 0xc76   : > { %10414 = vmatprep.subr.mxu1 %v12212_v1 }
 0xc77   : > { %10415 = vmatpush3.msra.mxu1 %v2725_v20 }
 0xc78   : > { %10416 = vmatprep.subr.mxu1 %v12212_v1 }
 0xc79   : > { %10417 = vmatpush3.msra.mxu1 %v2724_v21 }
 0xc7a   : > { %10437 = vmatprep.subr.mxu1 %v12212_v1 }
 0xd2a   : > { %v2683_v55 = vpop.f32.mrf.mxu1 }
 0xd2b   : > { %v2687_v56 = vadd.f32 %v2683_v55, %v2447_v49 }
 0xd2c   : > { %v10390_v57 = vpop.f32.mrf.mxu1 }
 0xd2d   : > { %v2688_v58 = vadd.f32 %v2687_v56, %v12793_v28  ;;  %v2720_v28 = vld [vmem:[%s13812_s3 + $0x8] sm:$0xff] }
 0xd2e   : > { %10396 = vmatpush3.msra.mxu0 %v2720_v28 }
 0xd2f   : > { %v2691_v59 = vsel %vm1648_vm2, %v2688_v58, 0.0  ;;  %10397 = vmatprep.subr.mxu0 %v12212_v1 }
 0xd30   : > { %2692 = vadd.xlane.f32.xlu1 %v2691_v59  ;;  %10398 = vmatpush3.msra.mxu0 %v2719_v4 }
 0xd31   : > { %10421 = vmatprep.subr.mxu0 %v12212_v1 }
 0xdb9   : > { %v2693_v60 = vpop.xlane.xlu1 %2692 }
 0xdba   : > { %v2695_v61 = vmul.f32 0.03125, %v2693_v60 }
 0xdbc   : > { %v2696_v62 = vsub.f32 %v2688_v58, %v2695_v61 }
 0xdbe   : > { %v2697_v63 = vmul.f32 %v2696_v62, %v2696_v62 }
 0xdc0   : > { %v2698_v0 = vsel %vm1648_vm2, %v2697_v63, 0.0 }
 0xdc1   : > { %2699 = vadd.xlane.f32.xlu1 %v2698_v0 }
 0xe4a   : > { %v2700_v10 = vpop.xlane.xlu1 %2699 }
 0xe4b   : > { %v2701_v11 = vmul.f32 0.03125, %v2700_v10 }
 0xe4d   : > { %v2702_v12 = vadd.f32 1e-05, %v2701_v11 }
 0xe4f   : > { %11288 = vrsqrt.f32 %v2702_v12 }
 0xe5c   : > { %v11289_v13 = vpop.eup %11288 }
 0xe5d   : > { %v2704_v15 = vmul.f32 %v11289_v13, %v2696_v62 }
 0xe5f   : > { %v2711_v17 = vmul.f32 %v9813_v14, %v2704_v15 }
 0xe61   : > { %v2718_v18 = vadd.f32 %v9814_v16, %v2711_v17 }
 0xe63   : > { %10400 = vmatmul.mubr.msk.f32.vlgmr.msra.gmra.mxu0 %vm1648_vm2, %v2718_v18 }
 0xe64   : > { %10429 = vmatprep.mubr.msk.f32.mxu0 %vm12213_vm0, %v12212_v1  ;;  %10422 = vmatpush3.msra.mxu0 %v9824_v42 }
 0xe65   : > { %10423 = vmatprep.subr.mxu0 %v12212_v1 }
 0xe66   : > { %10424 = vmatpush3.msra.mxu0 %v9823_v43 }
 0xe67   : > { %10425 = vmatprep.subr.mxu0 %v12212_v1 }
 0xe68   : > { %10426 = vmatpush3.msra.mxu0 %v9822_v44 }
 0xe69   : > { %10427 = vmatprep.subr.mxu0 %v12212_v1 }
 0xe6a   : > { %10428 = vmatpush3.msra.mxu0 %v9821_v45 }
 0xe6b   : > { %10432 = vmatprep.subr.mxu0 %v12212_v1 }
 0xf23   : > { %v2808_v25 = vpop.f32.mrf.mxu0 }
 0xf24   : > { %v2809_v26 = vadd.f32 %v9815_v23, %v2808_v25 }
 0xf25   : > { %v10401_v27 = vpop.f32.mrf.mxu0 }
 0xf26   : > { %v2812_v29 = vmax.f32 %v2809_v26, 0.0 }
 0xf28   : > { %10419 = vmatmul.mubr.msk.f32.vlgmr.msra.gmra.mxu1 %vm2819_vm4, %v2812_v29 }
 0xf29   : > { %10439 = vmatprep.mubr.msk.f32.mxu1 %vm12213_vm0, %v12212_v1 }
 0xfe8   : > { %v2889_v31 = vpop.f32.mrf.mxu1 }
 0xfe9   : > { %v2890_v33 = vadd.f32 %v9817_v30, %v2889_v31 }
 0xfea   : > { %v10420_v34 = vpop.f32.mrf.mxu1 }
 0xfeb   : > { %v2893_v35 = vadd.f32 %v2890_v33, %v2718_v18  ;;  %v9826_v34 = vld [vmem:[%s13810_s29 + $0x28] sm:$0xff] }
 0xfed   : > { %v2896_v36 = vsel %vm1648_vm2, %v2893_v35, 0.0 }
 0xfee   : > { %2897 = vadd.xlane.f32.xlu1 %v2896_v36 }
0x1077   : > { %v2898_v37 = vpop.xlane.xlu1 %2897 }
0x1078   : > { %v2899_v38 = vmul.f32 0.03125, %v2898_v37 }
0x107a   : > { %v2900_v39 = vsub.f32 %v2893_v35, %v2899_v38 }
0x107c   : > { %v2901_v40 = vmul.f32 %v2900_v39, %v2900_v39 }
0x107e   : > { %v2902_v41 = vsel %vm1648_vm2, %v2901_v40, 0.0 }
0x107f   : > { %2903 = vadd.xlane.f32.xlu1 %v2902_v41 }
0x1108   : > { %v2904_v46 = vpop.xlane.xlu1 %2903 }
0x1109   : > { %v2905_v47 = vmul.f32 0.03125, %v2904_v46 }
0x110b   : > { %v2906_v48 = vadd.f32 1e-05, %v2905_v47  ;;  %v9835_v47 = vld [vmem:[#allocation5 + $0x1] ss:$0 sm:$0xff] }
0x110d   : > { %11290 = vrsqrt.f32 %v2906_v48 }
0x111a   : > { %v11291_v49 = vpop.eup %11290 }
0x111b   : > { %v2908_v32 = vmul.f32 %v11291_v49, %v2900_v39 }
0x111d   : > { %v2915_v52 = vmul.f32 %v9819_v50, %v2908_v32 }
0x111f   : > { %v12934_v53 = vadd.f32 %v9820_v51, %v2915_v52 }
0x1121   : > { %10430 = vmatmul.mubr.msk.f32.vlgmr.msra.gmra.mxu0 %vm1648_vm2, %v12934_v53 }
0x1122   : > { %10434 = vmatprep.mubr.msk.f32.mxu0 %vm12213_vm0, %v12212_v1 }
0x11e1   : > { %v3012_v55 = vpop.f32.mrf.mxu0 }
0x11e2   : > { %v12940_v56 = vadd.f32 %v9829_v54, %v3012_v55 }
0x11e3   : > { %v10431_v57 = vpop.f32.mrf.mxu0 }
0x11e4   : > { %3017 = vrot.lane.b32.xlu0 %v12940_v56, %s13716_s8 }
0x1256   : > { %v3018_v58 = vpop.permute.xlu0 %3017 }
0x1257   : > { %10433 = vmatpush3.xpose.msk.msra.mxu0 %vm1725_vm3, %v3018_v58  ;;  %v9827_v58 = vld [vmem:[%s13810_s29 + $0x30] sm:$0xff] }
0x1258   : > { %10442 = vmatprep.subr.mxu0 %v12212_v1 }
0x125a   : > { %10435 = vmatmul.mubr.msk.f32.vlgmr.msra.gmra.mxu0 %vm1725_vm3, %v12940_v56 }
0x125b   : > { %10444 = vmatprep.mubr.msk.f32.mxu0 %vm12213_vm0, %v12212_v1  ;;  %10443 = vmatpush3.msra.mxu0 %v9825_v5 }
0x125c   : > { %10452 = vmatprep.subr.mxu0 %v12212_v1 }
0x131a   : > { %v3089_v59 = vpop.f32.mrf.mxu0 }
0x131b   : > { %v3093_v60 = vmul.f32 0.35355338, %v3089_v59 }
0x131c   : > { %v10436_v61 = vpop.f32.mrf.mxu0 }
0x131d   : > { %v3094_v62 = vsel %vm1725_vm3, %v3093_v60, -inf }
0x131e   : > { %3095 = vmax.xlane.f32.xlu1 %v3094_v62 }
0x132f   : > { %3105 = vrot.lane.b32.xlu1 %v12940_v56, %s13710_s11  ;;  %s13819_s11 = smov 40  }
0x1333   : > { %3263 = vrot.lane.b32.xlu1 %v12940_v56, %s13708_s2  ;;  %s13818_s2 = smov 104  }
0x1337   : > { %3261 = vrot.lane.b32.xlu1 %v12940_v56, %s13706_s7  ;;  %s13817_s7 = smov 72  }
0x13a7   : > { %v3096_v63 = vpop.xlane.xlu1 %3095 }
0x13a8   : > { %v3097_v0 = vsub.f32 %v3093_v60, %v3096_v63 }
0x13aa   : > { %v3098_v2 = vmul.f32 1.442695, %v3097_v0 }
0x13ab   : > { %v3106_v3 = vpop.permute.xlu1 %3105 }
0x13ac   : > { %11292 = vpow2.f32 %v3098_v2  ;;  %10438 = vmatpush3.msra.mxu1 %v3106_v3 }
0x13ad   : > { %10447 = vmatprep.subr.mxu1 %v12212_v1 }
0x13af   : > { %v3264_v8 = vpop.permute.xlu1 %3263 }
0x13b3   : > { %v3262_v10 = vpop.permute.xlu1 %3261 }
0x13b9   : > { %v11293_v28 = vpop.eup %11292 }
0x13ba   : > { %v3100_v4 = vsel %vm1725_vm3, %v11293_v28, 0.0 }
0x13bb   : > { %3101 = vadd.xlane.f32.xlu0 %v3100_v4 }
0x13d1   : > { %3351 = vrot.lane.b32.xlu0 %v12940_v56, %s13714_s0  ;;  %s13821_s0 = sshll.u32 %s12736_s10, 3  ;;  %s13822_s10 = sld [smem:[#allocation69_spill]] }
0x1444   : > { %v3102_v6 = vpop.xlane.xlu0 %3101 }
0x1445   : > { %11294 = vrcp.f32 %v3102_v6  ;;  %v9828_v6 = vld [vmem:[%s13810_s29 + $0x38] sm:$0xff] }
0x1448   : > { %v3352_v12 = vpop.permute.xlu0 %3351 }
0x1452   : > { %v11295_v7 = vpop.eup %11294 }
0x1453   : > { %v3104_v9 = vmul.f32 %v11295_v7, %v11293_v28 }
0x1455   : > { %10440 = vmatmul.mubr.msk.f32.vlgmr.msra.gmra.mxu1 %vm1725_vm3, %v3104_v9 }
0x1456   : > { %10448 = vmatpush3.xpose.msk.msra.mxu1 %vm1725_vm3, %v3264_v8  ;;  %10449 = vmatprep.mubr.msk.f32.mxu1 %vm12213_vm0, %v12212_v1 }
0x1457   : > { %10457 = vmatprep.subr.mxu1 %v12212_v1 }
0x1459   : > { %10450 = vmatmul.mubr.msk.f32.vlgmr.msra.gmra.mxu1 %vm1725_vm3, %v3262_v10 }
0x145a   : > { %10459 = vmatprep.mubr.msk.f32.mxu1 %vm12213_vm0, %v12212_v1  ;;  %10458 = vmatpush3.msra.mxu1 %v9826_v34  ;;  %v9860_v34 = vld [vmem:[%s13814_s1 + $0x70] sm:$0xff] }
0x145b   : > { %10467 = vmatprep.subr.mxu1 %v12212_v1 }
0x1515   : > { %v3177_v11 = vpop.f32.mrf.mxu1 }
0x1516   : > { %10445 = vmatmul.mubr.msk.f32.vlgmr.msra.gmra.mxu0 %vm1725_vm3, %v3177_v11 }
0x1517   : > { %10453 = vmatpush3.msra.mxu0 %v3352_v12  ;;  %v10441_v13 = vpop.f32.mrf.mxu1  ;;  %10454 = vmatprep.mubr.msk.f32.mxu0 %vm12213_vm0, %v12212_v1 }
0x1518   : > { %10462 = vmatprep.subr.mxu0 %v12212_v1 }
0x1519   : > { %v3335_v14 = vpop.f32.mrf.mxu1 }
0x151a   : > { %v3339_v15 = vmul.f32 0.35355338, %v3335_v14 }
0x151b   : > { %v10451_v16 = vpop.f32.mrf.mxu1 }
0x151c   : > { %v3340_v17 = vsel %vm1725_vm3, %v3339_v15, -inf }
0x151d   : > { %3341 = vmax.xlane.f32.xlu1 %v3340_v17 }
0x15a6   : > { %v3342_v18 = vpop.xlane.xlu1 %3341 }
0x15a7   : > { %v3343_v19 = vsub.f32 %v3339_v15, %v3342_v18 }
0x15a9   : > { %v3344_v20 = vmul.f32 1.442695, %v3343_v19 }
0x15ab   : > { %11296 = vpow2.f32 %v3344_v20 }
0x15b8   : > { %v11297_v21 = vpop.eup %11296 }
0x15b9   : > { %v3346_v23 = vsel %vm1725_vm3, %v11297_v21, 0.0 }
0x15ba   : > { %3347 = vadd.xlane.f32.xlu0 %v3346_v23 }
0x15d0   : > { %3503 = vrot.lane.b32.xlu0 %v12940_v56, %s13712_s16  ;;  %s13820_s16 = sld [smem:[#allocation56_spill]] }
0x15d4   : > { %3501 = vrot.lane.b32.xlu0 %v12940_v56, %s13815_s22 }
0x15d6   : > { %v3250_v25 = vpop.f32.mrf.mxu0  ;;  %s1535_s8 = scalar_lea.vmem %s13820_s16, %s13821_s0  ;;  %s13824_s16 = smov 56  }
0x15d7   : > { %v3260_v48 = vadd.f32 %v9835_v47, %v3250_v25  ;;  %v11392_v47 = vld [vmem:[%s13808_s18 + $0x78] sm:$0xff]  ;;  %s13825_s0 = smov 80  }
0x15d8   : > { %v10446_v26 = vpop.f32.mrf.mxu0 }
0x1643   : > { %v3348_v27 = vpop.xlane.xlu0 %3347 }
0x1644   : > { %11298 = vrcp.f32 %v3348_v27  ;;  %v4251_v27 = vld [vmem:[%s1535_s8] sm:$0xff]  ;;  %s13823_s8 = smov 96  }
0x1647   : > { %v3504_v30 = vpop.permute.xlu0 %3503 }
0x164b   : > { %v3502_v33 = vpop.permute.xlu0 %3501 }
0x1651   : > { %v11299_v29 = vpop.eup %11298 }
0x1652   : > { %v3350_v31 = vmul.f32 %v11299_v29, %v11297_v21  ;;  %v9853_v29 = vld [vmem:[%s13812_s3 + $0x38] sm:$0xff] }
0x1654   : > { %10455 = vmatmul.mubr.msk.f32.vlgmr.msra.gmra.mxu0 %vm1725_vm3, %v3350_v31  ;;  %v9850_v31 = vld [vmem:[%s13812_s3 + $0x20] sm:$0xff] }
0x1655   : > { %10463 = vmatpush3.xpose.msk.msra.mxu0 %vm1725_vm3, %v3504_v30  ;;  %10464 = vmatprep.mubr.msk.f32.mxu0 %vm12213_vm0, %v12212_v1  ;;  %v9852_v30 = vld [vmem:[%s13812_s3 + $0x30] sm:$0xff] }
0x1656   : > { %10472 = vmatprep.subr.mxu0 %v12212_v1 }
0x1658   : > { %10465 = vmatmul.mubr.msk.f32.vlgmr.msra.gmra.mxu0 %vm1725_vm3, %v3502_v33  ;;  %v9861_v33 = vld [vmem:[%s13814_s1 + $0x78] sm:$0xff] }
0x1659   : > { %10474 = vmatprep.mubr.msk.f32.mxu0 %vm12213_vm0, %v12212_v1  ;;  %10473 = vmatpush3.msra.mxu0 %v9827_v58  ;;  %v11402_v58 = vld [vmem:[%s13808_s18 + $0x28] sm:$0xff] }
0x165a   : > { %10482 = vmatprep.subr.mxu0 %v12212_v1 }
0x1714   : > { %v3423_v35 = vpop.f32.mrf.mxu0 }
0x1715   : > { %10460 = vmatmul.mubr.msk.f32.vlgmr.msra.gmra.mxu1 %vm1725_vm3, %v3423_v35  ;;  %v9859_v35 = vld [vmem:[%s13814_s1 + $0x68] sm:$0xff] }
0x1716   : > { %v10456_v36 = vpop.f32.mrf.mxu0  ;;  %10469 = vmatprep.mubr.msk.f32.mxu1 %vm12213_vm0, %v12212_v1 }
0x1717   : > { %v9858_v36 = vld [vmem:[%s13814_s1 + $0x60] sm:$0xff] }
0x1718   : > { %v3575_v37 = vpop.f32.mrf.mxu0 }
0x1719   : > { %v3579_v38 = vmul.f32 0.35355338, %v3575_v37  ;;  %v9857_v37 = vld [vmem:[%s13814_s1 + $0x58] sm:$0xff] }
0x171a   : > { %v10466_v39 = vpop.f32.mrf.mxu0 }
0x171b   : > { %v3580_v40 = vsel %vm1725_vm3, %v3579_v38, -inf }
0x171c   : > { %3581 = vmax.xlane.f32.xlu1 %v3580_v40 }
0x172d   : > { %3591 = vrot.lane.b32.xlu1 %v12940_v56, %s13816_s26 }
0x1731   : > { %3743 = vrot.lane.b32.xlu1 %v12940_v56, %s13817_s7 }
0x1735   : > { %3741 = vrot.lane.b32.xlu1 %v12940_v56, %s13818_s2 }
0x17a5   : > { %v3582_v41 = vpop.xlane.xlu1 %3581 }
0x17a6   : > { %v3583_v42 = vsub.f32 %v3579_v38, %v3582_v41 }
0x17a8   : > { %v3584_v43 = vmul.f32 1.442695, %v3583_v42  ;;  %v9848_v42 = vld [vmem:[#allocation7 + $0x1] ss:$0 sm:$0xff] }
0x17a9   : > { %v3592_v44 = vpop.permute.xlu1 %3591 }
0x17aa   : > { %11300 = vpow2.f32 %v3584_v43  ;;  %10468 = vmatpush3.msra.mxu1 %v3592_v44  ;;  %v9849_v44 = vld [vmem:[#allocation8 + $0x1] ss:$0 sm:$0xff] }
0x17ab   : > { %10477 = vmatprep.subr.mxu1 %v12212_v1 }
0x17ad   : > { %v3744_v54 = vpop.permute.xlu1 %3743 }
0x17b1   : > { %v3742_v57 = vpop.permute.xlu1 %3741 }
0x17b7   : > { %v11301_v45 = vpop.eup %11300 }
0x17b8   : > { %v3586_v46 = vsel %vm1725_vm3, %v11301_v45, 0.0 }
0x17b9   : > { %3587 = vadd.xlane.f32.xlu0 %v3586_v46 }
0x17d5   : > { %v3496_v49 = vpop.f32.mrf.mxu1 }
0x17d6   : > { %v3500_v50 = vadd.f32 %v3496_v49, %v3260_v48  ;;  %v11393_v48 = vld [vmem:[%s13808_s18 + $0x70] sm:$0xff]  ;;  %v11394_v49 = vld [vmem:[%s13808_s18 + $0x68] sm:$0xff] }
0x17d7   : > { %v10461_v32 = vpop.f32.mrf.mxu1 }
0x17d8   : > { %v11396_v32 = vld [vmem:[%s13808_s18 + $0x58] sm:$0xff] }
0x1842   : > { %v3588_v51 = vpop.xlane.xlu0 %3587 }
0x1843   : > { %11302 = vrcp.f32 %v3588_v51  ;;  %v11397_v51 = vld [vmem:[%s13808_s18 + $0x50] sm:$0xff] }
0x1850   : > { %v11303_v52 = vpop.eup %11302 }
0x1851   : > { %v3590_v55 = vmul.f32 %v11303_v52, %v11301_v45  ;;  %v11398_v52 = vld [vmem:[%s13808_s18 + $0x48] sm:$0xff] }
0x1853   : > { %10470 = vmatmul.mubr.msk.f32.vlgmr.msra.gmra.mxu1 %vm1725_vm3, %v3590_v55  ;;  %v11400_v55 = vld [vmem:[%s13808_s18 + $0x38] sm:$0xff] }
0x1854   : > { %10478 = vmatpush3.xpose.msk.msra.mxu1 %vm1725_vm3, %v3744_v54  ;;  %10479 = vmatprep.mubr.msk.f32.mxu1 %vm12213_vm0, %v12212_v1  ;;  %v11399_v54 = vld [vmem:[%s13808_s18 + $0x40] sm:$0xff] }
0x1855   : > { %10487 = vmatprep.subr.mxu1 %v12212_v1 }
0x1857   : > { %10480 = vmatmul.mubr.msk.f32.vlgmr.msra.gmra.mxu1 %vm1725_vm3, %v3742_v57  ;;  %v11401_v57 = vld [vmem:[%s13808_s18 + $0x30] sm:$0xff] }
0x1858   : > { %10489 = vmatprep.mubr.msk.f32.mxu1 %vm12213_vm0, %v12212_v1  ;;  %10488 = vmatpush3.msra.mxu1 %v9828_v6 }
0x1859   : > { %10503 = vmatprep.subr.mxu1 %v12212_v1 }
0x1913   : > { %v3663_v59 = vpop.f32.mrf.mxu1 }
0x1914   : > { %10475 = vmatmul.mubr.msk.f32.vlgmr.msra.gmra.mxu0 %vm1725_vm3, %v3663_v59  ;;  %v11403_v59 = vld [vmem:[%s13808_s18 + $0x20] sm:$0xff] }
0x1915   : > { %v10471_v60 = vpop.f32.mrf.mxu1  ;;  %10484 = vmatprep.mubr.msk.f32.mxu0 %vm12213_vm0, %v12212_v1 }
0x1916   : > { %v11404_v60 = vld [vmem:[%s13808_s18 + $0x18] sm:$0xff] }
0x1917   : > { %v3815_v61 = vpop.f32.mrf.mxu1 }
0x1918   : > { %v3819_v62 = vmul.f32 0.35355338, %v3815_v61 }
0x1919   : > { %v10481_v63 = vpop.f32.mrf.mxu1 }
0x191a   : > { %v3820_v0 = vsel %vm1725_vm3, %v3819_v62, -inf  ;;  %v11406_v63 = vld [vmem:[%s13808_s18 + $0x8] sm:$0xff] }
0x191b   : > { %3821 = vmax.xlane.f32.xlu1 %v3820_v0  ;;  %v11407_v0 = vld [vmem:[%s13808_s18] sm:$0xff] }
0x19a4   : > { %v3822_v2 = vpop.xlane.xlu1 %3821 }
0x19a5   : > { %v3823_v3 = vsub.f32 %v3819_v62, %v3822_v2  ;;  %v11405_v62 = vld [vmem:[%s13808_s18 + $0x10] sm:$0xff] }
0x19a6   : > { %v9856_v2 = vld [vmem:[%s13814_s1 + $0x50] sm:$0xff] }
0x19a7   : > { %v3824_v28 = vmul.f32 1.442695, %v3823_v3  ;;  %v9855_v3 = vld [vmem:[%s13814_s1 + $0x48] sm:$0xff] }
0x19a9   : > { %11304 = vpow2.f32 %v3824_v28 }
0x19b6   : > { %v11305_v4 = vpop.eup %11304 }
0x19b7   : > { %v3826_v5 = vsel %vm1725_vm3, %v11305_v4, 0.0 }
0x19b8   : > { %3827 = vadd.xlane.f32.xlu0 %v3826_v5 }
0x19ce   : > { %3831 = vrot.lane.b32.xlu0 %v12940_v56, %s13819_s11 }
0x19d4   : > { %v3736_v7 = vpop.f32.mrf.mxu0 }
0x19d5   : > { %v3740_v8 = vadd.f32 %v3736_v7, %v3500_v50  ;;  %v11395_v50 = vld [vmem:[%s13808_s18 + $0x60] sm:$0xff]  ;;  %v4332_v7 = vld [vmem:[%s13822_s10 + $0x18] sm:$0xff] }
0x19d6   : > { %v10476_v9 = vpop.f32.mrf.mxu0 }
0x19d7   : > { %v4330_v9 = vld [vmem:[%s13822_s10 + $0x8] sm:$0xff] }
0x1a41   : > { %v3828_v10 = vpop.xlane.xlu0 %3827 }
0x1a42   : > { %11306 = vrcp.f32 %v3828_v10  ;;  %v4329_v10 = vld [vmem:[%s13822_s10] sm:$0xff] }
0x1a45   : > { %v3832_v11 = vpop.permute.xlu0 %3831 }
0x1a46   : > { %10483 = vmatpush3.msra.mxu0 %v3832_v11 }
0x1a47   : > { %10492 = vmatprep.subr.mxu0 %v12212_v1 }
0x1a4f   : > { %v11307_v12 = vpop.eup %11306 }
0x1a50   : > { %v3830_v13 = vmul.f32 %v11307_v12, %v11305_v4 }
0x1a52   : > { %10485 = vmatmul.mubr.msk.f32.vlgmr.msra.gmra.mxu0 %vm1725_vm3, %v3830_v13 }
0x1a53   : > { %10500 = vmatprep.mubr.msk.f32.mxu0 %vm12213_vm0, %v12212_v1  ;;  %10493 = vmatpush3.msra.mxu0 %v9853_v29 }
0x1a54   : > { %10494 = vmatprep.subr.mxu0 %v12212_v1 }
0x1a55   : > { %10495 = vmatpush3.msra.mxu0 %v9852_v30 }
0x1a56   : > { %10496 = vmatprep.subr.mxu0 %v12212_v1 }
0x1b12   : > { %v3903_v56 = vpop.f32.mrf.mxu0 }
0x1b13   : > { %10490 = vmatmul.mubr.msk.f32.vlgmr.msra.gmra.mxu1 %vm1725_vm3, %v3903_v56 }
0x1b14   : > { %v10486_v14 = vpop.f32.mrf.mxu0  ;;  %10519 = vmatprep.mubr.msk.f32.mxu1 %vm12213_vm0, %v12212_v1  ;;  %10504 = vmatpush3.msra.mxu1 %v9861_v33 }
0x1b15   : > { %10505 = vmatprep.subr.mxu1 %v12212_v1 }
0x1b16   : > { %10506 = vmatpush3.msra.mxu1 %v9860_v34 }
0x1b17   : > { %10507 = vmatprep.subr.mxu1 %v12212_v1 }
0x1b18   : > { %10508 = vmatpush3.msra.mxu1 %v9859_v35 }
0x1b19   : > { %10509 = vmatprep.subr.mxu1 %v12212_v1 }
0x1b1a   : > { %10510 = vmatpush3.msra.mxu1 %v9858_v36 }
0x1b1b   : > { %10511 = vmatprep.subr.mxu1 %v12212_v1 }
0x1b1c   : > { %10512 = vmatpush3.msra.mxu1 %v9857_v37 }
0x1b1d   : > { %10513 = vmatprep.subr.mxu1 %v12212_v1 }
0x1b1e   : > { %10514 = vmatpush3.msra.mxu1 %v9856_v2 }
0x1b1f   : > { %10515 = vmatprep.subr.mxu1 %v12212_v1 }
0x1b20   : > { %10516 = vmatpush3.msra.mxu1 %v9855_v3 }
0x1b21   : > { %10517 = vmatprep.subr.mxu1 %v12212_v1 }
0x1bd3   : > { %v3976_v15 = vpop.f32.mrf.mxu1 }
0x1bd4   : > { %v3980_v16 = vadd.f32 %v3976_v15, %v3740_v8  ;;  %v4331_v8 = vld [vmem:[%s13822_s10 + $0x10] sm:$0xff] }
0x1bd5   : > { %v10491_v17 = vpop.f32.mrf.mxu1  ;;  %v9872_v15 = vld [vmem:[#allocation17] ss:$0 sm:$0xff] }
0x1bd6   : > { %v3981_v18 = vadd.f32 %v3980_v16, %v12934_v53  ;;  %v9851_v53 = vld [vmem:[%s13812_s3 + $0x28] sm:$0xff]  ;;  %s13827_s3 = smov 64  }
0x1bd7   : > { %10497 = vmatpush3.msra.mxu0 %v9851_v53 }
0x1bd8   : > { %v3986_v19 = vsel %vm1648_vm2, %v3981_v18, 0.0  ;;  %10498 = vmatprep.subr.mxu0 %v12212_v1 }
0x1bd9   : > { %3987 = vadd.xlane.f32.xlu0 %v3986_v19  ;;  %10499 = vmatpush3.msra.mxu0 %v9850_v31 }
0x1bda   : > { %10522 = vmatprep.subr.mxu0 %v12212_v1 }
0x1c62   : > { %v3988_v20 = vpop.xlane.xlu0 %3987 }
0x1c63   : > { %v3989_v21 = vmul.f32 0.03125, %v3988_v20 }
0x1c65   : > { %v3990_v23 = vsub.f32 %v3981_v18, %v3989_v21 }
0x1c67   : > { %v3991_v25 = vmul.f32 %v3990_v23, %v3990_v23 }
0x1c69   : > { %v3992_v26 = vsel %vm1648_vm2, %v3991_v25, 0.0 }
0x1c6a   : > { %3993 = vadd.xlane.f32.xlu1 %v3992_v26 }
0x1c7b   : > { %4253 = vperm.xlu1 %11271, %v4251_v27  }
0x1cf3   : > { %v3994_v38 = vpop.xlane.xlu1 %3993 }
0x1cf4   : > { %v3995_v39 = vmul.f32 0.03125, %v3994_v38 }
0x1cf6   : > { %v3996_v40 = vadd.f32 1e-05, %v3995_v39 }
0x1cf7   : > { %v4254_v61 = vpop.permute.xlu1 %4253 }
0x1cf8   : > { %11308 = vrsqrt.f32 %v3996_v40  ;;  %vm4255_vm5 = vcmp.eq.s32.totalorder %v12783_v22, %v4254_v61  ;;  %v9854_v22 = vld [vmem:[%s13814_s1 + $0x40] sm:$0xff]  ;;  %s13826_s1 = sld [smem:[#allocation71_spill]] }
0x1cf9   : > { %10518 = vmatpush3.msra.mxu1 %v9854_v22 }
0x1cfa   : > { %10557 = vmatprep.subr.mxu1 %v12212_v1 }
0x1cfe   : > { %v4334_v37 = vld [vmem:[%s13826_s1] sm:$0xff] }
0x1d05   : > { %v11309_v41 = vpop.eup %11308 }
0x1d06   : > { %v3998_v43 = vmul.f32 %v11309_v41, %v3990_v23 }
0x1d08   : > { %v4005_v45 = vmul.f32 %v9848_v42, %v3998_v43 }
0x1d0a   : > { %v13053_v46 = vadd.f32 %v9849_v44, %v4005_v45 }
0x1d0c   : > { %10501 = vmatmul.mubr.msk.f32.vlgmr.msra.gmra.mxu0 %vm1648_vm2, %v13053_v46 }
0x1d0d   : > { %10523 = vmatpush3.msra.mxu0 %v11392_v47  ;;  %10554 = vmatprep.mubr.msk.f32.mxu0 %vm12213_vm0, %v12212_v1 }
0x1d0e   : > { %10524 = vmatprep.subr.mxu0 %v12212_v1 }
0x1d0f   : > { %10525 = vmatpush3.msra.mxu0 %v11393_v48 }
0x1d10   : > { %10526 = vmatprep.subr.mxu0 %v12212_v1 }
0x1d11   : > { %10527 = vmatpush3.msra.mxu0 %v11394_v49 }
0x1d12   : > { %10528 = vmatprep.subr.mxu0 %v12212_v1 }
0x1d13   : > { %10529 = vmatpush3.msra.mxu0 %v11395_v50 }
0x1d14   : > { %10530 = vmatprep.subr.mxu0 %v12212_v1 }
0x1d15   : > { %10531 = vmatpush3.msra.mxu0 %v11396_v32 }
0x1d16   : > { %10532 = vmatprep.subr.mxu0 %v12212_v1 }
0x1d17   : > { %10533 = vmatpush3.msra.mxu0 %v11397_v51 }
0x1d18   : > { %10534 = vmatprep.subr.mxu0 %v12212_v1 }
0x1d19   : > { %10535 = vmatpush3.msra.mxu0 %v11398_v52 }
0x1d1a   : > { %10536 = vmatprep.subr.mxu0 %v12212_v1 }
0x1d1b   : > { %10537 = vmatpush3.msra.mxu0 %v11399_v54  ;;  %v4335_v54 = vld [vmem:[%s13826_s1 + $0x8] sm:$0xff] }
0x1d1c   : > { %10538 = vmatprep.subr.mxu0 %v12212_v1 }
0x1d1d   : > { %10539 = vmatpush3.msra.mxu0 %v11400_v55 }
0x1d1e   : > { %10540 = vmatprep.subr.mxu0 %v12212_v1 }
0x1d1f   : > { %10541 = vmatpush3.msra.mxu0 %v11401_v57 }
0x1d20   : > { %10542 = vmatprep.subr.mxu0 %v12212_v1 }
0x1d21   : > { %10543 = vmatpush3.msra.mxu0 %v11402_v58 }
0x1d22   : > { %10544 = vmatprep.subr.mxu0 %v12212_v1 }
0x1d23   : > { %10545 = vmatpush3.msra.mxu0 %v11403_v59 }
0x1d24   : > { %10546 = vmatprep.subr.mxu0 %v12212_v1 }
0x1d25   : > { %10547 = vmatpush3.msra.mxu0 %v11404_v60 }
0x1d26   : > { %10548 = vmatprep.subr.mxu0 %v12212_v1 }
0x1d27   : > { %10549 = vmatpush3.msra.mxu0 %v11405_v62 }
0x1d28   : > { %10550 = vmatprep.subr.mxu0 %v12212_v1 }
0x1d29   : > { %10551 = vmatpush3.msra.mxu0 %v11406_v63 }
0x1d2a   : > { %10552 = vmatprep.subr.mxu0 %v12212_v1 }
0x1d2b   : > { %10553 = vmatpush3.msra.mxu0 %v11407_v0 }
0x1d2c   : > { %10555 = vmatmul.mubr.msk.f32.vlgmr.msra.gmra.mxu0 %vm4255_vm5, %v12214_v24  ;;  %10588 = vmatprep.subr.mxu0 %v12212_v1  ;;  %v9862_v24 = vld [vmem:[#allocation10 + $0x1] ss:$0 sm:$0xff] }
0x1d2d   : > { %10590 = vmatprep.mubr.msk.f32.mxu0 %vm12213_vm0, %v12212_v1 }
0x1dcc   : > { %v4106_v28 = vpop.f32.mrf.mxu0 }
0x1dcd   : > { %v4107_v4 = vadd.f32 %v9862_v24, %v4106_v28 }
0x1dce   : > { %v10502_v5 = vpop.f32.mrf.mxu0 }
0x1dcf   : > { %v4110_v6 = vmax.f32 %v4107_v4, 0.0 }
0x1dd1   : > { %10520 = vmatmul.mubr.msk.f32.vlgmr.msra.gmra.mxu1 %vm2819_vm4, %v4110_v6 }
0x1dd2   : > { %10558 = vmatpush3.msra.mxu1 %v4332_v7  ;;  %10565 = vmatprep.mubr.msk.f32.mxu1 %vm12213_vm0, %v12212_v1  ;;  %v9878_v7 = vld [vmem:[#allocation19] ss:$0 sm:$0xff] }
0x1dd3   : > { %10559 = vmatprep.subr.mxu1 %v12212_v1 }
0x1dd4   : > { %10560 = vmatpush3.msra.mxu1 %v4331_v8 }
0x1dd5   : > { %10561 = vmatprep.subr.mxu1 %v12212_v1 }
0x1dd6   : > { %10562 = vmatpush3.msra.mxu1 %v4330_v9 }
0x1dd7   : > { %10563 = vmatprep.subr.mxu1 %v12212_v1 }
0x1dd8   : > { %10564 = vmatpush3.msra.mxu1 %v4329_v10 }
0x1dd9   : > { %10568 = vmatprep.subr.mxu1 %v12212_v1 }
0x1dec   : > { %v4324_v11 = vpop.f32.mrf.mxu0 }
0x1ded   : > { %v13112_v12 = vmul.f32 5.656854, %v4324_v11 }
0x1dee   : > { %v10556_v13 = vpop.f32.mrf.mxu0 }
0x1def   : > { %10566 = vmatmul.mubr.msk.f32.vlgmr.msra.gmra.mxu1 %vm1648_vm2, %v13112_v12 }
0x1df0   : > { %10570 = vmatprep.mubr.msk.f32.mxu1 %vm12213_vm0, %v12212_v1 }
0x1e91   : > { %v13118_v56 = vpop.f32.mrf.mxu1 }
0x1e93   : > { %v10521_v14 = vpop.f32.mrf.mxu1 }
0x1eaf   : > { %v4414_v16 = vpop.f32.mrf.mxu1 }
0x1eb0   : > { %v13120_v17 = vadd.f32 %v9872_v15, %v4414_v16 }
0x1eb1   : > { %v10567_v18 = vpop.f32.mrf.mxu1 }
0x1eb2   : > { %4419 = vrot.lane.b32.xlu1 %v13120_v17, %s13823_s8 }
0x1f24   : > { %v4420_v19 = vpop.permute.xlu1 %4419 }
0x1f25   : > { %10569 = vmatpush3.xpose.msk.msra.mxu1 %vm1725_vm3, %v4420_v19  ;;  %v4336_v19 = vld [vmem:[%s13826_s1 + $0x10] sm:$0xff] }
0x1f26   : > { %10573 = vmatprep.subr.mxu1 %v12212_v1 }
0x1f28   : > { %10571 = vmatmul.mubr.msk.f32.vlgmr.msra.gmra.mxu1 %vm1725_vm3, %v13120_v17 }
0x1f29   : > { %10575 = vmatprep.mubr.msk.f32.mxu1 %vm12213_vm0, %v12212_v1 }
0x1fe8   : > { %v4491_v20 = vpop.f32.mrf.mxu1 }
0x1fe9   : > { %v4495_v21 = vmul.f32 0.35355338, %v4491_v20 }
0x1fea   : > { %v10572_v23 = vpop.f32.mrf.mxu1 }
0x1feb   : > { %v4496_v25 = vsel %vm1725_vm3, %v4495_v21, -inf }
0x1fec   : > { %4497 = vmax.xlane.f32.xlu1 %v4496_v25 }
0x1ffd   : > { %4753 = vrot.lane.b32.xlu1 %v13120_v17, %s13824_s16 }
0x2001   : > { %4905 = vrot.lane.b32.xlu1 %v13120_v17, %s13825_s0 }
0x2075   : > { %v4498_v26 = vpop.xlane.xlu1 %4497 }
0x2076   : > { %v4499_v27 = vsub.f32 %v4495_v21, %v4498_v26 }
0x2078   : > { %v4500_v29 = vmul.f32 1.442695, %v4499_v27 }
0x2079   : > { %v4754_v30 = vpop.permute.xlu1 %4753 }
0x207a   : > { %11310 = vpow2.f32 %v4500_v29  ;;  %10589 = vmatpush3.msra.mxu0 %v4754_v30 }
0x207b   : > { %10598 = vmatprep.subr.mxu0 %v12212_v1 }
0x207d   : > { %v4906_v55 = vpop.permute.xlu1 %4905 }
0x2087   : > { %v11311_v53 = vpop.eup %11310 }
0x2088   : > { %v4502_v31 = vsel %vm1725_vm3, %v11311_v53, 0.0 }
0x2089   : > { %4503 = vadd.xlane.f32.xlu0 %v4502_v31 }
0x209f   : > { %4507 = vrot.lane.b32.xlu0 %v13120_v17, %s13827_s3 }
0x20a3   : > { %4665 = vrot.lane.b32.xlu0 %v13120_v17, %s13828_s4 }
0x20a7   : > { %4663 = vrot.lane.b32.xlu0 %v13120_v17, %s13829_s5 }
0x2112   : > { %v4504_v33 = vpop.xlane.xlu0 %4503 }
0x2113   : > { %11312 = vrcp.f32 %v4504_v33 }
0x2116   : > { %v4508_v34 = vpop.permute.xlu0 %4507 }
0x2117   : > { %10574 = vmatpush3.msra.mxu1 %v4508_v34 }
0x2118   : > { %10578 = vmatprep.subr.mxu1 %v12212_v1 }
0x211a   : > { %v4666_v38 = vpop.permute.xlu0 %4665 }
0x211e   : > { %v4664_v41 = vpop.permute.xlu0 %4663 }
0x2120   : > { %v11313_v35 = vpop.eup %11312 }
0x2121   : > { %v4506_v36 = vmul.f32 %v11313_v35, %v11311_v53 }
0x2123   : > { %10576 = vmatmul.mubr.msk.f32.vlgmr.msra.gmra.mxu1 %vm1725_vm3, %v4506_v36 }
0x2124   : > { %10579 = vmatpush3.msra.mxu1 %v4334_v37  ;;  %10580 = vmatprep.mubr.msk.f32.mxu1 %vm12213_vm0, %v12212_v1  ;;  %v9864_v37 = vld [vmem:[#allocation11 + $0x1] ss:$0 sm:$0xff] }
0x2125   : > { %10583 = vmatprep.subr.mxu1 %v12212_v1 }
0x21e3   : > { %v4579_v39 = vpop.f32.mrf.mxu1 }
0x21e4   : > { %10581 = vmatmul.mubr.msk.f32.vlgmr.msra.gmra.mxu1 %vm1725_vm3, %v4579_v39 }
0x21e5   : > { %10584 = vmatpush3.xpose.msk.msra.mxu1 %vm1725_vm3, %v4666_v38  ;;  %v10577_v40 = vpop.f32.mrf.mxu1  ;;  %10585 = vmatprep.mubr.msk.f32.mxu1 %vm12213_vm0, %v12212_v1  ;;  %v4187_v38 = vadd.f32 %v9864_v37, %v13118_v56  ;;  %v9891_v37 = vld [vmem:[#allocation20] ss:$0 sm:$0xff] }
0x21e6   : > { %10593 = vmatprep.subr.mxu1 %v12212_v1 }
0x21e7   : > { %v4190_v39 = vadd.f32 %v4187_v38, %v13053_v46 }
0x21e8   : > { %10586 = vmatmul.mubr.msk.f32.vlgmr.msra.gmra.mxu1 %vm1725_vm3, %v4664_v41 }
0x21e9   : > { %10595 = vmatprep.mubr.msk.f32.mxu1 %vm12213_vm0, %v12212_v1  ;;  %10594 = vmatpush3.msra.mxu1 %v4335_v54  ;;  %v4195_v40 = vsel %vm1648_vm2, %v4190_v39, 0.0 }
0x21ea   : > { %10603 = vmatprep.subr.mxu1 %v12212_v1 }
0x22a4   : > { %v4652_v42 = vpop.f32.mrf.mxu1 }
0x22a5   : > { %v4662_v8 = vadd.f32 %v9878_v7, %v4652_v42  ;;  %v5415_v7 = vld [vmem:[%s13830_s9 + $0x10] sm:$0xff] }
0x22a6   : > { %v10582_v43 = vpop.f32.mrf.mxu1 }
0x22a8   : > { %v4737_v44 = vpop.f32.mrf.mxu1 }
0x22a9   : > { %v4741_v45 = vmul.f32 0.35355338, %v4737_v44 }
0x22aa   : > { %v10587_v47 = vpop.f32.mrf.mxu1 }
0x22ab   : > { %v4742_v48 = vsel %vm1725_vm3, %v4741_v45, -inf }
0x22ac   : > { %4743 = vmax.xlane.f32.xlu0 %v4742_v48  ;;  %v4337_v48 = vld [vmem:[%s13826_s1 + $0x18] sm:$0xff] }
0x22c2   : > { %4993 = vrot.lane.b32.xlu0 %v13120_v17, %s13816_s26 }
0x2335   : > { %v4744_v49 = vpop.xlane.xlu0 %4743 }
0x2336   : > { %v4745_v50 = vsub.f32 %v4741_v45, %v4744_v49 }
0x2338   : > { %v4746_v32 = vmul.f32 1.442695, %v4745_v50 }
0x2339   : > { %v4994_v62 = vpop.permute.xlu0 %4993 }
0x233a   : > { %11314 = vpow2.f32 %v4746_v32 }
0x2347   : > { %v11315_v51 = vpop.eup %11314 }
0x2348   : > { %v4748_v52 = vsel %vm1725_vm3, %v11315_v51, 0.0 }
0x2349   : > { %4749 = vadd.xlane.f32.xlu1 %v4748_v52 }
0x235a   : > { %4903 = vrot.lane.b32.xlu1 %v13120_v17, %s13815_s22 }
0x23d2   : > { %v4750_v57 = vpop.xlane.xlu1 %4749 }
0x23d3   : > { %11316 = vrcp.f32 %v4750_v57 }
0x23d6   : > { %v4904_v60 = vpop.permute.xlu1 %4903 }
0x23e0   : > { %v11317_v58 = vpop.eup %11316 }
0x23e1   : > { %v4752_v59 = vmul.f32 %v11317_v58, %v11315_v51  ;;  %v9867_v58 = vld [vmem:[#allocation14 + $0x1] ss:$0 sm:$0xff] }
0x23e3   : > { %10591 = vmatmul.mubr.msk.f32.vlgmr.msra.gmra.mxu0 %vm1725_vm3, %v4752_v59 }
0x23e4   : > { %10599 = vmatpush3.xpose.msk.msra.mxu0 %vm1725_vm3, %v4906_v55  ;;  %10600 = vmatprep.mubr.msk.f32.mxu0 %vm12213_vm0, %v12212_v1  ;;  %v9866_v55 = vld [vmem:[#allocation13 + $0x1] ss:$0 sm:$0xff] }
0x23e5   : > { %10608 = vmatprep.subr.mxu0 %v12212_v1 }
0x23e7   : > { %10601 = vmatmul.mubr.msk.f32.vlgmr.msra.gmra.mxu0 %vm1725_vm3, %v4904_v60 }
0x23e8   : > { %10610 = vmatprep.mubr.msk.f32.mxu0 %vm12213_vm0, %v12212_v1  ;;  %10609 = vmatpush3.msra.mxu0 %v4336_v19  ;;  %v9893_v19 = vld [vmem:[#allocation23] ss:$0 sm:$0xff] }
0x23e9   : > { %10618 = vmatprep.subr.mxu0 %v12212_v1 }
0x24a3   : > { %v4825_v61 = vpop.f32.mrf.mxu0 }
0x24a4   : > { %10596 = vmatmul.mubr.msk.f32.vlgmr.msra.gmra.mxu1 %vm1725_vm3, %v4825_v61 }
0x24a5   : > { %10604 = vmatpush3.msra.mxu1 %v4994_v62  ;;  %v10592_v63 = vpop.f32.mrf.mxu0  ;;  %10605 = vmatprep.mubr.msk.f32.mxu1 %vm12213_vm0, %v12212_v1  ;;  %v5416_v62 = vld [vmem:[%s13830_s9 + $0x18] sm:$0xff] }
0x24a6   : > { %10613 = vmatprep.subr.mxu1 %v12212_v1 }
0x24a7   : > { %v4977_v0 = vpop.f32.mrf.mxu0 }
0x24a8   : > { %v4981_v2 = vmul.f32 0.35355338, %v4977_v0 }
0x24a9   : > { %v10602_v3 = vpop.f32.mrf.mxu0 }
0x24aa   : > { %v4982_v22 = vsel %vm1725_vm3, %v4981_v2, -inf }
0x24ab   : > { %4983 = vmax.xlane.f32.xlu1 %v4982_v22 }
0x2534   : > { %v4984_v24 = vpop.xlane.xlu1 %4983 }
0x2535   : > { %v4985_v28 = vsub.f32 %v4981_v2, %v4984_v24 }
0x2537   : > { %v4986_v4 = vmul.f32 1.442695, %v4985_v28 }
0x2539   : > { %11318 = vpow2.f32 %v4986_v4 }
0x2546   : > { %v11319_v5 = vpop.eup %11318 }
0x2547   : > { %v4988_v6 = vsel %vm1725_vm3, %v11319_v5, 0.0 }
0x2548   : > { %4989 = vadd.xlane.f32.xlu0 %v4988_v6 }
0x255e   : > { %5145 = vrot.lane.b32.xlu0 %v13120_v17, %s13817_s7 }
0x2562   : > { %5143 = vrot.lane.b32.xlu0 %v13120_v17, %s13818_s2 }
0x2564   : > { %v4898_v9 = vpop.f32.mrf.mxu1 }
0x2565   : > { %v4902_v10 = vadd.f32 %v4898_v9, %v4662_v8  ;;  %v5414_v8 = vld [vmem:[%s13830_s9 + $0x8] sm:$0xff] }
0x2566   : > { %v10597_v11 = vpop.f32.mrf.mxu1 }
0x25d1   : > { %v4990_v13 = vpop.xlane.xlu0 %4989 }
0x25d2   : > { %11320 = vrcp.f32 %v4990_v13 }
0x25d5   : > { %v5146_v15 = vpop.permute.xlu0 %5145 }
0x25d9   : > { %v5144_v18 = vpop.permute.xlu0 %5143 }
0x25df   : > { %v11321_v14 = vpop.eup %11320 }
0x25e0   : > { %v4992_v16 = vmul.f32 %v11321_v14, %v11319_v5 }
0x25e2   : > { %10606 = vmatmul.mubr.msk.f32.vlgmr.msra.gmra.mxu1 %vm1725_vm3, %v4992_v16 }
0x25e3   : > { %10614 = vmatpush3.xpose.msk.msra.mxu1 %vm1725_vm3, %v5146_v15  ;;  %10615 = vmatprep.mubr.msk.f32.mxu1 %vm12213_vm0, %v12212_v1 }
0x25e4   : > { %10623 = vmatprep.subr.mxu1 %v12212_v1 }
0x25e6   : > { %10616 = vmatmul.mubr.msk.f32.vlgmr.msra.gmra.mxu1 %vm1725_vm3, %v5144_v18 }
0x25e7   : > { %10625 = vmatprep.mubr.msk.f32.mxu1 %vm12213_vm0, %v12212_v1  ;;  %10624 = vmatpush3.msra.mxu1 %v4337_v48 }
0x25e8   : > { %10639 = vmatprep.subr.mxu1 %v12212_v1 }
0x26a2   : > { %v5065_v20 = vpop.f32.mrf.mxu1 }
0x26a3   : > { %10611 = vmatmul.mubr.msk.f32.vlgmr.msra.gmra.mxu0 %vm1725_vm3, %v5065_v20 }
0x26a4   : > { %v10607_v21 = vpop.f32.mrf.mxu1  ;;  %10620 = vmatprep.mubr.msk.f32.mxu0 %vm12213_vm0, %v12212_v1 }
0x26a6   : > { %v5217_v23 = vpop.f32.mrf.mxu1 }
0x26a7   : > { %v5221_v25 = vmul.f32 0.35355338, %v5217_v23 }
0x26a8   : > { %v10617_v26 = vpop.f32.mrf.mxu1 }
0x26a9   : > { %v5222_v27 = vsel %vm1725_vm3, %v5221_v25, -inf  ;;  %v9868_v26 = vld [vmem:[%s13831_s12] ss:$0 sm:$0xff]  ;;  %s13832_s12 = sld [smem:[#allocation76_spill]] }
0x26aa   : > { %5223 = vmax.xlane.f32.xlu0 %v5222_v27 }
0x2733   : > { %v5224_v29 = vpop.xlane.xlu0 %5223 }
0x2734   : > { %v5225_v30 = vsub.f32 %v5221_v25, %v5224_v29 }
0x2736   : > { %v5226_v53 = vmul.f32 1.442695, %v5225_v30 }
0x2738   : > { %11322 = vpow2.f32 %v5226_v53 }
0x2745   : > { %v11323_v31 = vpop.eup %11322 }
0x2746   : > { %v5228_v33 = vsel %vm1725_vm3, %v11323_v31, 0.0 }
0x2747   : > { %5229 = vadd.xlane.f32.xlu1 %v5228_v33 }
0x2758   : > { %5233 = vrot.lane.b32.xlu1 %v13120_v17, %s13819_s11 }
0x2763   : > { %v5138_v34 = vpop.f32.mrf.mxu0 }
0x2764   : > { %v5142_v35 = vadd.f32 %v5138_v34, %v4902_v10 }
0x2765   : > { %v10612_v36 = vpop.f32.mrf.mxu0 }
0x277c   : > { %4196 = vadd.xlane.f32.xlu1 %v4195_v40 }
0x278d   : > { %5510 = vrot.lane.b32.xlu1 %v5415_v7, %s13823_s8 }
0x27d0   : > { %v5230_v41 = vpop.xlane.xlu1 %5229 }
0x27d1   : > { %11324 = vrcp.f32 %v5230_v41 }
0x27d4   : > { %v5234_v42 = vpop.permute.xlu1 %5233 }
0x27d5   : > { %10619 = vmatpush3.msra.mxu0 %v5234_v42 }
0x27d6   : > { %10628 = vmatprep.subr.mxu0 %v12212_v1 }
0x27de   : > { %v11325_v43 = vpop.eup %11324 }
0x27df   : > { %v5232_v17 = vmul.f32 %v11325_v43, %v11323_v31  ;;  %v9869_v31 = vld [vmem:[#allocation16] ss:$0 sm:$0xff] }
0x27e1   : > { %10621 = vmatmul.mubr.msk.f32.vlgmr.msra.gmra.mxu0 %vm1725_vm3, %v5232_v17 }
0x27e2   : > { %10636 = vmatprep.mubr.msk.f32.mxu0 %vm12213_vm0, %v12212_v1  ;;  %10629 = vmatpush3.msra.mxu0 %v5416_v62 }
0x27e3   : > { %10630 = vmatprep.subr.mxu0 %v12212_v1 }
0x27e4   : > { %10631 = vmatpush3.msra.mxu0 %v5415_v7 }
0x27e5   : > { %10632 = vmatprep.subr.mxu0 %v12212_v1 }
0x27e6   : > { %10633 = vmatpush3.msra.mxu0 %v5414_v8 }
0x27e7   : > { %10634 = vmatprep.subr.mxu0 %v12212_v1 }
0x2805   : > { %v4197_v56 = vpop.xlane.xlu1 %4196 }
0x2806   : > { %v4198_v44 = vmul.f32 0.03125, %v4197_v56 }
0x2808   : > { %v4199_v46 = vsub.f32 %v4190_v39, %v4198_v44  ;;  %v9892_v39 = vld [vmem:[#allocation22] ss:$0 sm:$0xff] }
0x2809   : > { %v5511_v18 = vpop.permute.xlu1 %5510 }
0x280a   : > { %v4200_v45 = vmul.f32 %v4199_v46, %v4199_v46 }
0x280c   : > { %v4201_v47 = vsel %vm1648_vm2, %v4200_v45, 0.0 }
0x280d   : > { %4202 = vadd.xlane.f32.xlu0 %v4201_v47 }
0x2896   : > { %v4203_v49 = vpop.xlane.xlu0 %4202 }
0x2897   : > { %v4204_v50 = vmul.f32 0.03125, %v4203_v49 }
0x2899   : > { %v4205_v32 = vadd.f32 1e-05, %v4204_v50 }
0x289b   : > { %11326 = vrsqrt.f32 %v4205_v32 }
0x28a1   : > { %v5305_v51 = vpop.f32.mrf.mxu0 }
0x28a2   : > { %10626 = vmatmul.mubr.msk.f32.vlgmr.msra.gmra.mxu1 %vm1725_vm3, %v5305_v51 }
0x28a3   : > { %v10622_v52 = vpop.f32.mrf.mxu0  ;;  %10647 = vmatprep.mubr.msk.f32.mxu1 %vm12213_vm0, %v12212_v1 }
0x28a8   : > { %v11327_v54 = vpop.eup %11326 }
0x28a9   : > { %v4207_v57 = vmul.f32 %v11327_v54, %v4199_v46 }
0x28ab   : > { %v4214_v59 = vmul.f32 %v9866_v55, %v4207_v57 }
0x28ad   : > { %v4221_v60 = vadd.f32 %v9867_v58, %v4214_v59 }
0x28af   : > { %v4224_v61 = vsel %vm1648_vm2, %v4221_v60, 0.0 }
0x28b0   : > { %4225 = vadd.xlane.f32.xlu0 %v4224_v61 }
0x2939   : > { %v4226_v63 = vpop.xlane.xlu0 %4225 }
0x293a   : > { %v4227_v0 = vmul.f32 0.03125, %v4226_v63  ;;  %v5418_v63 = vld [vmem:[%s13832_s12] sm:$0xff] }
0x293c   : > { %v4228_v3 = vsub.f32 %v4221_v60, %v4227_v0 }
0x293e   : > { %v4229_v5 = vmul.f32 %v4228_v3, %v4228_v3 }
0x2940   : > { %v4230_v6 = vsel %vm1648_vm2, %v4229_v5, 0.0 }
0x2962   : > { %v5378_v2 = vpop.f32.mrf.mxu1 }
0x2963   : > { %v5382_v22 = vadd.f32 %v5378_v2, %v5142_v35 }
0x2964   : > { %v10627_v24 = vpop.f32.mrf.mxu1 }
0x2965   : > { %v5383_v28 = vadd.f32 %v5382_v22, %v13112_v12  ;;  %v5413_v12 = vld [vmem:[%s13830_s9] sm:$0xff] }
0x2966   : > { %5506 = vrot.lane.b32.xlu1 %v5413_v12, %s13823_s8  ;;  %10635 = vmatpush3.msra.mxu0 %v5413_v12 }
0x2967   : > { %v5386_v4 = vsel %vm1648_vm2, %v5383_v28, 0.0  ;;  %10650 = vmatprep.subr.mxu0 %v12212_v1 }
0x2968   : > { %5387 = vadd.xlane.f32.xlu0 %v5386_v4 }
0x296c   : > { %4231 = vadd.xlane.f32.xlu0 %v4230_v6 }
0x2982   : > { %5512 = vrot.lane.b32.xlu0 %v5416_v62, %s13823_s8 }
0x29d8   : > { %v5507_v34 = vpop.permute.xlu1 %5506 }
0x29f1   : > { %v5388_v9 = vpop.xlane.xlu0 %5387 }
0x29f2   : > { %v5389_v10 = vmul.f32 0.03125, %v5388_v9 }
0x29f4   : > { %v5390_v11 = vsub.f32 %v5383_v28, %v5389_v10 }
0x29f5   : > { %v4232_v13 = vpop.xlane.xlu0 %4231 }
0x29f6   : > { %v5391_v14 = vmul.f32 %v5390_v11, %v5390_v11  ;;  %v4233_v20 = vmul.f32 0.03125, %v4232_v13 }
0x29f8   : > { %v5392_v15 = vsel %vm1648_vm2, %v5391_v14, 0.0  ;;  %v4234_v21 = vadd.f32 1e-05, %v4233_v20 }
0x29f9   : > { %5393 = vadd.xlane.f32.xlu0 %v5392_v15  ;;  %v5513_v16 = vpop.permute.xlu0 %5512 }
0x29fa   : > { %10640 = vmatpush3.msra.mxu1 %v5513_v16  ;;  %11328 = vrsqrt.f32 %v4234_v21 }
0x29fb   : > { %10641 = vmatprep.subr.mxu1 %v12212_v1 }
0x29fc   : > { %10642 = vmatpush3.msra.mxu1 %v5511_v18  ;;  %v5419_v18 = vld [vmem:[%s13832_s12 + $0x8] sm:$0xff] }
0x29fd   : > { %10643 = vmatprep.subr.mxu1 %v12212_v1 }
0x2a07   : > { %v11329_v23 = vpop.eup %11328 }
0x2a08   : > { %v4236_v25 = vmul.f32 %v11329_v23, %v4228_v3 }
0x2a0a   : > { %v4243_v30 = vmul.f32 %v9868_v26, %v4236_v25 }
0x2a0c   : > { %v13235_v35 = vadd.f32 %v9869_v31, %v4243_v30 }
0x2a0f   : > { %5508 = vrot.lane.b32.xlu0 %v5414_v8, %s13823_s8 }
0x2a13   : > { %5518 = vrot.lane.b32.xlu0 %v9893_v19, %s13823_s8 }
0x2a82   : > { %v5394_v27 = vpop.xlane.xlu0 %5393 }
0x2a83   : > { %v5395_v29 = vmul.f32 0.03125, %v5394_v27 }
0x2a85   : > { %v5396_v53 = vadd.f32 1e-05, %v5395_v29 }
0x2a86   : > { %v5509_v33 = vpop.permute.xlu0 %5508 }
0x2a87   : > { %11330 = vrsqrt.f32 %v5396_v53  ;;  %10644 = vmatpush3.msra.mxu1 %v5509_v33  ;;  %v9900_v33 = vld [vmem:[#allocation25] ss:$0 sm:$0xff] }
0x2a88   : > { %10645 = vmatprep.subr.mxu1 %v12212_v1 }
0x2a89   : > { %10646 = vmatpush3.msra.mxu1 %v5507_v34 }
0x2a8a   : > { %10648 = vmatmul.mubr.msk.f32.vlgmr.msra.gmra.mxu1 %vm1648_vm2, %v13235_v35  ;;  %10655 = vmatprep.subr.mxu1 %v12212_v1  ;;  %v5519_v42 = vpop.permute.xlu0 %5518 }
0x2a8b   : > { %10657 = vmatprep.mubr.msk.f32.mxu1 %vm12213_vm0, %v12212_v1 }
0x2a94   : > { %v11331_v36 = vpop.eup %11330 }
0x2a95   : > { %v5398_v38 = vmul.f32 %v11331_v36, %v5390_v11 }
0x2a97   : > { %v5405_v40 = vmul.f32 %v9891_v37, %v5398_v38 }
0x2a99   : > { %v13242_v41 = vadd.f32 %v9892_v39, %v5405_v40 }
0x2a9b   : > { %10637 = vmatmul.mubr.msk.f32.vlgmr.msra.gmra.mxu0 %vm1648_vm2, %v13242_v41 }
0x2a9c   : > { %10652 = vmatprep.mubr.msk.f32.mxu0 %vm12213_vm0, %v12212_v1 }
0x2b4a   : > { %v5590_v43 = vpop.f32.mrf.mxu1 }
0x2b4b   : > { %v13248_v17 = vadd.f32 %v5590_v43, %v5519_v42 }
0x2b4c   : > { %v10649_v56 = vpop.f32.mrf.mxu1 }
0x2b4d   : > { %10651 = vmatpush3.xpose.msk.msra.mxu0 %vm1725_vm3, %v13248_v17 }
0x2b4e   : > { %10660 = vmatprep.subr.mxu0 %v12212_v1 }
0x2b5b   : > { %v5498_v44 = vpop.f32.mrf.mxu0 }
0x2b5c   : > { %v13253_v46 = vadd.f32 %v9893_v19, %v5498_v44 }
0x2b5d   : > { %v10638_v45 = vpop.f32.mrf.mxu0 }
0x2b5e   : > { %10653 = vmatmul.mubr.msk.f32.vlgmr.msra.gmra.mxu0 %vm1725_vm3, %v13253_v46 }
0x2b5f   : > { %10662 = vmatprep.mubr.msk.f32.mxu0 %vm12213_vm0, %v12212_v1  ;;  %10661 = vmatpush3.msra.mxu0 %v5418_v63 }
0x2b60   : > { %10670 = vmatprep.subr.mxu0 %v12212_v1 }
0x2c1e   : > { %v5666_v47 = vpop.f32.mrf.mxu0 }
0x2c1f   : > { %v5670_v48 = vmul.f32 0.35355338, %v5666_v47 }
0x2c20   : > { %v10654_v49 = vpop.f32.mrf.mxu0 }
0x2c21   : > { %v5671_v50 = vsel %vm1725_vm3, %v5670_v48, -inf }
0x2c22   : > { %5672 = vmax.xlane.f32.xlu1 %v5671_v50 }
0x2c33   : > { %5840 = vrot.lane.b32.xlu1 %v13248_v17, %s13829_s5 }
0x2c37   : > { %5838 = vrot.lane.b32.xlu1 %v13253_v46, %s13829_s5 }
0x2cab   : > { %v5673_v32 = vpop.xlane.xlu1 %5672 }
0x2cac   : > { %v5674_v51 = vsub.f32 %v5670_v48, %v5673_v32 }
0x2cae   : > { %v5675_v52 = vmul.f32 1.442695, %v5674_v51 }
0x2caf   : > { %v5841_v60 = vpop.permute.xlu1 %5840 }
0x2cb0   : > { %11332 = vpow2.f32 %v5675_v52 }
0x2cb3   : > { %v5839_v62 = vpop.permute.xlu1 %5838 }
0x2cbd   : > { %v11333_v54 = vpop.eup %11332 }
0x2cbe   : > { %v5677_v55 = vsel %vm1725_vm3, %v11333_v54, 0.0 }
0x2cbf   : > { %5678 = vadd.xlane.f32.xlu0 %v5677_v55 }
0x2cd5   : > { %5682 = vrot.lane.b32.xlu0 %v13248_v17, %s13823_s8 }
0x2d48   : > { %v5679_v57 = vpop.xlane.xlu0 %5678 }
0x2d49   : > { %11334 = vrcp.f32 %v5679_v57 }
0x2d4c   : > { %v5683_v58 = vpop.permute.xlu0 %5682 }
0x2d4d   : > { %10656 = vmatpush3.msra.mxu1 %v5683_v58 }
0x2d4e   : > { %10665 = vmatprep.subr.mxu1 %v12212_v1 }
0x2d56   : > { %v11335_v59 = vpop.eup %11334 }
0x2d57   : > { %v5681_v61 = vmul.f32 %v11335_v59, %v11333_v54  ;;  %v5421_v59 = vld [vmem:[%s13832_s12 + $0x18] sm:$0xff] }
0x2d59   : > { %10658 = vmatmul.mubr.msk.f32.vlgmr.msra.gmra.mxu1 %vm1725_vm3, %v5681_v61 }
0x2d5a   : > { %10666 = vmatpush3.xpose.msk.msra.mxu1 %vm1725_vm3, %v5841_v60  ;;  %10667 = vmatprep.mubr.msk.f32.mxu1 %vm12213_vm0, %v12212_v1 }
0x2d5b   : > { %10675 = vmatprep.subr.mxu1 %v12212_v1 }
0x2d5d   : > { %10668 = vmatmul.mubr.msk.f32.vlgmr.msra.gmra.mxu1 %vm1725_vm3, %v5839_v62 }
0x2d5e   : > { %10677 = vmatprep.mubr.msk.f32.mxu1 %vm12213_vm0, %v12212_v1  ;;  %10676 = vmatpush3.msra.mxu1 %v5419_v18  ;;  %v6597_v18 = vld [vmem:[%s13834_s14 + $0x20] sm:$0xff] }
0x2d5f   : > { %10685 = vmatprep.subr.mxu1 %v12212_v1 }
0x2e19   : > { %v5754_v0 = vpop.f32.mrf.mxu1 }
0x2e1a   : > { %10663 = vmatmul.mubr.msk.f32.vlgmr.msra.gmra.mxu0 %vm1725_vm3, %v5754_v0 }
0x2e1b   : > { %v10659_v2 = vpop.f32.mrf.mxu1  ;;  %10672 = vmatprep.mubr.msk.f32.mxu0 %vm12213_vm0, %v12212_v1 }
0x2e1d   : > { %v5912_v3 = vpop.f32.mrf.mxu1 }
0x2e1e   : > { %v5916_v22 = vmul.f32 0.35355338, %v5912_v3 }
0x2e1f   : > { %v10669_v24 = vpop.f32.mrf.mxu1 }
0x2e20   : > { %v5917_v28 = vsel %vm1725_vm3, %v5916_v22, -inf }
0x2e21   : > { %5918 = vmax.xlane.f32.xlu0 %v5917_v28 }
0x2e37   : > { %5928 = vrot.lane.b32.xlu0 %v13248_v17, %s13828_s4 }
0x2e3b   : > { %6078 = vrot.lane.b32.xlu0 %v13253_v46, %s13815_s22 }
0x2eaa   : > { %v5919_v4 = vpop.xlane.xlu0 %5918 }
0x2eab   : > { %v5920_v5 = vsub.f32 %v5916_v22, %v5919_v4 }
0x2ead   : > { %v5921_v6 = vmul.f32 1.442695, %v5920_v5 }
0x2eae   : > { %v5929_v7 = vpop.permute.xlu0 %5928 }
0x2eaf   : > { %11336 = vpow2.f32 %v5921_v6  ;;  %10671 = vmatpush3.msra.mxu0 %v5929_v7 }
0x2eb0   : > { %10680 = vmatprep.subr.mxu0 %v12212_v1 }
0x2eb2   : > { %v6079_v16 = vpop.permute.xlu0 %6078 }
0x2ebc   : > { %v11337_v8 = vpop.eup %11336 }
0x2ebd   : > { %v5923_v12 = vsel %vm1725_vm3, %v11337_v8, 0.0 }
0x2ebe   : > { %5924 = vadd.xlane.f32.xlu1 %v5923_v12 }
0x2ecf   : > { %6080 = vrot.lane.b32.xlu1 %v13248_v17, %s13815_s22 }
0x2eda   : > { %v5827_v9 = vpop.f32.mrf.mxu0 }
0x2edb   : > { %v5837_v34 = vadd.f32 %v9900_v33, %v5827_v9  ;;  %v6594_v33 = vld [vmem:[%s13834_s14 + $0x8] sm:$0xff] }
0x2edc   : > { %v10664_v10 = vpop.f32.mrf.mxu0 }
0x2edd   : > { %v6591_v10 = vld [vmem:[%s13833_s13 + $0x18] sm:$0xff] }
0x2f47   : > { %v5925_v11 = vpop.xlane.xlu1 %5924 }
0x2f48   : > { %11338 = vrcp.f32 %v5925_v11  ;;  %v6590_v11 = vld [vmem:[%s13833_s13 + $0x10] sm:$0xff] }
0x2f4b   : > { %v6081_v15 = vpop.permute.xlu1 %6080 }
0x2f55   : > { %v11339_v13 = vpop.eup %11338 }
0x2f56   : > { %v5927_v14 = vmul.f32 %v11339_v13, %v11337_v8  ;;  %v6588_v13 = vld [vmem:[%s13833_s13] sm:$0xff] }
0x2f58   : > { %10673 = vmatmul.mubr.msk.f32.vlgmr.msra.gmra.mxu0 %vm1725_vm3, %v5927_v14  ;;  %v6600_v14 = vld [vmem:[%s13834_s14 + $0x38] sm:$0xff] }
0x2f59   : > { %10681 = vmatpush3.xpose.msk.msra.mxu0 %vm1725_vm3, %v6081_v15  ;;  %10682 = vmatprep.mubr.msk.f32.mxu0 %vm12213_vm0, %v12212_v1  ;;  %v6599_v15 = vld [vmem:[%s13834_s14 + $0x30] sm:$0xff] }
0x2f5a   : > { %10690 = vmatprep.subr.mxu0 %v12212_v1 }
0x2f5c   : > { %10683 = vmatmul.mubr.msk.f32.vlgmr.msra.gmra.mxu0 %vm1725_vm3, %v6079_v16  ;;  %v6598_v16 = vld [vmem:[%s13834_s14 + $0x28] sm:$0xff] }
0x2f5d   : > { %10692 = vmatprep.mubr.msk.f32.mxu0 %vm12213_vm0, %v12212_v1 }
0x3018   : > { %v6000_v19 = vpop.f32.mrf.mxu0 }
0x3019   : > { %10678 = vmatmul.mubr.msk.f32.vlgmr.msra.gmra.mxu1 %vm1725_vm3, %v6000_v19  ;;  %v6596_v19 = vld [vmem:[%s13834_s14 + $0x18] sm:$0xff] }
0x301a   : > { %v10674_v20 = vpop.f32.mrf.mxu0  ;;  %10687 = vmatprep.mubr.msk.f32.mxu1 %vm12213_vm0, %v12212_v1 }
0x301c   : > { %v6152_v21 = vpop.f32.mrf.mxu0 }
0x301d   : > { %v6156_v23 = vmul.f32 0.35355338, %v6152_v21 }
0x301e   : > { %v10684_v25 = vpop.f32.mrf.mxu0 }
0x301f   : > { %v6157_v26 = vsel %vm1725_vm3, %v6156_v23, -inf }
0x3020   : > { %6158 = vmax.xlane.f32.xlu1 %v6157_v26  ;;  %v9913_v26 = vld [vmem:[#allocation26] ss:$0 sm:$0xff] }
0x3031   : > { %6320 = vrot.lane.b32.xlu1 %v13248_v17, %s13818_s2 }
0x3035   : > { %6318 = vrot.lane.b32.xlu1 %v13253_v46, %s13818_s2  ;;  %v5420_v46 = vld [vmem:[%s13832_s12 + $0x10] sm:$0xff] }
0x3036   : > { %10691 = vmatpush3.msra.mxu0 %v5420_v46 }
0x3037   : > { %10700 = vmatprep.subr.mxu0 %v12212_v1 }
0x30a9   : > { %v6159_v27 = vpop.xlane.xlu1 %6158 }
0x30aa   : > { %v6160_v29 = vsub.f32 %v6156_v23, %v6159_v27 }
0x30ac   : > { %v6161_v30 = vmul.f32 1.442695, %v6160_v29  ;;  %v9914_v29 = vld [vmem:[#allocation28] ss:$0 sm:$0xff] }
0x30ad   : > { %v6321_v43 = vpop.permute.xlu1 %6320 }
0x30ae   : > { %11340 = vpow2.f32 %v6161_v30 }
0x30b1   : > { %v6319_v44 = vpop.permute.xlu1 %6318 }
0x30bb   : > { %v11341_v53 = vpop.eup %11340 }
0x30bc   : > { %v6163_v31 = vsel %vm1725_vm3, %v11341_v53, 0.0 }
0x30bd   : > { %6164 = vadd.xlane.f32.xlu0 %v6163_v31  ;;  %v6595_v31 = vld [vmem:[%s13834_s14 + $0x10] sm:$0xff] }
0x30d3   : > { %6168 = vrot.lane.b32.xlu0 %v13248_v17, %s13825_s0 }
0x30d9   : > { %v6073_v36 = vpop.f32.mrf.mxu1 }
0x30da   : > { %v6077_v37 = vadd.f32 %v6073_v36, %v5837_v34  ;;  %v6593_v34 = vld [vmem:[%s13834_s14] sm:$0xff] }
0x30db   : > { %v10679_v38 = vpop.f32.mrf.mxu1  ;;  %v9915_v36 = vld [vmem:[#allocation29] ss:$0 sm:$0xff] }
0x3146   : > { %v6165_v39 = vpop.xlane.xlu0 %6164 }
0x3147   : > { %11342 = vrcp.f32 %v6165_v39 }
0x314a   : > { %v6169_v40 = vpop.permute.xlu0 %6168 }
0x314b   : > { %10686 = vmatpush3.msra.mxu1 %v6169_v40 }
0x314c   : > { %10695 = vmatprep.subr.mxu1 %v12212_v1 }
0x3154   : > { %v11343_v42 = vpop.eup %11342 }
0x3155   : > { %v6167_v56 = vmul.f32 %v11343_v42, %v11341_v53  ;;  %v9917_v42 = vld [vmem:[#allocation31] ss:$0 sm:$0xff] }
0x3157   : > { %10688 = vmatmul.mubr.msk.f32.vlgmr.msra.gmra.mxu1 %vm1725_vm3, %v6167_v56 }
0x3158   : > { %10696 = vmatpush3.xpose.msk.msra.mxu1 %vm1725_vm3, %v6321_v43  ;;  %10697 = vmatprep.mubr.msk.f32.mxu1 %vm12213_vm0, %v12212_v1 }
0x3159   : > { %10705 = vmatprep.subr.mxu1 %v12212_v1 }
0x315b   : > { %10698 = vmatmul.mubr.msk.f32.vlgmr.msra.gmra.mxu1 %vm1725_vm3, %v6319_v44 }
0x315c   : > { %10707 = vmatprep.mubr.msk.f32.mxu1 %vm12213_vm0, %v12212_v1  ;;  %10706 = vmatpush3.msra.mxu1 %v5421_v59 }
0x315d   : > { %10721 = vmatprep.subr.mxu1 %v12212_v1 }
0x3217   : > { %v6240_v45 = vpop.f32.mrf.mxu1 }
0x3218   : > { %10693 = vmatmul.mubr.msk.f32.vlgmr.msra.gmra.mxu0 %vm1725_vm3, %v6240_v45 }
0x3219   : > { %v10689_v47 = vpop.f32.mrf.mxu1  ;;  %10702 = vmatprep.mubr.msk.f32.mxu0 %vm12213_vm0, %v12212_v1 }
0x321b   : > { %v6392_v48 = vpop.f32.mrf.mxu1 }
0x321c   : > { %v6396_v49 = vmul.f32 0.35355338, %v6392_v48 }
0x321d   : > { %v10699_v50 = vpop.f32.mrf.mxu1 }
0x321e   : > { %v6397_v32 = vsel %vm1725_vm3, %v6396_v49, -inf }
0x321f   : > { %6398 = vmax.xlane.f32.xlu0 %v6397_v32 }
0x3235   : > { %6408 = vrot.lane.b32.xlu0 %v13248_v17, %s13817_s7 }
0x32a8   : > { %v6399_v51 = vpop.xlane.xlu0 %6398 }
0x32a9   : > { %v6400_v52 = vsub.f32 %v6396_v49, %v6399_v51  ;;  %v9924_v51 = vld [vmem:[%s13822_s10 + $0x38] sm:$0xff] }
0x32ab   : > { %v6401_v54 = vmul.f32 1.442695, %v6400_v52  ;;  %v9923_v52 = vld [vmem:[%s13822_s10 + $0x30] sm:$0xff] }
0x32ac   : > { %v6409_v55 = vpop.permute.xlu0 %6408 }
0x32ad   : > { %11344 = vpow2.f32 %v6401_v54  ;;  %10701 = vmatpush3.msra.mxu0 %v6409_v55  ;;  %v9922_v54 = vld [vmem:[%s13822_s10 + $0x28] sm:$0xff]  ;;  %v9921_v55 = vld [vmem:[%s13822_s10 + $0x20] sm:$0xff] }
0x32ae   : > { %10710 = vmatprep.subr.mxu0 %v12212_v1 }
0x32ba   : > { %v11345_v57 = vpop.eup %11344 }
0x32bb   : > { %v6403_v58 = vsel %vm1725_vm3, %v11345_v57, 0.0 }
0x32bc   : > { %6404 = vadd.xlane.f32.xlu1 %v6403_v58 }
0x32d8   : > { %v6313_v60 = vpop.f32.mrf.mxu0 }
0x32d9   : > { %v6317_v61 = vadd.f32 %v6313_v60, %v6077_v37 }
0x32da   : > { %v10694_v62 = vpop.f32.mrf.mxu0 }
0x3345   : > { %v6405_v17 = vpop.xlane.xlu1 %6404 }
0x3346   : > { %11346 = vrcp.f32 %v6405_v17  ;;  %v9920_v17 = vld [vmem:[#allocation34] ss:$0 sm:$0xff] }
0x3353   : > { %v11347_v63 = vpop.eup %11346 }
0x3354   : > { %v6407_v0 = vmul.f32 %v11347_v63, %v11345_v57 }
0x3356   : > { %10703 = vmatmul.mubr.msk.f32.vlgmr.msra.gmra.mxu0 %vm1725_vm3, %v6407_v0 }
0x3357   : > { %10718 = vmatprep.mubr.msk.f32.mxu0 %vm12213_vm0, %v12212_v1  ;;  %10711 = vmatpush3.msra.mxu0 %v6591_v10 }
0x3358   : > { %10712 = vmatprep.subr.mxu0 %v12212_v1 }
0x3359   : > { %10713 = vmatpush3.msra.mxu0 %v6590_v11 }
0x335a   : > { %10714 = vmatprep.subr.mxu0 %v12212_v1 }
0x3416   : > { %v6480_v2 = vpop.f32.mrf.mxu0 }
0x3417   : > { %10708 = vmatmul.mubr.msk.f32.vlgmr.msra.gmra.mxu1 %vm1725_vm3, %v6480_v2  ;;  %v9929_v2 = vld [vmem:[#allocation17 + $0x1] ss:$0 sm:$0xff] }
0x3418   : > { %v10704_v3 = vpop.f32.mrf.mxu0  ;;  %10737 = vmatprep.mubr.msk.f32.mxu1 %vm12213_vm0, %v12212_v1  ;;  %10722 = vmatpush3.msra.mxu1 %v6600_v14 }
0x3419   : > { %10723 = vmatprep.subr.mxu1 %v12212_v1 }
0x341a   : > { %10724 = vmatpush3.msra.mxu1 %v6599_v15 }
0x341b   : > { %10725 = vmatprep.subr.mxu1 %v12212_v1 }
0x341c   : > { %10726 = vmatpush3.msra.mxu1 %v6598_v16 }
0x341d   : > { %10727 = vmatprep.subr.mxu1 %v12212_v1 }
0x341e   : > { %10728 = vmatpush3.msra.mxu1 %v6597_v18 }
0x341f   : > { %10729 = vmatprep.subr.mxu1 %v12212_v1 }
0x3420   : > { %10730 = vmatpush3.msra.mxu1 %v6596_v19 }
0x3421   : > { %10731 = vmatprep.subr.mxu1 %v12212_v1 }
0x3422   : > { %10732 = vmatpush3.msra.mxu1 %v6595_v31 }
0x3423   : > { %10733 = vmatprep.subr.mxu1 %v12212_v1 }
0x3424   : > { %10734 = vmatpush3.msra.mxu1 %v6594_v33 }
0x3425   : > { %10735 = vmatprep.subr.mxu1 %v12212_v1 }
0x3426   : > { %10736 = vmatpush3.msra.mxu1 %v6593_v34 }
0x3427   : > { %10756 = vmatprep.subr.mxu1 %v12212_v1 }
0x34d7   : > { %v6553_v22 = vpop.f32.mrf.mxu1 }
0x34d8   : > { %v6557_v24 = vadd.f32 %v6553_v22, %v6317_v61  ;;  %v9919_v61 = vld [vmem:[#allocation32] ss:$0 sm:$0xff] }
0x34d9   : > { %v10709_v28 = vpop.f32.mrf.mxu1 }
0x34da   : > { %v6558_v4 = vadd.f32 %v6557_v24, %v13242_v41  ;;  %v6589_v41 = vld [vmem:[%s13833_s13 + $0x8] sm:$0xff] }
0x34db   : > { %10715 = vmatpush3.msra.mxu0 %v6589_v41 }
0x34dc   : > { %v6561_v5 = vsel %vm1648_vm2, %v6558_v4, 0.0  ;;  %10716 = vmatprep.subr.mxu0 %v12212_v1 }
0x34dd   : > { %6562 = vadd.xlane.f32.xlu1 %v6561_v5  ;;  %10717 = vmatpush3.msra.mxu0 %v6588_v13  ;;  %v9925_v13 = vld [vmem:[%s13826_s1 + $0x20] sm:$0xff] }
0x34de   : > { %10740 = vmatprep.subr.mxu0 %v12212_v1 }
0x3566   : > { %v6563_v6 = vpop.xlane.xlu1 %6562 }
0x3567   : > { %v6564_v7 = vmul.f32 0.03125, %v6563_v6 }
0x3569   : > { %v6565_v8 = vsub.f32 %v6558_v4, %v6564_v7 }
0x356b   : > { %v6566_v12 = vmul.f32 %v6565_v8, %v6565_v8 }
0x356d   : > { %v6567_v9 = vsel %vm1648_vm2, %v6566_v12, 0.0 }
0x356e   : > { %6568 = vadd.xlane.f32.xlu1 %v6567_v9 }
0x35f7   : > { %v6569_v20 = vpop.xlane.xlu1 %6568 }
0x35f8   : > { %v6570_v21 = vmul.f32 0.03125, %v6569_v20 }
0x35fa   : > { %v6571_v23 = vadd.f32 1e-05, %v6570_v21 }
0x35fc   : > { %11348 = vrsqrt.f32 %v6571_v23 }
0x3609   : > { %v11349_v25 = vpop.eup %11348 }
0x360a   : > { %v6573_v27 = vmul.f32 %v11349_v25, %v6565_v8 }
0x360c   : > { %v6580_v30 = vmul.f32 %v9913_v26, %v6573_v27 }
0x360e   : > { %v6587_v53 = vadd.f32 %v9914_v29, %v6580_v30 }
0x3610   : > { %10719 = vmatmul.mubr.msk.f32.vlgmr.msra.gmra.mxu0 %vm1648_vm2, %v6587_v53 }
0x3611   : > { %10748 = vmatprep.mubr.msk.f32.mxu0 %vm12213_vm0, %v12212_v1  ;;  %10741 = vmatpush3.msra.mxu0 %v9924_v51 }
0x3612   : > { %10742 = vmatprep.subr.mxu0 %v12212_v1 }
0x3613   : > { %10743 = vmatpush3.msra.mxu0 %v9923_v52 }
0x3614   : > { %10744 = vmatprep.subr.mxu0 %v12212_v1 }
0x3615   : > { %10745 = vmatpush3.msra.mxu0 %v9922_v54 }
0x3616   : > { %10746 = vmatprep.subr.mxu0 %v12212_v1 }
0x3617   : > { %10747 = vmatpush3.msra.mxu0 %v9921_v55 }
0x3618   : > { %10751 = vmatprep.subr.mxu0 %v12212_v1 }
0x36d0   : > { %v6677_v37 = vpop.f32.mrf.mxu0 }
0x36d1   : > { %v6678_v38 = vadd.f32 %v9915_v36, %v6677_v37 }
0x36d2   : > { %v10720_v39 = vpop.f32.mrf.mxu0 }
0x36d3   : > { %v6681_v40 = vmax.f32 %v6678_v38, 0.0 }
0x36d5   : > { %10738 = vmatmul.mubr.msk.f32.vlgmr.msra.gmra.mxu1 %vm2819_vm4, %v6681_v40 }
0x36d6   : > { %10758 = vmatprep.mubr.msk.f32.mxu1 %vm12213_vm0, %v12212_v1 }
0x3795   : > { %v6757_v43 = vpop.f32.mrf.mxu1 }
0x3796   : > { %v6758_v56 = vadd.f32 %v9917_v42, %v6757_v43 }
0x3797   : > { %v10739_v44 = vpop.f32.mrf.mxu1 }
0x3798   : > { %v6761_v46 = vadd.f32 %v6758_v56, %v6587_v53  ;;  %v9926_v56 = vld [vmem:[%s13826_s1 + $0x28] sm:$0xff] }
0x379a   : > { %v6764_v45 = vsel %vm1648_vm2, %v6761_v46, 0.0 }
0x379b   : > { %6765 = vadd.xlane.f32.xlu1 %v6764_v45 }
0x3824   : > { %v6766_v47 = vpop.xlane.xlu1 %6765 }
0x3825   : > { %v6767_v48 = vmul.f32 0.03125, %v6766_v47 }
0x3827   : > { %v6768_v49 = vsub.f32 %v6761_v46, %v6767_v48 }
0x3829   : > { %v6769_v50 = vmul.f32 %v6768_v49, %v6768_v49 }
0x382b   : > { %v6770_v32 = vsel %vm1648_vm2, %v6769_v50, 0.0 }
0x382c   : > { %6771 = vadd.xlane.f32.xlu1 %v6770_v32 }
0x38b5   : > { %v6772_v57 = vpop.xlane.xlu1 %6771 }
0x38b6   : > { %v6773_v58 = vmul.f32 0.03125, %v6772_v57  ;;  %v9935_v57 = vld [vmem:[#allocation19 + $0x1] ss:$0 sm:$0xff] }
0x38b8   : > { %v6774_v59 = vadd.f32 1e-05, %v6773_v58 }
0x38ba   : > { %11350 = vrsqrt.f32 %v6774_v59 }
0x38c7   : > { %v11351_v60 = vpop.eup %11350 }
0x38c8   : > { %v6776_v62 = vmul.f32 %v11351_v60, %v6768_v49 }
0x38ca   : > { %v6783_v63 = vmul.f32 %v9919_v61, %v6776_v62 }
0x38cc   : > { %v13381_v0 = vadd.f32 %v9920_v17, %v6783_v63 }
0x38ce   : > { %10749 = vmatmul.mubr.msk.f32.vlgmr.msra.gmra.mxu0 %vm1648_vm2, %v13381_v0 }
0x38cf   : > { %10753 = vmatprep.mubr.msk.f32.mxu0 %vm12213_vm0, %v12212_v1 }
0x398e   : > { %v6880_v3 = vpop.f32.mrf.mxu0 }
0x398f   : > { %v13387_v22 = vadd.f32 %v9929_v2, %v6880_v3 }
0x3990   : > { %v10750_v24 = vpop.f32.mrf.mxu0 }
0x3991   : > { %6885 = vrot.lane.b32.xlu0 %v13387_v22, %s13823_s8  ;;  %v9927_v24 = vld [vmem:[%s13826_s1 + $0x30] sm:$0xff] }
0x3a03   : > { %v6886_v28 = vpop.permute.xlu0 %6885 }
0x3a04   : > { %10752 = vmatpush3.xpose.msk.msra.mxu0 %vm1725_vm3, %v6886_v28 }
0x3a05   : > { %10761 = vmatprep.subr.mxu0 %v12212_v1 }
0x3a07   : > { %10754 = vmatmul.mubr.msk.f32.vlgmr.msra.gmra.mxu0 %vm1725_vm3, %v13387_v22 }
0x3a08   : > { %10763 = vmatprep.mubr.msk.f32.mxu0 %vm12213_vm0, %v12212_v1  ;;  %10762 = vmatpush3.msra.mxu0 %v9925_v13  ;;  %v9928_v13 = vld [vmem:[%s13826_s1 + $0x38] sm:$0xff] }
0x3a09   : > { %10771 = vmatprep.subr.mxu0 %v12212_v1 }
0x3ac7   : > { %v6957_v4 = vpop.f32.mrf.mxu0 }
0x3ac8   : > { %v6961_v5 = vmul.f32 0.35355338, %v6957_v4 }
0x3ac9   : > { %v10755_v6 = vpop.f32.mrf.mxu0 }
0x3aca   : > { %v6962_v7 = vsel %vm1725_vm3, %v6961_v5, -inf }
0x3acb   : > { %6963 = vmax.xlane.f32.xlu1 %v6962_v7 }
0x3adc   : > { %6973 = vrot.lane.b32.xlu1 %v13387_v22, %s13827_s3 }
0x3ae0   : > { %7131 = vrot.lane.b32.xlu1 %v13387_v22, %s13828_s4 }
0x3ae4   : > { %7129 = vrot.lane.b32.xlu1 %v13387_v22, %s13829_s5 }
0x3b54   : > { %v6964_v8 = vpop.xlane.xlu1 %6963 }
0x3b55   : > { %v6965_v12 = vsub.f32 %v6961_v5, %v6964_v8 }
0x3b57   : > { %v6966_v9 = vmul.f32 1.442695, %v6965_v12 }
0x3b58   : > { %v6974_v10 = vpop.permute.xlu1 %6973 }
0x3b59   : > { %11352 = vpow2.f32 %v6966_v9  ;;  %10757 = vmatpush3.msra.mxu1 %v6974_v10 }
0x3b5a   : > { %10766 = vmatprep.subr.mxu1 %v12212_v1 }
0x3b5c   : > { %v7132_v16 = vpop.permute.xlu1 %7131 }
0x3b60   : > { %v7130_v19 = vpop.permute.xlu1 %7129 }
0x3b66   : > { %v11353_v11 = vpop.eup %11352 }
0x3b67   : > { %v6968_v41 = vsel %vm1725_vm3, %v11353_v11, 0.0 }
0x3b68   : > { %6969 = vadd.xlane.f32.xlu0 %v6968_v41 }
0x3b7e   : > { %7219 = vrot.lane.b32.xlu0 %v13387_v22, %s13824_s16 }
0x3bf1   : > { %v6970_v14 = vpop.xlane.xlu0 %6969 }
0x3bf2   : > { %11354 = vrcp.f32 %v6970_v14 }
0x3bf5   : > { %v7220_v21 = vpop.permute.xlu0 %7219 }
0x3bff   : > { %v11355_v15 = vpop.eup %11354 }
0x3c00   : > { %v6972_v18 = vmul.f32 %v11355_v15, %v11353_v11 }
0x3c02   : > { %10759 = vmatmul.mubr.msk.f32.vlgmr.msra.gmra.mxu1 %vm1725_vm3, %v6972_v18 }
0x3c03   : > { %10767 = vmatpush3.xpose.msk.msra.mxu1 %vm1725_vm3, %v7132_v16  ;;  %10768 = vmatprep.mubr.msk.f32.mxu1 %vm12213_vm0, %v12212_v1 }
0x3c04   : > { %10776 = vmatprep.subr.mxu1 %v12212_v1 }
0x3c06   : > { %10769 = vmatmul.mubr.msk.f32.vlgmr.msra.gmra.mxu1 %vm1725_vm3, %v7130_v19 }
0x3c07   : > { %10778 = vmatprep.mubr.msk.f32.mxu1 %vm12213_vm0, %v12212_v1  ;;  %10777 = vmatpush3.msra.mxu1 %v9926_v56 }
0x3c08   : > { %10786 = vmatprep.subr.mxu1 %v12212_v1 }
0x3cc2   : > { %v7045_v20 = vpop.f32.mrf.mxu1 }
0x3cc3   : > { %10764 = vmatmul.mubr.msk.f32.vlgmr.msra.gmra.mxu0 %vm1725_vm3, %v7045_v20 }
0x3cc4   : > { %10772 = vmatpush3.msra.mxu0 %v7220_v21  ;;  %v10760_v23 = vpop.f32.mrf.mxu1  ;;  %10773 = vmatprep.mubr.msk.f32.mxu0 %vm12213_vm0, %v12212_v1 }
0x3cc5   : > { %10781 = vmatprep.subr.mxu0 %v12212_v1 }
0x3cc6   : > { %v7203_v25 = vpop.f32.mrf.mxu1 }
0x3cc7   : > { %v7207_v26 = vmul.f32 0.35355338, %v7203_v25  ;;  %v9953_v25 = vld [vmem:[%s13830_s9 + $0x38] sm:$0xff] }
0x3cc8   : > { %v10770_v27 = vpop.f32.mrf.mxu1 }
0x3cc9   : > { %v7208_v29 = vsel %vm1725_vm3, %v7207_v26, -inf }
0x3cca   : > { %7209 = vmax.xlane.f32.xlu1 %v7208_v29 }
0x3d53   : > { %v7210_v30 = vpop.xlane.xlu1 %7209 }
0x3d54   : > { %v7211_v53 = vsub.f32 %v7207_v26, %v7210_v30  ;;  %v9952_v26 = vld [vmem:[%s13830_s9 + $0x30] sm:$0xff] }
0x3d56   : > { %v7212_v31 = vmul.f32 1.442695, %v7211_v53 }
0x3d58   : > { %11356 = vpow2.f32 %v7212_v31 }
0x3d65   : > { %v11357_v33 = vpop.eup %11356 }
0x3d66   : > { %v7214_v34 = vsel %vm1725_vm3, %v11357_v33, 0.0 }
0x3d67   : > { %7215 = vadd.xlane.f32.xlu0 %v7214_v34  ;;  %v9950_v34 = vld [vmem:[%s13830_s9 + $0x20] sm:$0xff] }
0x3d7d   : > { %7371 = vrot.lane.b32.xlu0 %v13387_v22, %s13825_s0 }
0x3d81   : > { %7369 = vrot.lane.b32.xlu0 %v13387_v22, %s13815_s22 }
0x3d83   : > { %v7118_v36 = vpop.f32.mrf.mxu0 }
0x3d84   : > { %v7128_v58 = vadd.f32 %v9935_v57, %v7118_v36 }
0x3d85   : > { %v10765_v37 = vpop.f32.mrf.mxu0 }
0x3df0   : > { %v7216_v38 = vpop.xlane.xlu0 %7215 }
0x3df1   : > { %11358 = vrcp.f32 %v7216_v38 }
0x3df4   : > { %v7372_v40 = vpop.permute.xlu0 %7371 }
0x3df8   : > { %v7370_v43 = vpop.permute.xlu0 %7369 }
0x3dfe   : > { %v11359_v39 = vpop.eup %11358 }
0x3dff   : > { %v7218_v42 = vmul.f32 %v11359_v39, %v11357_v33  ;;  %v9951_v33 = vld [vmem:[%s13830_s9 + $0x28] sm:$0xff] }
0x3e01   : > { %10774 = vmatmul.mubr.msk.f32.vlgmr.msra.gmra.mxu0 %vm1725_vm3, %v7218_v42 }
0x3e02   : > { %10782 = vmatpush3.xpose.msk.msra.mxu0 %vm1725_vm3, %v7372_v40  ;;  %10783 = vmatprep.mubr.msk.f32.mxu0 %vm12213_vm0, %v12212_v1 }
0x3e03   : > { %10791 = vmatprep.subr.mxu0 %v12212_v1 }
0x3e05   : > { %10784 = vmatmul.mubr.msk.f32.vlgmr.msra.gmra.mxu0 %vm1725_vm3, %v7370_v43  ;;  %v9958_v43 = vld [vmem:[#allocation23 + $0x1] ss:$0 sm:$0xff] }
0x3e06   : > { %10793 = vmatprep.mubr.msk.f32.mxu0 %vm12213_vm0, %v12212_v1  ;;  %10792 = vmatpush3.msra.mxu0 %v9927_v24 }
0x3e07   : > { %10801 = vmatprep.subr.mxu0 %v12212_v1 }
0x3ec1   : > { %v7291_v44 = vpop.f32.mrf.mxu0 }
0x3ec2   : > { %10779 = vmatmul.mubr.msk.f32.vlgmr.msra.gmra.mxu1 %vm1725_vm3, %v7291_v44 }
0x3ec3   : > { %v10775_v46 = vpop.f32.mrf.mxu0  ;;  %10788 = vmatprep.mubr.msk.f32.mxu1 %vm12213_vm0, %v12212_v1 }
0x3ec5   : > { %v7443_v45 = vpop.f32.mrf.mxu0 }
0x3ec6   : > { %v7447_v47 = vmul.f32 0.35355338, %v7443_v45 }
0x3ec7   : > { %v10785_v48 = vpop.f32.mrf.mxu0 }
0x3ec8   : > { %v7448_v49 = vsel %vm1725_vm3, %v7447_v47, -inf }
0x3ec9   : > { %7449 = vmax.xlane.f32.xlu1 %v7448_v49  ;;  %v9948_v49 = vld [vmem:[#allocation20 + $0x1] ss:$0 sm:$0xff] }
0x3eda   : > { %7459 = vrot.lane.b32.xlu1 %v13387_v22, %s13816_s26 }
0x3ede   : > { %7611 = vrot.lane.b32.xlu1 %v13387_v22, %s13817_s7 }
0x3ee2   : > { %7609 = vrot.lane.b32.xlu1 %v13387_v22, %s13818_s2 }
0x3f52   : > { %v7450_v50 = vpop.xlane.xlu1 %7449 }
0x3f53   : > { %v7451_v32 = vsub.f32 %v7447_v47, %v7450_v50 }
0x3f55   : > { %v7452_v51 = vmul.f32 1.442695, %v7451_v32  ;;  %v9949_v32 = vld [vmem:[#allocation22 + $0x1] ss:$0 sm:$0xff] }
0x3f56   : > { %v7460_v52 = vpop.permute.xlu1 %7459 }
0x3f57   : > { %11360 = vpow2.f32 %v7452_v51  ;;  %10787 = vmatpush3.msra.mxu1 %v7460_v52 }
0x3f58   : > { %10796 = vmatprep.subr.mxu1 %v12212_v1 }
0x3f5a   : > { %v7612_v63 = vpop.permute.xlu1 %7611 }
0x3f5e   : > { %v7610_v3 = vpop.permute.xlu1 %7609 }
0x3f64   : > { %v11361_v54 = vpop.eup %11360 }
0x3f65   : > { %v7454_v55 = vsel %vm1725_vm3, %v11361_v54, 0.0 }
0x3f66   : > { %7455 = vadd.xlane.f32.xlu0 %v7454_v55 }
0x3f82   : > { %v7364_v59 = vpop.f32.mrf.mxu1 }
0x3f83   : > { %v7368_v60 = vadd.f32 %v7364_v59, %v7128_v58 }
0x3f84   : > { %v10780_v61 = vpop.f32.mrf.mxu1 }
0x3fef   : > { %v7456_v62 = vpop.xlane.xlu0 %7455 }
0x3ff0   : > { %11362 = vrcp.f32 %v7456_v62 }
0x3ffd   : > { %v11363_v17 = vpop.eup %11362 }
0x3ffe   : > { %v7458_v2 = vmul.f32 %v11363_v17, %v11361_v54 }
0x4000   : > { %10789 = vmatmul.mubr.msk.f32.vlgmr.msra.gmra.mxu1 %vm1725_vm3, %v7458_v2 }
0x4001   : > { %10797 = vmatpush3.xpose.msk.msra.mxu1 %vm1725_vm3, %v7612_v63  ;;  %10798 = vmatprep.mubr.msk.f32.mxu1 %vm12213_vm0, %v12212_v1 }
0x4002   : > { %10806 = vmatprep.subr.mxu1 %v12212_v1 }
0x4004   : > { %10799 = vmatmul.mubr.msk.f32.vlgmr.msra.gmra.mxu1 %vm1725_vm3, %v7610_v3 }
0x4005   : > { %10808 = vmatprep.mubr.msk.f32.mxu1 %vm12213_vm0, %v12212_v1  ;;  %10807 = vmatpush3.msra.mxu1 %v9928_v13 }
0x4006   : > { %10822 = vmatprep.subr.mxu1 %v12212_v1 }
0x40c0   : > { %v7531_v28 = vpop.f32.mrf.mxu1 }
0x40c1   : > { %10794 = vmatmul.mubr.msk.f32.vlgmr.msra.gmra.mxu0 %vm1725_vm3, %v7531_v28 }
0x40c2   : > { %v10790_v4 = vpop.f32.mrf.mxu1  ;;  %10803 = vmatprep.mubr.msk.f32.mxu0 %vm12213_vm0, %v12212_v1 }
0x40c4   : > { %v7683_v5 = vpop.f32.mrf.mxu1 }
0x40c5   : > { %v7687_v6 = vmul.f32 0.35355338, %v7683_v5 }
0x40c6   : > { %v10800_v7 = vpop.f32.mrf.mxu1 }
0x40c7   : > { %v7688_v8 = vsel %vm1725_vm3, %v7687_v6, -inf }
0x40c8   : > { %7689 = vmax.xlane.f32.xlu1 %v7688_v8 }
0x40d9   : > { %7984 = vrot.lane.b32.xlu1 %v9953_v25, %s13823_s8 }
0x40dd   : > { %7982 = vrot.lane.b32.xlu1 %v9952_v26, %s13823_s8 }
0x4151   : > { %v7690_v12 = vpop.xlane.xlu1 %7689 }
0x4152   : > { %v7691_v9 = vsub.f32 %v7687_v6, %v7690_v12 }
0x4154   : > { %v7692_v10 = vmul.f32 1.442695, %v7691_v9 }
0x4155   : > { %v7985_v36 = vpop.permute.xlu1 %7984 }
0x4156   : > { %11364 = vpow2.f32 %v7692_v10  ;;  %v9954_v10 = vld [vmem:[%s13832_s12 + $0x20] sm:$0xff] }
0x4159   : > { %v7983_v37 = vpop.permute.xlu1 %7982 }
0x4163   : > { %v11365_v11 = vpop.eup %11364 }
0x4164   : > { %v7694_v41 = vsel %vm1725_vm3, %v11365_v11, 0.0 }
0x4165   : > { %7695 = vadd.xlane.f32.xlu0 %v7694_v41 }
0x417b   : > { %7699 = vrot.lane.b32.xlu0 %v13387_v22, %s13819_s11 }
0x4181   : > { %v7604_v14 = vpop.f32.mrf.mxu0 }
0x4182   : > { %v7608_v15 = vadd.f32 %v7604_v14, %v7368_v60 }
0x4183   : > { %v10795_v16 = vpop.f32.mrf.mxu0 }
0x41ee   : > { %v7696_v18 = vpop.xlane.xlu0 %7695 }
0x41ef   : > { %11366 = vrcp.f32 %v7696_v18 }
0x41f2   : > { %v7700_v19 = vpop.permute.xlu0 %7699 }
0x41f3   : > { %10802 = vmatpush3.msra.mxu0 %v7700_v19 }
0x41f4   : > { %10811 = vmatprep.subr.mxu0 %v12212_v1 }
0x41fc   : > { %v11367_v20 = vpop.eup %11366 }
0x41fd   : > { %v7698_v21 = vmul.f32 %v11367_v20, %v11365_v11 }
0x41ff   : > { %10804 = vmatmul.mubr.msk.f32.vlgmr.msra.gmra.mxu0 %vm1725_vm3, %v7698_v21 }
0x4200   : > { %10819 = vmatprep.mubr.msk.f32.mxu0 %vm12213_vm0, %v12212_v1  ;;  %10812 = vmatpush3.msra.mxu0 %v9953_v25 }
0x4201   : > { %10813 = vmatprep.subr.mxu0 %v12212_v1 }
0x4202   : > { %10814 = vmatpush3.msra.mxu0 %v9952_v26 }
0x4203   : > { %10815 = vmatprep.subr.mxu0 %v12212_v1 }
0x4204   : > { %10816 = vmatpush3.msra.mxu0 %v9951_v33 }
0x4205   : > { %10817 = vmatprep.subr.mxu0 %v12212_v1 }
0x4206   : > { %10818 = vmatpush3.msra.mxu0 %v9950_v34 }
0x4207   : > { %10833 = vmatprep.subr.mxu0 %v12212_v1 }
0x42bf   : > { %v7771_v22 = vpop.f32.mrf.mxu0 }
0x42c0   : > { %10809 = vmatmul.mubr.msk.f32.vlgmr.msra.gmra.mxu1 %vm1725_vm3, %v7771_v22 }
0x42c1   : > { %v10805_v23 = vpop.f32.mrf.mxu0  ;;  %10830 = vmatprep.mubr.msk.f32.mxu1 %vm12213_vm0, %v12212_v1  ;;  %10823 = vmatpush3.msra.mxu1 %v7985_v36 }
0x42c2   : > { %10824 = vmatprep.subr.mxu1 %v12212_v1 }
0x42c3   : > { %10825 = vmatpush3.msra.mxu1 %v7983_v37 }
0x42c4   : > { %10826 = vmatprep.subr.mxu1 %v12212_v1 }
0x4380   : > { %v7844_v27 = vpop.f32.mrf.mxu1 }
0x4381   : > { %v7848_v29 = vadd.f32 %v7844_v27, %v7608_v15 }
0x4382   : > { %v10810_v30 = vpop.f32.mrf.mxu1 }
0x4383   : > { %v7849_v53 = vadd.f32 %v7848_v29, %v13381_v0 }
0x4385   : > { %v7854_v31 = vsel %vm1648_vm2, %v7849_v53, 0.0 }
0x4386   : > { %7855 = vadd.xlane.f32.xlu0 %v7854_v31 }
0x439c   : > { %7978 = vrot.lane.b32.xlu0 %v9950_v34, %s13823_s8 }
0x440f   : > { %v7856_v0 = vpop.xlane.xlu0 %7855 }
0x4410   : > { %v7857_v38 = vmul.f32 0.03125, %v7856_v0 }
0x4412   : > { %v7858_v39 = vsub.f32 %v7849_v53, %v7857_v38 }
0x4413   : > { %v7979_v47 = vpop.permute.xlu0 %7978 }
0x4414   : > { %v7859_v40 = vmul.f32 %v7858_v39, %v7858_v39 }
0x4416   : > { %v7860_v42 = vsel %vm1648_vm2, %v7859_v40, 0.0 }
0x4417   : > { %7861 = vadd.xlane.f32.xlu1 %v7860_v42 }
0x4428   : > { %7980 = vrot.lane.b32.xlu1 %v9951_v33, %s13823_s8  ;;  %v9955_v33 = vld [vmem:[%s13832_s12 + $0x28] sm:$0xff] }
0x442c   : > { %7990 = vrot.lane.b32.xlu1 %v9958_v43, %s13823_s8 }
0x44a0   : > { %v7862_v56 = vpop.xlane.xlu1 %7861 }
0x44a1   : > { %v7863_v44 = vmul.f32 0.03125, %v7862_v56 }
0x44a3   : > { %v7864_v46 = vadd.f32 1e-05, %v7863_v44 }
0x44a4   : > { %v7981_v45 = vpop.permute.xlu1 %7980 }
0x44a5   : > { %11368 = vrsqrt.f32 %v7864_v46  ;;  %10827 = vmatpush3.msra.mxu1 %v7981_v45  ;;  %v9965_v45 = vld [vmem:[#allocation25 + $0x1] ss:$0 sm:$0xff] }
0x44a6   : > { %10828 = vmatprep.subr.mxu1 %v12212_v1 }
0x44a7   : > { %10829 = vmatpush3.msra.mxu1 %v7979_v47 }
0x44a8   : > { %10831 = vmatmul.mubr.msk.f32.vlgmr.msra.gmra.mxu1 %vm1648_vm2, %v13235_v35  ;;  %10838 = vmatprep.subr.mxu1 %v12212_v1  ;;  %v7991_v54 = vpop.permute.xlu1 %7990 }
0x44a9   : > { %10840 = vmatprep.mubr.msk.f32.mxu1 %vm12213_vm0, %v12212_v1 }
0x44b2   : > { %v11369_v48 = vpop.eup %11368 }
0x44b3   : > { %v7866_v50 = vmul.f32 %v11369_v48, %v7858_v39 }
0x44b5   : > { %v7873_v51 = vmul.f32 %v9948_v49, %v7866_v50 }
0x44b7   : > { %v13500_v52 = vadd.f32 %v9949_v32, %v7873_v51 }
0x44b9   : > { %10820 = vmatmul.mubr.msk.f32.vlgmr.msra.gmra.mxu0 %vm1648_vm2, %v13500_v52 }
0x44ba   : > { %10835 = vmatprep.mubr.msk.f32.mxu0 %vm12213_vm0, %v12212_v1 }
0x4568   : > { %v8059_v35 = vpop.f32.mrf.mxu1 }
0x4569   : > { %v13506_v55 = vadd.f32 %v8059_v35, %v7991_v54 }
0x456a   : > { %v10832_v57 = vpop.f32.mrf.mxu1 }
0x456b   : > { %10834 = vmatpush3.xpose.msk.msra.mxu0 %vm1725_vm3, %v13506_v55 }
0x456c   : > { %10843 = vmatprep.subr.mxu0 %v12212_v1 }
0x4579   : > { %v7970_v58 = vpop.f32.mrf.mxu0 }
0x457a   : > { %v13511_v59 = vadd.f32 %v9958_v43, %v7970_v58  ;;  %v9956_v58 = vld [vmem:[%s13832_s12 + $0x30] sm:$0xff] }
0x457b   : > { %v10821_v60 = vpop.f32.mrf.mxu0 }
0x457c   : > { %10836 = vmatmul.mubr.msk.f32.vlgmr.msra.gmra.mxu0 %vm1725_vm3, %v13511_v59 }
0x457d   : > { %10845 = vmatprep.mubr.msk.f32.mxu0 %vm12213_vm0, %v12212_v1  ;;  %10844 = vmatpush3.msra.mxu0 %v9954_v10 }
0x457e   : > { %10853 = vmatprep.subr.mxu0 %v12212_v1 }
0x463c   : > { %v8135_v61 = vpop.f32.mrf.mxu0 }
0x463d   : > { %v8139_v62 = vmul.f32 0.35355338, %v8135_v61 }
0x463e   : > { %v10837_v17 = vpop.f32.mrf.mxu0 }
0x463f   : > { %v8140_v63 = vsel %vm1725_vm3, %v8139_v62, -inf }
0x4640   : > { %8141 = vmax.xlane.f32.xlu1 %v8140_v63 }
0x4651   : > { %8151 = vrot.lane.b32.xlu1 %v13506_v55, %s13823_s8  ;;  %s12226_s8 = smov [#allocation40]  }
0x4652   : > { %s12036_s16 = sshll.u32 %s12226_s8, 4  ;;  %s12037_s16 = int_to_ptr.vmem [resolvable:$false] %s12036_s16 }
0x4655   : > { %8307 = vrot.lane.b32.xlu1 %v13511_v59, %s13829_s5 }
0x46c9   : > { %v8142_v2 = vpop.xlane.xlu1 %8141 }
0x46ca   : > { %v8143_v3 = vsub.f32 %v8139_v62, %v8142_v2 }
0x46cc   : > { %v8144_v24 = vmul.f32 1.442695, %v8143_v3 }
0x46cd   : > { %v8152_v28 = vpop.permute.xlu1 %8151 }
0x46ce   : > { %11370 = vpow2.f32 %v8144_v24  ;;  %10839 = vmatpush3.msra.mxu1 %v8152_v28 }
0x46cf   : > { %10848 = vmatprep.subr.mxu1 %v12212_v1 }
0x46d1   : > { %v8308_v9 = vpop.permute.xlu1 %8307 }
0x46db   : > { %v11371_v4 = vpop.eup %11370 }
0x46dc   : > { %v8146_v5 = vsel %vm1725_vm3, %v11371_v4, 0.0 }
0x46dd   : > { %8147 = vadd.xlane.f32.xlu0 %v8146_v5  ;;  %v9957_v5 = vld [vmem:[%s13832_s12 + $0x38] sm:$0xff] }
0x46f3   : > { %8309 = vrot.lane.b32.xlu0 %v13506_v55, %s13829_s5  ;;  %s1525_s5 = sand.u32 1, %s12136_s23  }
0x46f4   : > { %s9789_s3 = sshll.u32 %s1525_s5, 3 }
0x46f5   : > { %s1527_s11 = scalar_lea.vmem [#allocation40], %s9789_s3 }
0x4766   : > { %v8148_v6 = vpop.xlane.xlu0 %8147 }
0x4767   : > { %11372 = vrcp.f32 %v8148_v6 }
0x476a   : > { %v8310_v12 = vpop.permute.xlu0 %8309 }
0x4774   : > { %v11373_v7 = vpop.eup %11372 }
0x4775   : > { %v8150_v8 = vmul.f32 %v11373_v7, %v11371_v4 }
0x4777   : > { %10841 = vmatmul.mubr.msk.f32.vlgmr.msra.gmra.mxu1 %vm1725_vm3, %v8150_v8 }
0x4778   : > { %10849 = vmatpush3.xpose.msk.msra.mxu1 %vm1725_vm3, %v8310_v12  ;;  %10850 = vmatprep.mubr.msk.f32.mxu1 %vm12213_vm0, %v12212_v1 }
0x4779   : > { %10858 = vmatprep.subr.mxu1 %v12212_v1 }
0x477b   : > { %10851 = vmatmul.mubr.msk.f32.vlgmr.msra.gmra.mxu1 %vm1725_vm3, %v8308_v9 }
0x477c   : > { %10860 = vmatprep.mubr.msk.f32.mxu1 %vm12213_vm0, %v12212_v1  ;;  %10859 = vmatpush3.msra.mxu1 %v9955_v33  ;;  %v9987_v33 = vld [vmem:[%s13834_s14 + $0x58] sm:$0xff] }
0x477d   : > { %10868 = vmatprep.subr.mxu1 %v12212_v1 }
0x4837   : > { %v8223_v11 = vpop.f32.mrf.mxu1 }
0x4838   : > { %10846 = vmatmul.mubr.msk.f32.vlgmr.msra.gmra.mxu0 %vm1725_vm3, %v8223_v11 }
0x4839   : > { %v10842_v41 = vpop.f32.mrf.mxu1  ;;  %10855 = vmatprep.mubr.msk.f32.mxu0 %vm12213_vm0, %v12212_v1 }
0x483b   : > { %v8381_v13 = vpop.f32.mrf.mxu1 }
0x483c   : > { %v8385_v14 = vmul.f32 0.35355338, %v8381_v13 }
0x483d   : > { %v10852_v15 = vpop.f32.mrf.mxu1 }
0x483e   : > { %v8386_v16 = vsel %vm1725_vm3, %v8385_v14, -inf }
0x483f   : > { %8387 = vmax.xlane.f32.xlu1 %v8386_v16 }
0x4850   : > { %8397 = vrot.lane.b32.xlu1 %v13506_v55, %s13828_s4  ;;  %s10003_s4 = sshll.u32 %s12453_s28, 7 }
0x4854   : > { %8547 = vrot.lane.b32.xlu1 %v13511_v59, %s13815_s22 }
0x48c8   : > { %v8388_v18 = vpop.xlane.xlu1 %8387 }
0x48c9   : > { %v8389_v19 = vsub.f32 %v8385_v14, %v8388_v18 }
0x48cb   : > { %v8390_v20 = vmul.f32 1.442695, %v8389_v19 }
0x48cc   : > { %v8398_v21 = vpop.permute.xlu1 %8397 }
0x48cd   : > { %11374 = vpow2.f32 %v8390_v20  ;;  %10854 = vmatpush3.msra.mxu0 %v8398_v21 }
0x48ce   : > { %10863 = vmatprep.subr.mxu0 %v12212_v1 }
0x48d0   : > { %v8548_v31 = vpop.permute.xlu1 %8547 }
0x48da   : > { %v11375_v22 = vpop.eup %11374 }
0x48db   : > { %v8392_v23 = vsel %vm1725_vm3, %v11375_v22, 0.0 }
0x48dc   : > { %8393 = vadd.xlane.f32.xlu0 %v8392_v23 }
0x48f2   : > { %8549 = vrot.lane.b32.xlu0 %v13506_v55, %s13815_s22  ;;  %s9383_s22 = scalar_lea.sflag [#allocation4], %s1525_s5 }
0x48f8   : > { %v8296_v25 = vpop.f32.mrf.mxu0 }
0x48f9   : > { %v8306_v47 = vadd.f32 %v9965_v45, %v8296_v25  ;;  %v9983_v25 = vld [vmem:[%s13833_s13 + $0x38] sm:$0xff]  ;;  %v9992_v45 = vld [vmem:[#allocation29 + $0x1] ss:$0 sm:$0xff] }
0x48fa   : > { %v10847_v26 = vpop.f32.mrf.mxu0 }
0x48fb   : > { %v9982_v26 = vld [vmem:[%s13833_s13 + $0x30] sm:$0xff] }
0x4965   : > { %v8394_v27 = vpop.xlane.xlu0 %8393 }
0x4966   : > { %11376 = vrcp.f32 %v8394_v27  ;;  %v9980_v27 = vld [vmem:[%s13833_s13 + $0x20] sm:$0xff] }
0x4969   : > { %v8550_v53 = vpop.permute.xlu0 %8549 }
0x4973   : > { %v11377_v29 = vpop.eup %11376 }
0x4974   : > { %v8396_v30 = vmul.f32 %v11377_v29, %v11375_v22  ;;  %v9991_v29 = vld [vmem:[%s13834_s14 + $0x78] sm:$0xff] }
0x4976   : > { %10856 = vmatmul.mubr.msk.f32.vlgmr.msra.gmra.mxu0 %vm1725_vm3, %v8396_v30  ;;  %v9990_v30 = vld [vmem:[%s13834_s14 + $0x70] sm:$0xff] }
0x4977   : > { %10864 = vmatpush3.xpose.msk.msra.mxu0 %vm1725_vm3, %v8550_v53  ;;  %10865 = vmatprep.mubr.msk.f32.mxu0 %vm12213_vm0, %v12212_v1  ;;  %v9989_v53 = vld [vmem:[%s13834_s14 + $0x68] sm:$0xff] }
0x4978   : > { %10873 = vmatprep.subr.mxu0 %v12212_v1 }
0x497a   : > { %10866 = vmatmul.mubr.msk.f32.vlgmr.msra.gmra.mxu0 %vm1725_vm3, %v8548_v31  ;;  %v9988_v31 = vld [vmem:[%s13834_s14 + $0x60] sm:$0xff] }
0x497b   : > { %10875 = vmatprep.mubr.msk.f32.mxu0 %vm12213_vm0, %v12212_v1  ;;  %10874 = vmatpush3.msra.mxu0 %v9956_v58 }
0x497c   : > { %10883 = vmatprep.subr.mxu0 %v12212_v1 }
0x4a36   : > { %v8469_v34 = vpop.f32.mrf.mxu0 }
0x4a37   : > { %10861 = vmatmul.mubr.msk.f32.vlgmr.msra.gmra.mxu1 %vm1725_vm3, %v8469_v34 }
0x4a38   : > { %v10857_v36 = vpop.f32.mrf.mxu0  ;;  %10870 = vmatprep.mubr.msk.f32.mxu1 %vm12213_vm0, %v12212_v1 }
0x4a3a   : > { %v8621_v37 = vpop.f32.mrf.mxu0 }
0x4a3b   : > { %v8625_v0 = vmul.f32 0.35355338, %v8621_v37 }
0x4a3c   : > { %v10867_v38 = vpop.f32.mrf.mxu0 }
0x4a3d   : > { %v8626_v39 = vsel %vm1725_vm3, %v8625_v0, -inf  ;;  %v9978_v38 = vld [vmem:[#allocation26 + $0x1] ss:$0 sm:$0xff] }
0x4a3e   : > { %8627 = vmax.xlane.f32.xlu1 %v8626_v39 }
0x4a4f   : > { %8637 = vrot.lane.b32.xlu1 %v13506_v55, %s13825_s0  ;;  %s12038_s0 = scalar_lea.vmem %s12037_s16, 256 }
0x4a53   : > { %8787 = vrot.lane.b32.xlu1 %v13511_v59, %s13818_s2 }
0x4ac7   : > { %v8628_v40 = vpop.xlane.xlu1 %8627 }
0x4ac8   : > { %v8629_v42 = vsub.f32 %v8625_v0, %v8628_v40  ;;  %v9979_v40 = vld [vmem:[#allocation28 + $0x1] ss:$0 sm:$0xff] }
0x4aca   : > { %v8630_v43 = vmul.f32 1.442695, %v8629_v42 }
0x4acb   : > { %v8638_v56 = vpop.permute.xlu1 %8637 }
0x4acc   : > { %11378 = vpow2.f32 %v8630_v43  ;;  %10869 = vmatpush3.msra.mxu1 %v8638_v56  ;;  %v9986_v56 = vld [vmem:[%s13834_s14 + $0x50] sm:$0xff] }
0x4acd   : > { %10878 = vmatprep.subr.mxu1 %v12212_v1 }
0x4acf   : > { %v8788_v57 = vpop.permute.xlu1 %8787 }
0x4ad9   : > { %v11379_v44 = vpop.eup %11378 }
0x4ada   : > { %v8632_v46 = vsel %vm1725_vm3, %v11379_v44, 0.0 }
0x4adb   : > { %8633 = vadd.xlane.f32.xlu0 %v8632_v46  ;;  %v9984_v46 = vld [vmem:[%s13834_s14 + $0x40] sm:$0xff] }
0x4af1   : > { %8789 = vrot.lane.b32.xlu0 %v13506_v55, %s13818_s2  ;;  %s13641_s2 = scalar_lea.hbm %s12430_s6, %s10003_s4 }
0x4af7   : > { %v8542_v48 = vpop.f32.mrf.mxu1 }
0x4af8   : > { %v8546_v49 = vadd.f32 %v8542_v48, %v8306_v47 }
0x4af9   : > { %v10862_v50 = vpop.f32.mrf.mxu1 }
0x4b64   : > { %v8634_v32 = vpop.xlane.xlu0 %8633 }
0x4b65   : > { %11380 = vrcp.f32 %v8634_v32  ;;  %v9994_v32 = vld [vmem:[#allocation31 + $0x1] ss:$0 sm:$0xff] }
0x4b68   : > { %v8790_v35 = vpop.permute.xlu0 %8789 }
0x4b72   : > { %v11381_v51 = vpop.eup %11380 }
0x4b73   : > { %v8636_v54 = vmul.f32 %v11381_v51, %v11379_v44  ;;  %v9985_v44 = vld [vmem:[%s13834_s14 + $0x48] sm:$0xff] }
0x4b75   : > { %10871 = vmatmul.mubr.msk.f32.vlgmr.msra.gmra.mxu1 %vm1725_vm3, %v8636_v54 }
0x4b76   : > { %10879 = vmatpush3.xpose.msk.msra.mxu1 %vm1725_vm3, %v8790_v35  ;;  %10880 = vmatprep.mubr.msk.f32.mxu1 %vm12213_vm0, %v12212_v1 }
0x4b77   : > { %10888 = vmatprep.subr.mxu1 %v12212_v1 }
0x4b79   : > { %10881 = vmatmul.mubr.msk.f32.vlgmr.msra.gmra.mxu1 %vm1725_vm3, %v8788_v57 }
0x4b7a   : > { %10890 = vmatprep.mubr.msk.f32.mxu1 %vm12213_vm0, %v12212_v1  ;;  %10889 = vmatpush3.msra.mxu1 %v9957_v5  ;;  %v9997_v5 = vld [vmem:[#allocation34 + $0x1] ss:$0 sm:$0xff] }
0x4b7b   : > { %10904 = vmatprep.subr.mxu1 %v12212_v1 }
0x4c35   : > { %v8709_v59 = vpop.f32.mrf.mxu1 }
0x4c36   : > { %10876 = vmatmul.mubr.msk.f32.vlgmr.msra.gmra.mxu0 %vm1725_vm3, %v8709_v59 }
0x4c37   : > { %v10872_v60 = vpop.f32.mrf.mxu1  ;;  %10885 = vmatprep.mubr.msk.f32.mxu0 %vm12213_vm0, %v12212_v1 }
0x4c39   : > { %v8861_v61 = vpop.f32.mrf.mxu1 }
0x4c3a   : > { %v8865_v62 = vmul.f32 0.35355338, %v8861_v61 }
0x4c3b   : > { %v10882_v17 = vpop.f32.mrf.mxu1 }
0x4c3c   : > { %v8866_v63 = vsel %vm1725_vm3, %v8865_v62, -inf }
0x4c3d   : > { %8867 = vmax.xlane.f32.xlu1 %v8866_v63 }
0x4cc6   : > { %v8868_v2 = vpop.xlane.xlu1 %8867 }
0x4cc7   : > { %v8869_v3 = vsub.f32 %v8865_v62, %v8868_v2 }
0x4cc9   : > { %v8870_v24 = vmul.f32 1.442695, %v8869_v3 }
0x4ccb   : > { %11382 = vpow2.f32 %v8870_v24 }
0x4cd8   : > { %v11383_v28 = vpop.eup %11382 }
0x4cd9   : > { %v8872_v4 = vsel %vm1725_vm3, %v11383_v28, 0.0 }
0x4cda   : > { %8873 = vadd.xlane.f32.xlu0 %v8872_v4 }
0x4cf0   : > { %8877 = vrot.lane.b32.xlu0 %v13506_v55, %s13817_s7  ;;  %s9396_s7 = sshll.u32 %s1527_s11, 4  ;;  %s9397_s7 = int_to_ptr.vmem [resolvable:$true] %s9396_s7 }
0x4cf1   : > { %s12032_s26 = scalar_lea.vmem %s9397_s7, 128  ;;  %p12039_p10 = scmp.lt.s32.totalorder %s9397_s7, %s12037_s16 }
0x4cf2   : > { %p12033_p6 = scmp.ne.s32.totalorder %s9397_s7, %s12032_s26  ;;  %p12040_p5 = scmp.lt.s32.totalorder %s12038_s0, %s12032_s26 }
0x4cf4   : > { %p12034_p1 = pnand %p12033_p6, %p13835_p9  ;;  %p12041_p12 = por %p12040_p5, %p12039_p10 }
0x4cf6   : > { %v8782_v6 = vpop.f32.mrf.mxu0  ;;  %p12035_p13 = pneg %p12034_p1 }
0x4cf7   : > { %v8786_v7 = vadd.f32 %v8782_v6, %v8546_v49 }
0x4cf8   : > { %v10877_v8 = vpop.f32.mrf.mxu0  ;;  %p12042_p2 = pnand %p12041_p12, %p12035_p13 }
0x4d63   : > { %v8874_v12 = vpop.xlane.xlu0 %8873 }
0x4d64   : > { %11384 = vrcp.f32 %v8874_v12 }
0x4d67   : > { %v8878_v9 = vpop.permute.xlu0 %8877 }
0x4d68   : > { %10884 = vmatpush3.msra.mxu0 %v8878_v9 }
0x4d69   : > { %10893 = vmatprep.subr.mxu0 %v12212_v1 }
0x4d71   : > { %v11385_v10 = vpop.eup %11384 }
0x4d72   : > { %v8876_v11 = vmul.f32 %v11385_v10, %v11383_v28  ;;  %v9996_v28 = vld [vmem:[#allocation32 + $0x1] ss:$0 sm:$0xff] }
0x4d74   : > { %10886 = vmatmul.mubr.msk.f32.vlgmr.msra.gmra.mxu0 %vm1725_vm3, %v8876_v11 }
0x4d75   : > { %10901 = vmatprep.mubr.msk.f32.mxu0 %vm12213_vm0, %v12212_v1  ;;  %10894 = vmatpush3.msra.mxu0 %v9983_v25 }
0x4d76   : > { %10895 = vmatprep.subr.mxu0 %v12212_v1 }
0x4d77   : > { %10896 = vmatpush3.msra.mxu0 %v9982_v26 }
0x4d78   : > { %10897 = vmatprep.subr.mxu0 %v12212_v1 }
0x4e34   : > { %v8949_v55 = vpop.f32.mrf.mxu0 }
0x4e35   : > { %10891 = vmatmul.mubr.msk.f32.vlgmr.msra.gmra.mxu1 %vm1725_vm3, %v8949_v55 }
0x4e36   : > { %v10887_v41 = vpop.f32.mrf.mxu0  ;;  %10920 = vmatprep.mubr.msk.f32.mxu1 %vm12213_vm0, %v12212_v1  ;;  %10905 = vmatpush3.msra.mxu1 %v9991_v29 }
0x4e37   : > { %10906 = vmatprep.subr.mxu1 %v12212_v1  ;;  %v9300_v41 = vld [vmem:[%s12420_s27 + $0x18] sm:$0xff] }
0x4e38   : > { %10907 = vmatpush3.msra.mxu1 %v9990_v30 }
0x4e39   : > { %10908 = vmatprep.subr.mxu1 %v12212_v1 }
0x4e3a   : > { %10909 = vmatpush3.msra.mxu1 %v9989_v53 }
0x4e3b   : > { %10910 = vmatprep.subr.mxu1 %v12212_v1 }
0x4e3c   : > { %10911 = vmatpush3.msra.mxu1 %v9988_v31 }
0x4e3d   : > { %10912 = vmatprep.subr.mxu1 %v12212_v1 }
0x4e3e   : > { %10913 = vmatpush3.msra.mxu1 %v9987_v33 }
0x4e3f   : > { %10914 = vmatprep.subr.mxu1 %v12212_v1 }
0x4e40   : > { %10915 = vmatpush3.msra.mxu1 %v9986_v56 }
0x4e41   : > { %10916 = vmatprep.subr.mxu1 %v12212_v1 }
0x4e42   : > { %10917 = vmatpush3.msra.mxu1 %v9985_v44 }
0x4e43   : > { %10918 = vmatprep.subr.mxu1 %v12212_v1 }
0x4e44   : > { %10919 = vmatpush3.msra.mxu1 %v9984_v46 }
0x4ef5   : > { %v9022_v13 = vpop.f32.mrf.mxu1 }
0x4ef6   : > { %v9026_v14 = vadd.f32 %v9022_v13, %v8786_v7  ;;  %v9299_v13 = vld [vmem:[%s12420_s27 + $0x10] sm:$0xff] }
0x4ef7   : > { %v10892_v15 = vpop.f32.mrf.mxu1 }
0x4ef8   : > { %v9027_v16 = vadd.f32 %v9026_v14, %v13500_v52  ;;  %v9981_v52 = vld [vmem:[%s13833_s13 + $0x28] sm:$0xff]  ;;  %v9297_v15 = vld [vmem:[%s12420_s27] sm:$0xff] }
0x4ef9   : > { %10898 = vmatpush3.msra.mxu0 %v9981_v52  ;;  %v9298_v14 = vld [vmem:[%s12420_s27 + $0x8] sm:$0xff] }
0x4efa   : > { %v9032_v18 = vsel %vm1648_vm2, %v9027_v16, 0.0  ;;  %10899 = vmatprep.subr.mxu0 %v12212_v1  ;;  %v10000_v52 = vld [vmem:[#allocation38] ss:$0 sm:$0xff] }
0x4efb   : > { %9033 = vadd.xlane.f32.xlu1 %v9032_v18  ;;  %10900 = vmatpush3.msra.mxu0 %v9980_v27 }
0x4efc   : > { %10923 = vmatprep.subr.mxu0 %v12212_v1 }
0x4f84   : > { %v9034_v19 = vpop.xlane.xlu1 %9033 }
0x4f85   : > { %v9035_v20 = vmul.f32 0.03125, %v9034_v19 }
0x4f87   : > { %v9036_v21 = vsub.f32 %v9027_v16, %v9035_v20 }
0x4f89   : > { %v9037_v22 = vmul.f32 %v9036_v21, %v9036_v21 }
0x4f8b   : > { %v9038_v23 = vsel %vm1648_vm2, %v9037_v22, 0.0 }
0x4f8c   : > { %9039 = vadd.xlane.f32.xlu1 %v9038_v23  ;;  %v9999_v23 = vld [vmem:[#allocation37] ss:$0 sm:$0xff] }
0x5015   : > { %v9040_v34 = vpop.xlane.xlu1 %9039 }
0x5016   : > { %v9041_v36 = vmul.f32 0.03125, %v9040_v34 }
0x5018   : > { %v9042_v37 = vadd.f32 1e-05, %v9041_v36 }
0x501a   : > { %11386 = vrsqrt.f32 %v9042_v37 }
0x5027   : > { %v11387_v0 = vpop.eup %11386 }
0x5028   : > { %v9044_v39 = vmul.f32 %v11387_v0, %v9036_v21  ;;  %v9998_v21 = vld [vmem:[#allocation35] ss:$0 sm:$0xff] }
0x502a   : > { %v9051_v42 = vmul.f32 %v9978_v38, %v9044_v39 }
0x502c   : > { %v9058_v43 = vadd.f32 %v9979_v40, %v9051_v42 }
0x502e   : > { %10902 = vmatmul.mubr.msk.f32.vlgmr.msra.gmra.mxu0 %vm1648_vm2, %v9058_v43 }
0x502f   : > { %10931 = vmatprep.mubr.msk.f32.mxu0 %vm12213_vm0, %v12212_v1  ;;  %10924 = vmatpush3.msra.mxu0 %v9300_v41 }
0x5030   : > { %10925 = vmatprep.subr.mxu0 %v12212_v1 }
0x5031   : > { %10926 = vmatpush3.msra.mxu0 %v9299_v13 }
0x5032   : > { %10927 = vmatprep.subr.mxu0 %v12212_v1 }
0x5033   : > { %10928 = vmatpush3.msra.mxu0 %v9298_v14 }
0x5034   : > { %10929 = vmatprep.subr.mxu0 %v12212_v1 }
0x5035   : > { %10930 = vmatpush3.msra.mxu0 %v9297_v15 }
0x50ee   : > { %v9152_v47 = vpop.f32.mrf.mxu0 }
0x50ef   : > { %v9153_v48 = vadd.f32 %v9992_v45, %v9152_v47 }
0x50f0   : > { %v10903_v49 = vpop.f32.mrf.mxu0 }
0x50f1   : > { %v9156_v50 = vmax.f32 %v9153_v48, 0.0 }
0x50f3   : > { %10921 = vmatmul.mubr.msk.f32.vlgmr.msra.gmra.mxu1 %vm2819_vm4, %v9156_v50 }
0x51b3   : > { %v9232_v51 = vpop.f32.mrf.mxu1 }
0x51b4   : > { %v9233_v54 = vadd.f32 %v9994_v32, %v9232_v51 }
0x51b5   : > { %v10922_v35 = vpop.f32.mrf.mxu1 }
0x51b6   : > { %v9236_v57 = vadd.f32 %v9233_v54, %v9058_v43 }
0x51b8   : > { %v9241_v58 = vsel %vm1648_vm2, %v9236_v57, 0.0 }
0x51b9   : > { %9242 = vadd.xlane.f32.xlu1 %v9241_v58 }
0x5242   : > { %v9243_v59 = vpop.xlane.xlu1 %9242 }
0x5243   : > { %v9244_v60 = vmul.f32 0.03125, %v9243_v59 }
0x5245   : > { %v9245_v61 = vsub.f32 %v9236_v57, %v9244_v60 }
0x5247   : > { %v9246_v62 = vmul.f32 %v9245_v61, %v9245_v61 }
0x5249   : > { %v9247_v17 = vsel %vm1648_vm2, %v9246_v62, 0.0 }
0x524a   : > { %9248 = vadd.xlane.f32.xlu1 %v9247_v17 }
0x52d3   : > { %v9249_v63 = vpop.xlane.xlu1 %9248 }
0x52d4   : > { %v9250_v2 = vmul.f32 0.03125, %v9249_v63 }
0x52d6   : > { %v9251_v3 = vadd.f32 1e-05, %v9250_v2 }
0x52d8   : > { %11388 = vrsqrt.f32 %v9251_v3 }
0x52e5   : > { %v11389_v24 = vpop.eup %11388 }
0x52e6   : > { %v9253_v4 = vmul.f32 %v11389_v24, %v9245_v61 }
0x52e8   : > { %v9260_v6 = vmul.f32 %v9996_v28, %v9253_v4 }
0x52ea   : > { %v9267_v7 = vadd.f32 %v9997_v5, %v9260_v6 }
0x52ec   : > { %v9270_v8 = vsel %vm1648_vm2, %v9267_v7, 0.0 }
0x52ed   : > { %9271 = vadd.xlane.f32.xlu1 %v9270_v8 }
0x5376   : > { %v9272_v12 = vpop.xlane.xlu1 %9271 }
0x5377   : > { %v9273_v9 = vmul.f32 0.03125, %v9272_v12 }
0x5379   : > { %v9274_v10 = vsub.f32 %v9267_v7, %v9273_v9 }
0x537b   : > { %v9275_v11 = vmul.f32 %v9274_v10, %v9274_v10 }
0x537d   : > { %v9276_v55 = vsel %vm1648_vm2, %v9275_v11, 0.0 }
0x537e   : > { %9277 = vadd.xlane.f32.xlu1 %v9276_v55 }
0x5407   : > { %v9278_v16 = vpop.xlane.xlu1 %9277 }
0x5408   : > { %v9279_v18 = vmul.f32 0.03125, %v9278_v16 }
0x540a   : > { %v9280_v19 = vadd.f32 1e-05, %v9279_v18 }
0x540c   : > { %11390 = vrsqrt.f32 %v9280_v19 }
0x5419   : > { %v11391_v20 = vpop.eup %11390 }
0x541a   : > { %v9282_v22 = vmul.f32 %v11391_v20, %v9274_v10 }
0x541c   : > { %v9289_v25 = vmul.f32 %v9998_v21, %v9282_v22 }
0x541e   : > { %v9296_v26 = vadd.f32 %v9999_v23, %v9289_v25 }
0x5420   : > { %10932 = vmatmul.mubr.msk.f32.vlgmr.msra.gmra.mxu0 %vm1648_vm2, %v9296_v26 }
0x54e0   : > { %v9377_v1 = vpop.f32.mrf.mxu0 }
0x54e1   : > { %v9378_v27 = vadd.f32 %v10000_v52, %v9377_v1 }
0x54e2   : > { %v10933_v29 = vpop.f32.mrf.mxu0 }
0x54e3   : > { %9381 = vst [vmem:[%s1527_s11] sm:$0xff] %v9378_v27 }
0x54e4   : > { %12045 = shalt.err (!%p12042_p2)
}
0x54e5   : > { %s12046_s28 = scalar_lea.hbm %s13641_s2, 128  ;;  %s12050_s5 = scalar_lea.hbm %s12430_s6, 256 }
0x54e6   : > { %p12047_p3 = scmp.ne.s32.totalorder %s13641_s2, %s12046_s28  ;;  %p12051_p4 = scmp.lt.s32.totalorder %s13641_s2, %s12430_s6 }
0x54e7   : > { %p12052_p0 = scmp.lt.s32.totalorder %s12050_s5, %s12046_s28 }
0x54e8   : > { %p12048_p7 = pnand %p12047_p3, %p13835_p9 }
0x54e9   : > { %p12053_p11 = por %p12052_p0, %p12051_p4 }
0x54ea   : > { %p12049_p8 = pneg %p12048_p7 }
0x54ec   : > { %p12054_p6 = pnand %p12053_p11, %p12049_p8 }
0x54ee   : > { %12057 = shalt.err (!%p12054_p6)
}
0x54ef   : > { %11030 = dma.vmem_to_hbm [thread:$0]  (%p13835_p9), %s9397_s7, 128, %s13641_s2, %s9383_s22  }
0x54f0 PF: > { %s13836_s3 = sld [smem:[#allocation88_spill]] }
0x54f1   : > { %s13837_s4 = sld [smem:[#allocation86_spill]] }
0x54f2   : > { %s13838_s11 = sld [smem:[#allocation91_spill]] }
0x54f6   : > { %p11157_p1 = scmp.ge.s32.totalorder %s13836_s3, 2 }
0x54f7   : > { %s9408_s26 = sand.u32 1, %s13837_s4  }
0x54f8   : > { %p13839_p13 = scmp.ne.s32.totalorder %s13838_s11, 0  ;;  %s9409_s8 = scalar_lea.sflag [#allocation4], %s9408_s26 }
0x54fa   : > { %p11106_p10 = pnand %p11157_p1, %p13839_p13 }
0x54fc   : > { %p11107_p5 = pneg %p11106_p10 }
0x54fe   : > { %12127 = dma.done.wait (%p11107_p5), %s9409_s8, 128  }
0x54ff   : > { %12129 = vsyncadd (%p11107_p5), %s9409_s8, 4294967168  ;;  %s13840_s26 = sld [smem:[#allocation89_spill]]  ;;  %s13843_s22 = smov %s12136_s23 }
0x5500   : > { %s13841_s16 = sld [smem:[#allocation87_spill]] }
0x5501   : > { %s13842_s0 = sld [smem:[#allocation90_spill]] }
0x5505   : > { %p102_p12 = scmp.ge.s32.totalorder %s13840_s26, 4  }
0x5506   : > { %s13844_s23 = smov %s13841_s16 }
0x5507   :  { %104 = sbr.rel (!%p102_p12) target bundleno = 89 (0x59), region = 380 }
0x550c   :  { %9414 = vsyncpa [#allocation3], 1 }
0x550d   :  { %9416 = vsyncpa [#allocation3 + $0x1], 1 }
0x550e   :  { %9417 = vsyncpa [#allocation6], 1 }
0x550f   :  { %9418 = vsyncpa [#allocation9], 1 }
0x5510   :  { %9419 = vsyncpa [#allocation12], 1 }
0x5511   :  { %9420 = vsyncpa [#allocation15], 1 }
0x5512   :  { %9421 = vsyncpa [#allocation18], 1 }
0x5513   :  { %9422 = vsyncpa [#allocation21], 1 }
0x5514   :  { %9423 = vsyncpa [#allocation24], 1 }
0x5515   :  { %9424 = vsyncpa [#allocation27], 1 }
0x5516   :  { %9425 = vsyncpa [#allocation30], 1 }
0x5517   :  { %9426 = vsyncpa [#allocation33], 1 }
0x5518   :  { %9427 = vsyncpa [#allocation36], 1 }
0x5519   :  { %9428 = vsyncpa [#allocation39], 1 }
0x551a   :  { %9429 = vsyncpa [#allocation4], 1 }
0x551b   :  { %9431 = vsyncpa [#allocation4 + $0x1], 1 }

</bundles_post_ra>
